<compile_context>
chip_gen: v7x
topology: tpu7x:2x2x1
jax: 0.10.0
libtpu: 0.0.40
codegen_flags: <defaults>
</compile_context>

<pallas_src>
import jax
import jax.numpy as jnp
from jax.experimental import pallas as pl
from jax.experimental.pallas import tpu as pltpu

_BN_EPS = 1e-5
_LANE = 128
_NUM_CLASSES = 10
_VMEM_SPEC = pl.BlockSpec(memory_space=pltpu.MemorySpace.VMEM)


def _rup(x, m):
    return (x + m - 1) // m * m


def _pick_tk(kp):
    """Largest K tile (multiple of 128, <= 2048) that divides kp (kp % 128 == 0)."""
    q = kp // _LANE
    best = 1
    for d in range(1, min(q, 16) + 1):
        if q % d == 0:
            best = d
    return best * _LANE


# ----------------------------------------------------------------------------
# Pallas kernels
# ----------------------------------------------------------------------------
def _make_conv_gemm_kernel(relu, has_res):
    """Tiled GEMM with fused BatchNorm affine (+ optional residual add) (+ ReLU)."""

    def kernel(*refs):
        if has_res:
            x_ref, w_ref, scale_ref, shift_ref, res_ref, o_ref, acc_ref = refs
        else:
            x_ref, w_ref, scale_ref, shift_ref, o_ref, acc_ref = refs

        k = pl.program_id(2)

        @pl.when(k == 0)
        def _init():
            acc_ref[...] = jnp.zeros_like(acc_ref)

        acc_ref[...] += jnp.dot(
            x_ref[...], w_ref[...], preferred_element_type=jnp.float32
        )

        @pl.when(k == pl.num_programs(2) - 1)
        def _epilogue():
            y = acc_ref[...] * scale_ref[...] + shift_ref[...]
            if has_res:
                y = y + res_ref[...].astype(jnp.float32)
            if relu:
                y = jnp.maximum(y, 0.0)
            o_ref[...] = y.astype(o_ref.dtype)

    return kernel


def _pool_fc_kernel(x_ref, w_ref, b_ref, o_ref):
    # x: [N, HW, C] bf16 -> adaptive_avg_pool2d([1,1]) == mean over HW, then Linear.
    pooled = jnp.mean(x_ref[...].astype(jnp.float32), axis=1)  # [N, C]
    o_ref[...] = (
        jnp.dot(pooled, w_ref[...], preferred_element_type=jnp.float32) + b_ref[...]
    )


# ----------------------------------------------------------------------------
# GEMM wrapper (tiled grid, bf16 operands, f32 accumulation)
# ----------------------------------------------------------------------------
def _conv_gemm(patches, wmat, scale, shift, residual, *, relu):
    """patches [Mp,Kp] bf16, wmat [Kp,Np] bf16, scale/shift [1,Np] f32,
    residual [Mp,Np] bf16 or None.  Returns [Mp,Np] bf16."""
    mp, kp = patches.shape
    np_ = wmat.shape[1]

    tm = min(128, mp)                      # mp is a multiple of tm by construction
    tk = _pick_tk(kp)
    if np_ <= 512:
        tn = np_
    elif np_ % 512 == 0:
        tn = 512
    else:
        tn = _LANE
    grid = (mp // tm, np_ // tn, kp // tk)

    in_specs = [
        pl.BlockSpec((tm, tk), lambda i, j, k: (i, k)),
        pl.BlockSpec((tk, tn), lambda i, j, k: (k, j)),
        pl.BlockSpec((1, tn), lambda i, j, k: (0, j)),
        pl.BlockSpec((1, tn), lambda i, j, k: (0, j)),
    ]
    args = [patches, wmat, scale, shift]
    if residual is not None:
        in_specs.append(pl.BlockSpec((tm, tn), lambda i, j, k: (i, j)))
        args.append(residual)

    return pl.pallas_call(
        _make_conv_gemm_kernel(relu, residual is not None),
        out_shape=jax.ShapeDtypeStruct((mp, np_), jnp.bfloat16),
        grid_spec=pltpu.PrefetchScalarGridSpec(
            num_scalar_prefetch=0,
            grid=grid,
            in_specs=in_specs,
            out_specs=pl.BlockSpec((tm, tn), lambda i, j, k: (i, j)),
            scratch_shapes=[pltpu.VMEM((tm, tn), jnp.float32)],
        ),
        compiler_params=pltpu.CompilerParams(
            dimension_semantics=("parallel", "parallel", "arbitrary"),
            vmem_limit_bytes=48 << 20,  # <= v7x's 64 MiB physical VMEM per TC
        ),
    )(*args)


# ----------------------------------------------------------------------------
# im2col + conv layer wrapper
# ----------------------------------------------------------------------------
def _im2col(x, kh, kw, stride, pad):
    """Extract conv patches (channel-minor [KH,KW,C]). -> ([N*OH*OW, KH*KW*C], OH, OW)."""
    n, h, w, c = x.shape
    if pad:
        x = jnp.pad(x, ((0, 0), (pad, pad), (pad, pad), (0, 0)))
    hp, wp = h + 2 * pad, w + 2 * pad
    oh = (hp - kh) // stride + 1
    ow = (wp - kw) // stride + 1
    cols = [
        x[:, i : i + stride * (oh - 1) + 1 : stride,
             j : j + stride * (ow - 1) + 1 : stride, :]
        for i in range(kh) for j in range(kw)
    ]
    patches = jnp.concatenate(cols, axis=-1) if len(cols) > 1 else cols[0]
    return patches.reshape(n * oh * ow, kh * kw * c), oh, ow


def conv_layer(x, lp, *, kh, kw, stride, pad, cout, relu, residual=None):
    """Conv2d(+bias) -> BatchNorm2d(eval) [-> fused residual add] [-> ReLU], bf16 NHWC."""
    n = x.shape[0]
    patches, oh, ow = _im2col(x, kh, kw, stride, pad)

    if residual is not None and residual.shape[1:3] != (oh, ow):
        # blk4 identity shortcut: PyTorch broadcasts the [N,C,1,1] conv2 output
        # against the [N,C,2,2] shortcut; replicate conv2's patch rows so the
        # residual add still fuses into the GEMM epilogue.
        assert oh == 1 and ow == 1
        oh, ow = residual.shape[1], residual.shape[2]
        patches = jnp.repeat(patches, oh * ow, axis=0)

    m, k = patches.shape
    kp, coutp = lp["wmat"].shape
    mp = _rup(m, 8) if m <= 128 else _rup(m, 128)
    patches = jnp.pad(patches, ((0, mp - m), (0, kp - k)))

    res = None
    if residual is not None:
        res = jnp.pad(residual.reshape(m, cout), ((0, mp - m), (0, coutp - cout)))

    out = _conv_gemm(patches, lp["wmat"], lp["scale"], lp["shift"], res, relu=relu)
    return out[:m, :cout].reshape(n, oh, ow, cout)


def pool_fc(x_nhwc, fc_w, fc_b):
    """adaptive_avg_pool2d([1,1]) + flatten + Linear (lane-padded to 128)."""
    n, h, w, c = x_nhwc.shape
    xr = x_nhwc.reshape(n, h * w, c)
    return pl.pallas_call(
        _pool_fc_kernel,
        out_shape=jax.ShapeDtypeStruct((n, fc_w.shape[1]), jnp.float32),
        in_specs=[_VMEM_SPEC] * 3,
        out_specs=_VMEM_SPEC,
    )(xr, fc_w, fc_b)


# ----------------------------------------------------------------------------
# Model (glue)
# ----------------------------------------------------------------------------
def resblk_forward(x, blk, *, cout, stride):
    out = conv_layer(x, blk["conv1"], kh=3, kw=3, stride=stride, pad=1,
                     cout=cout, relu=True)
    if "extra" in blk:  # ch_in != ch_out -> 1x1 conv + BN shortcut
        shortcut = conv_layer(x, blk["extra"], kh=1, kw=1, stride=stride, pad=0,
                              cout=cout, relu=False)
    else:  # identity shortcut (blk4)
        shortcut = x
    # conv2 -> bn2, with the residual add + ReLU fused into the GEMM epilogue.
    return conv_layer(out, blk["conv2"], kh=3, kw=3, stride=1, pad=1,
                      cout=cout, relu=True, residual=shortcut)


def resnet18_forward(x_nchw, prep):
    x = jnp.transpose(x_nchw, (0, 2, 3, 1)).astype(jnp.bfloat16)  # NCHW -> NHWC bf16
    x = conv_layer(x, prep["stem"], kh=3, kw=3, stride=3, pad=0, cout=64, relu=True)
    x = resblk_forward(x, prep["blk1"], cout=128, stride=2)
    x = resblk_forward(x, prep["blk2"], cout=256, stride=2)
    x = resblk_forward(x, prep["blk3"], cout=512, stride=2)
    x = resblk_forward(x, prep["blk4"], cout=512, stride=2)
    logits = pool_fc(x, prep["fc_w"], prep["fc_b"])  # [N, 128] padded
    return logits[:, :_NUM_CLASSES]


# ----------------------------------------------------------------------------
# Parameter preparation (done once, outside the jitted forward)
# ----------------------------------------------------------------------------
def _prep_conv(w_oihw, conv_b, bn):
    cout, cin, kh, kw = w_oihw.shape
    gamma, beta, rmean, rvar = bn
    k = kh * kw * cin
    kp = _rup(k, _LANE)
    coutp = _rup(cout, _LANE)
    # [Cout,Cin,KH,KW] -> [KH,KW,Cin,Cout] -> [K, Cout], padded + bf16.
    wmat = jnp.transpose(w_oihw, (2, 3, 1, 0)).reshape(k, cout)
    wmat = jnp.pad(wmat, ((0, kp - k), (0, coutp - cout))).astype(jnp.bfloat16)
    s = gamma / jnp.sqrt(rvar + _BN_EPS)
    scale = jnp.pad(s, (0, coutp - cout)).reshape(1, coutp).astype(jnp.float32)
    shift = jnp.pad((conv_b - rmean) * s + beta,
                    (0, coutp - cout)).reshape(1, coutp).astype(jnp.float32)
    return {"wmat": wmat, "scale": scale, "shift": shift}


def prepare_params(params):
    prep = {"stem": _prep_conv(params["stem"]["w"], params["stem"]["b"],
                               params["stem"]["bn"])}
    for name in ("blk1", "blk2", "blk3", "blk4"):
        p = params[name]
        blk = {"conv1": _prep_conv(p["conv1_w"], p["conv1_b"], p["bn1"]),
               "conv2": _prep_conv(p["conv2_w"], p["conv2_b"], p["bn2"])}
        if "extra_w" in p:
            blk["extra"] = _prep_conv(p["extra_w"], p["extra_b"], p["extra_bn"])
        prep[name] = blk
    nout, cin = params["fc_w"].shape  # (10, 512)
    noutp = _rup(nout, _LANE)
    prep["fc_w"] = jnp.pad(params["fc_w"].T,
                           ((0, 0), (0, noutp - nout))).astype(jnp.float32)
    prep["fc_b"] = jnp.pad(params["fc_b"],
                           (0, noutp - nout)).reshape(1, noutp).astype(jnp.float32)
    return prep


# ----------------------------------------------------------------------------
# Deterministic parameter initialization (synthetic weights)
# ----------------------------------------------------------------------------
def init_resnet18_params(key):
    keys = iter(jax.random.split(key, 128))
    nk = lambda: next(keys)

    def conv_init(cout, cin, k):
        bound = (cin * k * k) ** -0.5
        w = jax.random.uniform(nk(), (cout, cin, k, k), jnp.float32, -bound, bound)
        b = jax.random.uniform(nk(), (cout,), jnp.float32, -bound, bound)
        return w, b

    def bn_init(c):
        gamma = jax.random.uniform(nk(), (c,), jnp.float32, 0.5, 1.5)
        beta = jax.random.normal(nk(), (c,), jnp.float32) * 0.1
        rmean = jax.random.normal(nk(), (c,), jnp.float32) * 0.1
        rvar = jax.random.uniform(nk(), (c,), jnp.float32, 0.5, 1.5)
        return (gamma, beta, rmean, rvar)

    def blk_init(cin, cout):
        p = {}
        p["conv1_w"], p["conv1_b"] = conv_init(cout, cin, 3)
        p["bn1"] = bn_init(cout)
        p["conv2_w"], p["conv2_b"] = conv_init(cout, cout, 3)
        p["bn2"] = bn_init(cout)
        if cin != cout:
            p["extra_w"], p["extra_b"] = conv_init(cout, cin, 1)
            p["extra_bn"] = bn_init(cout)
        return p

    params = {}
    sw, sb = conv_init(64, 3, 3)
    params["stem"] = {"w": sw, "b": sb, "bn": bn_init(64)}
    params["blk1"] = blk_init(64, 128)
    params["blk2"] = blk_init(128, 256)
    params["blk3"] = blk_init(256, 512)
    params["blk4"] = blk_init(512, 512)
    bound = 512 ** -0.5
    params["fc_w"] = jax.random.uniform(nk(), (10, 512), jnp.float32, -bound, bound)
    params["fc_b"] = jax.random.uniform(nk(), (10,), jnp.float32, -bound, bound)
    return params


if __name__ == "__main__":
    key = jax.random.PRNGKey(0)
    pkey, xkey = jax.random.split(key)
    params = init_resnet18_params(pkey)
    prep = prepare_params(params)  # weight repack / BN fold: once, outside jit
    # CIFAR-style input, same as the tutorial's test: [b, 3, 32, 32]
    x = jax.random.normal(xkey, (2, 3, 32, 32), jnp.float32)

    fwd = jax.jit(resnet18_forward)
    logits = fwd(x, prep)
    jax.block_until_ready(logits)
    assert logits.shape == (2, _NUM_CLASSES) and logits.dtype == jnp.float32
    assert bool(jnp.all(jnp.isfinite(logits)))
    print("KERNEL_OK")
</pallas_src>

<mosaic_0001>
module attributes {stable_mosaic.version = 11 : i64} {
  func.func @kernel(%arg0: i32, %arg1: i32, %arg2: i32, %arg3: memref<128x128xbf16, #tpu.memory_space<vmem>>, %arg4: memref<128x128xbf16, #tpu.memory_space<vmem>>, %arg5: memref<1x128xf32, #tpu.memory_space<vmem>>, %arg6: memref<1x128xf32, #tpu.memory_space<vmem>>, %arg7: memref<128x128xbf16, #tpu.memory_space<vmem>>, %arg8: memref<128x128xf32, #tpu.memory_space<vmem>>) attributes {dimension_semantics = [#tpu.dimension_semantics<parallel>, #tpu.dimension_semantics<parallel>, #tpu.dimension_semantics<arbitrary>], iteration_bounds = array<i64: 2, 1, 1>, scalar_prefetch = 0 : i64, scratch_operands = 1 : i64, tpu.core_type = #tpu.core_type<tc>, window_params = [{transform_indices = @transform_0, window_bounds = array<i64: 128, 128>}, {transform_indices = @transform_1, window_bounds = array<i64: 128, 128>}, {transform_indices = @transform_2, window_bounds = array<i64: 1, 128>}, {transform_indices = @transform_3, window_bounds = array<i64: 1, 128>}, {transform_indices = @transform_4, window_bounds = array<i64: 128, 128>}]} {
    %c0_i32 = arith.constant 0 : i32
    %0 = arith.cmpi eq, %arg2, %c0_i32 : i32
    %1 = arith.extui %0 : i1 to i32
    %c0_i32_0 = arith.constant 0 : i32
    %2 = arith.cmpi ne, %1, %c0_i32_0 : i32
    scf.if %2 {
      %cst_10 = arith.constant 0.000000e+00 : f32
      %12 = vector.broadcast %cst_10 : f32 to vector<128x128xf32>
      %c0_11 = arith.constant 0 : index
      %c0_12 = arith.constant 0 : index
      %13 = vector.load %arg8[%c0_11, %c0_12] : memref<128x128xf32, #tpu.memory_space<vmem>>, vector<128x128xf32>
      tpu.vector_store %arg8[%c0_11, %c0_12], %12 {strides = array<i32>} : memref<128x128xf32, #tpu.memory_space<vmem>>, vector<128x128xf32>,
    } else {
    }
    %c0 = arith.constant 0 : index
    %c0_1 = arith.constant 0 : index
    %3 = vector.load %arg8[%c0, %c0_1] : memref<128x128xf32, #tpu.memory_space<vmem>>, vector<128x128xf32>
    %c0_2 = arith.constant 0 : index
    %c0_3 = arith.constant 0 : index
    %4 = vector.load %arg3[%c0_2, %c0_3] : memref<128x128xbf16, #tpu.memory_space<vmem>>, vector<128x128xbf16>
    %c0_4 = arith.constant 0 : index
    %c0_5 = arith.constant 0 : index
    %5 = vector.load %arg4[%c0_4, %c0_5] : memref<128x128xbf16, #tpu.memory_space<vmem>>, vector<128x128xbf16>
    %cst = arith.constant dense<0.000000e+00> : vector<128x128xf32>
    %6 = tpu.matmul %4, %5, %cst {dimension_numbers = #tpu.dot_dimension_numbers<[1], [0], [0], [1], [0, 0, 1, 1], [], []>} : vector<128x128xbf16>, vector<128x128xbf16>, vector<128x128xf32> -> vector<128x128xf32>
    %7 = arith.addf %3, %6 : vector<128x128xf32>
    %c0_6 = arith.constant 0 : index
    %c0_7 = arith.constant 0 : index
    %8 = vector.load %arg8[%c0_6, %c0_7] : memref<128x128xf32, #tpu.memory_space<vmem>>, vector<128x128xf32>
    tpu.vector_store %arg8[%c0_6, %c0_7], %7 {strides = array<i32>} : memref<128x128xf32, #tpu.memory_space<vmem>>, vector<128x128xf32>,
    %c0_i32_8 = arith.constant 0 : i32
    %9 = arith.cmpi eq, %arg2, %c0_i32_8 : i32
    %10 = arith.extui %9 : i1 to i32
    %c0_i32_9 = arith.constant 0 : i32
    %11 = arith.cmpi ne, %10, %c0_i32_9 : i32
    scf.if %11 {
      %c0_10 = arith.constant 0 : index
      %c0_11 = arith.constant 0 : index
      %12 = vector.load %arg8[%c0_10, %c0_11] : memref<128x128xf32, #tpu.memory_space<vmem>>, vector<128x128xf32>
      %c0_12 = arith.constant 0 : index
      %c0_13 = arith.constant 0 : index
      %13 = vector.load %arg5[%c0_12, %c0_13] : memref<1x128xf32, #tpu.memory_space<vmem>>, vector<1x128xf32>
      %14 = vector.broadcast %13 : vector<1x128xf32> to vector<128x128xf32>
      %15 = arith.mulf %12, %14 : vector<128x128xf32>
      %c0_14 = arith.constant 0 : index
      %c0_15 = arith.constant 0 : index
      %16 = vector.load %arg6[%c0_14, %c0_15] : memref<1x128xf32, #tpu.memory_space<vmem>>, vector<1x128xf32>
      %17 = vector.broadcast %16 : vector<1x128xf32> to vector<128x128xf32>
      %18 = arith.addf %15, %17 : vector<128x128xf32>
      %cst_16 = arith.constant 0.000000e+00 : f32
      %19 = vector.broadcast %cst_16 : f32 to vector<128x128xf32>
      %20 = arith.maximumf %18, %19 : vector<128x128xf32>
      %21 = arith.truncf %20 : vector<128x128xf32> to vector<128x128xbf16>
      %c0_17 = arith.constant 0 : index
      %c0_18 = arith.constant 0 : index
      %22 = vector.load %arg7[%c0_17, %c0_18] : memref<128x128xbf16, #tpu.memory_space<vmem>>, vector<128x128xbf16>
      tpu.vector_store %arg7[%c0_17, %c0_18], %21 {strides = array<i32>} : memref<128x128xbf16, #tpu.memory_space<vmem>>, vector<128x128xbf16>,
    } else {
    }
    return
  }
  func.func @transform_0(%arg0: i32, %arg1: i32, %arg2: i32) -> (i32, i32) {
    %c0_i32 = arith.constant 0 : i32
    return %arg0, %arg2 : i32, i32
  }
  func.func @transform_1(%arg0: i32, %arg1: i32, %arg2: i32) -> (i32, i32) {
    %c0_i32 = arith.constant 0 : i32
    return %arg2, %arg1 : i32, i32
  }
  func.func @transform_2(%arg0: i32, %arg1: i32, %arg2: i32) -> (i32, i32) {
    %c0_i32 = arith.constant 0 : i32
    %c0_i32_0 = arith.constant 0 : i32
    return %c0_i32, %arg1 : i32, i32
  }
  func.func @transform_3(%arg0: i32, %arg1: i32, %arg2: i32) -> (i32, i32) {
    %c0_i32 = arith.constant 0 : i32
    %c0_i32_0 = arith.constant 0 : i32
    return %c0_i32, %arg1 : i32, i32
  }
  func.func @transform_4(%arg0: i32, %arg1: i32, %arg2: i32) -> (i32, i32) {
    %c0_i32 = arith.constant 0 : i32
    return %arg0, %arg1 : i32, i32
  }
}

module attributes {stable_mosaic.version = 11 : i64} {
  func.func @kernel(%arg0: i32, %arg1: i32, %arg2: i32, %arg3: memref<56x640xbf16, #tpu.memory_space<vmem>>, %arg4: memref<640x128xbf16, #tpu.memory_space<vmem>>, %arg5: memref<1x128xf32, #tpu.memory_space<vmem>>, %arg6: memref<1x128xf32, #tpu.memory_space<vmem>>, %arg7: memref<56x128xbf16, #tpu.memory_space<vmem>>, %arg8: memref<56x128xf32, #tpu.memory_space<vmem>>) attributes {dimension_semantics = [#tpu.dimension_semantics<parallel>, #tpu.dimension_semantics<parallel>, #tpu.dimension_semantics<arbitrary>], iteration_bounds = array<i64: 1, 1, 1>, scalar_prefetch = 0 : i64, scratch_operands = 1 : i64, tpu.core_type = #tpu.core_type<tc>, window_params = [{transform_indices = @transform_0, window_bounds = array<i64: 56, 640>}, {transform_indices = @transform_1, window_bounds = array<i64: 640, 128>}, {transform_indices = @transform_2, window_bounds = array<i64: 1, 128>}, {transform_indices = @transform_3, window_bounds = array<i64: 1, 128>}, {transform_indices = @transform_4, window_bounds = array<i64: 56, 128>}]} {
    %c0_i32 = arith.constant 0 : i32
    %0 = arith.cmpi eq, %arg2, %c0_i32 : i32
    %1 = arith.extui %0 : i1 to i32
    %c0_i32_0 = arith.constant 0 : i32
    %2 = arith.cmpi ne, %1, %c0_i32_0 : i32
    scf.if %2 {
      %cst_10 = arith.constant 0.000000e+00 : f32
      %12 = vector.broadcast %cst_10 : f32 to vector<56x128xf32>
      %c0_11 = arith.constant 0 : index
      %c0_12 = arith.constant 0 : index
      %13 = vector.load %arg8[%c0_11, %c0_12] : memref<56x128xf32, #tpu.memory_space<vmem>>, vector<56x128xf32>
      tpu.vector_store %arg8[%c0_11, %c0_12], %12 {strides = array<i32>} : memref<56x128xf32, #tpu.memory_space<vmem>>, vector<56x128xf32>,
    } else {
    }
    %c0 = arith.constant 0 : index
    %c0_1 = arith.constant 0 : index
    %3 = vector.load %arg8[%c0, %c0_1] : memref<56x128xf32, #tpu.memory_space<vmem>>, vector<56x128xf32>
    %c0_2 = arith.constant 0 : index
    %c0_3 = arith.constant 0 : index
    %4 = vector.load %arg3[%c0_2, %c0_3] : memref<56x640xbf16, #tpu.memory_space<vmem>>, vector<56x640xbf16>
    %c0_4 = arith.constant 0 : index
    %c0_5 = arith.constant 0 : index
    %5 = vector.load %arg4[%c0_4, %c0_5] : memref<640x128xbf16, #tpu.memory_space<vmem>>, vector<640x128xbf16>
    %cst = arith.constant dense<0.000000e+00> : vector<56x128xf32>
    %6 = tpu.matmul %4, %5, %cst {dimension_numbers = #tpu.dot_dimension_numbers<[1], [0], [0], [1], [0, 0, 1, 1], [], []>} : vector<56x640xbf16>, vector<640x128xbf16>, vector<56x128xf32> -> vector<56x128xf32>
    %7 = arith.addf %3, %6 : vector<56x128xf32>
    %c0_6 = arith.constant 0 : index
    %c0_7 = arith.constant 0 : index
    %8 = vector.load %arg8[%c0_6, %c0_7] : memref<56x128xf32, #tpu.memory_space<vmem>>, vector<56x128xf32>
    tpu.vector_store %arg8[%c0_6, %c0_7], %7 {strides = array<i32>} : memref<56x128xf32, #tpu.memory_space<vmem>>, vector<56x128xf32>,
    %c0_i32_8 = arith.constant 0 : i32
    %9 = arith.cmpi eq, %arg2, %c0_i32_8 : i32
    %10 = arith.extui %9 : i1 to i32
    %c0_i32_9 = arith.constant 0 : i32
    %11 = arith.cmpi ne, %10, %c0_i32_9 : i32
    scf.if %11 {
      %c0_10 = arith.constant 0 : index
      %c0_11 = arith.constant 0 : index
      %12 = vector.load %arg8[%c0_10, %c0_11] : memref<56x128xf32, #tpu.memory_space<vmem>>, vector<56x128xf32>
      %c0_12 = arith.constant 0 : index
      %c0_13 = arith.constant 0 : index
      %13 = vector.load %arg5[%c0_12, %c0_13] : memref<1x128xf32, #tpu.memory_space<vmem>>, vector<1x128xf32>
      %14 = vector.broadcast %13 : vector<1x128xf32> to vector<56x128xf32>
      %15 = arith.mulf %12, %14 : vector<56x128xf32>
      %c0_14 = arith.constant 0 : index
      %c0_15 = arith.constant 0 : index
      %16 = vector.load %arg6[%c0_14, %c0_15] : memref<1x128xf32, #tpu.memory_space<vmem>>, vector<1x128xf32>
      %17 = vector.broadcast %16 : vector<1x128xf32> to vector<56x128xf32>
      %18 = arith.addf %15, %17 : vector<56x128xf32>
      %cst_16 = arith.constant 0.000000e+00 : f32
      %19 = vector.broadcast %cst_16 : f32 to vector<56x128xf32>
      %20 = arith.maximumf %18, %19 : vector<56x128xf32>
      %21 = arith.truncf %20 : vector<56x128xf32> to vector<56x128xbf16>
      %c0_17 = arith.constant 0 : index
      %c0_18 = arith.constant 0 : index
      %22 = vector.load %arg7[%c0_17, %c0_18] : memref<56x128xbf16, #tpu.memory_space<vmem>>, vector<56x128xbf16>
      tpu.vector_store %arg7[%c0_17, %c0_18], %21 {strides = array<i32>} : memref<56x128xbf16, #tpu.memory_space<vmem>>, vector<56x128xbf16>,
    } else {
    }
    return
  }
  func.func @transform_0(%arg0: i32, %arg1: i32, %arg2: i32) -> (i32, i32) {
    %c0_i32 = arith.constant 0 : i32
    return %arg0, %arg2 : i32, i32
  }
  func.func @transform_1(%arg0: i32, %arg1: i32, %arg2: i32) -> (i32, i32) {
    %c0_i32 = arith.constant 0 : i32
    return %arg2, %arg1 : i32, i32
  }
  func.func @transform_2(%arg0: i32, %arg1: i32, %arg2: i32) -> (i32, i32) {
    %c0_i32 = arith.constant 0 : i32
    %c0_i32_0 = arith.constant 0 : i32
    return %c0_i32, %arg1 : i32, i32
  }
  func.func @transform_3(%arg0: i32, %arg1: i32, %arg2: i32) -> (i32, i32) {
    %c0_i32 = arith.constant 0 : i32
    %c0_i32_0 = arith.constant 0 : i32
    return %c0_i32, %arg1 : i32, i32
  }
  func.func @transform_4(%arg0: i32, %arg1: i32, %arg2: i32) -> (i32, i32) {
    %c0_i32 = arith.constant 0 : i32
    return %arg0, %arg1 : i32, i32
  }
}

module attributes {stable_mosaic.version = 11 : i64} {
  func.func @kernel(%arg0: i32, %arg1: i32, %arg2: i32, %arg3: memref<56x128xbf16, #tpu.memory_space<vmem>>, %arg4: memref<128x128xbf16, #tpu.memory_space<vmem>>, %arg5: memref<1x128xf32, #tpu.memory_space<vmem>>, %arg6: memref<1x128xf32, #tpu.memory_space<vmem>>, %arg7: memref<56x128xbf16, #tpu.memory_space<vmem>>, %arg8: memref<56x128xf32, #tpu.memory_space<vmem>>) attributes {dimension_semantics = [#tpu.dimension_semantics<parallel>, #tpu.dimension_semantics<parallel>, #tpu.dimension_semantics<arbitrary>], iteration_bounds = array<i64: 1, 1, 1>, scalar_prefetch = 0 : i64, scratch_operands = 1 : i64, tpu.core_type = #tpu.core_type<tc>, window_params = [{transform_indices = @transform_0, window_bounds = array<i64: 56, 128>}, {transform_indices = @transform_1, window_bounds = array<i64: 128, 128>}, {transform_indices = @transform_2, window_bounds = array<i64: 1, 128>}, {transform_indices = @transform_3, window_bounds = array<i64: 1, 128>}, {transform_indices = @transform_4, window_bounds = array<i64: 56, 128>}]} {
    %c0_i32 = arith.constant 0 : i32
    %0 = arith.cmpi eq, %arg2, %c0_i32 : i32
    %1 = arith.extui %0 : i1 to i32
    %c0_i32_0 = arith.constant 0 : i32
    %2 = arith.cmpi ne, %1, %c0_i32_0 : i32
    scf.if %2 {
      %cst_10 = arith.constant 0.000000e+00 : f32
      %12 = vector.broadcast %cst_10 : f32 to vector<56x128xf32>
      %c0_11 = arith.constant 0 : index
      %c0_12 = arith.constant 0 : index
      %13 = vector.load %arg8[%c0_11, %c0_12] : memref<56x128xf32, #tpu.memory_space<vmem>>, vector<56x128xf32>
      tpu.vector_store %arg8[%c0_11, %c0_12], %12 {strides = array<i32>} : memref<56x128xf32, #tpu.memory_space<vmem>>, vector<56x128xf32>,
    } else {
    }
    %c0 = arith.constant 0 : index
    %c0_1 = arith.constant 0 : index
    %3 = vector.load %arg8[%c0, %c0_1] : memref<56x128xf32, #tpu.memory_space<vmem>>, vector<56x128xf32>
    %c0_2 = arith.constant 0 : index
    %c0_3 = arith.constant 0 : index
    %4 = vector.load %arg3[%c0_2, %c0_3] : memref<56x128xbf16, #tpu.memory_space<vmem>>, vector<56x128xbf16>
    %c0_4 = arith.constant 0 : index
    %c0_5 = arith.constant 0 : index
    %5 = vector.load %arg4[%c0_4, %c0_5] : memref<128x128xbf16, #tpu.memory_space<vmem>>, vector<128x128xbf16>
    %cst = arith.constant dense<0.000000e+00> : vector<56x128xf32>
    %6 = tpu.matmul %4, %5, %cst {dimension_numbers = #tpu.dot_dimension_numbers<[1], [0], [0], [1], [0, 0, 1, 1], [], []>} : vector<56x128xbf16>, vector<128x128xbf16>, vector<56x128xf32> -> vector<56x128xf32>
    %7 = arith.addf %3, %6 : vector<56x128xf32>
    %c0_6 = arith.constant 0 : index
    %c0_7 = arith.constant 0 : index
    %8 = vector.load %arg8[%c0_6, %c0_7] : memref<56x128xf32, #tpu.memory_space<vmem>>, vector<56x128xf32>
    tpu.vector_store %arg8[%c0_6, %c0_7], %7 {strides = array<i32>} : memref<56x128xf32, #tpu.memory_space<vmem>>, vector<56x128xf32>,
    %c0_i32_8 = arith.constant 0 : i32
    %9 = arith.cmpi eq, %arg2, %c0_i32_8 : i32
    %10 = arith.extui %9 : i1 to i32
    %c0_i32_9 = arith.constant 0 : i32
    %11 = arith.cmpi ne, %10, %c0_i32_9 : i32
    scf.if %11 {
      %c0_10 = arith.constant 0 : index
      %c0_11 = arith.constant 0 : index
      %12 = vector.load %arg8[%c0_10, %c0_11] : memref<56x128xf32, #tpu.memory_space<vmem>>, vector<56x128xf32>
      %c0_12 = arith.constant 0 : index
      %c0_13 = arith.constant 0 : index
      %13 = vector.load %arg5[%c0_12, %c0_13] : memref<1x128xf32, #tpu.memory_space<vmem>>, vector<1x128xf32>
      %14 = vector.broadcast %13 : vector<1x128xf32> to vector<56x128xf32>
      %15 = arith.mulf %12, %14 : vector<56x128xf32>
      %c0_14 = arith.constant 0 : index
      %c0_15 = arith.constant 0 : index
      %16 = vector.load %arg6[%c0_14, %c0_15] : memref<1x128xf32, #tpu.memory_space<vmem>>, vector<1x128xf32>
      %17 = vector.broadcast %16 : vector<1x128xf32> to vector<56x128xf32>
      %18 = arith.addf %15, %17 : vector<56x128xf32>
      %19 = arith.truncf %18 : vector<56x128xf32> to vector<56x128xbf16>
      %c0_16 = arith.constant 0 : index
      %c0_17 = arith.constant 0 : index
      %20 = vector.load %arg7[%c0_16, %c0_17] : memref<56x128xbf16, #tpu.memory_space<vmem>>, vector<56x128xbf16>
      tpu.vector_store %arg7[%c0_16, %c0_17], %19 {strides = array<i32>} : memref<56x128xbf16, #tpu.memory_space<vmem>>, vector<56x128xbf16>,
    } else {
    }
    return
  }
  func.func @transform_0(%arg0: i32, %arg1: i32, %arg2: i32) -> (i32, i32) {
    %c0_i32 = arith.constant 0 : i32
    return %arg0, %arg2 : i32, i32
  }
  func.func @transform_1(%arg0: i32, %arg1: i32, %arg2: i32) -> (i32, i32) {
    %c0_i32 = arith.constant 0 : i32
    return %arg2, %arg1 : i32, i32
  }
  func.func @transform_2(%arg0: i32, %arg1: i32, %arg2: i32) -> (i32, i32) {
    %c0_i32 = arith.constant 0 : i32
    %c0_i32_0 = arith.constant 0 : i32
    return %c0_i32, %arg1 : i32, i32
  }
  func.func @transform_3(%arg0: i32, %arg1: i32, %arg2: i32) -> (i32, i32) {
    %c0_i32 = arith.constant 0 : i32
    %c0_i32_0 = arith.constant 0 : i32
    return %c0_i32, %arg1 : i32, i32
  }
  func.func @transform_4(%arg0: i32, %arg1: i32, %arg2: i32) -> (i32, i32) {
    %c0_i32 = arith.constant 0 : i32
    return %arg0, %arg1 : i32, i32
  }
}

module attributes {stable_mosaic.version = 11 : i64} {
  func.func @kernel(%arg0: i32, %arg1: i32, %arg2: i32, %arg3: memref<56x1152xbf16, #tpu.memory_space<vmem>>, %arg4: memref<1152x128xbf16, #tpu.memory_space<vmem>>, %arg5: memref<1x128xf32, #tpu.memory_space<vmem>>, %arg6: memref<1x128xf32, #tpu.memory_space<vmem>>, %arg7: memref<56x128xbf16, #tpu.memory_space<vmem>>, %arg8: memref<56x128xbf16, #tpu.memory_space<vmem>>, %arg9: memref<56x128xf32, #tpu.memory_space<vmem>>) attributes {dimension_semantics = [#tpu.dimension_semantics<parallel>, #tpu.dimension_semantics<parallel>, #tpu.dimension_semantics<arbitrary>], iteration_bounds = array<i64: 1, 1, 1>, scalar_prefetch = 0 : i64, scratch_operands = 1 : i64, tpu.core_type = #tpu.core_type<tc>, window_params = [{transform_indices = @transform_0, window_bounds = array<i64: 56, 1152>}, {transform_indices = @transform_1, window_bounds = array<i64: 1152, 128>}, {transform_indices = @transform_2, window_bounds = array<i64: 1, 128>}, {transform_indices = @transform_3, window_bounds = array<i64: 1, 128>}, {transform_indices = @transform_4, window_bounds = array<i64: 56, 128>}, {transform_indices = @transform_5, window_bounds = array<i64: 56, 128>}]} {
    %c0_i32 = arith.constant 0 : i32
    %0 = arith.cmpi eq, %arg2, %c0_i32 : i32
    %1 = arith.extui %0 : i1 to i32
    %c0_i32_0 = arith.constant 0 : i32
    %2 = arith.cmpi ne, %1, %c0_i32_0 : i32
    scf.if %2 {
      %cst_10 = arith.constant 0.000000e+00 : f32
      %12 = vector.broadcast %cst_10 : f32 to vector<56x128xf32>
      %c0_11 = arith.constant 0 : index
      %c0_12 = arith.constant 0 : index
      %13 = vector.load %arg9[%c0_11, %c0_12] : memref<56x128xf32, #tpu.memory_space<vmem>>, vector<56x128xf32>
      tpu.vector_store %arg9[%c0_11, %c0_12], %12 {strides = array<i32>} : memref<56x128xf32, #tpu.memory_space<vmem>>, vector<56x128xf32>,
    } else {
    }
    %c0 = arith.constant 0 : index
    %c0_1 = arith.constant 0 : index
    %3 = vector.load %arg9[%c0, %c0_1] : memref<56x128xf32, #tpu.memory_space<vmem>>, vector<56x128xf32>
    %c0_2 = arith.constant 0 : index
    %c0_3 = arith.constant 0 : index
    %4 = vector.load %arg3[%c0_2, %c0_3] : memref<56x1152xbf16, #tpu.memory_space<vmem>>, vector<56x1152xbf16>
    %c0_4 = arith.constant 0 : index
    %c0_5 = arith.constant 0 : index
    %5 = vector.load %arg4[%c0_4, %c0_5] : memref<1152x128xbf16, #tpu.memory_space<vmem>>, vector<1152x128xbf16>
    %cst = arith.constant dense<0.000000e+00> : vector<56x128xf32>
    %6 = tpu.matmul %4, %5, %cst {dimension_numbers = #tpu.dot_dimension_numbers<[1], [0], [0], [1], [0, 0, 1, 1], [], []>} : vector<56x1152xbf16>, vector<1152x128xbf16>, vector<56x128xf32> -> vector<56x128xf32>
    %7 = arith.addf %3, %6 : vector<56x128xf32>
    %c0_6 = arith.constant 0 : index
    %c0_7 = arith.constant 0 : index
    %8 = vector.load %arg9[%c0_6, %c0_7] : memref<56x128xf32, #tpu.memory_space<vmem>>, vector<56x128xf32>
    tpu.vector_store %arg9[%c0_6, %c0_7], %7 {strides = array<i32>} : memref<56x128xf32, #tpu.memory_space<vmem>>, vector<56x128xf32>,
    %c0_i32_8 = arith.constant 0 : i32
    %9 = arith.cmpi eq, %arg2, %c0_i32_8 : i32
    %10 = arith.extui %9 : i1 to i32
    %c0_i32_9 = arith.constant 0 : i32
    %11 = arith.cmpi ne, %10, %c0_i32_9 : i32
    scf.if %11 {
      %c0_10 = arith.constant 0 : index
      %c0_11 = arith.constant 0 : index
      %12 = vector.load %arg9[%c0_10, %c0_11] : memref<56x128xf32, #tpu.memory_space<vmem>>, vector<56x128xf32>
      %c0_12 = arith.constant 0 : index
      %c0_13 = arith.constant 0 : index
      %13 = vector.load %arg5[%c0_12, %c0_13] : memref<1x128xf32, #tpu.memory_space<vmem>>, vector<1x128xf32>
      %14 = vector.broadcast %13 : vector<1x128xf32> to vector<56x128xf32>
      %15 = arith.mulf %12, %14 : vector<56x128xf32>
      %c0_14 = arith.constant 0 : index
      %c0_15 = arith.constant 0 : index
      %16 = vector.load %arg6[%c0_14, %c0_15] : memref<1x128xf32, #tpu.memory_space<vmem>>, vector<1x128xf32>
      %17 = vector.broadcast %16 : vector<1x128xf32> to vector<56x128xf32>
      %18 = arith.addf %15, %17 : vector<56x128xf32>
      %c0_16 = arith.constant 0 : index
      %c0_17 = arith.constant 0 : index
      %19 = vector.load %arg7[%c0_16, %c0_17] : memref<56x128xbf16, #tpu.memory_space<vmem>>, vector<56x128xbf16>
      %20 = arith.extf %19 : vector<56x128xbf16> to vector<56x128xf32>
      %21 = arith.addf %18, %20 : vector<56x128xf32>
      %cst_18 = arith.constant 0.000000e+00 : f32
      %22 = vector.broadcast %cst_18 : f32 to vector<56x128xf32>
      %23 = arith.maximumf %21, %22 : vector<56x128xf32>
      %24 = arith.truncf %23 : vector<56x128xf32> to vector<56x128xbf16>
      %c0_19 = arith.constant 0 : index
      %c0_20 = arith.constant 0 : index
      %25 = vector.load %arg8[%c0_19, %c0_20] : memref<56x128xbf16, #tpu.memory_space<vmem>>, vector<56x128xbf16>
      tpu.vector_store %arg8[%c0_19, %c0_20], %24 {strides = array<i32>} : memref<56x128xbf16, #tpu.memory_space<vmem>>, vector<56x128xbf16>,
    } else {
    }
    return
  }
  func.func @transform_0(%arg0: i32, %arg1: i32, %arg2: i32) -> (i32, i32) {
    %c0_i32 = arith.constant 0 : i32
    return %arg0, %arg2 : i32, i32
  }
  func.func @transform_1(%arg0: i32, %arg1: i32, %arg2: i32) -> (i32, i32) {
    %c0_i32 = arith.constant 0 : i32
    return %arg2, %arg1 : i32, i32
  }
  func.func @transform_2(%arg0: i32, %arg1: i32, %arg2: i32) -> (i32, i32) {
    %c0_i32 = arith.constant 0 : i32
    %c0_i32_0 = arith.constant 0 : i32
    return %c0_i32, %arg1 : i32, i32
  }
  func.func @transform_3(%arg0: i32, %arg1: i32, %arg2: i32) -> (i32, i32) {
    %c0_i32 = arith.constant 0 : i32
    %c0_i32_0 = arith.constant 0 : i32
    return %c0_i32, %arg1 : i32, i32
  }
  func.func @transform_4(%arg0: i32, %arg1: i32, %arg2: i32) -> (i32, i32) {
    %c0_i32 = arith.constant 0 : i32
    return %arg0, %arg1 : i32, i32
  }
  func.func @transform_5(%arg0: i32, %arg1: i32, %arg2: i32) -> (i32, i32) {
    %c0_i32 = arith.constant 0 : i32
    return %arg0, %arg1 : i32, i32
  }
}

module attributes {stable_mosaic.version = 11 : i64} {
  func.func @kernel(%arg0: i32, %arg1: i32, %arg2: i32, %arg3: memref<24x1152xbf16, #tpu.memory_space<vmem>>, %arg4: memref<1152x256xbf16, #tpu.memory_space<vmem>>, %arg5: memref<1x256xf32, #tpu.memory_space<vmem>>, %arg6: memref<1x256xf32, #tpu.memory_space<vmem>>, %arg7: memref<24x256xbf16, #tpu.memory_space<vmem>>, %arg8: memref<24x256xf32, #tpu.memory_space<vmem>>) attributes {dimension_semantics = [#tpu.dimension_semantics<parallel>, #tpu.dimension_semantics<parallel>, #tpu.dimension_semantics<arbitrary>], iteration_bounds = array<i64: 1, 1, 1>, scalar_prefetch = 0 : i64, scratch_operands = 1 : i64, tpu.core_type = #tpu.core_type<tc>, window_params = [{transform_indices = @transform_0, window_bounds = array<i64: 24, 1152>}, {transform_indices = @transform_1, window_bounds = array<i64: 1152, 256>}, {transform_indices = @transform_2, window_bounds = array<i64: 1, 256>}, {transform_indices = @transform_3, window_bounds = array<i64: 1, 256>}, {transform_indices = @transform_4, window_bounds = array<i64: 24, 256>}]} {
    %c0_i32 = arith.constant 0 : i32
    %0 = arith.cmpi eq, %arg2, %c0_i32 : i32
    %1 = arith.extui %0 : i1 to i32
    %c0_i32_0 = arith.constant 0 : i32
    %2 = arith.cmpi ne, %1, %c0_i32_0 : i32
    scf.if %2 {
      %cst_10 = arith.constant 0.000000e+00 : f32
      %12 = vector.broadcast %cst_10 : f32 to vector<24x256xf32>
      %c0_11 = arith.constant 0 : index
      %c0_12 = arith.constant 0 : index
      %13 = vector.load %arg8[%c0_11, %c0_12] : memref<24x256xf32, #tpu.memory_space<vmem>>, vector<24x256xf32>
      tpu.vector_store %arg8[%c0_11, %c0_12], %12 {strides = array<i32>} : memref<24x256xf32, #tpu.memory_space<vmem>>, vector<24x256xf32>,
    } else {
    }
    %c0 = arith.constant 0 : index
    %c0_1 = arith.constant 0 : index
    %3 = vector.load %arg8[%c0, %c0_1] : memref<24x256xf32, #tpu.memory_space<vmem>>, vector<24x256xf32>
    %c0_2 = arith.constant 0 : index
    %c0_3 = arith.constant 0 : index
    %4 = vector.load %arg3[%c0_2, %c0_3] : memref<24x1152xbf16, #tpu.memory_space<vmem>>, vector<24x1152xbf16>
    %c0_4 = arith.constant 0 : index
    %c0_5 = arith.constant 0 : index
    %5 = vector.load %arg4[%c0_4, %c0_5] : memref<1152x256xbf16, #tpu.memory_space<vmem>>, vector<1152x256xbf16>
    %cst = arith.constant dense<0.000000e+00> : vector<24x256xf32>
    %6 = tpu.matmul %4, %5, %cst {dimension_numbers = #tpu.dot_dimension_numbers<[1], [0], [0], [1], [0, 0, 1, 1], [], []>} : vector<24x1152xbf16>, vector<1152x256xbf16>, vector<24x256xf32> -> vector<24x256xf32>
    %7 = arith.addf %3, %6 : vector<24x256xf32>
    %c0_6 = arith.constant 0 : index
    %c0_7 = arith.constant 0 : index
    %8 = vector.load %arg8[%c0_6, %c0_7] : memref<24x256xf32, #tpu.memory_space<vmem>>, vector<24x256xf32>
    tpu.vector_store %arg8[%c0_6, %c0_7], %7 {strides = array<i32>} : memref<24x256xf32, #tpu.memory_space<vmem>>, vector<24x256xf32>,
    %c0_i32_8 = arith.constant 0 : i32
    %9 = arith.cmpi eq, %arg2, %c0_i32_8 : i32
    %10 = arith.extui %9 : i1 to i32
    %c0_i32_9 = arith.constant 0 : i32
    %11 = arith.cmpi ne, %10, %c0_i32_9 : i32
    scf.if %11 {
      %c0_10 = arith.constant 0 : index
      %c0_11 = arith.constant 0 : index
      %12 = vector.load %arg8[%c0_10, %c0_11] : memref<24x256xf32, #tpu.memory_space<vmem>>, vector<24x256xf32>
      %c0_12 = arith.constant 0 : index
      %c0_13 = arith.constant 0 : index
      %13 = vector.load %arg5[%c0_12, %c0_13] : memref<1x256xf32, #tpu.memory_space<vmem>>, vector<1x256xf32>
      %14 = vector.broadcast %13 : vector<1x256xf32> to vector<24x256xf32>
      %15 = arith.mulf %12, %14 : vector<24x256xf32>
      %c0_14 = arith.constant 0 : index
      %c0_15 = arith.constant 0 : index
      %16 = vector.load %arg6[%c0_14, %c0_15] : memref<1x256xf32, #tpu.memory_space<vmem>>, vector<1x256xf32>
      %17 = vector.broadcast %16 : vector<1x256xf32> to vector<24x256xf32>
      %18 = arith.addf %15, %17 : vector<24x256xf32>
      %cst_16 = arith.constant 0.000000e+00 : f32
      %19 = vector.broadcast %cst_16 : f32 to vector<24x256xf32>
      %20 = arith.maximumf %18, %19 : vector<24x256xf32>
      %21 = arith.truncf %20 : vector<24x256xf32> to vector<24x256xbf16>
      %c0_17 = arith.constant 0 : index
      %c0_18 = arith.constant 0 : index
      %22 = vector.load %arg7[%c0_17, %c0_18] : memref<24x256xbf16, #tpu.memory_space<vmem>>, vector<24x256xbf16>
      tpu.vector_store %arg7[%c0_17, %c0_18], %21 {strides = array<i32>} : memref<24x256xbf16, #tpu.memory_space<vmem>>, vector<24x256xbf16>,
    } else {
    }
    return
  }
  func.func @transform_0(%arg0: i32, %arg1: i32, %arg2: i32) -> (i32, i32) {
    %c0_i32 = arith.constant 0 : i32
    return %arg0, %arg2 : i32, i32
  }
  func.func @transform_1(%arg0: i32, %arg1: i32, %arg2: i32) -> (i32, i32) {
    %c0_i32 = arith.constant 0 : i32
    return %arg2, %arg1 : i32, i32
  }
  func.func @transform_2(%arg0: i32, %arg1: i32, %arg2: i32) -> (i32, i32) {
    %c0_i32 = arith.constant 0 : i32
    %c0_i32_0 = arith.constant 0 : i32
    return %c0_i32, %arg1 : i32, i32
  }
  func.func @transform_3(%arg0: i32, %arg1: i32, %arg2: i32) -> (i32, i32) {
    %c0_i32 = arith.constant 0 : i32
    %c0_i32_0 = arith.constant 0 : i32
    return %c0_i32, %arg1 : i32, i32
  }
  func.func @transform_4(%arg0: i32, %arg1: i32, %arg2: i32) -> (i32, i32) {
    %c0_i32 = arith.constant 0 : i32
    return %arg0, %arg1 : i32, i32
  }
}

module attributes {stable_mosaic.version = 11 : i64} {
  func.func @kernel(%arg0: i32, %arg1: i32, %arg2: i32, %arg3: memref<24x128xbf16, #tpu.memory_space<vmem>>, %arg4: memref<128x256xbf16, #tpu.memory_space<vmem>>, %arg5: memref<1x256xf32, #tpu.memory_space<vmem>>, %arg6: memref<1x256xf32, #tpu.memory_space<vmem>>, %arg7: memref<24x256xbf16, #tpu.memory_space<vmem>>, %arg8: memref<24x256xf32, #tpu.memory_space<vmem>>) attributes {dimension_semantics = [#tpu.dimension_semantics<parallel>, #tpu.dimension_semantics<parallel>, #tpu.dimension_semantics<arbitrary>], iteration_bounds = array<i64: 1, 1, 1>, scalar_prefetch = 0 : i64, scratch_operands = 1 : i64, tpu.core_type = #tpu.core_type<tc>, window_params = [{transform_indices = @transform_0, window_bounds = array<i64: 24, 128>}, {transform_indices = @transform_1, window_bounds = array<i64: 128, 256>}, {transform_indices = @transform_2, window_bounds = array<i64: 1, 256>}, {transform_indices = @transform_3, window_bounds = array<i64: 1, 256>}, {transform_indices = @transform_4, window_bounds = array<i64: 24, 256>}]} {
    %c0_i32 = arith.constant 0 : i32
    %0 = arith.cmpi eq, %arg2, %c0_i32 : i32
    %1 = arith.extui %0 : i1 to i32
    %c0_i32_0 = arith.constant 0 : i32
    %2 = arith.cmpi ne, %1, %c0_i32_0 : i32
    scf.if %2 {
      %cst_10 = arith.constant 0.000000e+00 : f32
      %12 = vector.broadcast %cst_10 : f32 to vector<24x256xf32>
      %c0_11 = arith.constant 0 : index
      %c0_12 = arith.constant 0 : index
      %13 = vector.load %arg8[%c0_11, %c0_12] : memref<24x256xf32, #tpu.memory_space<vmem>>, vector<24x256xf32>
      tpu.vector_store %arg8[%c0_11, %c0_12], %12 {strides = array<i32>} : memref<24x256xf32, #tpu.memory_space<vmem>>, vector<24x256xf32>,
    } else {
    }
    %c0 = arith.constant 0 : index
    %c0_1 = arith.constant 0 : index
    %3 = vector.load %arg8[%c0, %c0_1] : memref<24x256xf32, #tpu.memory_space<vmem>>, vector<24x256xf32>
    %c0_2 = arith.constant 0 : index
    %c0_3 = arith.constant 0 : index
    %4 = vector.load %arg3[%c0_2, %c0_3] : memref<24x128xbf16, #tpu.memory_space<vmem>>, vector<24x128xbf16>
    %c0_4 = arith.constant 0 : index
    %c0_5 = arith.constant 0 : index
    %5 = vector.load %arg4[%c0_4, %c0_5] : memref<128x256xbf16, #tpu.memory_space<vmem>>, vector<128x256xbf16>
    %cst = arith.constant dense<0.000000e+00> : vector<24x256xf32>
    %6 = tpu.matmul %4, %5, %cst {dimension_numbers = #tpu.dot_dimension_numbers<[1], [0], [0], [1], [0, 0, 1, 1], [], []>} : vector<24x128xbf16>, vector<128x256xbf16>, vector<24x256xf32> -> vector<24x256xf32>
    %7 = arith.addf %3, %6 : vector<24x256xf32>
    %c0_6 = arith.constant 0 : index
    %c0_7 = arith.constant 0 : index
    %8 = vector.load %arg8[%c0_6, %c0_7] : memref<24x256xf32, #tpu.memory_space<vmem>>, vector<24x256xf32>
    tpu.vector_store %arg8[%c0_6, %c0_7], %7 {strides = array<i32>} : memref<24x256xf32, #tpu.memory_space<vmem>>, vector<24x256xf32>,
    %c0_i32_8 = arith.constant 0 : i32
    %9 = arith.cmpi eq, %arg2, %c0_i32_8 : i32
    %10 = arith.extui %9 : i1 to i32
    %c0_i32_9 = arith.constant 0 : i32
    %11 = arith.cmpi ne, %10, %c0_i32_9 : i32
    scf.if %11 {
      %c0_10 = arith.constant 0 : index
      %c0_11 = arith.constant 0 : index
      %12 = vector.load %arg8[%c0_10, %c0_11] : memref<24x256xf32, #tpu.memory_space<vmem>>, vector<24x256xf32>
      %c0_12 = arith.constant 0 : index
      %c0_13 = arith.constant 0 : index
      %13 = vector.load %arg5[%c0_12, %c0_13] : memref<1x256xf32, #tpu.memory_space<vmem>>, vector<1x256xf32>
      %14 = vector.broadcast %13 : vector<1x256xf32> to vector<24x256xf32>
      %15 = arith.mulf %12, %14 : vector<24x256xf32>
      %c0_14 = arith.constant 0 : index
      %c0_15 = arith.constant 0 : index
      %16 = vector.load %arg6[%c0_14, %c0_15] : memref<1x256xf32, #tpu.memory_space<vmem>>, vector<1x256xf32>
      %17 = vector.broadcast %16 : vector<1x256xf32> to vector<24x256xf32>
      %18 = arith.addf %15, %17 : vector<24x256xf32>
      %19 = arith.truncf %18 : vector<24x256xf32> to vector<24x256xbf16>
      %c0_16 = arith.constant 0 : index
      %c0_17 = arith.constant 0 : index
      %20 = vector.load %arg7[%c0_16, %c0_17] : memref<24x256xbf16, #tpu.memory_space<vmem>>, vector<24x256xbf16>
      tpu.vector_store %arg7[%c0_16, %c0_17], %19 {strides = array<i32>} : memref<24x256xbf16, #tpu.memory_space<vmem>>, vector<24x256xbf16>,
    } else {
    }
    return
  }
  func.func @transform_0(%arg0: i32, %arg1: i32, %arg2: i32) -> (i32, i32) {
    %c0_i32 = arith.constant 0 : i32
    return %arg0, %arg2 : i32, i32
  }
  func.func @transform_1(%arg0: i32, %arg1: i32, %arg2: i32) -> (i32, i32) {
    %c0_i32 = arith.constant 0 : i32
    return %arg2, %arg1 : i32, i32
  }
  func.func @transform_2(%arg0: i32, %arg1: i32, %arg2: i32) -> (i32, i32) {
    %c0_i32 = arith.constant 0 : i32
    %c0_i32_0 = arith.constant 0 : i32
    return %c0_i32, %arg1 : i32, i32
  }
  func.func @transform_3(%arg0: i32, %arg1: i32, %arg2: i32) -> (i32, i32) {
    %c0_i32 = arith.constant 0 : i32
    %c0_i32_0 = arith.constant 0 : i32
    return %c0_i32, %arg1 : i32, i32
  }
  func.func @transform_4(%arg0: i32, %arg1: i32, %arg2: i32) -> (i32, i32) {
    %c0_i32 = arith.constant 0 : i32
    return %arg0, %arg1 : i32, i32
  }
}

module attributes {stable_mosaic.version = 11 : i64} {
  func.func @kernel(%arg0: i32, %arg1: i32, %arg2: i32, %arg3: memref<24x1152xbf16, #tpu.memory_space<vmem>>, %arg4: memref<1152x256xbf16, #tpu.memory_space<vmem>>, %arg5: memref<1x256xf32, #tpu.memory_space<vmem>>, %arg6: memref<1x256xf32, #tpu.memory_space<vmem>>, %arg7: memref<24x256xbf16, #tpu.memory_space<vmem>>, %arg8: memref<24x256xbf16, #tpu.memory_space<vmem>>, %arg9: memref<24x256xf32, #tpu.memory_space<vmem>>) attributes {dimension_semantics = [#tpu.dimension_semantics<parallel>, #tpu.dimension_semantics<parallel>, #tpu.dimension_semantics<arbitrary>], iteration_bounds = array<i64: 1, 1, 2>, scalar_prefetch = 0 : i64, scratch_operands = 1 : i64, tpu.core_type = #tpu.core_type<tc>, window_params = [{transform_indices = @transform_0, window_bounds = array<i64: 24, 1152>}, {transform_indices = @transform_1, window_bounds = array<i64: 1152, 256>}, {transform_indices = @transform_2, window_bounds = array<i64: 1, 256>}, {transform_indices = @transform_3, window_bounds = array<i64: 1, 256>}, {transform_indices = @transform_4, window_bounds = array<i64: 24, 256>}, {transform_indices = @transform_5, window_bounds = array<i64: 24, 256>}]} {
    %c0_i32 = arith.constant 0 : i32
    %0 = arith.cmpi eq, %arg2, %c0_i32 : i32
    %1 = arith.extui %0 : i1 to i32
    %c0_i32_0 = arith.constant 0 : i32
    %2 = arith.cmpi ne, %1, %c0_i32_0 : i32
    scf.if %2 {
      %cst_9 = arith.constant 0.000000e+00 : f32
      %12 = vector.broadcast %cst_9 : f32 to vector<24x256xf32>
      %c0_10 = arith.constant 0 : index
      %c0_11 = arith.constant 0 : index
      %13 = vector.load %arg9[%c0_10, %c0_11] : memref<24x256xf32, #tpu.memory_space<vmem>>, vector<24x256xf32>
      tpu.vector_store %arg9[%c0_10, %c0_11], %12 {strides = array<i32>} : memref<24x256xf32, #tpu.memory_space<vmem>>, vector<24x256xf32>,
    } else {
    }
    %c0 = arith.constant 0 : index
    %c0_1 = arith.constant 0 : index
    %3 = vector.load %arg9[%c0, %c0_1] : memref<24x256xf32, #tpu.memory_space<vmem>>, vector<24x256xf32>
    %c0_2 = arith.constant 0 : index
    %c0_3 = arith.constant 0 : index
    %4 = vector.load %arg3[%c0_2, %c0_3] : memref<24x1152xbf16, #tpu.memory_space<vmem>>, vector<24x1152xbf16>
    %c0_4 = arith.constant 0 : index
    %c0_5 = arith.constant 0 : index
    %5 = vector.load %arg4[%c0_4, %c0_5] : memref<1152x256xbf16, #tpu.memory_space<vmem>>, vector<1152x256xbf16>
    %cst = arith.constant dense<0.000000e+00> : vector<24x256xf32>
    %6 = tpu.matmul %4, %5, %cst {dimension_numbers = #tpu.dot_dimension_numbers<[1], [0], [0], [1], [0, 0, 1, 1], [], []>} : vector<24x1152xbf16>, vector<1152x256xbf16>, vector<24x256xf32> -> vector<24x256xf32>
    %7 = arith.addf %3, %6 : vector<24x256xf32>
    %c0_6 = arith.constant 0 : index
    %c0_7 = arith.constant 0 : index
    %8 = vector.load %arg9[%c0_6, %c0_7] : memref<24x256xf32, #tpu.memory_space<vmem>>, vector<24x256xf32>
    tpu.vector_store %arg9[%c0_6, %c0_7], %7 {strides = array<i32>} : memref<24x256xf32, #tpu.memory_space<vmem>>, vector<24x256xf32>,
    %c1_i32 = arith.constant 1 : i32
    %9 = arith.cmpi eq, %arg2, %c1_i32 : i32
    %10 = arith.extui %9 : i1 to i32
    %c0_i32_8 = arith.constant 0 : i32
    %11 = arith.cmpi ne, %10, %c0_i32_8 : i32
    scf.if %11 {
      %c0_9 = arith.constant 0 : index
      %c0_10 = arith.constant 0 : index
      %12 = vector.load %arg9[%c0_9, %c0_10] : memref<24x256xf32, #tpu.memory_space<vmem>>, vector<24x256xf32>
      %c0_11 = arith.constant 0 : index
      %c0_12 = arith.constant 0 : index
      %13 = vector.load %arg5[%c0_11, %c0_12] : memref<1x256xf32, #tpu.memory_space<vmem>>, vector<1x256xf32>
      %14 = vector.broadcast %13 : vector<1x256xf32> to vector<24x256xf32>
      %15 = arith.mulf %12, %14 : vector<24x256xf32>
      %c0_13 = arith.constant 0 : index
      %c0_14 = arith.constant 0 : index
      %16 = vector.load %arg6[%c0_13, %c0_14] : memref<1x256xf32, #tpu.memory_space<vmem>>, vector<1x256xf32>
      %17 = vector.broadcast %16 : vector<1x256xf32> to vector<24x256xf32>
      %18 = arith.addf %15, %17 : vector<24x256xf32>
      %c0_15 = arith.constant 0 : index
      %c0_16 = arith.constant 0 : index
      %19 = vector.load %arg7[%c0_15, %c0_16] : memref<24x256xbf16, #tpu.memory_space<vmem>>, vector<24x256xbf16>
      %20 = arith.extf %19 : vector<24x256xbf16> to vector<24x256xf32>
      %21 = arith.addf %18, %20 : vector<24x256xf32>
      %cst_17 = arith.constant 0.000000e+00 : f32
      %22 = vector.broadcast %cst_17 : f32 to vector<24x256xf32>
      %23 = arith.maximumf %21, %22 : vector<24x256xf32>
      %24 = arith.truncf %23 : vector<24x256xf32> to vector<24x256xbf16>
      %c0_18 = arith.constant 0 : index
      %c0_19 = arith.constant 0 : index
      %25 = vector.load %arg8[%c0_18, %c0_19] : memref<24x256xbf16, #tpu.memory_space<vmem>>, vector<24x256xbf16>
      tpu.vector_store %arg8[%c0_18, %c0_19], %24 {strides = array<i32>} : memref<24x256xbf16, #tpu.memory_space<vmem>>, vector<24x256xbf16>,
    } else {
    }
    return
  }
  func.func @transform_0(%arg0: i32, %arg1: i32, %arg2: i32) -> (i32, i32) {
    %c0_i32 = arith.constant 0 : i32
    return %arg0, %arg2 : i32, i32
  }
  func.func @transform_1(%arg0: i32, %arg1: i32, %arg2: i32) -> (i32, i32) {
    %c0_i32 = arith.constant 0 : i32
    return %arg2, %arg1 : i32, i32
  }
  func.func @transform_2(%arg0: i32, %arg1: i32, %arg2: i32) -> (i32, i32) {
    %c0_i32 = arith.constant 0 : i32
    %c0_i32_0 = arith.constant 0 : i32
    return %c0_i32, %arg1 : i32, i32
  }
  func.func @transform_3(%arg0: i32, %arg1: i32, %arg2: i32) -> (i32, i32) {
    %c0_i32 = arith.constant 0 : i32
    %c0_i32_0 = arith.constant 0 : i32
    return %c0_i32, %arg1 : i32, i32
  }
  func.func @transform_4(%arg0: i32, %arg1: i32, %arg2: i32) -> (i32, i32) {
    %c0_i32 = arith.constant 0 : i32
    return %arg0, %arg1 : i32, i32
  }
  func.func @transform_5(%arg0: i32, %arg1: i32, %arg2: i32) -> (i32, i32) {
    %c0_i32 = arith.constant 0 : i32
    return %arg0, %arg1 : i32, i32
  }
}

module attributes {stable_mosaic.version = 11 : i64} {
  func.func @kernel(%arg0: i32, %arg1: i32, %arg2: i32, %arg3: memref<8x1152xbf16, #tpu.memory_space<vmem>>, %arg4: memref<1152x512xbf16, #tpu.memory_space<vmem>>, %arg5: memref<1x512xf32, #tpu.memory_space<vmem>>, %arg6: memref<1x512xf32, #tpu.memory_space<vmem>>, %arg7: memref<8x512xbf16, #tpu.memory_space<vmem>>, %arg8: memref<8x512xf32, #tpu.memory_space<vmem>>) attributes {dimension_semantics = [#tpu.dimension_semantics<parallel>, #tpu.dimension_semantics<parallel>, #tpu.dimension_semantics<arbitrary>], iteration_bounds = array<i64: 1, 1, 2>, scalar_prefetch = 0 : i64, scratch_operands = 1 : i64, tpu.core_type = #tpu.core_type<tc>, window_params = [{transform_indices = @transform_0, window_bounds = array<i64: 8, 1152>}, {transform_indices = @transform_1, window_bounds = array<i64: 1152, 512>}, {transform_indices = @transform_2, window_bounds = array<i64: 1, 512>}, {transform_indices = @transform_3, window_bounds = array<i64: 1, 512>}, {transform_indices = @transform_4, window_bounds = array<i64: 8, 512>}]} {
    %c0_i32 = arith.constant 0 : i32
    %0 = arith.cmpi eq, %arg2, %c0_i32 : i32
    %1 = arith.extui %0 : i1 to i32
    %c0_i32_0 = arith.constant 0 : i32
    %2 = arith.cmpi ne, %1, %c0_i32_0 : i32
    scf.if %2 {
      %cst_9 = arith.constant 0.000000e+00 : f32
      %12 = vector.broadcast %cst_9 : f32 to vector<8x512xf32>
      %c0_10 = arith.constant 0 : index
      %c0_11 = arith.constant 0 : index
      %13 = vector.load %arg8[%c0_10, %c0_11] : memref<8x512xf32, #tpu.memory_space<vmem>>, vector<8x512xf32>
      tpu.vector_store %arg8[%c0_10, %c0_11], %12 {strides = array<i32>} : memref<8x512xf32, #tpu.memory_space<vmem>>, vector<8x512xf32>,
    } else {
    }
    %c0 = arith.constant 0 : index
    %c0_1 = arith.constant 0 : index
    %3 = vector.load %arg8[%c0, %c0_1] : memref<8x512xf32, #tpu.memory_space<vmem>>, vector<8x512xf32>
    %c0_2 = arith.constant 0 : index
    %c0_3 = arith.constant 0 : index
    %4 = vector.load %arg3[%c0_2, %c0_3] : memref<8x1152xbf16, #tpu.memory_space<vmem>>, vector<8x1152xbf16>
    %c0_4 = arith.constant 0 : index
    %c0_5 = arith.constant 0 : index
    %5 = vector.load %arg4[%c0_4, %c0_5] : memref<1152x512xbf16, #tpu.memory_space<vmem>>, vector<1152x512xbf16>
    %cst = arith.constant dense<0.000000e+00> : vector<8x512xf32>
    %6 = tpu.matmul %4, %5, %cst {dimension_numbers = #tpu.dot_dimension_numbers<[1], [0], [0], [1], [0, 0, 1, 1], [], []>} : vector<8x1152xbf16>, vector<1152x512xbf16>, vector<8x512xf32> -> vector<8x512xf32>
    %7 = arith.addf %3, %6 : vector<8x512xf32>
    %c0_6 = arith.constant 0 : index
    %c0_7 = arith.constant 0 : index
    %8 = vector.load %arg8[%c0_6, %c0_7] : memref<8x512xf32, #tpu.memory_space<vmem>>, vector<8x512xf32>
    tpu.vector_store %arg8[%c0_6, %c0_7], %7 {strides = array<i32>} : memref<8x512xf32, #tpu.memory_space<vmem>>, vector<8x512xf32>,
    %c1_i32 = arith.constant 1 : i32
    %9 = arith.cmpi eq, %arg2, %c1_i32 : i32
    %10 = arith.extui %9 : i1 to i32
    %c0_i32_8 = arith.constant 0 : i32
    %11 = arith.cmpi ne, %10, %c0_i32_8 : i32
    scf.if %11 {
      %c0_9 = arith.constant 0 : index
      %c0_10 = arith.constant 0 : index
      %12 = vector.load %arg8[%c0_9, %c0_10] : memref<8x512xf32, #tpu.memory_space<vmem>>, vector<8x512xf32>
      %c0_11 = arith.constant 0 : index
      %c0_12 = arith.constant 0 : index
      %13 = vector.load %arg5[%c0_11, %c0_12] : memref<1x512xf32, #tpu.memory_space<vmem>>, vector<1x512xf32>
      %14 = vector.broadcast %13 : vector<1x512xf32> to vector<8x512xf32>
      %15 = arith.mulf %12, %14 : vector<8x512xf32>
      %c0_13 = arith.constant 0 : index
      %c0_14 = arith.constant 0 : index
      %16 = vector.load %arg6[%c0_13, %c0_14] : memref<1x512xf32, #tpu.memory_space<vmem>>, vector<1x512xf32>
      %17 = vector.broadcast %16 : vector<1x512xf32> to vector<8x512xf32>
      %18 = arith.addf %15, %17 : vector<8x512xf32>
      %cst_15 = arith.constant 0.000000e+00 : f32
      %19 = vector.broadcast %cst_15 : f32 to vector<8x512xf32>
      %20 = arith.maximumf %18, %19 : vector<8x512xf32>
      %21 = arith.truncf %20 : vector<8x512xf32> to vector<8x512xbf16>
      %c0_16 = arith.constant 0 : index
      %c0_17 = arith.constant 0 : index
      %22 = vector.load %arg7[%c0_16, %c0_17] : memref<8x512xbf16, #tpu.memory_space<vmem>>, vector<8x512xbf16>
      tpu.vector_store %arg7[%c0_16, %c0_17], %21 {strides = array<i32>} : memref<8x512xbf16, #tpu.memory_space<vmem>>, vector<8x512xbf16>,
    } else {
    }
    return
  }
  func.func @transform_0(%arg0: i32, %arg1: i32, %arg2: i32) -> (i32, i32) {
    %c0_i32 = arith.constant 0 : i32
    return %arg0, %arg2 : i32, i32
  }
  func.func @transform_1(%arg0: i32, %arg1: i32, %arg2: i32) -> (i32, i32) {
    %c0_i32 = arith.constant 0 : i32
    return %arg2, %arg1 : i32, i32
  }
  func.func @transform_2(%arg0: i32, %arg1: i32, %arg2: i32) -> (i32, i32) {
    %c0_i32 = arith.constant 0 : i32
    %c0_i32_0 = arith.constant 0 : i32
    return %c0_i32, %arg1 : i32, i32
  }
  func.func @transform_3(%arg0: i32, %arg1: i32, %arg2: i32) -> (i32, i32) {
    %c0_i32 = arith.constant 0 : i32
    %c0_i32_0 = arith.constant 0 : i32
    return %c0_i32, %arg1 : i32, i32
  }
  func.func @transform_4(%arg0: i32, %arg1: i32, %arg2: i32) -> (i32, i32) {
    %c0_i32 = arith.constant 0 : i32
    return %arg0, %arg1 : i32, i32
  }
}

module attributes {stable_mosaic.version = 11 : i64} {
  func.func @kernel(%arg0: i32, %arg1: i32, %arg2: i32, %arg3: memref<8x1536xbf16, #tpu.memory_space<vmem>>, %arg4: memref<1536x512xbf16, #tpu.memory_space<vmem>>, %arg5: memref<1x512xf32, #tpu.memory_space<vmem>>, %arg6: memref<1x512xf32, #tpu.memory_space<vmem>>, %arg7: memref<8x512xbf16, #tpu.memory_space<vmem>>, %arg8: memref<8x512xbf16, #tpu.memory_space<vmem>>, %arg9: memref<8x512xf32, #tpu.memory_space<vmem>>) attributes {dimension_semantics = [#tpu.dimension_semantics<parallel>, #tpu.dimension_semantics<parallel>, #tpu.dimension_semantics<arbitrary>], iteration_bounds = array<i64: 1, 1, 3>, scalar_prefetch = 0 : i64, scratch_operands = 1 : i64, tpu.core_type = #tpu.core_type<tc>, window_params = [{transform_indices = @transform_0, window_bounds = array<i64: 8, 1536>}, {transform_indices = @transform_1, window_bounds = array<i64: 1536, 512>}, {transform_indices = @transform_2, window_bounds = array<i64: 1, 512>}, {transform_indices = @transform_3, window_bounds = array<i64: 1, 512>}, {transform_indices = @transform_4, window_bounds = array<i64: 8, 512>}, {transform_indices = @transform_5, window_bounds = array<i64: 8, 512>}]} {
    %c0_i32 = arith.constant 0 : i32
    %0 = arith.cmpi eq, %arg2, %c0_i32 : i32
    %1 = arith.extui %0 : i1 to i32
    %c0_i32_0 = arith.constant 0 : i32
    %2 = arith.cmpi ne, %1, %c0_i32_0 : i32
    scf.if %2 {
      %cst_9 = arith.constant 0.000000e+00 : f32
      %12 = vector.broadcast %cst_9 : f32 to vector<8x512xf32>
      %c0_10 = arith.constant 0 : index
      %c0_11 = arith.constant 0 : index
      %13 = vector.load %arg9[%c0_10, %c0_11] : memref<8x512xf32, #tpu.memory_space<vmem>>, vector<8x512xf32>
      tpu.vector_store %arg9[%c0_10, %c0_11], %12 {strides = array<i32>} : memref<8x512xf32, #tpu.memory_space<vmem>>, vector<8x512xf32>,
    } else {
    }
    %c0 = arith.constant 0 : index
    %c0_1 = arith.constant 0 : index
    %3 = vector.load %arg9[%c0, %c0_1] : memref<8x512xf32, #tpu.memory_space<vmem>>, vector<8x512xf32>
    %c0_2 = arith.constant 0 : index
    %c0_3 = arith.constant 0 : index
    %4 = vector.load %arg3[%c0_2, %c0_3] : memref<8x1536xbf16, #tpu.memory_space<vmem>>, vector<8x1536xbf16>
    %c0_4 = arith.constant 0 : index
    %c0_5 = arith.constant 0 : index
    %5 = vector.load %arg4[%c0_4, %c0_5] : memref<1536x512xbf16, #tpu.memory_space<vmem>>, vector<1536x512xbf16>
    %cst = arith.constant dense<0.000000e+00> : vector<8x512xf32>
    %6 = tpu.matmul %4, %5, %cst {dimension_numbers = #tpu.dot_dimension_numbers<[1], [0], [0], [1], [0, 0, 1, 1], [], []>} : vector<8x1536xbf16>, vector<1536x512xbf16>, vector<8x512xf32> -> vector<8x512xf32>
    %7 = arith.addf %3, %6 : vector<8x512xf32>
    %c0_6 = arith.constant 0 : index
    %c0_7 = arith.constant 0 : index
    %8 = vector.load %arg9[%c0_6, %c0_7] : memref<8x512xf32, #tpu.memory_space<vmem>>, vector<8x512xf32>
    tpu.vector_store %arg9[%c0_6, %c0_7], %7 {strides = array<i32>} : memref<8x512xf32, #tpu.memory_space<vmem>>, vector<8x512xf32>,
    %c2_i32 = arith.constant 2 : i32
    %9 = arith.cmpi eq, %arg2, %c2_i32 : i32
    %10 = arith.extui %9 : i1 to i32
    %c0_i32_8 = arith.constant 0 : i32
    %11 = arith.cmpi ne, %10, %c0_i32_8 : i32
    scf.if %11 {
      %c0_9 = arith.constant 0 : index
      %c0_10 = arith.constant 0 : index
      %12 = vector.load %arg9[%c0_9, %c0_10] : memref<8x512xf32, #tpu.memory_space<vmem>>, vector<8x512xf32>
      %c0_11 = arith.constant 0 : index
      %c0_12 = arith.constant 0 : index
      %13 = vector.load %arg5[%c0_11, %c0_12] : memref<1x512xf32, #tpu.memory_space<vmem>>, vector<1x512xf32>
      %14 = vector.broadcast %13 : vector<1x512xf32> to vector<8x512xf32>
      %15 = arith.mulf %12, %14 : vector<8x512xf32>
      %c0_13 = arith.constant 0 : index
      %c0_14 = arith.constant 0 : index
      %16 = vector.load %arg6[%c0_13, %c0_14] : memref<1x512xf32, #tpu.memory_space<vmem>>, vector<1x512xf32>
      %17 = vector.broadcast %16 : vector<1x512xf32> to vector<8x512xf32>
      %18 = arith.addf %15, %17 : vector<8x512xf32>
      %c0_15 = arith.constant 0 : index
      %c0_16 = arith.constant 0 : index
      %19 = vector.load %arg7[%c0_15, %c0_16] : memref<8x512xbf16, #tpu.memory_space<vmem>>, vector<8x512xbf16>
      %20 = arith.extf %19 : vector<8x512xbf16> to vector<8x512xf32>
      %21 = arith.addf %18, %20 : vector<8x512xf32>
      %cst_17 = arith.constant 0.000000e+00 : f32
      %22 = vector.broadcast %cst_17 : f32 to vector<8x512xf32>
      %23 = arith.maximumf %21, %22 : vector<8x512xf32>
      %24 = arith.truncf %23 : vector<8x512xf32> to vector<8x512xbf16>
      %c0_18 = arith.constant 0 : index
      %c0_19 = arith.constant 0 : index
      %25 = vector.load %arg8[%c0_18, %c0_19] : memref<8x512xbf16, #tpu.memory_space<vmem>>, vector<8x512xbf16>
      tpu.vector_store %arg8[%c0_18, %c0_19], %24 {strides = array<i32>} : memref<8x512xbf16, #tpu.memory_space<vmem>>, vector<8x512xbf16>,
    } else {
    }
    return
  }
  func.func @transform_0(%arg0: i32, %arg1: i32, %arg2: i32) -> (i32, i32) {
    %c0_i32 = arith.constant 0 : i32
    return %arg0, %arg2 : i32, i32
  }
  func.func @transform_1(%arg0: i32, %arg1: i32, %arg2: i32) -> (i32, i32) {
    %c0_i32 = arith.constant 0 : i32
    return %arg2, %arg1 : i32, i32
  }
  func.func @transform_2(%arg0: i32, %arg1: i32, %arg2: i32) -> (i32, i32) {
    %c0_i32 = arith.constant 0 : i32
    %c0_i32_0 = arith.constant 0 : i32
    return %c0_i32, %arg1 : i32, i32
  }
  func.func @transform_3(%arg0: i32, %arg1: i32, %arg2: i32) -> (i32, i32) {
    %c0_i32 = arith.constant 0 : i32
    %c0_i32_0 = arith.constant 0 : i32
    return %c0_i32, %arg1 : i32, i32
  }
  func.func @transform_4(%arg0: i32, %arg1: i32, %arg2: i32) -> (i32, i32) {
    %c0_i32 = arith.constant 0 : i32
    return %arg0, %arg1 : i32, i32
  }
  func.func @transform_5(%arg0: i32, %arg1: i32, %arg2: i32) -> (i32, i32) {
    %c0_i32 = arith.constant 0 : i32
    return %arg0, %arg1 : i32, i32
  }
}

module attributes {stable_mosaic.version = 11 : i64} {
  func.func @kernel(%arg0: i32, %arg1: i32, %arg2: i32, %arg3: memref<8x256xbf16, #tpu.memory_space<vmem>>, %arg4: memref<256x512xbf16, #tpu.memory_space<vmem>>, %arg5: memref<1x512xf32, #tpu.memory_space<vmem>>, %arg6: memref<1x512xf32, #tpu.memory_space<vmem>>, %arg7: memref<8x512xbf16, #tpu.memory_space<vmem>>, %arg8: memref<8x512xf32, #tpu.memory_space<vmem>>) attributes {dimension_semantics = [#tpu.dimension_semantics<parallel>, #tpu.dimension_semantics<parallel>, #tpu.dimension_semantics<arbitrary>], iteration_bounds = array<i64: 1, 1, 1>, scalar_prefetch = 0 : i64, scratch_operands = 1 : i64, tpu.core_type = #tpu.core_type<tc>, window_params = [{transform_indices = @transform_0, window_bounds = array<i64: 8, 256>}, {transform_indices = @transform_1, window_bounds = array<i64: 256, 512>}, {transform_indices = @transform_2, window_bounds = array<i64: 1, 512>}, {transform_indices = @transform_3, window_bounds = array<i64: 1, 512>}, {transform_indices = @transform_4, window_bounds = array<i64: 8, 512>}]} {
    %c0_i32 = arith.constant 0 : i32
    %0 = arith.cmpi eq, %arg2, %c0_i32 : i32
    %1 = arith.extui %0 : i1 to i32
    %c0_i32_0 = arith.constant 0 : i32
    %2 = arith.cmpi ne, %1, %c0_i32_0 : i32
    scf.if %2 {
      %cst_10 = arith.constant 0.000000e+00 : f32
      %12 = vector.broadcast %cst_10 : f32 to vector<8x512xf32>
      %c0_11 = arith.constant 0 : index
      %c0_12 = arith.constant 0 : index
      %13 = vector.load %arg8[%c0_11, %c0_12] : memref<8x512xf32, #tpu.memory_space<vmem>>, vector<8x512xf32>
      tpu.vector_store %arg8[%c0_11, %c0_12], %12 {strides = array<i32>} : memref<8x512xf32, #tpu.memory_space<vmem>>, vector<8x512xf32>,
    } else {
    }
    %c0 = arith.constant 0 : index
    %c0_1 = arith.constant 0 : index
    %3 = vector.load %arg8[%c0, %c0_1] : memref<8x512xf32, #tpu.memory_space<vmem>>, vector<8x512xf32>
    %c0_2 = arith.constant 0 : index
    %c0_3 = arith.constant 0 : index
    %4 = vector.load %arg3[%c0_2, %c0_3] : memref<8x256xbf16, #tpu.memory_space<vmem>>, vector<8x256xbf16>
    %c0_4 = arith.constant 0 : index
    %c0_5 = arith.constant 0 : index
    %5 = vector.load %arg4[%c0_4, %c0_5] : memref<256x512xbf16, #tpu.memory_space<vmem>>, vector<256x512xbf16>
    %cst = arith.constant dense<0.000000e+00> : vector<8x512xf32>
    %6 = tpu.matmul %4, %5, %cst {dimension_numbers = #tpu.dot_dimension_numbers<[1], [0], [0], [1], [0, 0, 1, 1], [], []>} : vector<8x256xbf16>, vector<256x512xbf16>, vector<8x512xf32> -> vector<8x512xf32>
    %7 = arith.addf %3, %6 : vector<8x512xf32>
    %c0_6 = arith.constant 0 : index
    %c0_7 = arith.constant 0 : index
    %8 = vector.load %arg8[%c0_6, %c0_7] : memref<8x512xf32, #tpu.memory_space<vmem>>, vector<8x512xf32>
    tpu.vector_store %arg8[%c0_6, %c0_7], %7 {strides = array<i32>} : memref<8x512xf32, #tpu.memory_space<vmem>>, vector<8x512xf32>,
    %c0_i32_8 = arith.constant 0 : i32
    %9 = arith.cmpi eq, %arg2, %c0_i32_8 : i32
    %10 = arith.extui %9 : i1 to i32
    %c0_i32_9 = arith.constant 0 : i32
    %11 = arith.cmpi ne, %10, %c0_i32_9 : i32
    scf.if %11 {
      %c0_10 = arith.constant 0 : index
      %c0_11 = arith.constant 0 : index
      %12 = vector.load %arg8[%c0_10, %c0_11] : memref<8x512xf32, #tpu.memory_space<vmem>>, vector<8x512xf32>
      %c0_12 = arith.constant 0 : index
      %c0_13 = arith.constant 0 : index
      %13 = vector.load %arg5[%c0_12, %c0_13] : memref<1x512xf32, #tpu.memory_space<vmem>>, vector<1x512xf32>
      %14 = vector.broadcast %13 : vector<1x512xf32> to vector<8x512xf32>
      %15 = arith.mulf %12, %14 : vector<8x512xf32>
      %c0_14 = arith.constant 0 : index
      %c0_15 = arith.constant 0 : index
      %16 = vector.load %arg6[%c0_14, %c0_15] : memref<1x512xf32, #tpu.memory_space<vmem>>, vector<1x512xf32>
      %17 = vector.broadcast %16 : vector<1x512xf32> to vector<8x512xf32>
      %18 = arith.addf %15, %17 : vector<8x512xf32>
      %19 = arith.truncf %18 : vector<8x512xf32> to vector<8x512xbf16>
      %c0_16 = arith.constant 0 : index
      %c0_17 = arith.constant 0 : index
      %20 = vector.load %arg7[%c0_16, %c0_17] : memref<8x512xbf16, #tpu.memory_space<vmem>>, vector<8x512xbf16>
      tpu.vector_store %arg7[%c0_16, %c0_17], %19 {strides = array<i32>} : memref<8x512xbf16, #tpu.memory_space<vmem>>, vector<8x512xbf16>,
    } else {
    }
    return
  }
  func.func @transform_0(%arg0: i32, %arg1: i32, %arg2: i32) -> (i32, i32) {
    %c0_i32 = arith.constant 0 : i32
    return %arg0, %arg2 : i32, i32
  }
  func.func @transform_1(%arg0: i32, %arg1: i32, %arg2: i32) -> (i32, i32) {
    %c0_i32 = arith.constant 0 : i32
    return %arg2, %arg1 : i32, i32
  }
  func.func @transform_2(%arg0: i32, %arg1: i32, %arg2: i32) -> (i32, i32) {
    %c0_i32 = arith.constant 0 : i32
    %c0_i32_0 = arith.constant 0 : i32
    return %c0_i32, %arg1 : i32, i32
  }
  func.func @transform_3(%arg0: i32, %arg1: i32, %arg2: i32) -> (i32, i32) {
    %c0_i32 = arith.constant 0 : i32
    %c0_i32_0 = arith.constant 0 : i32
    return %c0_i32, %arg1 : i32, i32
  }
  func.func @transform_4(%arg0: i32, %arg1: i32, %arg2: i32) -> (i32, i32) {
    %c0_i32 = arith.constant 0 : i32
    return %arg0, %arg1 : i32, i32
  }
}

module attributes {stable_mosaic.version = 11 : i64} {
  func.func @kernel(%arg0: i32, %arg1: i32, %arg2: i32, %arg3: memref<8x1536xbf16, #tpu.memory_space<vmem>>, %arg4: memref<1536x512xbf16, #tpu.memory_space<vmem>>, %arg5: memref<1x512xf32, #tpu.memory_space<vmem>>, %arg6: memref<1x512xf32, #tpu.memory_space<vmem>>, %arg7: memref<8x512xbf16, #tpu.memory_space<vmem>>, %arg8: memref<8x512xf32, #tpu.memory_space<vmem>>) attributes {dimension_semantics = [#tpu.dimension_semantics<parallel>, #tpu.dimension_semantics<parallel>, #tpu.dimension_semantics<arbitrary>], iteration_bounds = array<i64: 1, 1, 3>, scalar_prefetch = 0 : i64, scratch_operands = 1 : i64, tpu.core_type = #tpu.core_type<tc>, window_params = [{transform_indices = @transform_0, window_bounds = array<i64: 8, 1536>}, {transform_indices = @transform_1, window_bounds = array<i64: 1536, 512>}, {transform_indices = @transform_2, window_bounds = array<i64: 1, 512>}, {transform_indices = @transform_3, window_bounds = array<i64: 1, 512>}, {transform_indices = @transform_4, window_bounds = array<i64: 8, 512>}]} {
    %c0_i32 = arith.constant 0 : i32
    %0 = arith.cmpi eq, %arg2, %c0_i32 : i32
    %1 = arith.extui %0 : i1 to i32
    %c0_i32_0 = arith.constant 0 : i32
    %2 = arith.cmpi ne, %1, %c0_i32_0 : i32
    scf.if %2 {
      %cst_9 = arith.constant 0.000000e+00 : f32
      %12 = vector.broadcast %cst_9 : f32 to vector<8x512xf32>
      %c0_10 = arith.constant 0 : index
      %c0_11 = arith.constant 0 : index
      %13 = vector.load %arg8[%c0_10, %c0_11] : memref<8x512xf32, #tpu.memory_space<vmem>>, vector<8x512xf32>
      tpu.vector_store %arg8[%c0_10, %c0_11], %12 {strides = array<i32>} : memref<8x512xf32, #tpu.memory_space<vmem>>, vector<8x512xf32>,
    } else {
    }
    %c0 = arith.constant 0 : index
    %c0_1 = arith.constant 0 : index
    %3 = vector.load %arg8[%c0, %c0_1] : memref<8x512xf32, #tpu.memory_space<vmem>>, vector<8x512xf32>
    %c0_2 = arith.constant 0 : index
    %c0_3 = arith.constant 0 : index
    %4 = vector.load %arg3[%c0_2, %c0_3] : memref<8x1536xbf16, #tpu.memory_space<vmem>>, vector<8x1536xbf16>
    %c0_4 = arith.constant 0 : index
    %c0_5 = arith.constant 0 : index
    %5 = vector.load %arg4[%c0_4, %c0_5] : memref<1536x512xbf16, #tpu.memory_space<vmem>>, vector<1536x512xbf16>
    %cst = arith.constant dense<0.000000e+00> : vector<8x512xf32>
    %6 = tpu.matmul %4, %5, %cst {dimension_numbers = #tpu.dot_dimension_numbers<[1], [0], [0], [1], [0, 0, 1, 1], [], []>} : vector<8x1536xbf16>, vector<1536x512xbf16>, vector<8x512xf32> -> vector<8x512xf32>
    %7 = arith.addf %3, %6 : vector<8x512xf32>
    %c0_6 = arith.constant 0 : index
    %c0_7 = arith.constant 0 : index
    %8 = vector.load %arg8[%c0_6, %c0_7] : memref<8x512xf32, #tpu.memory_space<vmem>>, vector<8x512xf32>
    tpu.vector_store %arg8[%c0_6, %c0_7], %7 {strides = array<i32>} : memref<8x512xf32, #tpu.memory_space<vmem>>, vector<8x512xf32>,
    %c2_i32 = arith.constant 2 : i32
    %9 = arith.cmpi eq, %arg2, %c2_i32 : i32
    %10 = arith.extui %9 : i1 to i32
    %c0_i32_8 = arith.constant 0 : i32
    %11 = arith.cmpi ne, %10, %c0_i32_8 : i32
    scf.if %11 {
      %c0_9 = arith.constant 0 : index
      %c0_10 = arith.constant 0 : index
      %12 = vector.load %arg8[%c0_9, %c0_10] : memref<8x512xf32, #tpu.memory_space<vmem>>, vector<8x512xf32>
      %c0_11 = arith.constant 0 : index
      %c0_12 = arith.constant 0 : index
      %13 = vector.load %arg5[%c0_11, %c0_12] : memref<1x512xf32, #tpu.memory_space<vmem>>, vector<1x512xf32>
      %14 = vector.broadcast %13 : vector<1x512xf32> to vector<8x512xf32>
      %15 = arith.mulf %12, %14 : vector<8x512xf32>
      %c0_13 = arith.constant 0 : index
      %c0_14 = arith.constant 0 : index
      %16 = vector.load %arg6[%c0_13, %c0_14] : memref<1x512xf32, #tpu.memory_space<vmem>>, vector<1x512xf32>
      %17 = vector.broadcast %16 : vector<1x512xf32> to vector<8x512xf32>
      %18 = arith.addf %15, %17 : vector<8x512xf32>
      %cst_15 = arith.constant 0.000000e+00 : f32
      %19 = vector.broadcast %cst_15 : f32 to vector<8x512xf32>
      %20 = arith.maximumf %18, %19 : vector<8x512xf32>
      %21 = arith.truncf %20 : vector<8x512xf32> to vector<8x512xbf16>
      %c0_16 = arith.constant 0 : index
      %c0_17 = arith.constant 0 : index
      %22 = vector.load %arg7[%c0_16, %c0_17] : memref<8x512xbf16, #tpu.memory_space<vmem>>, vector<8x512xbf16>
      tpu.vector_store %arg7[%c0_16, %c0_17], %21 {strides = array<i32>} : memref<8x512xbf16, #tpu.memory_space<vmem>>, vector<8x512xbf16>,
    } else {
    }
    return
  }
  func.func @transform_0(%arg0: i32, %arg1: i32, %arg2: i32) -> (i32, i32) {
    %c0_i32 = arith.constant 0 : i32
    return %arg0, %arg2 : i32, i32
  }
  func.func @transform_1(%arg0: i32, %arg1: i32, %arg2: i32) -> (i32, i32) {
    %c0_i32 = arith.constant 0 : i32
    return %arg2, %arg1 : i32, i32
  }
  func.func @transform_2(%arg0: i32, %arg1: i32, %arg2: i32) -> (i32, i32) {
    %c0_i32 = arith.constant 0 : i32
    %c0_i32_0 = arith.constant 0 : i32
    return %c0_i32, %arg1 : i32, i32
  }
  func.func @transform_3(%arg0: i32, %arg1: i32, %arg2: i32) -> (i32, i32) {
    %c0_i32 = arith.constant 0 : i32
    %c0_i32_0 = arith.constant 0 : i32
    return %c0_i32, %arg1 : i32, i32
  }
  func.func @transform_4(%arg0: i32, %arg1: i32, %arg2: i32) -> (i32, i32) {
    %c0_i32 = arith.constant 0 : i32
    return %arg0, %arg1 : i32, i32
  }
}

module attributes {stable_mosaic.version = 11 : i64} {
  func.func @_pool_fc_kernel(%arg0: memref<2x4x512xbf16, #tpu.memory_space<vmem>>, %arg1: memref<512x128xf32, #tpu.memory_space<vmem>>, %arg2: memref<1x128xf32, #tpu.memory_space<vmem>>, %arg3: memref<2x128xf32, #tpu.memory_space<vmem>>) attributes {dimension_semantics = [], scalar_prefetch = 0 : i64, scratch_operands = 0 : i64, tpu.core_type = #tpu.core_type<tc>} {
    %c0 = arith.constant 0 : index
    %c0_0 = arith.constant 0 : index
    %c0_1 = arith.constant 0 : index
    %0 = vector.load %arg0[%c0, %c0_0, %c0_1] : memref<2x4x512xbf16, #tpu.memory_space<vmem>>, vector<2x4x512xbf16>
    %1 = arith.extf %0 : vector<2x4x512xbf16> to vector<2x4x512xf32>
    %cst = arith.constant dense<0.000000e+00> : vector<2x512xf32>
    %2 = vector.multi_reduction <add>, %1, %cst [1] : vector<2x4x512xf32> to vector<2x512xf32>
    %cst_2 = arith.constant 4.000000e+00 : f32
    %3 = vector.broadcast %cst_2 : f32 to vector<2x512xf32>
    %4 = arith.divf %2, %3 : vector<2x512xf32>
    %c0_3 = arith.constant 0 : index
    %c0_4 = arith.constant 0 : index
    %5 = vector.load %arg1[%c0_3, %c0_4] : memref<512x128xf32, #tpu.memory_space<vmem>>, vector<512x128xf32>
    %cst_5 = arith.constant dense<0.000000e+00> : vector<2x128xf32>
    %6 = tpu.matmul %4, %5, %cst_5 {dimension_numbers = #tpu.dot_dimension_numbers<[1], [0], [0], [1], [0, 0, 1, 1], [], []>} : vector<2x512xf32>, vector<512x128xf32>, vector<2x128xf32> -> vector<2x128xf32>
    %c0_6 = arith.constant 0 : index
    %c0_7 = arith.constant 0 : index
    %7 = vector.load %arg2[%c0_6, %c0_7] : memref<1x128xf32, #tpu.memory_space<vmem>>, vector<1x128xf32>
    %8 = vector.broadcast %7 : vector<1x128xf32> to vector<2x128xf32>
    %9 = arith.addf %6, %8 : vector<2x128xf32>
    %c0_8 = arith.constant 0 : index
    %c0_9 = arith.constant 0 : index
    %10 = vector.load %arg3[%c0_8, %c0_9] : memref<2x128xf32, #tpu.memory_space<vmem>>, vector<2x128xf32>
    tpu.vector_store %arg3[%c0_8, %c0_9], %9 {strides = array<i32>} : memref<2x128xf32, #tpu.memory_space<vmem>>, vector<2x128xf32>,
    return
  }
}

</mosaic_0001>

<bundles_post_ra>
// kernel: resnet18_forward.13
= control target key start
LH: loop header
LB: loop body
LE: loop exit
PB: predicated region body
PF: predicated region fallthrough
CT: control target
= control target key end

     0   :  { %9 = vsyncpa [#allocation4], 0  ;;  %s1458_s0 = inlined_call_operand.vmem [shape: bf16[256,128], index: 0, kind: input, shape index: {}]   ;;  %s1459_s1 = inlined_call_operand.hbm [shape: bf16[128,128], index: 1, kind: input, shape index: {}]   ;;  %s1460_s2 = inlined_call_operand.hbm [shape: f32[1,128], index: 2, kind: input, shape index: {}]   ;;  %s1461_s3 = inlined_call_operand.hbm [shape: f32[1,128], index: 3, kind: input, shape index: {}]   ;;  %s1462_s4 = inlined_call_operand.vmem [shape: bf16[256,128], index: 4, kind: output, shape index: {}]  }
   0x1   :  { %10 = vsyncpa [#allocation6], 0  ;;  %s1277_s15 = smov 0   ;;  %s1279_s16 = smov 0  }
   0x2   :  { %s1281_s17 = smov 0  }
   0x3 LB: > { %s1247_s18 = smov [#allocation5]   ;;  %s880_s20 = sadd.s32 4294967295, %s1245_s17   ;;  %s1245_s17 = sphi %s1281_s17, %s16_s17   ;;  %s1241_s16 = sphi %s1279_s16, %s1475_s16   ;;  %s1237_s15 = sphi %s1277_s15, %s1474_s15  }
   0x4   : > { %s208_s19 = sshll.u32 %s1247_s18, 4  ;;  %p882_p0 = scmp.ge.s32.totalorder %s1245_s17, 1  ;;  %s209_s19 = int_to_ptr.vmem [resolvable:$true] %s208_s19 }
   0x5   : > { %p176_p1 = scmp.lt.s32.totalorder %s1245_s17, 3  ;;  %p1295_p2 = scmp.eq.s32.totalorder %s880_s20, 0 }
   0x6   : > { %s35_s23 = sadd.s32 1, %s1241_s16  ;;  %s1248_s26 = smov [#allocation3]  }
   0x7   : > { %s1466_s21 = scalar_select %p1295_p2, 1, 0 }
   0x8   : > { %p1299_p3 = pnand %p882_p0, %p176_p1  ;;  %p1312_p6 = scmp.ge.s32.totalorder %s35_s23, 2 }
   0x9   : > { %s192_s27 = sshll.u32 %s1248_s26, 4  ;;  %s1131_s30 = scalar_lea.hbm %s1460_s2, 16  ;;  %s1316_s27 = int_to_ptr.vmem [resolvable:$true] %s192_s27 }
   0xa   : > { %s1467_s22 = scalar_select %p1299_p3, 1, 0 }
   0xb   : > { %p1070_p4 = pneg %p1299_p3  ;;  %p1132_p7 = scmp.ne.s32.totalorder %s1460_s2, %s1131_s30 }
   0xc   : > { %s1469_s25 = scalar_select %p1312_p6, 1, 0 }
   0xd   : > { %p1308_p5 = pnand %p1295_p2, %p1070_p4  ;;  %p1138_p11 = scmp.lt.u32.totalorder %s1131_s30, %s1460_s2 }
   0xf   : > { %p1326_p8 = pneg %p1308_p5 }
  0x11   : > { %p1134_p9 = pnand %p1326_p8, %p1132_p7 }
  0x13   : > { %p1135_p10 = pneg %p1134_p9 }
  0x15   : > { %p1140_p12 = pnand %p1138_p11, %p1135_p10 }
  0x17   : > { %1143 = shalt.err (!%p1140_p12)
}
  0x18   : > { %s1144_s10 = scalar_lea.vmem %s209_s19, 16  ;;  %s1151_s11 = scalar_lea.vmem %s209_s19, 32 }
  0x19   : > { %p1145_p13 = scmp.ne.s32.totalorder %s209_s19, %s1144_s10  ;;  %p1152_p4 = scmp.lt.s32.totalorder %s209_s19, %s209_s19 }
  0x1a   : > { %p1153_p2 = scmp.lt.s32.totalorder %s1151_s11, %s1144_s10 }
  0x1b   : > { %p1147_p0 = pnand %p1145_p13, %p1326_p8 }
  0x1c   : > { %p1154_p3 = por %p1153_p2, %p1152_p4 }
  0x1d   : > { %p1148_p1 = pneg %p1147_p0 }
  0x1f   : > { %p1155_p6 = pnand %p1154_p3, %p1148_p1 }
  0x21   : > { %1158 = shalt.err (!%p1155_p6)
}
  0x22   : > { %1076 = dma.hbm_to_vmem [thread:$0]  (!%p1308_p5), %s1460_s2, 16, %s209_s19, [#allocation6]  }
  0x23   : > { %p1471_p7 = scmp.ne.s32.totalorder %s1469_s25, 0  ;;  %s1159_s20 = scalar_lea.hbm %s1459_s1, 1024 }
  0x24   : > { %p1160_p2 = scmp.ne.s32.totalorder %s1459_s1, %s1159_s20  ;;  %p1166_p9 = scmp.lt.u32.totalorder %s1159_s20, %s1459_s1 }
  0x25   : > { %s1477_s23 = smov (%p1471_p7, %s35_s23), 0 }
  0x26   : > { %p1162_p3 = pnand %p1160_p2, %p1326_p8 }
  0x28   : > { %p1163_p6 = pneg %p1162_p3 }
  0x2a   : > { %p1168_p10 = pnand %p1166_p9, %p1163_p6 }
  0x2c   : > { %1171 = shalt.err (!%p1168_p10)
}
  0x2d   : > { %s1172_s19 = scalar_lea.vmem %s1316_s27, 1024  ;;  %p1180_p0 = scmp.lt.s32.totalorder %s1316_s27, %s1316_s27 }
  0x2e   : > { %p1173_p11 = scmp.ne.s32.totalorder %s1316_s27, %s1172_s19  ;;  %p1181_p1 = scmp.lt.s32.totalorder %s1172_s19, %s1172_s19 }
  0x30   : > { %p1175_p12 = pnand %p1173_p11, %p1326_p8  ;;  %p1182_p4 = por %p1181_p1, %p1180_p0 }
  0x32   : > { %p1176_p13 = pneg %p1175_p12 }
  0x34   : > { %p1183_p7 = pnand %p1182_p4, %p1176_p13 }
  0x36   : > { %1186 = shalt.err (!%p1183_p7)
}
  0x37   : > { %s1249_s25 = smov 64   ;;  %s1250_s5 = smov 4  }
  0x38   : > { %1073 = dma.hbm_to_vmem [thread:$0]  (!%p1308_p5), %s1459_s1, 1024, %s1316_s27, [#allocation4], %s1249_s25, %s1249_s25, %s1250_s5  }
  0x39   : > { %s1251_s9 = smov [#allocation7]   ;;  %s1187_s13 = scalar_lea.hbm %s1461_s3, 16 }
  0x3a   : > { %s221_s10 = sshll.u32 %s1251_s9, 4  ;;  %p1188_p2 = scmp.ne.s32.totalorder %s1461_s3, %s1187_s13  ;;  %s222_s10 = int_to_ptr.vmem [resolvable:$true] %s221_s10 }
  0x3b   : > { %p1194_p9 = scmp.lt.u32.totalorder %s1187_s13, %s1461_s3 }
  0x3c   : > { %p1190_p3 = pnand %p1188_p2, %p1326_p8 }
  0x3e   : > { %p1191_p6 = pneg %p1190_p3 }
  0x40   : > { %p1196_p10 = pnand %p1194_p9, %p1191_p6 }
  0x42   : > { %1199 = shalt.err (!%p1196_p10)
}
  0x43   : > { %s1200_s27 = scalar_lea.vmem %s222_s10, 16  ;;  %s1207_s28 = scalar_lea.vmem %s222_s10, 32 }
  0x44   : > { %p1201_p11 = scmp.ne.s32.totalorder %s222_s10, %s1200_s27  ;;  %p1208_p0 = scmp.lt.s32.totalorder %s222_s10, %s222_s10 }
  0x45   : > { %p1209_p1 = scmp.lt.s32.totalorder %s1207_s28, %s1200_s27 }
  0x46   : > { %p1203_p12 = pnand %p1201_p11, %p1326_p8 }
  0x47   : > { %p1210_p4 = por %p1209_p1, %p1208_p0 }
  0x48   : > { %p1204_p13 = pneg %p1203_p12 }
  0x4a   : > { %p1211_p7 = pnand %p1210_p4, %p1204_p13 }
  0x4c   : > { %1214 = shalt.err (!%p1211_p7)
}
  0x4d   : > { %1079 = dma.hbm_to_vmem [thread:$0]  (!%p1308_p5), %s1461_s3, 16, %s222_s10, [#allocation6]  }
  0x4e   : > { %p1472_p2 = scmp.ne.s32.totalorder %s1467_s22, 0 }
  0x4f   : > { %p1473_p3 = scmp.ne.s32.totalorder (!%p1472_p2), %s1466_s21, 0 }
  0x50   : > { %246 = sbr.rel (%p1472_p2) target bundleno = 356 (0x164), region = 36 }
  0x57   : > { %1228 = dma.done.wait (%p1473_p3), [#allocation4], 1024  }
  0x58   : > { %1230 = vsyncadd (%p1473_p3), [#allocation4], 4294966272 }
  0x59   : > { %1232 = dma.done.wait (%p1473_p3), [#allocation6], 32  }
  0x5a   : > { %1234 = vsyncadd (%p1473_p3), [#allocation6], 4294967264  ;;  %s891_s24 = sshll.u32 %s1237_s15, 4  ;;  %v1115_v0 = vld [vmem:[#allocation3] sm:$0xff]   ;;  %v1116_v1 = vld [vmem:[#allocation3 + $0x8] sm:$0xff]  }
  0x5b   : > { %p287_p8 = scmp.lt.s32.totalorder %s891_s24, 31  ;;  %1010 = vmatprep.subr.bf16.mxu0 %v1115_v0  ;;  %1042 = vmatprep.subr.bf16.mxu1 %v1115_v0  ;;  %v1117_v2 = vld [vmem:[#allocation3 + $0x10] sm:$0xff]   ;;  %v1118_v3 = vld [vmem:[#allocation3 + $0x18] sm:$0xff]   ;;  %v1119_v6 = vld [vmem:[#allocation3 + $0x20] sm:$0xff]  }
  0x5c   : > { %1011 = vmatpush3.bf16.msra.mxu0 %v1115_v0  ;;  %1050 = vmatpush3.bf16.msra.mxu1 %v1115_v0  ;;  %v1120_v7 = vld [vmem:[#allocation3 + $0x28] sm:$0xff]   ;;  %v1121_v8 = vld [vmem:[#allocation3 + $0x30] sm:$0xff]   ;;  %v1122_v9 = vld [vmem:[#allocation3 + $0x38] sm:$0xff]  }
  0x5d   : > { %s1479_s24 = smov (!%p287_p8, %s891_s24), 31  ;;  %1012 = vmatprep.subr.bf16.mxu0 %v1116_v1  ;;  %1043 = vmatprep.subr.bf16.mxu1 %v1116_v1  ;;  %v911_v16 = vld [vmem:[#allocation5] ss:$0 sm:$0xff]  ;;  %v1416_v18 = vld [vmem:[#allocation7] ss:$0 sm:$0xff] }
  0x5e   : > { %s892_s22 = sshll.u32 %s1479_s24, 2 }
  0x5f   : > { %s1406_s15 = scalar_lea.vmem %s1458_s0, %s892_s22  ;;  %s1431_s5 = scalar_lea.vmem %s1462_s4, %s892_s22 }
  0x60   : > { %1013 = vmatpush3.bf16.msra.mxu0 %v1116_v1  ;;  %1051 = vmatpush3.bf16.msra.mxu1 %v1116_v1  ;;  %v1123_v4 = vld [vmem:[%s1406_s15] sm:$0xff]   ;;  %v1125_v10 = vld [vmem:[%s1406_s15 + $0x8] sm:$0xff]   ;;  %v1127_v12 = vld [vmem:[%s1406_s15 + $0x10] sm:$0xff]  }
  0x61   : > { %1014 = vmatprep.subr.bf16.mxu0 %v1117_v2  ;;  %1044 = vmatprep.subr.bf16.mxu1 %v1117_v2  ;;  %v1124_v5 = vld [vmem:[%s1406_s15 + $0x20] sm:$0xff]   ;;  %v1126_v11 = vld [vmem:[%s1406_s15 + $0x28] sm:$0xff]   ;;  %v1128_v13 = vld [vmem:[%s1406_s15 + $0x30] sm:$0xff]  }
  0x62   : > { %1026 = vmatprep.mubr.bf16.mxu0 %v1123_v4  ;;  %1034 = vmatprep.mubr.bf16.mxu1 %v1124_v5  ;;  %v1129_v14 = vld [vmem:[%s1406_s15 + $0x18] sm:$0xff]  }
  0x63   : > { %v1130_v15 = vld [vmem:[%s1406_s15 + $0x38] sm:$0xff]  }
  0x64   : > { %1015 = vmatpush3.bf16.msra.mxu0 %v1117_v2  ;;  %1052 = vmatpush3.bf16.msra.mxu1 %v1117_v2 }
  0x65   : > { %1016 = vmatprep.subr.bf16.mxu0 %v1118_v3  ;;  %1045 = vmatprep.subr.bf16.mxu1 %v1118_v3 }
  0x68   : > { %1017 = vmatpush3.bf16.msra.mxu0 %v1118_v3  ;;  %1053 = vmatpush3.bf16.msra.mxu1 %v1118_v3 }
  0x69   : > { %1018 = vmatprep.subr.bf16.mxu0 %v1119_v6  ;;  %1046 = vmatprep.subr.bf16.mxu1 %v1119_v6 }
  0x6c   : > { %1019 = vmatpush3.bf16.msra.mxu0 %v1119_v6  ;;  %1054 = vmatpush3.bf16.msra.mxu1 %v1119_v6 }
  0x6d   : > { %1020 = vmatprep.subr.bf16.mxu0 %v1120_v7  ;;  %1047 = vmatprep.subr.bf16.mxu1 %v1120_v7 }
  0x70   : > { %1021 = vmatpush3.bf16.msra.mxu0 %v1120_v7  ;;  %1055 = vmatpush3.bf16.msra.mxu1 %v1120_v7 }
  0x71   : > { %1022 = vmatprep.subr.bf16.mxu0 %v1121_v8  ;;  %1048 = vmatprep.subr.bf16.mxu1 %v1121_v8 }
  0x74   : > { %1023 = vmatpush3.bf16.msra.mxu0 %v1121_v8  ;;  %1056 = vmatpush3.bf16.msra.mxu1 %v1121_v8 }
  0x75   : > { %1024 = vmatprep.subr.bf16.mxu0 %v1122_v9  ;;  %1049 = vmatprep.subr.bf16.mxu1 %v1122_v9 }
  0x78   : > { %1025 = vmatpush3.bf16.msra.mxu0 %v1122_v9  ;;  %1057 = vmatpush3.bf16.msra.mxu1 %v1122_v9 }
  0x7b   : > { %1027 = vmatmul.mubr.bf16.vlgmr.msra.gmra.mrb[0].mxu0 %v1125_v10  ;;  %1035 = vmatmul.mubr.bf16.vlgmr.msra.gmra.mrb[0].mxu1 %v1126_v11 }
  0x7c   : > { %1030 = vmatprep.mubr.bf16.mxu0 %v1127_v12  ;;  %1038 = vmatprep.mubr.bf16.mxu1 %v1128_v13 }
  0x83   : > { %1031 = vmatmul.mubr.bf16.gmra.mrb[4].mxu0 %v1129_v14  ;;  %1039 = vmatmul.mubr.bf16.gmra.mrb[4].mxu1 %v1130_v15 }
 0x14e   : > { %v1028_v17 = vpop.f32.mrb[0].mxu0  ;;  %v1036_v19 = vpop.f32.mrb[0].mxu1 }
 0x14f   : > { %v627_v20 = vmul.f32 %v1028_v17, %v911_v16  ;;  %v635_v21 = vmul.f32 %v1036_v19, %v911_v16  ;;  %v504_v22 = vpop.f32.mrb[1].mxu0  ;;  %v536_v23 = vpop.f32.mrb[1].mxu1 }
 0x150   : > { %v625_v24 = vmul.f32 %v911_v16, %v504_v22  ;;  %v633_v25 = vmul.f32 %v911_v16, %v536_v23  ;;  %v1029_v26 = vpop.f32.mrb[2].mxu0  ;;  %v1037_v27 = vpop.f32.mrb[2].mxu1 }
 0x151   : > { %v650_v28 = vadd.f32 %v1416_v18, %v627_v20  ;;  %v658_v29 = vadd.f32 %v1416_v18, %v635_v21  ;;  %v628_v30 = vmul.f32 %v1029_v26, %v911_v16  ;;  %v636_v31 = vmul.f32 %v1037_v27, %v911_v16  ;;  %v507_v32 = vpop.f32.mrb[3].mxu0  ;;  %v539_v33 = vpop.f32.mrb[3].mxu1 }
 0x152   : > { %v648_v34 = vadd.f32 %v1416_v18, %v625_v24  ;;  %v656_v35 = vadd.f32 %v1416_v18, %v633_v25  ;;  %v626_v36 = vmul.f32 %v911_v16, %v507_v32  ;;  %v634_v37 = vmul.f32 %v911_v16, %v539_v33 }
 0x153   : > { %v651_v38 = vadd.f32 %v1416_v18, %v628_v30  ;;  %v659_v39 = vadd.f32 %v1416_v18, %v636_v31  ;;  %v666_v42 = vmax.f32 %v650_v28, 0.0  ;;  %v674_v43 = vmax.f32 %v658_v29, 0.0 }
 0x154   : > { %v649_v40 = vadd.f32 %v1416_v18, %v626_v36  ;;  %v657_v41 = vadd.f32 %v1416_v18, %v634_v37  ;;  %v664_v46 = vmax.f32 %v648_v34, 0.0  ;;  %v672_v47 = vmax.f32 %v656_v35, 0.0 }
 0x155   : > { %v667_v44 = vmax.f32 %v651_v38, 0.0  ;;  %v675_v45 = vmax.f32 %v659_v39, 0.0 }
 0x156   : > { %v665_v48 = vmax.f32 %v649_v40, 0.0  ;;  %v673_v49 = vmax.f32 %v657_v41, 0.0  ;;  %v1032_v50 = vpop.f32.mrb[4].mxu0  ;;  %v1040_v51 = vpop.f32.mrb[4].mxu1 }
 0x157   : > { %v955_v52 = vpack.c.bf16 %v667_v44, %v666_v42  ;;  %v975_v53 = vpack.c.bf16 %v675_v45, %v674_v43  ;;  %v631_v54 = vmul.f32 %v1032_v50, %v911_v16  ;;  %v639_v55 = vmul.f32 %v1040_v51, %v911_v16  ;;  %v520_v56 = vpop.f32.mrb[5].mxu0  ;;  %v552_v57 = vpop.f32.mrb[5].mxu1 }
 0x158   : > { %v950_v58 = vpack.c.bf16 %v665_v48, %v664_v46  ;;  %v970_v59 = vpack.c.bf16 %v673_v49, %v672_v47  ;;  %v629_v60 = vmul.f32 %v911_v16, %v520_v56  ;;  %v637_v61 = vmul.f32 %v911_v16, %v552_v57  ;;  %v1033_v62 = vpop.f32.mrb[6].mxu0  ;;  %v1041_v63 = vpop.f32.mrb[6].mxu1 }
 0x159   : > { %987 = vst [vmem:[%s1431_s5 + $0x8] sm:$0xff] %v955_v52   ;;  %991 = vst [vmem:[%s1431_s5 + $0x28] sm:$0xff] %v975_v53   ;;  %v654_v0 = vadd.f32 %v1416_v18, %v631_v54  ;;  %v662_v1 = vadd.f32 %v1416_v18, %v639_v55  ;;  %v632_v2 = vmul.f32 %v1033_v62, %v911_v16  ;;  %v523_v4 = vpop.f32.mrb[7].mxu0  ;;  %v555_v5 = vpop.f32.mrb[7].mxu1 }
 0x15a   : > { %v640_v3 = vmul.f32 %v1041_v63, %v911_v16  ;;  %951 = vst [vmem:[%s1431_s5] sm:$0xff] %v950_v58   ;;  %990 = vst [vmem:[%s1431_s5 + $0x20] sm:$0xff] %v970_v59   ;;  %v652_v6 = vadd.f32 %v1416_v18, %v629_v60  ;;  %v660_v7 = vadd.f32 %v1416_v18, %v637_v61 }
 0x15b   : > { %v630_v8 = vmul.f32 %v911_v16, %v523_v4  ;;  %v638_v9 = vmul.f32 %v911_v16, %v555_v5  ;;  %v655_v10 = vadd.f32 %v1416_v18, %v632_v2  ;;  %v670_v14 = vmax.f32 %v654_v0, 0.0 }
 0x15c   : > { %v663_v11 = vadd.f32 %v1416_v18, %v640_v3  ;;  %v678_v15 = vmax.f32 %v662_v1, 0.0  ;;  %v668_v20 = vmax.f32 %v652_v6, 0.0  ;;  %v676_v21 = vmax.f32 %v660_v7, 0.0 }
 0x15d   : > { %v653_v12 = vadd.f32 %v1416_v18, %v630_v8  ;;  %v661_v13 = vadd.f32 %v1416_v18, %v638_v9  ;;  %v671_v17 = vmax.f32 %v655_v10, 0.0 }
 0x15e   : > { %v679_v19 = vmax.f32 %v663_v11, 0.0 }
 0x15f   : > { %v669_v22 = vmax.f32 %v653_v12, 0.0  ;;  %v677_v16 = vmax.f32 %v661_v13, 0.0  ;;  %v965_v23 = vpack.c.bf16 %v671_v17, %v670_v14 }
 0x160   : > { %v985_v24 = vpack.c.bf16 %v679_v19, %v678_v15 }
 0x161   : > { %v960_v25 = vpack.c.bf16 %v669_v22, %v668_v20  ;;  %v980_v26 = vpack.c.bf16 %v677_v16, %v676_v21  ;;  %989 = vst [vmem:[%s1431_s5 + $0x18] sm:$0xff] %v965_v23  }
 0x162   : > { %993 = vst [vmem:[%s1431_s5 + $0x38] sm:$0xff] %v985_v24  }
 0x163   : > { %988 = vst [vmem:[%s1431_s5 + $0x10] sm:$0xff] %v960_v25   ;;  %992 = vst [vmem:[%s1431_s5 + $0x30] sm:$0xff] %v980_v26  }
 0x164 PF: > { %s16_s17 = sadd.s32 1, %s1245_s17   ;;  %s1474_s15 = smov %s1241_s16 }
 0x165   : > { %p13_p5 = scmp.ge.s32.totalorder %s16_s17, 4   ;;  %s1475_s16 = smov %s1477_s23 }
 0x167   :  { %15 = sbr.rel (!%p13_p5) target bundleno = 3 (0x3), region = 90 }
 0x16e   :  { %788 = vsyncpa [#allocation4], 1 }
 0x16f   :  { %790 = vsyncpa [#allocation4 + $0x1], 1 }
 0x170   :  { %791 = vsyncpa [#allocation6], 1 }

// kernel: resnet18_forward.14
= control target key start
LH: loop header
LB: loop body
LE: loop exit
PB: predicated region body
PF: predicated region fallthrough
CT: control target
= control target key end

     0   :  { %9 = vsyncpa [#allocation4], 0  ;;  %s1308_s0 = inlined_call_operand.vmem [shape: bf16[56,640], index: 0, kind: input, shape index: {}]   ;;  %s1309_s1 = inlined_call_operand.hbm [shape: bf16[640,128], index: 1, kind: input, shape index: {}]   ;;  %s1310_s2 = inlined_call_operand.hbm [shape: f32[1,128], index: 2, kind: input, shape index: {}]   ;;  %s1311_s3 = inlined_call_operand.hbm [shape: f32[1,128], index: 3, kind: input, shape index: {}]   ;;  %s1312_s4 = inlined_call_operand.vmem [shape: bf16[56,128], index: 4, kind: output, shape index: {}]  }
   0x1   :  { %10 = vsyncpa [#allocation6], 0  ;;  %s1169_s15 = smov [#allocation5]   ;;  %s1170_s17 = smov [#allocation3]  }
   0x2   :  { %s31_s16 = sshll.u32 %s1169_s15, 4  ;;  %s18_s18 = sshll.u32 %s1170_s17, 4  ;;  %s32_s16 = int_to_ptr.vmem [resolvable:$true] %s31_s16  ;;  %s1199_s18 = int_to_ptr.vmem [resolvable:$true] %s18_s18 }
   0x3   :  { %s1099_s21 = scalar_lea.hbm %s1310_s2, 16 }
   0x4   :  { %p1100_p0 = scmp.ne.s32.totalorder %s1310_s2, %s1099_s21  ;;  %p1103_p1 = scmp.lt.u32.totalorder %s1099_s21, %s1310_s2 }
   0x6   :  { %p1105_p2 = pnand %p1103_p1, %p1100_p0 }
   0x8   :  { %1108 = shalt.err (!%p1105_p2)
}
   0x9   :  { %s1109_s26 = scalar_lea.vmem %s32_s16, 16  ;;  %s1113_s27 = scalar_lea.vmem %s32_s16, 32 }
   0xa   :  { %p1110_p3 = scmp.ne.s32.totalorder %s32_s16, %s1109_s26  ;;  %p1114_p4 = scmp.lt.s32.totalorder %s32_s16, %s32_s16 }
   0xb   :  { %p1115_p5 = scmp.lt.s32.totalorder %s1113_s27, %s1109_s26 }
   0xd   :  { %p1116_p6 = por %p1115_p5, %p1114_p4 }
   0xf   :  { %p1117_p7 = pnand %p1116_p6, %p1110_p3 }
  0x11   :  { %1120 = shalt.err (!%p1117_p7)
}
  0x12   :  { %34 = dma.hbm_to_vmem [thread:$0]  %s1310_s2, 16, %s32_s16, [#allocation6]  }
  0x13   :  { %s1121_s6 = scalar_lea.hbm %s1309_s1, 5120 }
  0x14   :  { %p1122_p8 = scmp.ne.s32.totalorder %s1309_s1, %s1121_s6  ;;  %p1125_p9 = scmp.lt.u32.totalorder %s1121_s6, %s1309_s1 }
  0x16   :  { %p1127_p10 = pnand %p1125_p9, %p1122_p8 }
  0x18   :  { %1130 = shalt.err (!%p1127_p10)
}
  0x19   :  { %s1131_s11 = scalar_lea.vmem %s1199_s18, 5120  ;;  %p1136_p12 = scmp.lt.s32.totalorder %s1199_s18, %s1199_s18 }
  0x1a   :  { %p1132_p11 = scmp.ne.s32.totalorder %s1199_s18, %s1131_s11  ;;  %p1137_p13 = scmp.lt.s32.totalorder %s1131_s11, %s1131_s11 }
  0x1c   :  { %p1138_p0 = por %p1137_p13, %p1136_p12 }
  0x1e   :  { %p1139_p1 = pnand %p1138_p0, %p1132_p11 }
  0x20   :  { %1142 = shalt.err (!%p1139_p1)
}
  0x21   :  { %s1171_s2 = smov 64   ;;  %s1172_s12 = smov 4  }
  0x22   :  { %24 = dma.hbm_to_vmem [thread:$0]  %s1309_s1, 5120, %s1199_s18, [#allocation4], %s1171_s2, %s1171_s2, %s1172_s12  }
  0x23   :  { %s1173_s15 = smov [#allocation7]   ;;  %s1143_s20 = scalar_lea.hbm %s1311_s3, 16 }
  0x24   :  { %s41_s16 = sshll.u32 %s1173_s15, 4  ;;  %p1144_p2 = scmp.ne.s32.totalorder %s1311_s3, %s1143_s20  ;;  %s42_s16 = int_to_ptr.vmem [resolvable:$true] %s41_s16 }
  0x25   :  { %p1147_p3 = scmp.lt.u32.totalorder %s1143_s20, %s1311_s3 }
  0x27   :  { %p1149_p4 = pnand %p1147_p3, %p1144_p2 }
  0x29   :  { %1152 = shalt.err (!%p1149_p4)
}
  0x2a   :  { %s1153_s25 = scalar_lea.vmem %s42_s16, 16  ;;  %s1157_s1 = scalar_lea.vmem %s42_s16, 32 }
  0x2b   :  { %p1154_p5 = scmp.ne.s32.totalorder %s42_s16, %s1153_s25  ;;  %p1158_p6 = scmp.lt.s32.totalorder %s42_s16, %s42_s16 }
  0x2c   :  { %p1159_p7 = scmp.lt.s32.totalorder %s1157_s1, %s1153_s25 }
  0x2e   :  { %p1160_p8 = por %p1159_p7, %p1158_p6 }
  0x30   :  { %p1161_p9 = pnand %p1160_p8, %p1154_p5 }
  0x32   :  { %1164 = shalt.err (!%p1161_p9)
}
  0x33   :  { %44 = dma.hbm_to_vmem [thread:$0]  %s1311_s3, 16, %s42_s16, [#allocation6]  }
  0x34   :  { %1165 = dma.done.wait [#allocation4], 5120  }
  0x35   :  { %1166 = vsyncadd [#allocation4], 4294962176 }
  0x36   :  { %1167 = dma.done.wait [#allocation6], 32  }
  0x37   :  { %1168 = vsyncadd [#allocation6], 4294967264  ;;  %v1033_v0 = vld [vmem:[#allocation3 + $0x40] sm:$0xff]   ;;  %v1037_v4 = vld [vmem:[#allocation3 + $0x48] sm:$0xff]  }
  0x38   :  { %v1034_v1 = vld [vmem:[#allocation3 + $0xc0] sm:$0xff]   ;;  %896 = vmatprep.subr.bf16.mxu0 %v1033_v0  ;;  %v1038_v5 = vld [vmem:[#allocation3 + $0xc8] sm:$0xff]   ;;  %v1041_v8 = vld [vmem:[#allocation3 + $0x50] sm:$0xff]  }
  0x39   :  { %v1035_v2 = vld [vmem:[#allocation3] sm:$0xff]   ;;  %936 = vmatprep.subr.bf16.mxu1 %v1034_v1  ;;  %v1039_v6 = vld [vmem:[#allocation3 + $0x8] sm:$0xff]   ;;  %v1042_v9 = vld [vmem:[#allocation3 + $0xd0] sm:$0xff]  }
  0x3a   :  { %v1036_v3 = vld [vmem:[#allocation3 + $0x80] sm:$0xff]   ;;  %897 = vmatpush3.bf16.msra.mxu0 %v1035_v2  ;;  %v1040_v7 = vld [vmem:[#allocation3 + $0x88] sm:$0xff]   ;;  %v1043_v10 = vld [vmem:[#allocation3 + $0x10] sm:$0xff]  }
  0x3b   :  { %937 = vmatpush3.bf16.msra.mxu1 %v1036_v3  ;;  %898 = vmatprep.subr.bf16.mxu0 %v1037_v4  ;;  %v1044_v11 = vld [vmem:[#allocation3 + $0x90] sm:$0xff]   ;;  %v1045_v12 = vld [vmem:[#allocation3 + $0x58] sm:$0xff]   ;;  %v1049_v16 = vld [vmem:[#allocation3 + $0x60] sm:$0xff]  }
  0x3c   :  { %938 = vmatprep.subr.bf16.mxu1 %v1038_v5  ;;  %v1046_v13 = vld [vmem:[#allocation3 + $0xd8] sm:$0xff]   ;;  %v1050_v17 = vld [vmem:[#allocation3 + $0xe0] sm:$0xff]   ;;  %v1053_v20 = vld [vmem:[#allocation3 + $0x68] sm:$0xff]  }
  0x3d   :  { %v1047_v14 = vld [vmem:[#allocation3 + $0x18] sm:$0xff]   ;;  %v1051_v18 = vld [vmem:[#allocation3 + $0x20] sm:$0xff]   ;;  %v1054_v21 = vld [vmem:[#allocation3 + $0xe8] sm:$0xff]  }
  0x3e   :  { %899 = vmatpush3.bf16.msra.mxu0 %v1039_v6  ;;  %v1048_v15 = vld [vmem:[#allocation3 + $0x98] sm:$0xff]   ;;  %v1052_v19 = vld [vmem:[#allocation3 + $0xa0] sm:$0xff]   ;;  %v1055_v22 = vld [vmem:[#allocation3 + $0x28] sm:$0xff]  }
  0x3f   :  { %939 = vmatpush3.bf16.msra.mxu1 %v1040_v7  ;;  %900 = vmatprep.subr.bf16.mxu0 %v1041_v8  ;;  %v1056_v23 = vld [vmem:[#allocation3 + $0xa8] sm:$0xff]   ;;  %v1057_v24 = vld [vmem:[#allocation3 + $0x70] sm:$0xff]   ;;  %v1061_v28 = vld [vmem:[#allocation3 + $0x78] sm:$0xff]  }
  0x40   :  { %940 = vmatprep.subr.bf16.mxu1 %v1042_v9  ;;  %v1058_v25 = vld [vmem:[#allocation3 + $0xf0] sm:$0xff]   ;;  %v1062_v29 = vld [vmem:[#allocation3 + $0xf8] sm:$0xff]   ;;  %v1070_v35 = vld [vmem:[%s1308_s0 + $0xc] ss:$20 sps:$4 sm:$0xff]  }
  0x41   :  { %v1059_v26 = vld [vmem:[#allocation3 + $0x30] sm:$0xff]   ;;  %v1063_v30 = vld [vmem:[#allocation3 + $0x38] sm:$0xff]   ;;  %v1071_v36 = vld [vmem:[#allocation3 + $0x100] sm:$0xff]   ;;  %606 = vmatprep.mubr.bf16.mxu1 %v1070_v35 }
  0x42   :  { %901 = vmatpush3.bf16.msra.mxu0 %v1043_v10  ;;  %v1060_v27 = vld [vmem:[#allocation3 + $0xb0] sm:$0xff]   ;;  %v1064_v31 = vld [vmem:[#allocation3 + $0xb8] sm:$0xff]   ;;  %v1072_v37 = vld [vmem:[#allocation3 + $0x108] sm:$0xff]  }
  0x43   :  { %941 = vmatpush3.bf16.msra.mxu1 %v1044_v11  ;;  %902 = vmatprep.subr.bf16.mxu0 %v1045_v12  ;;  %v1065_v32 = vld [vmem:[%s1308_s0] ss:$20 sps:$4 sm:$0xff]   ;;  %v1067_v33 = vld [vmem:[%s1308_s0 + $0x4] ss:$20 sps:$4 sm:$0xff]   ;;  %v1068_v34 = vld [vmem:[%s1308_s0 + $0x8] ss:$20 sps:$4 sm:$0xff]  }
  0x44   :  { %942 = vmatprep.subr.bf16.mxu1 %v1046_v13  ;;  %542 = vmatprep.mubr.bf16.mxu0 %v1067_v33  ;;  %v1073_v38 = vld [vmem:[%s1308_s0 + $0x2c] ss:$20 sps:$4 sm:$0xff]   ;;  %v1075_v39 = vld [vmem:[%s1308_s0 + $0x34] ss:$20 sps:$4 sm:$0xff]   ;;  %v1078_v42 = vld [vmem:[%s1308_s0 + $0x30] ss:$20 sps:$4 sm:$0xff]  }
  0x45   :  { %v1077_v40 = vld [vmem:[%s1308_s0 + $0x28] ss:$20 sps:$4 sm:$0xff]   ;;  %v1079_v41 = vld [vmem:[#allocation3 + $0x110] sm:$0xff]   ;;  %v1087_v46 = vld [vmem:[#allocation3 + $0x120] sm:$0xff]  }
  0x46   :  { %903 = vmatpush3.bf16.msra.mxu0 %v1047_v14  ;;  %v1081_v43 = vld [vmem:[%s1308_s0 + $0x54] ss:$20 sps:$4 sm:$0xff]   ;;  %v1080_v44 = vld [vmem:[#allocation3 + $0x118] sm:$0xff]   ;;  %v92_v48 = vld [vmem:[%s1308_s0 + $0x80] sm:$0xff] }
  0x47   :  { %943 = vmatpush3.bf16.msra.mxu1 %v1048_v15  ;;  %904 = vmatprep.subr.bf16.mxu0 %v1049_v16  ;;  %v1083_v45 = vld [vmem:[%s1308_s0 + $0x5c] ss:$20 sps:$4 sm:$0xff]   ;;  %v1086_v50 = vld [vmem:[%s1308_s0 + $0x58] ss:$20 sps:$4 sm:$0xff]   ;;  %v821_v52 = vcombine.high %v92_v48, %v92_v48  ;;  %v820_v56 = vcombine.low %v92_v48, %v92_v48  ;;  %v1096_v58 = vld [vmem:[%s1308_s0 + $0x60] ss:$20 sps:$4 sm:$0xff]  }
  0x48   :  { %944 = vmatprep.subr.bf16.mxu1 %v1050_v17  ;;  %v91_v47 = vld [vmem:[%s1308_s0 + $0x78] sm:$0xff]  ;;  %v1085_v49 = vld [vmem:[%s1308_s0 + $0x50] ss:$20 sps:$4 sm:$0xff]   ;;  %v1088_v53 = vld [vmem:[#allocation3 + $0x128] sm:$0xff]  }
  0x49   :  { %v819_v51 = vcombine.high %v91_v47, %v91_v47  ;;  %v1093_v54 = vld [vmem:[#allocation3 + $0x130] sm:$0xff]   ;;  %v818_v55 = vcombine.low %v91_v47, %v91_v47  ;;  %v1094_v59 = vld [vmem:[#allocation3 + $0x138] sm:$0xff]   ;;  %v1098_v61 = vld [vmem:[%s1308_s0 + $0x88] ss:$0 sps:$4 sm:$0xff]  }
  0x4a   :  { %905 = vmatpush3.bf16.msra.mxu0 %v1051_v18  ;;  %v1095_v57 = vld [vmem:[%s1308_s0 + $0x10] ss:$20 sps:$4 sm:$0xff]   ;;  %v1097_v60 = vld [vmem:[%s1308_s0 + $0x38] ss:$20 sps:$4 sm:$0xff]  }
  0x4b   :  { %945 = vmatpush3.bf16.msra.mxu1 %v1052_v19  ;;  %906 = vmatprep.subr.bf16.mxu0 %v1053_v20 }
  0x4c   :  { %946 = vmatprep.subr.bf16.mxu1 %v1054_v21 }
  0x4e   :  { %907 = vmatpush3.bf16.msra.mxu0 %v1055_v22 }
  0x4f   :  { %947 = vmatpush3.bf16.msra.mxu1 %v1056_v23  ;;  %908 = vmatprep.subr.bf16.mxu0 %v1057_v24 }
  0x50   :  { %948 = vmatprep.subr.bf16.mxu1 %v1058_v25 }
  0x52   :  { %909 = vmatpush3.bf16.msra.mxu0 %v1059_v26 }
  0x53   :  { %949 = vmatpush3.bf16.msra.mxu1 %v1060_v27  ;;  %910 = vmatprep.subr.bf16.mxu0 %v1061_v28 }
  0x54   :  { %950 = vmatprep.subr.bf16.mxu1 %v1062_v29 }
  0x56   :  { %911 = vmatpush3.bf16.msra.mxu0 %v1063_v30 }
  0x57   :  { %951 = vmatpush3.bf16.msra.mxu1 %v1064_v31  ;;  %988 = vmatprep.subr.bf16.mxu0 %v1071_v36 }
  0x58   :  { %1012 = vmatprep.subr.bf16.mxu1 %v1071_v36 }
  0x59   :  { %543 = vmatmul.mubr.bf16.vlgmr.msra.gmra.mrb[0].mxu0 %v1065_v32 }
  0x5a   :  { %607 = vmatmul.mubr.bf16.vlgmr.msra.gmra.mrb[0].mxu1 %v1068_v34  ;;  %989 = vmatpush3.bf16.msra.mxu0 %v1071_v36 }
  0x5b   :  { %1020 = vmatpush3.bf16.msra.mxu1 %v1071_v36  ;;  %990 = vmatprep.subr.bf16.mxu0 %v1072_v37 }
  0x5c   :  { %1013 = vmatprep.subr.bf16.mxu1 %v1072_v37  ;;  %550 = vmatprep.mubr.bf16.mxu0 %v1073_v38 }
  0x5d   :  { %614 = vmatprep.mubr.bf16.mxu1 %v1075_v39 }
  0x5e   :  { %991 = vmatpush3.bf16.msra.mxu0 %v1072_v37 }
  0x5f   :  { %1021 = vmatpush3.bf16.msra.mxu1 %v1072_v37  ;;  %992 = vmatprep.subr.bf16.mxu0 %v1079_v41 }
  0x60   :  { %1014 = vmatprep.subr.bf16.mxu1 %v1079_v41 }
  0x61   :  { %551 = vmatmul.mubr.bf16.gmra.mrb[4].mxu0 %v1077_v40 }
  0x62   :  { %615 = vmatmul.mubr.bf16.gmra.mrb[4].mxu1 %v1078_v42  ;;  %558 = vmatprep.mubr.bf16.mxu0 %v1081_v43 }
  0x63   :  { %993 = vmatpush3.bf16.msra.mxu0 %v1079_v41  ;;  %622 = vmatprep.mubr.bf16.mxu1 %v1083_v45 }
  0x64   :  { %1022 = vmatpush3.bf16.msra.mxu1 %v1079_v41  ;;  %994 = vmatprep.subr.bf16.mxu0 %v1080_v44 }
  0x65   :  { %1015 = vmatprep.subr.bf16.mxu1 %v1080_v44 }
  0x67   :  { %995 = vmatpush3.bf16.msra.mxu0 %v1080_v44 }
  0x68   :  { %1023 = vmatpush3.bf16.msra.mxu1 %v1080_v44  ;;  %996 = vmatprep.subr.bf16.mxu0 %v1087_v46 }
  0x69   :  { %559 = vmatmul.mubr.bf16.gmra.mrb[8].mxu0 %v1085_v49  ;;  %1016 = vmatprep.subr.bf16.mxu1 %v1087_v46 }
  0x6a   :  { %623 = vmatmul.mubr.bf16.gmra.mrb[8].mxu1 %v1086_v50  ;;  %566 = vmatprep.mubr.bf16.mxu0 %v819_v51 }
  0x6b   :  { %997 = vmatpush3.bf16.msra.mxu0 %v1087_v46  ;;  %630 = vmatprep.mubr.bf16.mxu1 %v821_v52  ;;  %v863_v52 = vld [vmem:[#allocation5] ss:$0 sm:$0xff] }
  0x6c   :  { %1024 = vmatpush3.bf16.msra.mxu1 %v1087_v46  ;;  %998 = vmatprep.subr.bf16.mxu0 %v1088_v53 }
  0x6d   :  { %1017 = vmatprep.subr.bf16.mxu1 %v1088_v53 }
  0x6f   :  { %999 = vmatpush3.bf16.msra.mxu0 %v1088_v53 }
  0x70   :  { %1025 = vmatpush3.bf16.msra.mxu1 %v1088_v53  ;;  %1000 = vmatprep.subr.bf16.mxu0 %v1093_v54 }
  0x71   :  { %567 = vmatmul.mubr.bf16.gmra.mrb[12].mxu0 %v818_v55  ;;  %1018 = vmatprep.subr.bf16.mxu1 %v1093_v54 }
  0x72   :  { %631 = vmatmul.mubr.bf16.gmra.mrb[12].mxu1 %v820_v56  ;;  %1004 = vmatprep.mubr.bf16.mxu0 %v1095_v57  ;;  %v864_v56 = vld [vmem:[#allocation7] ss:$0 sm:$0xff] }
  0x73   :  { %1001 = vmatpush3.bf16.msra.mxu0 %v1093_v54  ;;  %1008 = vmatprep.mubr.bf16.mxu1 %v1096_v58 }
  0x74   :  { %1026 = vmatpush3.bf16.msra.mxu1 %v1093_v54  ;;  %1002 = vmatprep.subr.bf16.mxu0 %v1094_v59 }
  0x75   :  { %1019 = vmatprep.subr.bf16.mxu1 %v1094_v59 }
  0x77   :  { %1003 = vmatpush3.bf16.msra.mxu0 %v1094_v59 }
  0x78   :  { %1027 = vmatpush3.bf16.msra.mxu1 %v1094_v59 }
  0x7a   :  { %1005 = vmatmul.mubr.bf16.vlgmr.msra.gmra.mrb[16].mxu0 %v1097_v60 }
  0x7b   :  { %1009 = vmatmul.mubr.bf16.vlgmr.msra.gmra.mrb[16].mxu1 %v1098_v61 }
 0x12c   :  { %v912_v62 = vpop.f32.mrb[0].mxu0 }
 0x12d   :  { %v952_v63 = vpop.f32.mrb[0].mxu1  ;;  %v913_v0 = vpop.f32.mrb[1].mxu0 }
 0x12e   :  { %v914_v1 = vadd.f32 %v913_v0, %v912_v62  ;;  %v953_v2 = vpop.f32.mrb[1].mxu1  ;;  %v915_v3 = vpop.f32.mrb[2].mxu0 }
 0x12f   :  { %v954_v4 = vadd.f32 %v953_v2, %v952_v63  ;;  %v955_v5 = vpop.f32.mrb[2].mxu1  ;;  %v916_v6 = vpop.f32.mrb[3].mxu0 }
 0x130   :  { %v917_v7 = vadd.f32 %v916_v6, %v915_v3  ;;  %v956_v8 = vpop.f32.mrb[3].mxu1 }
 0x131   :  { %v957_v9 = vadd.f32 %v956_v8, %v955_v5  ;;  %v609_v10 = vadd.f32 %v954_v4, %v914_v1 }
 0x133   :  { %v612_v11 = vadd.f32 %v957_v9, %v917_v7 }
 0x134   :  { %v918_v12 = vpop.f32.mrb[4].mxu0 }
 0x135   :  { %v958_v13 = vpop.f32.mrb[4].mxu1  ;;  %v919_v14 = vpop.f32.mrb[5].mxu0 }
 0x136   :  { %v920_v15 = vadd.f32 %v919_v14, %v918_v12  ;;  %v959_v16 = vpop.f32.mrb[5].mxu1  ;;  %v921_v17 = vpop.f32.mrb[6].mxu0 }
 0x137   :  { %v960_v18 = vadd.f32 %v959_v16, %v958_v13  ;;  %v961_v19 = vpop.f32.mrb[6].mxu1  ;;  %v922_v20 = vpop.f32.mrb[7].mxu0 }
 0x138   :  { %v923_v21 = vadd.f32 %v922_v20, %v921_v17  ;;  %v962_v22 = vpop.f32.mrb[7].mxu1 }
 0x139   :  { %v963_v23 = vadd.f32 %v962_v22, %v961_v19  ;;  %v617_v24 = vadd.f32 %v960_v18, %v920_v15 }
 0x13b   :  { %v620_v25 = vadd.f32 %v963_v23, %v923_v21 }
 0x13c   :  { %v924_v26 = vpop.f32.mrb[8].mxu0 }
 0x13d   :  { %v964_v27 = vpop.f32.mrb[8].mxu1  ;;  %v925_v28 = vpop.f32.mrb[9].mxu0 }
 0x13e   :  { %v926_v29 = vadd.f32 %v925_v28, %v924_v26  ;;  %v965_v30 = vpop.f32.mrb[9].mxu1  ;;  %v927_v31 = vpop.f32.mrb[10].mxu0 }
 0x13f   :  { %v966_v32 = vadd.f32 %v965_v30, %v964_v27  ;;  %v967_v33 = vpop.f32.mrb[10].mxu1  ;;  %v928_v34 = vpop.f32.mrb[11].mxu0 }
 0x140   :  { %v929_v35 = vadd.f32 %v928_v34, %v927_v31  ;;  %v968_v36 = vpop.f32.mrb[11].mxu1 }
 0x141   :  { %v969_v37 = vadd.f32 %v968_v36, %v967_v33  ;;  %v625_v38 = vadd.f32 %v966_v32, %v926_v29 }
 0x143   :  { %v628_v39 = vadd.f32 %v969_v37, %v929_v35 }
 0x144   :  { %v930_v40 = vpop.f32.mrb[12].mxu0 }
 0x145   :  { %v970_v41 = vpop.f32.mrb[12].mxu1  ;;  %v931_v42 = vpop.f32.mrb[13].mxu0 }
 0x146   :  { %v932_v43 = vadd.f32 %v931_v42, %v930_v40  ;;  %v971_v44 = vpop.f32.mrb[13].mxu1  ;;  %v933_v45 = vpop.f32.mrb[14].mxu0 }
 0x147   :  { %v972_v46 = vadd.f32 %v971_v44, %v970_v41  ;;  %v973_v47 = vpop.f32.mrb[14].mxu1  ;;  %v934_v48 = vpop.f32.mrb[15].mxu0 }
 0x148   :  { %v974_v49 = vpop.f32.mrb[15].mxu1 }
 0x149   :  { %v633_v50 = vadd.f32 %v972_v46, %v932_v43 }
 0x14d   :  { %v1006_v51 = vpop.f32.mrb[16].mxu0 }
 0x14e   :  { %v681_v53 = vadd.f32 %v1006_v51, %v617_v24  ;;  %v1010_v54 = vpop.f32.mrb[16].mxu1  ;;  %v672_v55 = vpop.f32.mrb[17].mxu0 }
 0x14f   :  { %v697_v57 = vadd.f32 %v1010_v54, %v633_v50  ;;  %v673_v58 = vadd.f32 %v672_v55, %v609_v10  ;;  %v688_v59 = vpop.f32.mrb[17].mxu1  ;;  %v1007_v60 = vpop.f32.mrb[18].mxu0 }
 0x150   :  { %v735_v61 = vmul.f32 %v863_v52, %v681_v53  ;;  %v689_v62 = vadd.f32 %v688_v59, %v625_v38  ;;  %v684_v63 = vadd.f32 %v1007_v60, %v620_v25  ;;  %v1011_v0 = vpop.f32.mrb[18].mxu1  ;;  %v675_v1 = vpop.f32.mrb[19].mxu0 }
 0x151   :  { %v739_v2 = vmul.f32 %v863_v52, %v697_v57  ;;  %v733_v3 = vmul.f32 %v863_v52, %v673_v58  ;;  %v676_v4 = vadd.f32 %v675_v1, %v612_v11  ;;  %v691_v5 = vpop.f32.mrb[19].mxu1 }
 0x152   :  { %v749_v6 = vadd.f32 %v864_v56, %v735_v61  ;;  %v737_v7 = vmul.f32 %v863_v52, %v689_v62  ;;  %v736_v8 = vmul.f32 %v863_v52, %v684_v63  ;;  %v692_v9 = vadd.f32 %v691_v5, %v628_v39 }
 0x153   :  { %v753_v12 = vadd.f32 %v864_v56, %v739_v2  ;;  %v747_v13 = vadd.f32 %v864_v56, %v733_v3  ;;  %v734_v14 = vmul.f32 %v863_v52, %v676_v4 }
 0x154   :  { %v751_v15 = vadd.f32 %v864_v56, %v737_v7  ;;  %v750_v10 = vadd.f32 %v864_v56, %v736_v8  ;;  %v738_v16 = vmul.f32 %v863_v52, %v692_v9  ;;  %v756_v19 = vmax.f32 %v749_v6, 0.0 }
 0x155   :  { %v760_v17 = vmax.f32 %v753_v12, 0.0  ;;  %v748_v18 = vadd.f32 %v864_v56, %v734_v14  ;;  %v754_v23 = vmax.f32 %v747_v13, 0.0 }
 0x156   :  { %v757_v20 = vmax.f32 %v750_v10, 0.0  ;;  %v752_v21 = vadd.f32 %v864_v56, %v738_v16  ;;  %v758_v11 = vmax.f32 %v751_v15, 0.0 }
 0x157   :  { %v878_v22 = vpack.c.bf16 %v760_v17, %v760_v17  ;;  %v755_v24 = vmax.f32 %v748_v18, 0.0 }
 0x158   :  { %v887_v25 = vpack.c.bf16 %v757_v20, %v756_v19  ;;  %v759_v26 = vmax.f32 %v752_v21, 0.0 }
 0x159   :  { %796 = vst [vmem:[%s1312_s4 + $0x18] sm:$0xf] %v878_v22  ;;  %v882_v27 = vpack.c.bf16 %v755_v24, %v754_v23 }
 0x15a   :  { %894 = vst [vmem:[%s1312_s4 + $0x8] sm:$0xff] %v887_v25   ;;  %v892_v28 = vpack.c.bf16 %v759_v26, %v758_v11 }
 0x15b   :  { %883 = vst [vmem:[%s1312_s4] sm:$0xff] %v882_v27  }
 0x15c   :  { %895 = vst [vmem:[%s1312_s4 + $0x10] sm:$0xff] %v892_v28  }
 0x15d   :  { %801 = vsyncpa [#allocation4], 1 }
 0x15e   :  { %802 = vsyncpa [#allocation6], 1 }

// kernel: resnet18_forward.15
= control target key start
LH: loop header
LB: loop body
LE: loop exit
PB: predicated region body
PF: predicated region fallthrough
CT: control target
= control target key end

     0   :  { %s473_s1 = inlined_call_operand.vmem [shape: bf16[128,128], index: 1, kind: input, shape index: {}]   ;;  %s474_s0 = inlined_call_operand.vmem [shape: bf16[56,128], index: 0, kind: input, shape index: {}]   ;;  %s475_s2 = inlined_call_operand.vmem [shape: f32[1,128], index: 2, kind: input, shape index: {}]   ;;  %s476_s3 = inlined_call_operand.vmem [shape: f32[1,128], index: 3, kind: input, shape index: {}]   ;;  %s477_s4 = inlined_call_operand.vmem [shape: bf16[56,128], index: 4, kind: output, shape index: {}]  }
   0x1   :  { %v382_v0 = vld [vmem:[%s473_s1] sm:$0xff]   ;;  %v383_v1 = vld [vmem:[%s473_s1 + $0x8] sm:$0xff]   ;;  %v384_v2 = vld [vmem:[%s473_s1 + $0x10] sm:$0xff]  }
   0x2   :  { %342 = vmatprep.subr.bf16.mxu0 %v382_v0  ;;  %366 = vmatprep.subr.bf16.mxu1 %v382_v0  ;;  %v385_v3 = vld [vmem:[%s473_s1 + $0x18] sm:$0xff]   ;;  %v390_v4 = vld [vmem:[%s474_s0] sm:$0xff]   ;;  %v391_v5 = vld [vmem:[%s474_s0 + $0x10] sm:$0xff]  }
   0x3   :  { %343 = vmatpush3.bf16.msra.mxu0 %v382_v0  ;;  %374 = vmatpush3.bf16.msra.mxu1 %v382_v0  ;;  %v386_v6 = vld [vmem:[%s473_s1 + $0x20] sm:$0xff]   ;;  %v387_v7 = vld [vmem:[%s473_s1 + $0x28] sm:$0xff]   ;;  %v388_v8 = vld [vmem:[%s473_s1 + $0x30] sm:$0xff]  }
   0x4   :  { %344 = vmatprep.subr.bf16.mxu0 %v383_v1  ;;  %367 = vmatprep.subr.bf16.mxu1 %v383_v1  ;;  %v389_v9 = vld [vmem:[%s473_s1 + $0x38] sm:$0xff]   ;;  %v392_v10 = vld [vmem:[%s474_s0 + $0x8] sm:$0xff]   ;;  %v297_v12 = vld [vmem:[%s475_s2] ss:$0 sm:$0xff] }
   0x5   :  { %358 = vmatprep.mubr.bf16.mxu0 %v390_v4  ;;  %362 = vmatprep.mubr.bf16.mxu1 %v391_v5  ;;  %v393_v11 = vld [vmem:[%s474_s0 + $0x18] ss:$0 sps:$4 sm:$0xff]   ;;  %v298_v14 = vld [vmem:[%s476_s3] ss:$0 sm:$0xff] }
   0x7   :  { %345 = vmatpush3.bf16.msra.mxu0 %v383_v1  ;;  %375 = vmatpush3.bf16.msra.mxu1 %v383_v1 }
   0x8   :  { %346 = vmatprep.subr.bf16.mxu0 %v384_v2  ;;  %368 = vmatprep.subr.bf16.mxu1 %v384_v2 }
   0xb   :  { %347 = vmatpush3.bf16.msra.mxu0 %v384_v2  ;;  %376 = vmatpush3.bf16.msra.mxu1 %v384_v2 }
   0xc   :  { %348 = vmatprep.subr.bf16.mxu0 %v385_v3  ;;  %369 = vmatprep.subr.bf16.mxu1 %v385_v3 }
   0xf   :  { %349 = vmatpush3.bf16.msra.mxu0 %v385_v3  ;;  %377 = vmatpush3.bf16.msra.mxu1 %v385_v3 }
  0x10   :  { %350 = vmatprep.subr.bf16.mxu0 %v386_v6  ;;  %370 = vmatprep.subr.bf16.mxu1 %v386_v6 }
  0x13   :  { %351 = vmatpush3.bf16.msra.mxu0 %v386_v6  ;;  %378 = vmatpush3.bf16.msra.mxu1 %v386_v6 }
  0x14   :  { %352 = vmatprep.subr.bf16.mxu0 %v387_v7  ;;  %371 = vmatprep.subr.bf16.mxu1 %v387_v7 }
  0x17   :  { %353 = vmatpush3.bf16.msra.mxu0 %v387_v7  ;;  %379 = vmatpush3.bf16.msra.mxu1 %v387_v7 }
  0x18   :  { %354 = vmatprep.subr.bf16.mxu0 %v388_v8  ;;  %372 = vmatprep.subr.bf16.mxu1 %v388_v8 }
  0x1b   :  { %355 = vmatpush3.bf16.msra.mxu0 %v388_v8  ;;  %380 = vmatpush3.bf16.msra.mxu1 %v388_v8 }
  0x1c   :  { %356 = vmatprep.subr.bf16.mxu0 %v389_v9  ;;  %373 = vmatprep.subr.bf16.mxu1 %v389_v9 }
  0x1f   :  { %357 = vmatpush3.bf16.msra.mxu0 %v389_v9  ;;  %381 = vmatpush3.bf16.msra.mxu1 %v389_v9 }
  0x22   :  { %359 = vmatmul.mubr.bf16.vlgmr.msra.gmra.mrb[0].mxu0 %v392_v10  ;;  %363 = vmatmul.mubr.bf16.vlgmr.msra.gmra.mrb[0].mxu1 %v393_v11 }
  0xf5   :  { %v360_v13 = vpop.f32.mrb[0].mxu0  ;;  %v364_v15 = vpop.f32.mrb[0].mxu1 }
  0xf6   :  { %v226_v16 = vmul.f32 %v360_v13, %v297_v12  ;;  %v230_v17 = vmul.f32 %v364_v15, %v297_v12  ;;  %v163_v18 = vpop.f32.mrb[1].mxu0  ;;  %v179_v19 = vpop.f32.mrb[1].mxu1 }
  0xf7   :  { %v224_v20 = vmul.f32 %v297_v12, %v163_v18  ;;  %v228_v21 = vmul.f32 %v297_v12, %v179_v19  ;;  %v361_v22 = vpop.f32.mrb[2].mxu0  ;;  %v365_v23 = vpop.f32.mrb[2].mxu1 }
  0xf8   :  { %v244_v24 = vadd.f32 %v298_v14, %v230_v17  ;;  %v227_v25 = vmul.f32 %v361_v22, %v297_v12  ;;  %v166_v26 = vpop.f32.mrb[3].mxu0  ;;  %v182_v27 = vpop.f32.mrb[3].mxu1  ;;  %v240_v30 = vadd.f32 %v298_v14, %v226_v16 }
  0xf9   :  { %v225_v28 = vmul.f32 %v297_v12, %v166_v26  ;;  %v229_v29 = vmul.f32 %v297_v12, %v182_v27  ;;  %v238_v33 = vadd.f32 %v298_v14, %v224_v20  ;;  %v242_v34 = vadd.f32 %v298_v14, %v228_v21 }
  0xfa   :  { %v312_v31 = vpack.c.bf16 %v244_v24, %v244_v24  ;;  %v241_v32 = vadd.f32 %v298_v14, %v227_v25 }
  0xfb   :  { %v239_v35 = vadd.f32 %v298_v14, %v225_v28  ;;  %v243_v36 = vadd.f32 %v298_v14, %v229_v29 }
  0xfc   :  { %280 = vst [vmem:[%s477_s4 + $0x18] sm:$0xf] %v312_v31  ;;  %v321_v37 = vpack.c.bf16 %v241_v32, %v240_v30 }
  0xfd   :  { %v316_v38 = vpack.c.bf16 %v239_v35, %v238_v33  ;;  %v326_v39 = vpack.c.bf16 %v243_v36, %v242_v34 }
  0xfe   :  { %328 = vst [vmem:[%s477_s4 + $0x8] sm:$0xff] %v321_v37  }
  0xff   :  { %317 = vst [vmem:[%s477_s4] sm:$0xff] %v316_v38   ;;  %329 = vst [vmem:[%s477_s4 + $0x10] sm:$0xff] %v326_v39  }

// kernel: resnet18_forward.16
= control target key start
LH: loop header
LB: loop body
LE: loop exit
PB: predicated region body
PF: predicated region fallthrough
CT: control target
= control target key end

     0   :  { %s2122_s1 = inlined_call_operand.vmem [shape: bf16[1152,128], index: 1, kind: input, shape index: {}]   ;;  %s2123_s0 = inlined_call_operand.vmem [shape: bf16[56,1152], index: 0, kind: input, shape index: {}]   ;;  %s2124_s4 = inlined_call_operand.vmem [shape: bf16[56,128], index: 4, kind: input, shape index: {}]   ;;  %s2125_s2 = inlined_call_operand.vmem [shape: f32[1,128], index: 2, kind: input, shape index: {}]   ;;  %s2126_s3 = inlined_call_operand.vmem [shape: f32[1,128], index: 3, kind: input, shape index: {}]   ;;  %s2127_s5 = inlined_call_operand.vmem [shape: bf16[56,128], index: 5, kind: output, shape index: {}]  }
   0x1   :  { %v1627_v0 = vld [vmem:[%s2122_s1 + $0x40] sm:$0xff]   ;;  %v1631_v4 = vld [vmem:[%s2122_s1 + $0x48] sm:$0xff]   ;;  %v1635_v8 = vld [vmem:[%s2122_s1 + $0x50] sm:$0xff]  }
   0x2   :  { %v1628_v1 = vld [vmem:[%s2122_s1 + $0xc0] sm:$0xff]   ;;  %1415 = vmatprep.subr.bf16.mxu0 %v1627_v0  ;;  %v1632_v5 = vld [vmem:[%s2122_s1 + $0xc8] sm:$0xff]   ;;  %v1636_v9 = vld [vmem:[%s2122_s1 + $0xd0] sm:$0xff]  }
   0x3   :  { %v1629_v2 = vld [vmem:[%s2122_s1] sm:$0xff]   ;;  %1455 = vmatprep.subr.bf16.mxu1 %v1628_v1  ;;  %v1633_v6 = vld [vmem:[%s2122_s1 + $0x8] sm:$0xff]   ;;  %v1637_v10 = vld [vmem:[%s2122_s1 + $0x10] sm:$0xff]  }
   0x4   :  { %v1630_v3 = vld [vmem:[%s2122_s1 + $0x80] sm:$0xff]   ;;  %1416 = vmatpush3.bf16.msra.mxu0 %v1629_v2  ;;  %v1634_v7 = vld [vmem:[%s2122_s1 + $0x88] sm:$0xff]   ;;  %v1638_v11 = vld [vmem:[%s2122_s1 + $0x90] sm:$0xff]  }
   0x5   :  { %1456 = vmatpush3.bf16.msra.mxu1 %v1630_v3  ;;  %1417 = vmatprep.subr.bf16.mxu0 %v1631_v4  ;;  %v1639_v12 = vld [vmem:[%s2122_s1 + $0x58] sm:$0xff]   ;;  %v1643_v16 = vld [vmem:[%s2122_s1 + $0x60] sm:$0xff]   ;;  %v1647_v20 = vld [vmem:[%s2122_s1 + $0x68] sm:$0xff]  }
   0x6   :  { %1457 = vmatprep.subr.bf16.mxu1 %v1632_v5  ;;  %v1640_v13 = vld [vmem:[%s2122_s1 + $0xd8] sm:$0xff]   ;;  %v1644_v17 = vld [vmem:[%s2122_s1 + $0xe0] sm:$0xff]   ;;  %v1648_v21 = vld [vmem:[%s2122_s1 + $0xe8] sm:$0xff]  }
   0x7   :  { %v1641_v14 = vld [vmem:[%s2122_s1 + $0x18] sm:$0xff]   ;;  %v1645_v18 = vld [vmem:[%s2122_s1 + $0x20] sm:$0xff]   ;;  %v1649_v22 = vld [vmem:[%s2122_s1 + $0x28] sm:$0xff]  }
   0x8   :  { %1418 = vmatpush3.bf16.msra.mxu0 %v1633_v6  ;;  %v1642_v15 = vld [vmem:[%s2122_s1 + $0x98] sm:$0xff]   ;;  %v1646_v19 = vld [vmem:[%s2122_s1 + $0xa0] sm:$0xff]   ;;  %v1650_v23 = vld [vmem:[%s2122_s1 + $0xa8] sm:$0xff]  }
   0x9   :  { %1458 = vmatpush3.bf16.msra.mxu1 %v1634_v7  ;;  %1419 = vmatprep.subr.bf16.mxu0 %v1635_v8  ;;  %v1651_v24 = vld [vmem:[%s2122_s1 + $0x70] sm:$0xff]   ;;  %v1655_v28 = vld [vmem:[%s2122_s1 + $0x78] sm:$0xff]   ;;  %v1659_v32 = vld [vmem:[%s2123_s0] ss:$36 sps:$4 sm:$0xff]  }
   0xa   :  { %1459 = vmatprep.subr.bf16.mxu1 %v1636_v9  ;;  %v1652_v25 = vld [vmem:[%s2122_s1 + $0xf0] sm:$0xff]   ;;  %v1656_v29 = vld [vmem:[%s2122_s1 + $0xf8] sm:$0xff]   ;;  %v1661_v33 = vld [vmem:[%s2123_s0 + $0x4] ss:$36 sps:$4 sm:$0xff]  }
   0xb   :  { %v1653_v26 = vld [vmem:[%s2122_s1 + $0x30] sm:$0xff]   ;;  %v1657_v30 = vld [vmem:[%s2122_s1 + $0x38] sm:$0xff]   ;;  %v1662_v34 = vld [vmem:[%s2123_s0 + $0x8] ss:$36 sps:$4 sm:$0xff]   ;;  %852 = vmatprep.mubr.bf16.mxu0 %v1661_v33 }
   0xc   :  { %1420 = vmatpush3.bf16.msra.mxu0 %v1637_v10  ;;  %v1654_v27 = vld [vmem:[%s2122_s1 + $0xb0] sm:$0xff]   ;;  %v1658_v31 = vld [vmem:[%s2122_s1 + $0xb8] sm:$0xff]   ;;  %v1665_v36 = vld [vmem:[%s2122_s1 + $0x140] sm:$0xff]  }
   0xd   :  { %1460 = vmatpush3.bf16.msra.mxu1 %v1638_v11  ;;  %1421 = vmatprep.subr.bf16.mxu0 %v1639_v12  ;;  %v1664_v35 = vld [vmem:[%s2123_s0 + $0xc] ss:$36 sps:$4 sm:$0xff]   ;;  %v1666_v37 = vld [vmem:[%s2122_s1 + $0x1c0] sm:$0xff]   ;;  %v1675_v45 = vld [vmem:[%s2123_s0 + $0x54] ss:$36 sps:$4 sm:$0xff]  }
   0xe   :  { %1461 = vmatprep.subr.bf16.mxu1 %v1640_v13  ;;  %916 = vmatprep.mubr.bf16.mxu1 %v1664_v35  ;;  %v1667_v38 = vld [vmem:[%s2122_s1 + $0x100] sm:$0xff]   ;;  %v1669_v40 = vld [vmem:[%s2122_s1 + $0x148] sm:$0xff]   ;;  %v1678_v47 = vld [vmem:[%s2123_s0 + $0x50] ss:$36 sps:$4 sm:$0xff]  }
   0xf   :  { %v1668_v39 = vld [vmem:[%s2122_s1 + $0x180] sm:$0xff]   ;;  %v1670_v41 = vld [vmem:[%s2122_s1 + $0x1c8] sm:$0xff]   ;;  %v1679_v48 = vld [vmem:[%s2122_s1 + $0x150] sm:$0xff]  }
  0x10   :  { %1422 = vmatpush3.bf16.msra.mxu0 %v1641_v14  ;;  %v1671_v42 = vld [vmem:[%s2122_s1 + $0x108] sm:$0xff]   ;;  %v1680_v49 = vld [vmem:[%s2122_s1 + $0x1d0] sm:$0xff]   ;;  %v1683_v52 = vld [vmem:[%s2122_s1 + $0x158] sm:$0xff]  }
  0x11   :  { %1462 = vmatpush3.bf16.msra.mxu1 %v1642_v15  ;;  %1423 = vmatprep.subr.bf16.mxu0 %v1643_v16  ;;  %v1672_v43 = vld [vmem:[%s2122_s1 + $0x188] sm:$0xff]   ;;  %v1681_v50 = vld [vmem:[%s2122_s1 + $0x110] sm:$0xff]   ;;  %v1684_v53 = vld [vmem:[%s2122_s1 + $0x1d8] sm:$0xff]  }
  0x12   :  { %1463 = vmatprep.subr.bf16.mxu1 %v1644_v17  ;;  %v1673_v44 = vld [vmem:[%s2123_s0 + $0x4c] ss:$36 sps:$4 sm:$0xff]   ;;  %v1685_v54 = vld [vmem:[%s2122_s1 + $0x118] sm:$0xff]   ;;  %v1693_v60 = vld [vmem:[%s2122_s1 + $0x160] sm:$0xff]  }
  0x13   :  { %v1677_v46 = vld [vmem:[%s2123_s0 + $0x48] ss:$36 sps:$4 sm:$0xff]   ;;  %v1682_v51 = vld [vmem:[%s2122_s1 + $0x190] sm:$0xff]   ;;  %v1686_v55 = vld [vmem:[%s2122_s1 + $0x198] sm:$0xff]  }
  0x14   :  { %1424 = vmatpush3.bf16.msra.mxu0 %v1645_v18  ;;  %v1687_v56 = vld [vmem:[%s2123_s0 + $0x94] ss:$36 sps:$4 sm:$0xff]   ;;  %v1689_v57 = vld [vmem:[%s2123_s0 + $0x9c] ss:$36 sps:$4 sm:$0xff]   ;;  %v1697_v0 = vld [vmem:[%s2122_s1 + $0x168] sm:$0xff]  }
  0x15   :  { %1464 = vmatpush3.bf16.msra.mxu1 %v1646_v19  ;;  %1425 = vmatprep.subr.bf16.mxu0 %v1647_v20  ;;  %v1691_v58 = vld [vmem:[%s2123_s0 + $0x90] ss:$36 sps:$4 sm:$0xff]   ;;  %v1692_v59 = vld [vmem:[%s2123_s0 + $0x98] ss:$36 sps:$4 sm:$0xff]   ;;  %v1694_v61 = vld [vmem:[%s2122_s1 + $0x1e0] sm:$0xff]  }
  0x16   :  { %1465 = vmatprep.subr.bf16.mxu1 %v1648_v21  ;;  %v1695_v62 = vld [vmem:[%s2122_s1 + $0x120] sm:$0xff]   ;;  %v1698_v1 = vld [vmem:[%s2122_s1 + $0x1e8] sm:$0xff]   ;;  %v69_v4 = vld [vmem:[%s2123_s0 + $0xd8] sm:$0xff] }
  0x17   :  { %v1696_v63 = vld [vmem:[%s2122_s1 + $0x1a0] sm:$0xff]   ;;  %v1699_v2 = vld [vmem:[%s2122_s1 + $0x128] sm:$0xff]   ;;  %v1288_v6 = vcombine.high %v69_v4, %v69_v4  ;;  %v1287_v8 = vcombine.low %v69_v4, %v69_v4  ;;  %v1705_v10 = vld [vmem:[%s2122_s1 + $0x170] sm:$0xff]  }
  0x18   :  { %1426 = vmatpush3.bf16.msra.mxu0 %v1649_v22  ;;  %v1700_v3 = vld [vmem:[%s2122_s1 + $0x1a8] sm:$0xff]   ;;  %v70_v5 = vld [vmem:[%s2123_s0 + $0xe0] sm:$0xff]  ;;  %v1706_v11 = vld [vmem:[%s2122_s1 + $0x1f0] sm:$0xff]  }
  0x19   :  { %1466 = vmatpush3.bf16.msra.mxu1 %v1650_v23  ;;  %1427 = vmatprep.subr.bf16.mxu0 %v1651_v24  ;;  %v1290_v7 = vcombine.high %v70_v5, %v70_v5  ;;  %v1289_v9 = vcombine.low %v70_v5, %v70_v5  ;;  %v1707_v12 = vld [vmem:[%s2122_s1 + $0x130] sm:$0xff]   ;;  %v1709_v14 = vld [vmem:[%s2122_s1 + $0x178] sm:$0xff]   ;;  %v1719_v22 = vld [vmem:[%s2122_s1 + $0x200] sm:$0xff]  }
  0x1a   :  { %1467 = vmatprep.subr.bf16.mxu1 %v1652_v25  ;;  %v1708_v13 = vld [vmem:[%s2122_s1 + $0x1b0] sm:$0xff]   ;;  %v1710_v15 = vld [vmem:[%s2122_s1 + $0x1f8] sm:$0xff]   ;;  %v1720_v23 = vld [vmem:[%s2122_s1 + $0x208] sm:$0xff]  }
  0x1b   :  { %v1711_v16 = vld [vmem:[%s2122_s1 + $0x138] sm:$0xff]   ;;  %v1713_v18 = vld [vmem:[%s2123_s0 + $0x10] ss:$36 sps:$4 sm:$0xff]   ;;  %v1723_v25 = vld [vmem:[%s2123_s0 + $0x64] ss:$36 sps:$4 sm:$0xff]  }
  0x1c   :  { %1428 = vmatpush3.bf16.msra.mxu0 %v1653_v26  ;;  %v1712_v17 = vld [vmem:[%s2122_s1 + $0x1b8] sm:$0xff]   ;;  %v71_v33 = vld [vmem:[%s2123_s0 + $0xe8] sm:$0xff]  ;;  %v1733_v35 = vld [vmem:[%s2123_s0 + $0xa0] ss:$36 sps:$4 sm:$0xff]  }
  0x1d   :  { %1468 = vmatpush3.bf16.msra.mxu1 %v1654_v27  ;;  %1429 = vmatprep.subr.bf16.mxu0 %v1655_v28  ;;  %v1715_v19 = vld [vmem:[%s2123_s0 + $0x14] ss:$36 sps:$4 sm:$0xff]   ;;  %v1718_v21 = vld [vmem:[%s2123_s0 + $0x1c] ss:$36 sps:$4 sm:$0xff]  }
  0x1e   :  { %1469 = vmatprep.subr.bf16.mxu1 %v1656_v29  ;;  %v1716_v20 = vld [vmem:[%s2123_s0 + $0x18] ss:$36 sps:$4 sm:$0xff]   ;;  %v1727_v27 = vld [vmem:[%s2122_s1 + $0x210] sm:$0xff]   ;;  %v1726_v28 = vld [vmem:[%s2123_s0 + $0x60] ss:$36 sps:$4 sm:$0xff]  }
  0x1f   :  { %v1721_v24 = vld [vmem:[%s2123_s0 + $0x5c] ss:$36 sps:$4 sm:$0xff]   ;;  %v1729_v29 = vld [vmem:[%s2123_s0 + $0xa4] ss:$36 sps:$4 sm:$0xff]  }
  0x20   :  { %1430 = vmatpush3.bf16.msra.mxu0 %v1657_v30  ;;  %v1725_v26 = vld [vmem:[%s2123_s0 + $0x58] ss:$36 sps:$4 sm:$0xff]   ;;  %v1731_v30 = vld [vmem:[%s2123_s0 + $0xac] ss:$36 sps:$4 sm:$0xff]  }
  0x21   :  { %1470 = vmatpush3.bf16.msra.mxu1 %v1658_v31  ;;  %1495 = vmatprep.subr.bf16.mxu0 %v1665_v36  ;;  %v1728_v31 = vld [vmem:[%s2122_s1 + $0x218] sm:$0xff]   ;;  %v1734_v36 = vld [vmem:[%s2123_s0 + $0xa8] ss:$36 sps:$4 sm:$0xff]  }
  0x22   :  { %1535 = vmatprep.subr.bf16.mxu1 %v1666_v37  ;;  %v1292_v37 = vcombine.high %v71_v33, %v71_v33 }
  0x23   :  { %853 = vmatmul.mubr.bf16.vlgmr.msra.gmra.mrb[0].mxu0 %v1659_v32  ;;  %v1735_v32 = vld [vmem:[%s2122_s1 + $0x220] sm:$0xff]  }
  0x24   :  { %917 = vmatmul.mubr.bf16.vlgmr.msra.gmra.mrb[0].mxu1 %v1662_v34  ;;  %1496 = vmatpush3.bf16.msra.mxu0 %v1667_v38  ;;  %v72_v34 = vld [vmem:[%s2123_s0 + $0xf0] sm:$0xff] }
  0x25   :  { %1536 = vmatpush3.bf16.msra.mxu1 %v1668_v39  ;;  %1497 = vmatprep.subr.bf16.mxu0 %v1669_v40  ;;  %v1294_v38 = vcombine.high %v72_v34, %v72_v34  ;;  %v1736_v39 = vld [vmem:[%s2122_s1 + $0x228] sm:$0xff]   ;;  %v1741_v40 = vld [vmem:[%s2122_s1 + $0x230] sm:$0xff]  }
  0x26   :  { %1537 = vmatprep.subr.bf16.mxu1 %v1670_v41  ;;  %860 = vmatprep.mubr.bf16.mxu0 %v1673_v44  ;;  %v1291_v41 = vcombine.low %v71_v33, %v71_v33  ;;  %v1744_v44 = vld [vmem:[%s2123_s0 + $0xb0] ss:$36 sps:$4 sm:$0xff]  }
  0x27   :  { %924 = vmatprep.mubr.bf16.mxu1 %v1675_v45  ;;  %v1742_v45 = vld [vmem:[%s2122_s1 + $0x238] sm:$0xff]  }
  0x28   :  { %1498 = vmatpush3.bf16.msra.mxu0 %v1671_v42  ;;  %v1293_v42 = vcombine.low %v72_v34, %v72_v34 }
  0x29   :  { %1538 = vmatpush3.bf16.msra.mxu1 %v1672_v43  ;;  %1499 = vmatprep.subr.bf16.mxu0 %v1679_v48  ;;  %v1743_v43 = vld [vmem:[%s2123_s0 + $0x20] ss:$36 sps:$4 sm:$0xff]  }
  0x2a   :  { %1539 = vmatprep.subr.bf16.mxu1 %v1680_v49 }
  0x2b   :  { %861 = vmatmul.mubr.bf16.gmra.mrb[4].mxu0 %v1677_v46  ;;  %v1745_v46 = vld [vmem:[%s2123_s0 + $0x68] ss:$36 sps:$4 sm:$0xff]  }
  0x2c   :  { %925 = vmatmul.mubr.bf16.gmra.mrb[4].mxu1 %v1678_v47  ;;  %1500 = vmatpush3.bf16.msra.mxu0 %v1681_v50  ;;  %v1746_v47 = vld [vmem:[%s2123_s0 + $0xf8] ss:$0 sps:$4 sm:$0xff]  }
  0x2d   :  { %1540 = vmatpush3.bf16.msra.mxu1 %v1682_v51  ;;  %1501 = vmatprep.subr.bf16.mxu0 %v1683_v52 }
  0x2e   :  { %1541 = vmatprep.subr.bf16.mxu1 %v1684_v53  ;;  %868 = vmatprep.mubr.bf16.mxu0 %v1687_v56 }
  0x2f   :  { %932 = vmatprep.mubr.bf16.mxu1 %v1689_v57 }
  0x30   :  { %1502 = vmatpush3.bf16.msra.mxu0 %v1685_v54 }
  0x31   :  { %1542 = vmatpush3.bf16.msra.mxu1 %v1686_v55  ;;  %1503 = vmatprep.subr.bf16.mxu0 %v1693_v60 }
  0x32   :  { %1543 = vmatprep.subr.bf16.mxu1 %v1694_v61 }
  0x33   :  { %869 = vmatmul.mubr.bf16.gmra.mrb[8].mxu0 %v1691_v58 }
  0x34   :  { %933 = vmatmul.mubr.bf16.gmra.mrb[8].mxu1 %v1692_v59  ;;  %1504 = vmatpush3.bf16.msra.mxu0 %v1695_v62 }
  0x35   :  { %1544 = vmatpush3.bf16.msra.mxu1 %v1696_v63  ;;  %1505 = vmatprep.subr.bf16.mxu0 %v1697_v0 }
  0x36   :  { %1545 = vmatprep.subr.bf16.mxu1 %v1698_v1  ;;  %876 = vmatprep.mubr.bf16.mxu0 %v1288_v6 }
  0x37   :  { %940 = vmatprep.mubr.bf16.mxu1 %v1290_v7 }
  0x38   :  { %1506 = vmatpush3.bf16.msra.mxu0 %v1699_v2 }
  0x39   :  { %1546 = vmatpush3.bf16.msra.mxu1 %v1700_v3  ;;  %1507 = vmatprep.subr.bf16.mxu0 %v1705_v10 }
  0x3a   :  { %1547 = vmatprep.subr.bf16.mxu1 %v1706_v11 }
  0x3b   :  { %877 = vmatmul.mubr.bf16.gmra.mrb[12].mxu0 %v1287_v8 }
  0x3c   :  { %941 = vmatmul.mubr.bf16.gmra.mrb[12].mxu1 %v1289_v9  ;;  %1508 = vmatpush3.bf16.msra.mxu0 %v1707_v12 }
  0x3d   :  { %1548 = vmatpush3.bf16.msra.mxu1 %v1708_v13  ;;  %1509 = vmatprep.subr.bf16.mxu0 %v1709_v14 }
  0x3e   :  { %1549 = vmatprep.subr.bf16.mxu1 %v1710_v15  ;;  %980 = vmatprep.mubr.bf16.mxu0 %v1715_v19 }
  0x3f   :  { %1044 = vmatprep.mubr.bf16.mxu1 %v1718_v21 }
  0x40   :  { %1510 = vmatpush3.bf16.msra.mxu0 %v1711_v16 }
  0x41   :  { %1550 = vmatpush3.bf16.msra.mxu1 %v1712_v17  ;;  %1587 = vmatprep.subr.bf16.mxu0 %v1719_v22 }
  0x42   :  { %1611 = vmatprep.subr.bf16.mxu1 %v1719_v22 }
  0x43   :  { %981 = vmatmul.mubr.bf16.vlgmr.msra.gmra.mrb[16].mxu0 %v1713_v18 }
  0x44   :  { %1045 = vmatmul.mubr.bf16.vlgmr.msra.gmra.mrb[16].mxu1 %v1716_v20  ;;  %1588 = vmatpush3.bf16.msra.mxu0 %v1719_v22 }
  0x45   :  { %1619 = vmatpush3.bf16.msra.mxu1 %v1719_v22  ;;  %1589 = vmatprep.subr.bf16.mxu0 %v1720_v23 }
  0x46   :  { %1612 = vmatprep.subr.bf16.mxu1 %v1720_v23  ;;  %988 = vmatprep.mubr.bf16.mxu0 %v1721_v24 }
  0x47   :  { %1052 = vmatprep.mubr.bf16.mxu1 %v1723_v25 }
  0x48   :  { %1590 = vmatpush3.bf16.msra.mxu0 %v1720_v23 }
  0x49   :  { %1620 = vmatpush3.bf16.msra.mxu1 %v1720_v23  ;;  %1591 = vmatprep.subr.bf16.mxu0 %v1727_v27 }
  0x4a   :  { %1613 = vmatprep.subr.bf16.mxu1 %v1727_v27 }
  0x4b   :  { %989 = vmatmul.mubr.bf16.gmra.mrb[20].mxu0 %v1725_v26 }
  0x4c   :  { %1053 = vmatmul.mubr.bf16.gmra.mrb[20].mxu1 %v1726_v28  ;;  %996 = vmatprep.mubr.bf16.mxu0 %v1729_v29 }
  0x4d   :  { %1592 = vmatpush3.bf16.msra.mxu0 %v1727_v27  ;;  %1060 = vmatprep.mubr.bf16.mxu1 %v1731_v30 }
  0x4e   :  { %1621 = vmatpush3.bf16.msra.mxu1 %v1727_v27  ;;  %1593 = vmatprep.subr.bf16.mxu0 %v1728_v31 }
  0x4f   :  { %1614 = vmatprep.subr.bf16.mxu1 %v1728_v31 }
  0x51   :  { %1594 = vmatpush3.bf16.msra.mxu0 %v1728_v31 }
  0x52   :  { %1622 = vmatpush3.bf16.msra.mxu1 %v1728_v31  ;;  %1595 = vmatprep.subr.bf16.mxu0 %v1735_v32 }
  0x53   :  { %997 = vmatmul.mubr.bf16.gmra.mrb[24].mxu0 %v1733_v35  ;;  %1615 = vmatprep.subr.bf16.mxu1 %v1735_v32 }
  0x54   :  { %1061 = vmatmul.mubr.bf16.gmra.mrb[24].mxu1 %v1734_v36  ;;  %1004 = vmatprep.mubr.bf16.mxu0 %v1292_v37 }
  0x55   :  { %1596 = vmatpush3.bf16.msra.mxu0 %v1735_v32  ;;  %1068 = vmatprep.mubr.bf16.mxu1 %v1294_v38 }
  0x56   :  { %1623 = vmatpush3.bf16.msra.mxu1 %v1735_v32  ;;  %1597 = vmatprep.subr.bf16.mxu0 %v1736_v39 }
  0x57   :  { %1616 = vmatprep.subr.bf16.mxu1 %v1736_v39 }
  0x59   :  { %1598 = vmatpush3.bf16.msra.mxu0 %v1736_v39 }
  0x5a   :  { %1624 = vmatpush3.bf16.msra.mxu1 %v1736_v39  ;;  %1599 = vmatprep.subr.bf16.mxu0 %v1741_v40 }
  0x5b   :  { %1005 = vmatmul.mubr.bf16.gmra.mrb[28].mxu0 %v1291_v41  ;;  %1617 = vmatprep.subr.bf16.mxu1 %v1741_v40 }
  0x5c   :  { %1069 = vmatmul.mubr.bf16.gmra.mrb[28].mxu1 %v1293_v42  ;;  %1603 = vmatprep.mubr.bf16.mxu0 %v1743_v43 }
  0x5d   :  { %1600 = vmatpush3.bf16.msra.mxu0 %v1741_v40  ;;  %1607 = vmatprep.mubr.bf16.mxu1 %v1744_v44 }
  0x5e   :  { %1625 = vmatpush3.bf16.msra.mxu1 %v1741_v40  ;;  %1601 = vmatprep.subr.bf16.mxu0 %v1742_v45 }
  0x5f   :  { %1618 = vmatprep.subr.bf16.mxu1 %v1742_v45 }
  0x61   :  { %1602 = vmatpush3.bf16.msra.mxu0 %v1742_v45 }
  0x62   :  { %1626 = vmatpush3.bf16.msra.mxu1 %v1742_v45 }
  0x64   :  { %1604 = vmatmul.mubr.bf16.vlgmr.msra.gmra.mrb[32].mxu0 %v1745_v46 }
  0x65   :  { %1608 = vmatmul.mubr.bf16.vlgmr.msra.gmra.mrb[32].mxu1 %v1746_v47 }
  0xf6   :  { %v1431_v48 = vpop.f32.mrb[0].mxu0 }
  0xf7   :  { %v1471_v49 = vpop.f32.mrb[0].mxu1  ;;  %v1432_v50 = vpop.f32.mrb[1].mxu0 }
  0xf8   :  { %v1433_v51 = vadd.f32 %v1432_v50, %v1431_v48  ;;  %v1472_v52 = vpop.f32.mrb[1].mxu1  ;;  %v1434_v53 = vpop.f32.mrb[2].mxu0 }
  0xf9   :  { %v1473_v54 = vadd.f32 %v1472_v52, %v1471_v49  ;;  %v1474_v55 = vpop.f32.mrb[2].mxu1  ;;  %v1435_v56 = vpop.f32.mrb[3].mxu0 }
  0xfa   :  { %v1436_v57 = vadd.f32 %v1435_v56, %v1434_v53  ;;  %v1475_v58 = vpop.f32.mrb[3].mxu1 }
  0xfb   :  { %v919_v59 = vadd.f32 %v1473_v54, %v1433_v51  ;;  %v1476_v60 = vadd.f32 %v1475_v58, %v1474_v55 }
  0xfd   :  { %v922_v61 = vadd.f32 %v1476_v60, %v1436_v57 }
  0xfe   :  { %v1437_v62 = vpop.f32.mrb[4].mxu0 }
  0xff   :  { %v1477_v63 = vpop.f32.mrb[4].mxu1  ;;  %v1438_v0 = vpop.f32.mrb[5].mxu0 }
 0x100   :  { %v1439_v1 = vadd.f32 %v1438_v0, %v1437_v62  ;;  %v1478_v2 = vpop.f32.mrb[5].mxu1  ;;  %v1440_v3 = vpop.f32.mrb[6].mxu0 }
 0x101   :  { %v1479_v4 = vadd.f32 %v1478_v2, %v1477_v63  ;;  %v1480_v5 = vpop.f32.mrb[6].mxu1  ;;  %v1441_v6 = vpop.f32.mrb[7].mxu0 }
 0x102   :  { %v1442_v7 = vadd.f32 %v1441_v6, %v1440_v3  ;;  %v1481_v8 = vpop.f32.mrb[7].mxu1 }
 0x103   :  { %v927_v9 = vadd.f32 %v1479_v4, %v1439_v1  ;;  %v1482_v10 = vadd.f32 %v1481_v8, %v1480_v5 }
 0x105   :  { %v930_v11 = vadd.f32 %v1482_v10, %v1442_v7 }
 0x106   :  { %v1443_v12 = vpop.f32.mrb[8].mxu0 }
 0x107   :  { %v1483_v13 = vpop.f32.mrb[8].mxu1  ;;  %v1444_v14 = vpop.f32.mrb[9].mxu0 }
 0x108   :  { %v1445_v15 = vadd.f32 %v1444_v14, %v1443_v12  ;;  %v1484_v16 = vpop.f32.mrb[9].mxu1  ;;  %v1446_v17 = vpop.f32.mrb[10].mxu0 }
 0x109   :  { %v1485_v18 = vadd.f32 %v1484_v16, %v1483_v13  ;;  %v1486_v19 = vpop.f32.mrb[10].mxu1  ;;  %v1447_v20 = vpop.f32.mrb[11].mxu0 }
 0x10a   :  { %v1448_v21 = vadd.f32 %v1447_v20, %v1446_v17  ;;  %v1487_v22 = vpop.f32.mrb[11].mxu1 }
 0x10b   :  { %v935_v23 = vadd.f32 %v1485_v18, %v1445_v15  ;;  %v1488_v24 = vadd.f32 %v1487_v22, %v1486_v19 }
 0x10d   :  { %v938_v25 = vadd.f32 %v1488_v24, %v1448_v21 }
 0x10e   :  { %v1449_v26 = vpop.f32.mrb[12].mxu0 }
 0x10f   :  { %v1489_v27 = vpop.f32.mrb[12].mxu1  ;;  %v1450_v28 = vpop.f32.mrb[13].mxu0 }
 0x110   :  { %v1490_v29 = vpop.f32.mrb[13].mxu1  ;;  %v1451_v30 = vadd.f32 %v1450_v28, %v1449_v26  ;;  %v1452_v32 = vpop.f32.mrb[14].mxu0 }
 0x111   :  { %v1491_v31 = vadd.f32 %v1490_v29, %v1489_v27  ;;  %v1492_v33 = vpop.f32.mrb[14].mxu1  ;;  %v1453_v34 = vpop.f32.mrb[15].mxu0 }
 0x112   :  { %v1493_v35 = vpop.f32.mrb[15].mxu1 }
 0x113   :  { %v943_v36 = vadd.f32 %v1491_v31, %v1451_v30  ;;  %v1385_v35 = vld [vmem:[%s2124_s4] sm:$0xff]  }
 0x116   :  { %v1511_v37 = vpop.f32.mrb[16].mxu0 }
 0x117   :  { %v1551_v38 = vpop.f32.mrb[16].mxu1  ;;  %v1512_v39 = vpop.f32.mrb[17].mxu0 }
 0x118   :  { %v1513_v40 = vadd.f32 %v1512_v39, %v1511_v37  ;;  %v1552_v41 = vpop.f32.mrb[17].mxu1  ;;  %v1514_v42 = vpop.f32.mrb[18].mxu0  ;;  %v1412_v37 = vld [vmem:[%s2124_s4 + $0x10] sm:$0xff]  }
 0x119   :  { %v1553_v43 = vadd.f32 %v1552_v41, %v1551_v38  ;;  %v1554_v44 = vpop.f32.mrb[18].mxu1  ;;  %v1515_v45 = vpop.f32.mrb[19].mxu0 }
 0x11a   :  { %v983_v46 = vadd.f32 %v1513_v40, %v919_v59  ;;  %v1516_v47 = vadd.f32 %v1515_v45, %v1514_v42  ;;  %v1555_v48 = vpop.f32.mrb[19].mxu1 }
 0x11b   :  { %v1556_v49 = vadd.f32 %v1555_v48, %v1554_v44  ;;  %v1369_v44 = vld [vmem:[%s2126_s3] ss:$0 sm:$0xff] }
 0x11c   :  { %v986_v50 = vadd.f32 %v1516_v47, %v922_v61  ;;  %v1047_v51 = vadd.f32 %v1553_v43, %v983_v46  ;;  %v1386_v47 = vunpack.c.l.bf16 %v1385_v35 }
 0x11e   :  { %v1517_v52 = vpop.f32.mrb[20].mxu0  ;;  %v2089_v53 = vadd.f32 %v1556_v49, %v986_v50  ;;  %v1394_v49 = vunpack.c.l.bf16 %v1412_v37 }
 0x11f   :  { %v1557_v54 = vpop.f32.mrb[20].mxu1  ;;  %v1518_v55 = vpop.f32.mrb[21].mxu0 }
 0x120   :  { %v1519_v56 = vadd.f32 %v1518_v55, %v1517_v52  ;;  %v1558_v57 = vpop.f32.mrb[21].mxu1  ;;  %v1520_v58 = vpop.f32.mrb[22].mxu0 }
 0x121   :  { %v1559_v60 = vadd.f32 %v1558_v57, %v1557_v54  ;;  %v1560_v62 = vpop.f32.mrb[22].mxu1  ;;  %v1521_v63 = vpop.f32.mrb[23].mxu0 }
 0x122   :  { %v991_v0 = vadd.f32 %v1519_v56, %v927_v9  ;;  %v1522_v1 = vadd.f32 %v1521_v63, %v1520_v58  ;;  %v1561_v2 = vpop.f32.mrb[23].mxu1 }
 0x123   :  { %v1562_v59 = vadd.f32 %v1561_v2, %v1560_v62 }
 0x124   :  { %v994_v3 = vadd.f32 %v1522_v1, %v930_v11  ;;  %v1055_v4 = vadd.f32 %v1559_v60, %v991_v0  ;;  %v1387_v0 = vunpack.c.h.bf16 %v1385_v35 }
 0x126   :  { %v1523_v5 = vpop.f32.mrb[24].mxu0  ;;  %v1058_v61 = vadd.f32 %v1562_v59, %v994_v3 }
 0x127   :  { %v1563_v6 = vpop.f32.mrb[24].mxu1  ;;  %v1524_v7 = vpop.f32.mrb[25].mxu0 }
 0x128   :  { %v1525_v8 = vadd.f32 %v1524_v7, %v1523_v5  ;;  %v1564_v10 = vpop.f32.mrb[25].mxu1  ;;  %v1526_v12 = vpop.f32.mrb[26].mxu0  ;;  %v1395_v7 = vunpack.c.h.bf16 %v1412_v37 }
 0x129   :  { %v1565_v13 = vadd.f32 %v1564_v10, %v1563_v6  ;;  %v1566_v14 = vpop.f32.mrb[26].mxu1  ;;  %v1527_v15 = vpop.f32.mrb[27].mxu0 }
 0x12a   :  { %v999_v16 = vadd.f32 %v1525_v8, %v935_v23  ;;  %v1528_v17 = vadd.f32 %v1527_v15, %v1526_v12  ;;  %v1567_v18 = vpop.f32.mrb[27].mxu1  ;;  %v1411_v23 = vld [vmem:[%s2124_s4 + $0x8] sm:$0xff]  }
 0x12b   :  { %v1568_v19 = vadd.f32 %v1567_v18, %v1566_v14  ;;  %v1390_v40 = vunpack.c.l.bf16 %v1411_v23  ;;  %v1391_v56 = vunpack.c.h.bf16 %v1411_v23 }
 0x12c   :  { %v1002_v9 = vadd.f32 %v1528_v17, %v938_v25  ;;  %v1063_v20 = vadd.f32 %v1565_v13, %v999_v16  ;;  %v1198_v25 = vld [vmem:[%s2124_s4 + $0x18] sm:$0xf] }
 0x12d   :  { %v1205_v42 = vunpack.c.l.bf16 %v1198_v25 }
 0x12e   :  { %v1529_v21 = vpop.f32.mrb[28].mxu0  ;;  %v1066_v22 = vadd.f32 %v1568_v19, %v1002_v9 }
 0x12f   :  { %v1569_v11 = vpop.f32.mrb[28].mxu1  ;;  %v1530_v24 = vpop.f32.mrb[29].mxu0 }
 0x130   :  { %v1531_v26 = vadd.f32 %v1530_v24, %v1529_v21  ;;  %v1570_v27 = vpop.f32.mrb[29].mxu1  ;;  %v1532_v28 = vpop.f32.mrb[30].mxu0 }
 0x131   :  { %v1571_v29 = vadd.f32 %v1570_v27, %v1569_v11  ;;  %v1572_v30 = vpop.f32.mrb[30].mxu1  ;;  %v1533_v31 = vpop.f32.mrb[31].mxu0 }
 0x132   :  { %v1007_v32 = vadd.f32 %v1531_v26, %v943_v36  ;;  %v1573_v33 = vpop.f32.mrb[31].mxu1  ;;  %v1368_v36 = vld [vmem:[%s2125_s2] ss:$0 sm:$0xff] }
 0x134   :  { %v1071_v34 = vadd.f32 %v1571_v29, %v1007_v32 }
 0x137   :  { %v1605_v38 = vpop.f32.mrb[32].mxu0 }
 0x138   :  { %v1119_v39 = vadd.f32 %v1605_v38, %v1055_v4  ;;  %v1609_v41 = vpop.f32.mrb[32].mxu1  ;;  %v1110_v43 = vpop.f32.mrb[33].mxu0 }
 0x139   :  { %v1135_v45 = vadd.f32 %v1609_v41, %v1071_v34  ;;  %v1111_v46 = vadd.f32 %v1110_v43, %v1047_v51  ;;  %v1126_v48 = vpop.f32.mrb[33].mxu1  ;;  %v1606_v50 = vpop.f32.mrb[34].mxu0 }
 0x13a   :  { %v1173_v52 = vmul.f32 %v1368_v36, %v1119_v39  ;;  %v1127_v54 = vadd.f32 %v1126_v48, %v1063_v20  ;;  %v1122_v55 = vadd.f32 %v1606_v50, %v1058_v61  ;;  %v1610_v57 = vpop.f32.mrb[34].mxu1  ;;  %v1113_v58 = vpop.f32.mrb[35].mxu0 }
 0x13b   :  { %v1177_v60 = vmul.f32 %v1368_v36, %v1135_v45  ;;  %v1171_v62 = vmul.f32 %v1368_v36, %v1111_v46  ;;  %v1114_v63 = vadd.f32 %v1113_v58, %v2089_v53  ;;  %v1129_v1 = vpop.f32.mrb[35].mxu1 }
 0x13c   :  { %v1187_v2 = vadd.f32 %v1369_v44, %v1173_v52  ;;  %v1175_v59 = vmul.f32 %v1368_v36, %v1127_v54  ;;  %v1174_v3 = vmul.f32 %v1368_v36, %v1122_v55  ;;  %v1130_v51 = vadd.f32 %v1129_v1, %v1066_v22 }
 0x13d   :  { %v1191_v4 = vadd.f32 %v1369_v44, %v1177_v60  ;;  %v1185_v5 = vadd.f32 %v1369_v44, %v1171_v62  ;;  %v1172_v6 = vmul.f32 %v1368_v36, %v1114_v63 }
 0x13e   :  { %v1208_v8 = vadd.f32 %v1390_v40, %v1187_v2  ;;  %v1189_v10 = vadd.f32 %v1369_v44, %v1175_v59  ;;  %v1188_v61 = vadd.f32 %v1369_v44, %v1174_v3  ;;  %v1176_v12 = vmul.f32 %v1368_v36, %v1130_v51 }
 0x13f   :  { %v1212_v13 = vadd.f32 %v1205_v42, %v1191_v4  ;;  %v1206_v14 = vadd.f32 %v1386_v47, %v1185_v5  ;;  %v1186_v15 = vadd.f32 %v1369_v44, %v1172_v6 }
 0x140   :  { %v1210_v16 = vadd.f32 %v1394_v49, %v1189_v10  ;;  %v1209_v17 = vadd.f32 %v1391_v56, %v1188_v61  ;;  %v1190_v53 = vadd.f32 %v1369_v44, %v1176_v12  ;;  %v1215_v9 = vmax.f32 %v1208_v8, 0.0 }
 0x141   :  { %v1219_v18 = vmax.f32 %v1212_v13, 0.0  ;;  %v1207_v19 = vadd.f32 %v1387_v0, %v1186_v15  ;;  %v1213_v11 = vmax.f32 %v1206_v14, 0.0 }
 0x142   :  { %v1216_v20 = vmax.f32 %v1209_v17, 0.0  ;;  %v1211_v21 = vadd.f32 %v1395_v7, %v1190_v53  ;;  %v1217_v26 = vmax.f32 %v1210_v16, 0.0 }
 0x143   :  { %v1383_v22 = vpack.c.bf16 %v1219_v18, %v1219_v18  ;;  %v1214_v24 = vmax.f32 %v1207_v19, 0.0 }
 0x144   :  { %v1404_v27 = vpack.c.bf16 %v1216_v20, %v1215_v9  ;;  %v1218_v28 = vmax.f32 %v1211_v21, 0.0 }
 0x145   :  { %1255 = vst [vmem:[%s2127_s5 + $0x18] sm:$0xf] %v1383_v22  ;;  %v1399_v29 = vpack.c.bf16 %v1214_v24, %v1213_v11 }
 0x146   :  { %1413 = vst [vmem:[%s2127_s5 + $0x8] sm:$0xff] %v1404_v27   ;;  %v1409_v30 = vpack.c.bf16 %v1218_v28, %v1217_v26 }
 0x147   :  { %1400 = vst [vmem:[%s2127_s5] sm:$0xff] %v1399_v29  }
 0x148   :  { %1414 = vst [vmem:[%s2127_s5 + $0x10] sm:$0xff] %v1409_v30  }

// kernel: resnet18_forward.18
= control target key start
LH: loop header
LB: loop body
LE: loop exit
PB: predicated region body
PF: predicated region fallthrough
CT: control target
= control target key end

     0   :  { %v345_v1 = vmov 0   ;;  %v217_v19 = vlaneseq  ;;  %s440_s1 = inlined_call_operand.vmem [shape: bf16[128,256], index: 1, kind: input, shape index: {}]   ;;  %s441_s0 = inlined_call_operand.vmem [shape: bf16[24,128], index: 0, kind: input, shape index: {}]   ;;  %s442_s2 = inlined_call_operand.vmem [shape: f32[1,256], index: 2, kind: input, shape index: {}]   ;;  %s443_s3 = inlined_call_operand.vmem [shape: f32[1,256], index: 3, kind: input, shape index: {}]   ;;  %s444_s4 = inlined_call_operand.vmem [shape: bf16[24,256], index: 4, kind: output, shape index: {}]  }
   0x1   :  { %v319_v0 = vld [vmem:[%s440_s1 + $0x4] ss:$8 sps:$4 sm:$0xff]   ;;  %175 = vmatprep.mubr.bf16.mxu0 %v345_v1  ;;  %185 = vmatprep.mubr.bf16.mxu1 %v345_v1  ;;  %v321_v2 = vld [vmem:[%s440_s1] ss:$8 sps:$4 sm:$0xff]   ;;  %v322_v3 = vld [vmem:[%s440_s1 + $0x14] ss:$8 sps:$4 sm:$0xff]  }
   0x2   :  { %143 = vmatprep.subr.bf16.mxu0 %v319_v0  ;;  %302 = vmatprep.subr.bf16.mxu1 %v319_v0  ;;  %v324_v4 = vld [vmem:[%s440_s1 + $0x10] ss:$8 sps:$4 sm:$0xff]   ;;  %v325_v5 = vld [vmem:[%s440_s1 + $0x24] ss:$8 sps:$4 sm:$0xff]   ;;  %v327_v6 = vld [vmem:[%s440_s1 + $0x20] ss:$8 sps:$4 sm:$0xff]  }
   0x3   :  { %144 = vmatpush1.bf16.msra.mxu0 %v321_v2  ;;  %310 = vmatpush1.bf16.msra.mxu1 %v321_v2  ;;  %v328_v7 = vld [vmem:[%s440_s1 + $0x34] ss:$8 sps:$4 sm:$0xff]   ;;  %v330_v8 = vld [vmem:[%s440_s1 + $0x30] ss:$8 sps:$4 sm:$0xff]   ;;  %v331_v9 = vld [vmem:[%s440_s1 + $0x44] ss:$8 sps:$4 sm:$0xff]  }
   0x4   :  { %145 = vmatprep.subr.bf16.mxu0 %v322_v3  ;;  %303 = vmatprep.subr.bf16.mxu1 %v322_v3  ;;  %v333_v10 = vld [vmem:[%s440_s1 + $0x40] ss:$8 sps:$4 sm:$0xff]   ;;  %v334_v11 = vld [vmem:[%s440_s1 + $0x54] ss:$8 sps:$4 sm:$0xff]   ;;  %v336_v12 = vld [vmem:[%s440_s1 + $0x50] ss:$8 sps:$4 sm:$0xff]  }
   0x5   :  { %v337_v13 = vld [vmem:[%s440_s1 + $0x64] ss:$8 sps:$4 sm:$0xff]   ;;  %v339_v14 = vld [vmem:[%s440_s1 + $0x60] ss:$8 sps:$4 sm:$0xff]   ;;  %v340_v15 = vld [vmem:[%s440_s1 + $0x74] ss:$8 sps:$4 sm:$0xff]  }
   0x6   :  { %v342_v16 = vld [vmem:[%s440_s1 + $0x70] ss:$8 sps:$4 sm:$0xff]   ;;  %v343_v17 = vld [vmem:[%s441_s0] sm:$0xff]   ;;  %v344_v18 = vld [vmem:[%s441_s0 + $0x8] ss:$0 sps:$4 sm:$0xff]   ;;  %v218_v20 = vshrl.u32 %v217_v19, 7 }
   0x7   :  { %146 = vmatpush1.bf16.msra.mxu0 %v324_v4  ;;  %311 = vmatpush1.bf16.msra.mxu1 %v324_v4  ;;  %v215_v22 = vld [vmem:[%s442_s2] sm:$0x3] }
   0x8   :  { %147 = vmatprep.subr.bf16.mxu0 %v325_v5  ;;  %304 = vmatprep.subr.bf16.mxu1 %v325_v5  ;;  %v219_v21 = vsub.s32 0, %v218_v20  ;;  %v223_v23 = vsub.s32 1, %v218_v20  ;;  %v233_v24 = vld [vmem:[%s443_s3] sm:$0x3] }
   0xa   :  { %v220_v25 = vrot.slane %v215_v22, %v219_v21  ;;  %v224_v26 = vrot.slane %v215_v22, %v223_v23  ;;  %v238_v27 = vrot.slane %v233_v24, %v219_v21  ;;  %v242_v30 = vrot.slane %v233_v24, %v223_v23 }
   0xb   :  { %148 = vmatpush1.bf16.msra.mxu0 %v327_v6  ;;  %312 = vmatpush1.bf16.msra.mxu1 %v327_v6 }
   0xc   :  { %149 = vmatprep.subr.bf16.mxu0 %v328_v7  ;;  %305 = vmatprep.subr.bf16.mxu1 %v328_v7 }
   0xf   :  { %150 = vmatpush1.bf16.msra.mxu0 %v330_v8  ;;  %313 = vmatpush1.bf16.msra.mxu1 %v330_v8 }
  0x10   :  { %151 = vmatprep.subr.bf16.mxu0 %v331_v9  ;;  %306 = vmatprep.subr.bf16.mxu1 %v331_v9 }
  0x13   :  { %152 = vmatpush1.bf16.msra.mxu0 %v333_v10  ;;  %314 = vmatpush1.bf16.msra.mxu1 %v333_v10 }
  0x14   :  { %153 = vmatprep.subr.bf16.mxu0 %v334_v11  ;;  %307 = vmatprep.subr.bf16.mxu1 %v334_v11 }
  0x17   :  { %154 = vmatpush1.bf16.msra.mxu0 %v336_v12  ;;  %315 = vmatpush1.bf16.msra.mxu1 %v336_v12 }
  0x18   :  { %155 = vmatprep.subr.bf16.mxu0 %v337_v13  ;;  %308 = vmatprep.subr.bf16.mxu1 %v337_v13 }
  0x1b   :  { %156 = vmatpush1.bf16.msra.mxu0 %v339_v14  ;;  %316 = vmatpush1.bf16.msra.mxu1 %v339_v14 }
  0x1c   :  { %157 = vmatprep.subr.bf16.mxu0 %v340_v15  ;;  %309 = vmatprep.subr.bf16.mxu1 %v340_v15 }
  0x1f   :  { %158 = vmatpush1.bf16.msra.mxu0 %v342_v16  ;;  %317 = vmatpush1.bf16.msra.mxu1 %v342_v16 }
  0x22   :  { %176 = vmatmul.mubr.bf16.vlgmr.msra.gmra.mrb[0].mxu0 %v343_v17  ;;  %186 = vmatmul.mubr.bf16.vlgmr.msra.gmra.mrb[0].mxu1 %v344_v18 }
  0xf5   :  { %v177_v28 = vpop.f32.mrb[0].mxu0  ;;  %v187_v29 = vpop.f32.mrb[0].mxu1 }
  0xf6   :  { %v227_v31 = vmul.f32 %v220_v25, %v177_v28  ;;  %v231_v32 = vmul.f32 %v220_v25, %v187_v29  ;;  %v179_v33 = vpop.f32.mrb[1].mxu0  ;;  %v189_v34 = vpop.f32.mrb[1].mxu1 }
  0xf7   :  { %v228_v35 = vmul.f32 %v224_v26, %v179_v33  ;;  %v232_v36 = vmul.f32 %v224_v26, %v189_v34  ;;  %v181_v37 = vpop.f32.mrb[2].mxu0  ;;  %v191_v38 = vpop.f32.mrb[2].mxu1 }
  0xf8   :  { %v245_v39 = vadd.f32 %v238_v27, %v227_v31  ;;  %v249_v40 = vadd.f32 %v238_v27, %v231_v32  ;;  %v229_v41 = vmul.f32 %v220_v25, %v181_v37  ;;  %v183_v42 = vpop.f32.mrb[3].mxu0  ;;  %v192_v43 = vpop.f32.mrb[3].mxu1 }
  0xf9   :  { %v246_v44 = vadd.f32 %v242_v30, %v228_v35  ;;  %v250_v45 = vadd.f32 %v242_v30, %v232_v36  ;;  %v230_v46 = vmul.f32 %v224_v26, %v183_v42 }
  0xfa   :  { %v247_v47 = vadd.f32 %v238_v27, %v229_v41 }
  0xfb   :  { %v299_v48 = vpack.c.bf16 %v246_v44, %v245_v39  ;;  %v301_v49 = vpack.c.bf16 %v250_v45, %v249_v40  ;;  %v248_v50 = vadd.f32 %v242_v30, %v230_v46 }
  0xfd   :  { %271 = vst [vmem:[%s444_s4] sm:$0xff] %v299_v48  ;;  %273 = vst [vmem:[%s444_s4 + $0x10] sm:$0xff] %v301_v49  ;;  %v300_v51 = vpack.c.bf16 %v248_v50, %v247_v47 }
  0xff   :  { %272 = vst [vmem:[%s444_s4 + $0x8] sm:$0xff] %v300_v51 }

// kernel: resnet18_forward.17
= control target key start
LH: loop header
LB: loop body
LE: loop exit
PB: predicated region body
PF: predicated region fallthrough
CT: control target
= control target key end

     0   :  { %s2302_s1 = inlined_call_operand.vmem [shape: bf16[1152,256], index: 1, kind: input, shape index: {}]   ;;  %s2303_s0 = inlined_call_operand.vmem [shape: bf16[24,1152], index: 0, kind: input, shape index: {}]   ;;  %s2304_s2 = inlined_call_operand.vmem [shape: f32[1,256], index: 2, kind: input, shape index: {}]   ;;  %s2305_s3 = inlined_call_operand.vmem [shape: f32[1,256], index: 3, kind: input, shape index: {}]   ;;  %s2306_s4 = inlined_call_operand.vmem [shape: bf16[24,256], index: 4, kind: output, shape index: {}]  }
   0x1   :  { %v1549_v0 = vld [vmem:[%s2302_s1 + $0x4] ss:$8 sps:$4 sm:$0xff]   ;;  %v1553_v2 = vld [vmem:[%s2302_s1] ss:$8 sps:$4 sm:$0xff]   ;;  %v1555_v4 = vld [vmem:[%s2302_s1 + $0x14] ss:$8 sps:$4 sm:$0xff]  }
   0x2   :  { %v1551_v1 = vld [vmem:[%s2302_s1 + $0x204] ss:$8 sps:$4 sm:$0xff]   ;;  %991 = vmatprep.subr.bf16.mxu1 %v1549_v0  ;;  %v1554_v3 = vld [vmem:[%s2302_s1 + $0x200] ss:$8 sps:$4 sm:$0xff]   ;;  %v1557_v5 = vld [vmem:[%s2302_s1 + $0x214] ss:$8 sps:$4 sm:$0xff]  }
   0x3   :  { %1093 = vmatprep.subr.bf16.mxu0 %v1551_v1  ;;  %992 = vmatpush1.bf16.msra.mxu1 %v1553_v2  ;;  %v1559_v6 = vld [vmem:[%s2302_s1 + $0x10] ss:$8 sps:$4 sm:$0xff]   ;;  %v1561_v8 = vld [vmem:[%s2302_s1 + $0x24] ss:$8 sps:$4 sm:$0xff]   ;;  %v1565_v10 = vld [vmem:[%s2302_s1 + $0x20] ss:$8 sps:$4 sm:$0xff]  }
   0x4   :  { %1094 = vmatpush1.bf16.msra.mxu0 %v1554_v3  ;;  %993 = vmatprep.subr.bf16.mxu1 %v1555_v4  ;;  %v1560_v7 = vld [vmem:[%s2302_s1 + $0x210] ss:$8 sps:$4 sm:$0xff]   ;;  %v1563_v9 = vld [vmem:[%s2302_s1 + $0x224] ss:$8 sps:$4 sm:$0xff]   ;;  %v1566_v11 = vld [vmem:[%s2302_s1 + $0x220] ss:$8 sps:$4 sm:$0xff]  }
   0x5   :  { %1095 = vmatprep.subr.bf16.mxu0 %v1557_v5  ;;  %v1567_v12 = vld [vmem:[%s2302_s1 + $0x34] ss:$8 sps:$4 sm:$0xff]   ;;  %v1571_v14 = vld [vmem:[%s2302_s1 + $0x30] ss:$8 sps:$4 sm:$0xff]   ;;  %v1573_v16 = vld [vmem:[%s2302_s1 + $0x44] ss:$8 sps:$4 sm:$0xff]  }
   0x6   :  { %v1569_v13 = vld [vmem:[%s2302_s1 + $0x234] ss:$8 sps:$4 sm:$0xff]   ;;  %v1572_v15 = vld [vmem:[%s2302_s1 + $0x230] ss:$8 sps:$4 sm:$0xff]   ;;  %v1575_v17 = vld [vmem:[%s2302_s1 + $0x244] ss:$8 sps:$4 sm:$0xff]  }
   0x7   :  { %994 = vmatpush1.bf16.msra.mxu1 %v1559_v6  ;;  %v1577_v18 = vld [vmem:[%s2302_s1 + $0x40] ss:$8 sps:$4 sm:$0xff]   ;;  %v1579_v20 = vld [vmem:[%s2302_s1 + $0x54] ss:$8 sps:$4 sm:$0xff]   ;;  %v1583_v22 = vld [vmem:[%s2302_s1 + $0x50] ss:$8 sps:$4 sm:$0xff]  }
   0x8   :  { %1096 = vmatpush1.bf16.msra.mxu0 %v1560_v7  ;;  %995 = vmatprep.subr.bf16.mxu1 %v1561_v8  ;;  %v1578_v19 = vld [vmem:[%s2302_s1 + $0x240] ss:$8 sps:$4 sm:$0xff]   ;;  %v1581_v21 = vld [vmem:[%s2302_s1 + $0x254] ss:$8 sps:$4 sm:$0xff]   ;;  %v1584_v23 = vld [vmem:[%s2302_s1 + $0x250] ss:$8 sps:$4 sm:$0xff]  }
   0x9   :  { %1097 = vmatprep.subr.bf16.mxu0 %v1563_v9  ;;  %v1585_v24 = vld [vmem:[%s2302_s1 + $0x64] ss:$8 sps:$4 sm:$0xff]   ;;  %v1589_v26 = vld [vmem:[%s2302_s1 + $0x60] ss:$8 sps:$4 sm:$0xff]   ;;  %v1591_v28 = vld [vmem:[%s2302_s1 + $0x74] ss:$8 sps:$4 sm:$0xff]  }
   0xa   :  { %v1587_v25 = vld [vmem:[%s2302_s1 + $0x264] ss:$8 sps:$4 sm:$0xff]   ;;  %v1590_v27 = vld [vmem:[%s2302_s1 + $0x260] ss:$8 sps:$4 sm:$0xff]   ;;  %v1593_v29 = vld [vmem:[%s2302_s1 + $0x274] ss:$8 sps:$4 sm:$0xff]  }
   0xb   :  { %996 = vmatpush1.bf16.msra.mxu1 %v1565_v10  ;;  %v1595_v30 = vld [vmem:[%s2302_s1 + $0x70] ss:$8 sps:$4 sm:$0xff]   ;;  %v1597_v32 = vld [vmem:[%s2302_s1 + $0x84] ss:$8 sps:$4 sm:$0xff]   ;;  %v1601_v34 = vld [vmem:[%s2302_s1 + $0x80] ss:$8 sps:$4 sm:$0xff]  }
   0xc   :  { %1098 = vmatpush1.bf16.msra.mxu0 %v1566_v11  ;;  %997 = vmatprep.subr.bf16.mxu1 %v1567_v12  ;;  %v1596_v31 = vld [vmem:[%s2302_s1 + $0x270] ss:$8 sps:$4 sm:$0xff]   ;;  %v1599_v33 = vld [vmem:[%s2302_s1 + $0x284] ss:$8 sps:$4 sm:$0xff]   ;;  %v1602_v35 = vld [vmem:[%s2302_s1 + $0x280] ss:$8 sps:$4 sm:$0xff]  }
   0xd   :  { %1099 = vmatprep.subr.bf16.mxu0 %v1569_v13  ;;  %v1603_v36 = vld [vmem:[%s2302_s1 + $0x94] ss:$8 sps:$4 sm:$0xff]   ;;  %v1607_v38 = vld [vmem:[%s2302_s1 + $0x90] ss:$8 sps:$4 sm:$0xff]   ;;  %v1609_v40 = vld [vmem:[%s2302_s1 + $0xa4] ss:$8 sps:$4 sm:$0xff]  }
   0xe   :  { %v1605_v37 = vld [vmem:[%s2302_s1 + $0x294] ss:$8 sps:$4 sm:$0xff]   ;;  %v1608_v39 = vld [vmem:[%s2302_s1 + $0x290] ss:$8 sps:$4 sm:$0xff]   ;;  %v1611_v41 = vld [vmem:[%s2302_s1 + $0x2a4] ss:$8 sps:$4 sm:$0xff]  }
   0xf   :  { %998 = vmatpush1.bf16.msra.mxu1 %v1571_v14  ;;  %v1613_v42 = vld [vmem:[%s2302_s1 + $0xa0] ss:$8 sps:$4 sm:$0xff]   ;;  %v1615_v44 = vld [vmem:[%s2302_s1 + $0xb4] ss:$8 sps:$4 sm:$0xff]   ;;  %v1619_v46 = vld [vmem:[%s2302_s1 + $0xb0] ss:$8 sps:$4 sm:$0xff]  }
  0x10   :  { %1100 = vmatpush1.bf16.msra.mxu0 %v1572_v15  ;;  %999 = vmatprep.subr.bf16.mxu1 %v1573_v16  ;;  %v1614_v43 = vld [vmem:[%s2302_s1 + $0x2a0] ss:$8 sps:$4 sm:$0xff]   ;;  %v1617_v45 = vld [vmem:[%s2302_s1 + $0x2b4] ss:$8 sps:$4 sm:$0xff]   ;;  %v1620_v47 = vld [vmem:[%s2302_s1 + $0x2b0] ss:$8 sps:$4 sm:$0xff]  }
  0x11   :  { %1101 = vmatprep.subr.bf16.mxu0 %v1575_v17  ;;  %v1647_v48 = vld [vmem:[%s2303_s0 + $0x4] ss:$36 sps:$4 sm:$0xff]   ;;  %v1653_v51 = vld [vmem:[%s2303_s0 + $0x14] ss:$36 sps:$4 sm:$0xff]  }
  0x12   :  { %v1621_v49 = vld [vmem:[%s2302_s1 + $0xc4] ss:$8 sps:$4 sm:$0xff]   ;;  %1023 = vmatprep.mubr.bf16.mxu1 %v1647_v48  ;;  %v1625_v52 = vld [vmem:[%s2302_s1 + $0xc0] ss:$8 sps:$4 sm:$0xff]   ;;  %v1627_v54 = vld [vmem:[%s2302_s1 + $0xd4] ss:$8 sps:$4 sm:$0xff]   ;;  %1125 = vmatprep.mubr.bf16.mxu0 %v1653_v51 }
  0x13   :  { %1000 = vmatpush1.bf16.msra.mxu1 %v1577_v18  ;;  %v1623_v50 = vld [vmem:[%s2302_s1 + $0x2c4] ss:$8 sps:$4 sm:$0xff]   ;;  %v1626_v53 = vld [vmem:[%s2302_s1 + $0x2c0] ss:$8 sps:$4 sm:$0xff]   ;;  %v1629_v55 = vld [vmem:[%s2302_s1 + $0x2d4] ss:$8 sps:$4 sm:$0xff]  }
  0x14   :  { %1102 = vmatpush1.bf16.msra.mxu0 %v1578_v19  ;;  %1001 = vmatprep.subr.bf16.mxu1 %v1579_v20  ;;  %v1631_v56 = vld [vmem:[%s2302_s1 + $0xd0] ss:$8 sps:$4 sm:$0xff]   ;;  %v1633_v58 = vld [vmem:[%s2302_s1 + $0xe4] ss:$8 sps:$4 sm:$0xff]   ;;  %v1637_v60 = vld [vmem:[%s2302_s1 + $0xe0] ss:$8 sps:$4 sm:$0xff]  }
  0x15   :  { %1103 = vmatprep.subr.bf16.mxu0 %v1581_v21  ;;  %v1632_v57 = vld [vmem:[%s2302_s1 + $0x2d0] ss:$8 sps:$4 sm:$0xff]   ;;  %v1635_v59 = vld [vmem:[%s2302_s1 + $0x2e4] ss:$8 sps:$4 sm:$0xff]   ;;  %v1638_v61 = vld [vmem:[%s2302_s1 + $0x2e0] ss:$8 sps:$4 sm:$0xff]  }
  0x16   :  { %v1639_v62 = vld [vmem:[%s2302_s1 + $0xf4] ss:$8 sps:$4 sm:$0xff]   ;;  %v1643_v0 = vld [vmem:[%s2302_s1 + $0xf0] ss:$8 sps:$4 sm:$0xff]   ;;  %v1650_v2 = vld [vmem:[%s2302_s1 + $0x104] ss:$8 sps:$4 sm:$0xff]  }
  0x17   :  { %1002 = vmatpush1.bf16.msra.mxu1 %v1583_v22  ;;  %v1641_v63 = vld [vmem:[%s2302_s1 + $0x2f4] ss:$8 sps:$4 sm:$0xff]   ;;  %v1644_v1 = vld [vmem:[%s2302_s1 + $0x2f0] ss:$8 sps:$4 sm:$0xff]   ;;  %v1656_v3 = vld [vmem:[%s2302_s1 + $0x304] ss:$8 sps:$4 sm:$0xff]  }
  0x18   :  { %1104 = vmatpush1.bf16.msra.mxu0 %v1584_v23  ;;  %1003 = vmatprep.subr.bf16.mxu1 %v1585_v24  ;;  %v1645_v4 = vld [vmem:[%s2303_s0] ss:$36 sps:$4 sm:$0xff]   ;;  %v1651_v6 = vld [vmem:[%s2303_s0 + $0x10] ss:$36 sps:$4 sm:$0xff]  }
  0x19   :  { %1105 = vmatprep.subr.bf16.mxu0 %v1587_v25  ;;  %v1648_v5 = vld [vmem:[%s2302_s1 + $0x100] ss:$8 sps:$4 sm:$0xff]   ;;  %v1659_v8 = vld [vmem:[%s2302_s1 + $0x114] ss:$8 sps:$4 sm:$0xff]   ;;  %v1657_v10 = vld [vmem:[%s2302_s1 + $0x110] ss:$8 sps:$4 sm:$0xff]  }
  0x1a   :  { %v1654_v7 = vld [vmem:[%s2302_s1 + $0x300] ss:$8 sps:$4 sm:$0xff]   ;;  %v1662_v9 = vld [vmem:[%s2302_s1 + $0x314] ss:$8 sps:$4 sm:$0xff]   ;;  %v1660_v11 = vld [vmem:[%s2302_s1 + $0x310] ss:$8 sps:$4 sm:$0xff]  }
  0x1b   :  { %1004 = vmatpush1.bf16.msra.mxu1 %v1589_v26  ;;  %v1665_v12 = vld [vmem:[%s2302_s1 + $0x124] ss:$8 sps:$4 sm:$0xff]   ;;  %v1663_v14 = vld [vmem:[%s2302_s1 + $0x120] ss:$8 sps:$4 sm:$0xff]   ;;  %v1671_v16 = vld [vmem:[%s2302_s1 + $0x134] ss:$8 sps:$4 sm:$0xff]  }
  0x1c   :  { %1106 = vmatpush1.bf16.msra.mxu0 %v1590_v27  ;;  %1005 = vmatprep.subr.bf16.mxu1 %v1591_v28  ;;  %v1668_v13 = vld [vmem:[%s2302_s1 + $0x324] ss:$8 sps:$4 sm:$0xff]   ;;  %v1666_v15 = vld [vmem:[%s2302_s1 + $0x320] ss:$8 sps:$4 sm:$0xff]   ;;  %v1674_v17 = vld [vmem:[%s2302_s1 + $0x334] ss:$8 sps:$4 sm:$0xff]  }
  0x1d   :  { %1107 = vmatprep.subr.bf16.mxu0 %v1593_v29  ;;  %v1669_v18 = vld [vmem:[%s2302_s1 + $0x130] ss:$8 sps:$4 sm:$0xff]   ;;  %v1677_v20 = vld [vmem:[%s2302_s1 + $0x144] ss:$8 sps:$4 sm:$0xff]   ;;  %v1675_v22 = vld [vmem:[%s2302_s1 + $0x140] ss:$8 sps:$4 sm:$0xff]  }
  0x1e   :  { %v1672_v19 = vld [vmem:[%s2302_s1 + $0x330] ss:$8 sps:$4 sm:$0xff]   ;;  %v1680_v21 = vld [vmem:[%s2302_s1 + $0x344] ss:$8 sps:$4 sm:$0xff]   ;;  %v1678_v23 = vld [vmem:[%s2302_s1 + $0x340] ss:$8 sps:$4 sm:$0xff]  }
  0x1f   :  { %1006 = vmatpush1.bf16.msra.mxu1 %v1595_v30  ;;  %v1683_v24 = vld [vmem:[%s2302_s1 + $0x154] ss:$8 sps:$4 sm:$0xff]   ;;  %v44_v26 = vld [vmem:[%s2303_s0 + $0x48] sm:$0xff]  ;;  %v1681_v30 = vld [vmem:[%s2302_s1 + $0x150] ss:$8 sps:$4 sm:$0xff]  }
  0x20   :  { %1108 = vmatpush1.bf16.msra.mxu0 %v1596_v31  ;;  %1007 = vmatprep.subr.bf16.mxu1 %v1597_v32  ;;  %v1686_v25 = vld [vmem:[%s2302_s1 + $0x354] ss:$8 sps:$4 sm:$0xff]   ;;  %v1346_v27 = vcombine.high %v44_v26, %v44_v26  ;;  %v1345_v29 = vcombine.low %v44_v26, %v44_v26  ;;  %v1684_v31 = vld [vmem:[%s2302_s1 + $0x350] ss:$8 sps:$4 sm:$0xff]  }
  0x21   :  { %1109 = vmatprep.subr.bf16.mxu0 %v1599_v33  ;;  %v46_v28 = vld [vmem:[%s2303_s0 + $0x58] sm:$0xff] }
  0x22   :  { %v1350_v32 = vcombine.high %v46_v28, %v46_v28  ;;  %v1349_v33 = vcombine.low %v46_v28, %v46_v28  ;;  %v1707_v48 = vld [vmem:[%s2302_s1 + $0x194] ss:$8 sps:$4 sm:$0xff]   ;;  %v1708_v51 = vld [vmem:[%s2302_s1 + $0x390] ss:$8 sps:$4 sm:$0xff]   ;;  %v1775_v28 = vld [vmem:[%s2302_s1 + $0x444] ss:$8 sps:$4 sm:$0xff]  }
  0x23   :  { %1008 = vmatpush1.bf16.msra.mxu1 %v1601_v34  ;;  %v1689_v34 = vld [vmem:[%s2302_s1 + $0x164] ss:$8 sps:$4 sm:$0xff]   ;;  %v1772_v26 = vld [vmem:[%s2302_s1 + $0x434] ss:$8 sps:$4 sm:$0xff]  }
  0x24   :  { %1110 = vmatpush1.bf16.msra.mxu0 %v1602_v35  ;;  %1009 = vmatprep.subr.bf16.mxu1 %v1603_v36  ;;  %v1692_v35 = vld [vmem:[%s2302_s1 + $0x364] ss:$8 sps:$4 sm:$0xff]   ;;  %v1687_v36 = vld [vmem:[%s2302_s1 + $0x160] ss:$8 sps:$4 sm:$0xff]  }
  0x25   :  { %1111 = vmatprep.subr.bf16.mxu0 %v1605_v37  ;;  %v1690_v37 = vld [vmem:[%s2302_s1 + $0x360] ss:$8 sps:$4 sm:$0xff]  }
  0x27   :  { %1010 = vmatpush1.bf16.msra.mxu1 %v1607_v38  ;;  %v1695_v38 = vld [vmem:[%s2302_s1 + $0x174] ss:$8 sps:$4 sm:$0xff]  }
  0x28   :  { %1112 = vmatpush1.bf16.msra.mxu0 %v1608_v39  ;;  %1011 = vmatprep.subr.bf16.mxu1 %v1609_v40  ;;  %v1698_v39 = vld [vmem:[%s2302_s1 + $0x374] ss:$8 sps:$4 sm:$0xff]   ;;  %v1753_v40 = vld [vmem:[%s2303_s0 + $0xc] ss:$36 sps:$4 sm:$0xff]  }
  0x29   :  { %1113 = vmatprep.subr.bf16.mxu0 %v1611_v41  ;;  %v1756_v41 = vld [vmem:[%s2303_s0 + $0x1c] ss:$36 sps:$4 sm:$0xff]  }
  0x2b   :  { %1012 = vmatpush1.bf16.msra.mxu1 %v1613_v42  ;;  %v1693_v42 = vld [vmem:[%s2302_s1 + $0x170] ss:$8 sps:$4 sm:$0xff]  }
  0x2c   :  { %1114 = vmatpush1.bf16.msra.mxu0 %v1614_v43  ;;  %1013 = vmatprep.subr.bf16.mxu1 %v1615_v44  ;;  %v1696_v43 = vld [vmem:[%s2302_s1 + $0x370] ss:$8 sps:$4 sm:$0xff]   ;;  %v1701_v44 = vld [vmem:[%s2302_s1 + $0x184] ss:$8 sps:$4 sm:$0xff]  }
  0x2d   :  { %1115 = vmatprep.subr.bf16.mxu0 %v1617_v45  ;;  %v1704_v45 = vld [vmem:[%s2302_s1 + $0x384] ss:$8 sps:$4 sm:$0xff]  }
  0x2f   :  { %1014 = vmatpush1.bf16.msra.mxu1 %v1619_v46  ;;  %v1699_v46 = vld [vmem:[%s2302_s1 + $0x180] ss:$8 sps:$4 sm:$0xff]  }
  0x30   :  { %1116 = vmatpush1.bf16.msra.mxu0 %v1620_v47  ;;  %1015 = vmatprep.subr.bf16.mxu1 %v1621_v49  ;;  %v1702_v47 = vld [vmem:[%s2302_s1 + $0x380] ss:$8 sps:$4 sm:$0xff]   ;;  %v1710_v49 = vld [vmem:[%s2302_s1 + $0x394] ss:$8 sps:$4 sm:$0xff]  }
  0x31   :  { %1117 = vmatprep.subr.bf16.mxu0 %v1623_v50  ;;  %v1705_v50 = vld [vmem:[%s2302_s1 + $0x190] ss:$8 sps:$4 sm:$0xff]  }
  0x33   :  { %1016 = vmatpush1.bf16.msra.mxu1 %v1625_v52  ;;  %v1713_v52 = vld [vmem:[%s2302_s1 + $0x1a4] ss:$8 sps:$4 sm:$0xff]  }
  0x34   :  { %1118 = vmatpush1.bf16.msra.mxu0 %v1626_v53  ;;  %1017 = vmatprep.subr.bf16.mxu1 %v1627_v54  ;;  %v1716_v53 = vld [vmem:[%s2302_s1 + $0x3a4] ss:$8 sps:$4 sm:$0xff]   ;;  %v1711_v54 = vld [vmem:[%s2302_s1 + $0x1a0] ss:$8 sps:$4 sm:$0xff]  }
  0x35   :  { %1119 = vmatprep.subr.bf16.mxu0 %v1629_v55  ;;  %v1714_v55 = vld [vmem:[%s2302_s1 + $0x3a0] ss:$8 sps:$4 sm:$0xff]  }
  0x37   :  { %1018 = vmatpush1.bf16.msra.mxu1 %v1631_v56  ;;  %v1719_v56 = vld [vmem:[%s2302_s1 + $0x1b4] ss:$8 sps:$4 sm:$0xff]  }
  0x38   :  { %1120 = vmatpush1.bf16.msra.mxu0 %v1632_v57  ;;  %1019 = vmatprep.subr.bf16.mxu1 %v1633_v58  ;;  %v1722_v57 = vld [vmem:[%s2302_s1 + $0x3b4] ss:$8 sps:$4 sm:$0xff]   ;;  %v1717_v58 = vld [vmem:[%s2302_s1 + $0x1b0] ss:$8 sps:$4 sm:$0xff]  }
  0x39   :  { %1121 = vmatprep.subr.bf16.mxu0 %v1635_v59  ;;  %v1720_v59 = vld [vmem:[%s2302_s1 + $0x3b0] ss:$8 sps:$4 sm:$0xff]  }
  0x3b   :  { %1020 = vmatpush1.bf16.msra.mxu1 %v1637_v60  ;;  %v1725_v60 = vld [vmem:[%s2302_s1 + $0x1c4] ss:$8 sps:$4 sm:$0xff]  }
  0x3c   :  { %1122 = vmatpush1.bf16.msra.mxu0 %v1638_v61  ;;  %1021 = vmatprep.subr.bf16.mxu1 %v1639_v62  ;;  %v1728_v61 = vld [vmem:[%s2302_s1 + $0x3c4] ss:$8 sps:$4 sm:$0xff]   ;;  %v1723_v62 = vld [vmem:[%s2302_s1 + $0x1c0] ss:$8 sps:$4 sm:$0xff]  }
  0x3d   :  { %1123 = vmatprep.subr.bf16.mxu0 %v1641_v63  ;;  %v1726_v63 = vld [vmem:[%s2302_s1 + $0x3c0] ss:$8 sps:$4 sm:$0xff]  }
  0x3f   :  { %1022 = vmatpush1.bf16.msra.mxu1 %v1643_v0  ;;  %v1731_v0 = vld [vmem:[%s2302_s1 + $0x1d4] ss:$8 sps:$4 sm:$0xff]  }
  0x40   :  { %1124 = vmatpush1.bf16.msra.mxu0 %v1644_v1  ;;  %1042 = vmatprep.subr.bf16.mxu1 %v1650_v2  ;;  %v1734_v1 = vld [vmem:[%s2302_s1 + $0x3d4] ss:$8 sps:$4 sm:$0xff]   ;;  %v1729_v2 = vld [vmem:[%s2302_s1 + $0x1d0] ss:$8 sps:$4 sm:$0xff]  }
  0x41   :  { %1144 = vmatprep.subr.bf16.mxu0 %v1656_v3  ;;  %v1732_v3 = vld [vmem:[%s2302_s1 + $0x3d0] ss:$8 sps:$4 sm:$0xff]  }
  0x42   :  { %1024 = vmatmul.mubr.bf16.vlgmr.msra.gmra.mrb[0].mxu1 %v1645_v4  ;;  %v1740_v4 = vld [vmem:[%s2302_s1 + $0x1e4] ss:$8 sps:$4 sm:$0xff]  }
  0x43   :  { %1126 = vmatmul.mubr.bf16.vlgmr.msra.gmra.mrb[0].mxu0 %v1651_v6  ;;  %1043 = vmatpush1.bf16.msra.mxu1 %v1648_v5  ;;  %v1744_v5 = vld [vmem:[%s2302_s1 + $0x3e4] ss:$8 sps:$4 sm:$0xff]   ;;  %v1738_v6 = vld [vmem:[%s2302_s1 + $0x1e0] ss:$8 sps:$4 sm:$0xff]  }
  0x44   :  { %1145 = vmatpush1.bf16.msra.mxu0 %v1654_v7  ;;  %1044 = vmatprep.subr.bf16.mxu1 %v1659_v8  ;;  %v1742_v7 = vld [vmem:[%s2302_s1 + $0x3e0] ss:$8 sps:$4 sm:$0xff]   ;;  %v1747_v8 = vld [vmem:[%s2302_s1 + $0x1f4] ss:$8 sps:$4 sm:$0xff]  }
  0x45   :  { %1146 = vmatprep.subr.bf16.mxu0 %v1662_v9  ;;  %1033 = vmatprep.mubr.bf16.mxu1 %v1346_v27  ;;  %v1750_v9 = vld [vmem:[%s2302_s1 + $0x3f4] ss:$8 sps:$4 sm:$0xff]   ;;  %v1770_v27 = vld [vmem:[%s2302_s1 + $0x430] ss:$8 sps:$4 sm:$0xff]  }
  0x46   :  { %1135 = vmatprep.mubr.bf16.mxu0 %v1350_v32  ;;  %v1776_v32 = vld [vmem:[%s2302_s1 + $0x450] ss:$8 sps:$4 sm:$0xff]  }
  0x47   :  { %1045 = vmatpush1.bf16.msra.mxu1 %v1657_v10  ;;  %v1745_v10 = vld [vmem:[%s2302_s1 + $0x1f0] ss:$8 sps:$4 sm:$0xff]  }
  0x48   :  { %1147 = vmatpush1.bf16.msra.mxu0 %v1660_v11  ;;  %1046 = vmatprep.subr.bf16.mxu1 %v1665_v12  ;;  %v1748_v11 = vld [vmem:[%s2302_s1 + $0x3f0] ss:$8 sps:$4 sm:$0xff]   ;;  %v1759_v12 = vld [vmem:[%s2302_s1 + $0x404] ss:$8 sps:$4 sm:$0xff]  }
  0x49   :  { %1148 = vmatprep.subr.bf16.mxu0 %v1668_v13  ;;  %v1751_v13 = vld [vmem:[%s2303_s0 + $0x8] ss:$36 sps:$4 sm:$0xff]  }
  0x4a   :  { %1034 = vmatmul.mubr.bf16.gmra.mrb[4].mxu1 %v1345_v29  ;;  %v1787_v29 = vmov 0  }
  0x4b   :  { %1047 = vmatpush1.bf16.msra.mxu1 %v1663_v14  ;;  %1136 = vmatmul.mubr.bf16.gmra.mrb[4].mxu0 %v1349_v33  ;;  %v1754_v14 = vld [vmem:[%s2303_s0 + $0x18] ss:$36 sps:$4 sm:$0xff]   ;;  %v1781_v33 = vld [vmem:[%s2302_s1 + $0x464] ss:$8 sps:$4 sm:$0xff]  }
  0x4c   :  { %1149 = vmatpush1.bf16.msra.mxu0 %v1666_v15  ;;  %1048 = vmatprep.subr.bf16.mxu1 %v1671_v16  ;;  %v45_v15 = vld [vmem:[%s2303_s0 + $0x50] sm:$0xff]  ;;  %v47_v16 = vld [vmem:[%s2303_s0 + $0x60] sm:$0xff] }
  0x4d   :  { %1150 = vmatprep.subr.bf16.mxu0 %v1674_v17  ;;  %1074 = vmatprep.mubr.bf16.mxu1 %v1753_v40  ;;  %v1757_v17 = vld [vmem:[%s2302_s1 + $0x400] ss:$8 sps:$4 sm:$0xff]  }
  0x4e   :  { %1176 = vmatprep.mubr.bf16.mxu0 %v1756_v41 }
  0x4f   :  { %1049 = vmatpush1.bf16.msra.mxu1 %v1669_v18  ;;  %v1762_v18 = vld [vmem:[%s2302_s1 + $0x414] ss:$8 sps:$4 sm:$0xff]  }
  0x50   :  { %1151 = vmatpush1.bf16.msra.mxu0 %v1672_v19  ;;  %1050 = vmatprep.subr.bf16.mxu1 %v1677_v20  ;;  %v1348_v19 = vcombine.high %v45_v15, %v45_v15  ;;  %v1352_v20 = vcombine.high %v47_v16, %v47_v16 }
  0x51   :  { %1152 = vmatprep.subr.bf16.mxu0 %v1680_v21  ;;  %v1760_v21 = vld [vmem:[%s2302_s1 + $0x410] ss:$8 sps:$4 sm:$0xff]  }
  0x53   :  { %1051 = vmatpush1.bf16.msra.mxu1 %v1675_v22  ;;  %v1769_v22 = vld [vmem:[%s2302_s1 + $0x424] ss:$8 sps:$4 sm:$0xff]  }
  0x54   :  { %1153 = vmatpush1.bf16.msra.mxu0 %v1678_v23  ;;  %1052 = vmatprep.subr.bf16.mxu1 %v1683_v24  ;;  %v1347_v23 = vcombine.low %v45_v15, %v45_v15  ;;  %v1351_v24 = vcombine.low %v47_v16, %v47_v16 }
  0x55   :  { %1154 = vmatprep.subr.bf16.mxu0 %v1686_v25  ;;  %v1767_v25 = vld [vmem:[%s2302_s1 + $0x420] ss:$8 sps:$4 sm:$0xff]  }
  0x57   :  { %1053 = vmatpush1.bf16.msra.mxu1 %v1681_v30  ;;  %v1773_v30 = vld [vmem:[%s2302_s1 + $0x440] ss:$8 sps:$4 sm:$0xff]  }
  0x58   :  { %1155 = vmatpush1.bf16.msra.mxu0 %v1684_v31  ;;  %1054 = vmatprep.subr.bf16.mxu1 %v1689_v34  ;;  %v1778_v31 = vld [vmem:[%s2302_s1 + $0x454] ss:$8 sps:$4 sm:$0xff]   ;;  %v1779_v34 = vld [vmem:[%s2302_s1 + $0x460] ss:$8 sps:$4 sm:$0xff]  }
  0x59   :  { %1156 = vmatprep.subr.bf16.mxu0 %v1692_v35  ;;  %v1784_v35 = vld [vmem:[%s2302_s1 + $0x474] ss:$8 sps:$4 sm:$0xff]  }
  0x5b   :  { %1055 = vmatpush1.bf16.msra.mxu1 %v1687_v36  ;;  %v1782_v36 = vld [vmem:[%s2302_s1 + $0x470] ss:$8 sps:$4 sm:$0xff]  }
  0x5c   :  { %1157 = vmatpush1.bf16.msra.mxu0 %v1690_v37  ;;  %1056 = vmatprep.subr.bf16.mxu1 %v1695_v38  ;;  %v1785_v37 = vld [vmem:[%s2303_s0 + $0x20] ss:$36 sps:$4 sm:$0xff]   ;;  %v1786_v38 = vld [vmem:[%s2303_s0 + $0x68] ss:$0 sps:$4 sm:$0xff]  }
  0x5d   :  { %1158 = vmatprep.subr.bf16.mxu0 %v1698_v39 }
  0x5f   :  { %1057 = vmatpush1.bf16.msra.mxu1 %v1693_v42 }
  0x60   :  { %1159 = vmatpush1.bf16.msra.mxu0 %v1696_v43  ;;  %1058 = vmatprep.subr.bf16.mxu1 %v1701_v44 }
  0x61   :  { %1160 = vmatprep.subr.bf16.mxu0 %v1704_v45 }
  0x63   :  { %1059 = vmatpush1.bf16.msra.mxu1 %v1699_v46 }
  0x64   :  { %1161 = vmatpush1.bf16.msra.mxu0 %v1702_v47  ;;  %1060 = vmatprep.subr.bf16.mxu1 %v1707_v48 }
  0x65   :  { %1162 = vmatprep.subr.bf16.mxu0 %v1710_v49 }
  0x67   :  { %1061 = vmatpush1.bf16.msra.mxu1 %v1705_v50 }
  0x68   :  { %1163 = vmatpush1.bf16.msra.mxu0 %v1708_v51  ;;  %1062 = vmatprep.subr.bf16.mxu1 %v1713_v52 }
  0x69   :  { %1164 = vmatprep.subr.bf16.mxu0 %v1716_v53  ;;  %v1269_v53 = vlaneseq }
  0x6b   :  { %1063 = vmatpush1.bf16.msra.mxu1 %v1711_v54  ;;  %v1270_v54 = vshrl.u32 %v1269_v53, 7 }
  0x6c   :  { %1165 = vmatpush1.bf16.msra.mxu0 %v1714_v55  ;;  %1064 = vmatprep.subr.bf16.mxu1 %v1719_v56  ;;  %v1267_v56 = vld [vmem:[%s2304_s2] sm:$0x3] }
  0x6d   :  { %1166 = vmatprep.subr.bf16.mxu0 %v1722_v57  ;;  %v1271_v55 = vsub.s32 0, %v1270_v54  ;;  %v1275_v57 = vsub.s32 1, %v1270_v54 }
  0x6f   :  { %1065 = vmatpush1.bf16.msra.mxu1 %v1717_v58  ;;  %v1285_v58 = vld [vmem:[%s2305_s3] sm:$0x3] }
  0x70   :  { %1167 = vmatpush1.bf16.msra.mxu0 %v1720_v59  ;;  %1066 = vmatprep.subr.bf16.mxu1 %v1725_v60  ;;  %v1272_v59 = vrot.slane %v1267_v56, %v1271_v55 }
  0x71   :  { %1168 = vmatprep.subr.bf16.mxu0 %v1728_v61 }
  0x73   :  { %1067 = vmatpush1.bf16.msra.mxu1 %v1723_v62  ;;  %v1276_v62 = vrot.slane %v1267_v56, %v1275_v57 }
  0x74   :  { %1169 = vmatpush1.bf16.msra.mxu0 %v1726_v63  ;;  %1068 = vmatprep.subr.bf16.mxu1 %v1731_v0  ;;  %v1290_v0 = vrot.slane %v1285_v58, %v1271_v55 }
  0x75   :  { %1170 = vmatprep.subr.bf16.mxu0 %v1734_v1 }
  0x77   :  { %1069 = vmatpush1.bf16.msra.mxu1 %v1729_v2 }
  0x78   :  { %1171 = vmatpush1.bf16.msra.mxu0 %v1732_v3  ;;  %1070 = vmatprep.subr.bf16.mxu1 %v1740_v4 }
  0x79   :  { %1172 = vmatprep.subr.bf16.mxu0 %v1744_v5  ;;  %v1294_v5 = vrot.slane %v1285_v58, %v1275_v57 }
  0x7b   :  { %1071 = vmatpush1.bf16.msra.mxu1 %v1738_v6 }
  0x7c   :  { %1173 = vmatpush1.bf16.msra.mxu0 %v1742_v7  ;;  %1072 = vmatprep.subr.bf16.mxu1 %v1747_v8 }
  0x7d   :  { %1174 = vmatprep.subr.bf16.mxu0 %v1750_v9 }
  0x7f   :  { %1073 = vmatpush1.bf16.msra.mxu1 %v1745_v10 }
  0x80   :  { %1175 = vmatpush1.bf16.msra.mxu0 %v1748_v11  ;;  %1504 = vmatprep.subr.bf16.mxu1 %v1759_v12 }
  0x81   :  { %1195 = vmatprep.subr.bf16.mxu0 %v1759_v12 }
  0x82   :  { %1075 = vmatmul.mubr.bf16.vlgmr.msra.gmra.mrb[0].mxu1 %v1751_v13 }
  0x83   :  { %1177 = vmatmul.mubr.bf16.vlgmr.msra.gmra.mrb[0].mxu0 %v1754_v14  ;;  %1512 = vmatpush1.bf16.msra.mxu1 %v1757_v17 }
  0x84   :  { %1196 = vmatpush1.bf16.msra.mxu0 %v1757_v17  ;;  %1505 = vmatprep.subr.bf16.mxu1 %v1762_v18 }
  0x85   :  { %1197 = vmatprep.subr.bf16.mxu0 %v1762_v18  ;;  %1084 = vmatprep.mubr.bf16.mxu1 %v1348_v19 }
  0x86   :  { %1186 = vmatprep.mubr.bf16.mxu0 %v1352_v20 }
  0x87   :  { %1513 = vmatpush1.bf16.msra.mxu1 %v1760_v21 }
  0x88   :  { %1198 = vmatpush1.bf16.msra.mxu0 %v1760_v21  ;;  %1506 = vmatprep.subr.bf16.mxu1 %v1769_v22 }
  0x89   :  { %1199 = vmatprep.subr.bf16.mxu0 %v1769_v22 }
  0x8a   :  { %1085 = vmatmul.mubr.bf16.gmra.mrb[4].mxu1 %v1347_v23 }
  0x8b   :  { %1187 = vmatmul.mubr.bf16.gmra.mrb[4].mxu0 %v1351_v24  ;;  %1514 = vmatpush1.bf16.msra.mxu1 %v1767_v25 }
  0x8c   :  { %1200 = vmatpush1.bf16.msra.mxu0 %v1767_v25  ;;  %1507 = vmatprep.subr.bf16.mxu1 %v1772_v26 }
  0x8d   :  { %1201 = vmatprep.subr.bf16.mxu0 %v1772_v26  ;;  %1227 = vmatprep.mubr.bf16.mxu0 %v1787_v29 }
  0x8e   :  { %1237 = vmatprep.mubr.bf16.mxu1 %v1787_v29 }
  0x8f   :  { %1515 = vmatpush1.bf16.msra.mxu1 %v1770_v27 }
  0x90   :  { %1202 = vmatpush1.bf16.msra.mxu0 %v1770_v27  ;;  %1508 = vmatprep.subr.bf16.mxu1 %v1775_v28 }
  0x91   :  { %1203 = vmatprep.subr.bf16.mxu0 %v1775_v28 }
  0x93   :  { %1516 = vmatpush1.bf16.msra.mxu1 %v1773_v30 }
  0x94   :  { %1204 = vmatpush1.bf16.msra.mxu0 %v1773_v30  ;;  %1509 = vmatprep.subr.bf16.mxu1 %v1778_v31 }
  0x95   :  { %1205 = vmatprep.subr.bf16.mxu0 %v1778_v31 }
  0x97   :  { %1517 = vmatpush1.bf16.msra.mxu1 %v1776_v32 }
  0x98   :  { %1206 = vmatpush1.bf16.msra.mxu0 %v1776_v32  ;;  %1510 = vmatprep.subr.bf16.mxu1 %v1781_v33 }
  0x99   :  { %1207 = vmatprep.subr.bf16.mxu0 %v1781_v33 }
  0x9b   :  { %1518 = vmatpush1.bf16.msra.mxu1 %v1779_v34 }
  0x9c   :  { %1208 = vmatpush1.bf16.msra.mxu0 %v1779_v34  ;;  %1511 = vmatprep.subr.bf16.mxu1 %v1784_v35 }
  0x9d   :  { %1209 = vmatprep.subr.bf16.mxu0 %v1784_v35 }
  0x9f   :  { %1519 = vmatpush1.bf16.msra.mxu1 %v1782_v36 }
  0xa0   :  { %1210 = vmatpush1.bf16.msra.mxu0 %v1782_v36 }
  0xa2   :  { %1238 = vmatmul.mubr.bf16.vlgmr.msra.gmra.mrb[8].mxu1 %v1786_v38 }
  0xa3   :  { %1228 = vmatmul.mubr.bf16.vlgmr.msra.gmra.mrb[0].mxu0 %v1785_v37 }
 0x155   :  { %v1076_v39 = vpop.f32.mrb[0].mxu1 }
 0x156   :  { %v1078_v40 = vpop.f32.mrb[1].mxu1 }
 0x157   :  { %v1080_v41 = vpop.f32.mrb[2].mxu1 }
 0x158   :  { %v1082_v42 = vpop.f32.mrb[3].mxu1 }
 0x15d   :  { %v1086_v43 = vpop.f32.mrb[4].mxu1 }
 0x15e   :  { %v1188_v44 = vpop.f32.mrb[4].mxu0  ;;  %v1088_v46 = vpop.f32.mrb[5].mxu1 }
 0x15f   :  { %v1524_v45 = vadd.f32 %v1188_v44, %v1086_v43  ;;  %v1190_v47 = vpop.f32.mrb[5].mxu0  ;;  %v1090_v49 = vpop.f32.mrb[6].mxu1 }
 0x160   :  { %v1526_v48 = vadd.f32 %v1190_v47, %v1088_v46  ;;  %v1192_v50 = vpop.f32.mrb[6].mxu0  ;;  %v1091_v51 = vpop.f32.mrb[7].mxu1 }
 0x161   :  { %v1193_v52 = vpop.f32.mrb[7].mxu0 }
 0x175   :  { %v1239_v61 = vpop.f32.mrb[8].mxu1 }
 0x176   :  { %v1229_v60 = vpop.f32.mrb[0].mxu0  ;;  %v1525_v1 = vadd.f32 %v1524_v45, %v1239_v61  ;;  %v1241_v3 = vpop.f32.mrb[9].mxu1 }
 0x177   :  { %v1520_v63 = vadd.f32 %v1229_v60, %v1076_v39  ;;  %v1231_v2 = vpop.f32.mrb[1].mxu0  ;;  %v1527_v6 = vadd.f32 %v1526_v48, %v1241_v3  ;;  %v1243_v8 = vpop.f32.mrb[10].mxu1 }
 0x178   :  { %v1521_v4 = vadd.f32 %v1231_v2, %v1078_v40  ;;  %v1233_v7 = vpop.f32.mrb[2].mxu0  ;;  %v1283_v10 = vmul.f32 %v1525_v1, %v1272_v59  ;;  %v1244_v13 = vpop.f32.mrb[11].mxu1 }
 0x179   :  { %v1279_v9 = vmul.f32 %v1520_v63, %v1272_v59  ;;  %v1522_v11 = vadd.f32 %v1233_v7, %v1080_v41  ;;  %v1235_v12 = vpop.f32.mrb[3].mxu0  ;;  %v1284_v15 = vmul.f32 %v1527_v6, %v1276_v62 }
 0x17a   :  { %v1280_v14 = vmul.f32 %v1521_v4, %v1276_v62  ;;  %v1523_v16 = vadd.f32 %v1235_v12, %v1082_v42  ;;  %v1301_v18 = vadd.f32 %v1290_v0, %v1283_v10 }
 0x17b   :  { %v1297_v17 = vadd.f32 %v1290_v0, %v1279_v9  ;;  %v1281_v19 = vmul.f32 %v1522_v11, %v1272_v59  ;;  %v1302_v21 = vadd.f32 %v1294_v5, %v1284_v15 }
 0x17c   :  { %v1298_v20 = vadd.f32 %v1294_v5, %v1280_v14  ;;  %v1282_v22 = vmul.f32 %v1523_v16, %v1276_v62  ;;  %v1307_v24 = vmax.f32 %v1301_v18, 0.0 }
 0x17d   :  { %v1303_v23 = vmax.f32 %v1297_v17, 0.0  ;;  %v1299_v25 = vadd.f32 %v1290_v0, %v1281_v19  ;;  %v1308_v27 = vmax.f32 %v1302_v21, 0.0 }
 0x17e   :  { %v1304_v26 = vmax.f32 %v1298_v20, 0.0  ;;  %v1300_v28 = vadd.f32 %v1294_v5, %v1282_v22 }
 0x17f   :  { %v1305_v29 = vmax.f32 %v1299_v25, 0.0  ;;  %v1503_v31 = vpack.c.bf16 %v1308_v27, %v1307_v24 }
 0x180   :  { %v1501_v30 = vpack.c.bf16 %v1304_v26, %v1303_v23  ;;  %v1306_v32 = vmax.f32 %v1300_v28, 0.0 }
 0x181   :  { %1331 = vst [vmem:[%s2306_s4 + $0x10] sm:$0xff] %v1503_v31 }
 0x182   :  { %1329 = vst [vmem:[%s2306_s4] sm:$0xff] %v1501_v30  ;;  %v1502_v33 = vpack.c.bf16 %v1306_v32, %v1305_v29 }
 0x184   :  { %1330 = vst [vmem:[%s2306_s4 + $0x8] sm:$0xff] %v1502_v33 }

// kernel: resnet18_forward.19
= control target key start
LH: loop header
LB: loop body
LE: loop exit
PB: predicated region body
PF: predicated region fallthrough
CT: control target
= control target key end

     0   :  { %s2511_s18 = smov 0   ;;  %s2513_s19 = smov 0   ;;  %s2764_s0 = inlined_call_operand.vmem [shape: bf16[24,2304], index: 0, kind: input, shape index: {}]   ;;  %s2765_s1 = inlined_call_operand.vmem [shape: bf16[2304,256], index: 1, kind: input, shape index: {}]   ;;  %s2766_s2 = inlined_call_operand.vmem [shape: f32[1,256], index: 2, kind: input, shape index: {}]   ;;  %s2767_s3 = inlined_call_operand.vmem [shape: f32[1,256], index: 3, kind: input, shape index: {}]   ;;  %s2768_s4 = inlined_call_operand.vmem [shape: bf16[24,256], index: 4, kind: input, shape index: {}]   ;;  %s2769_s5 = inlined_call_operand.vmem [shape: bf16[24,256], index: 5, kind: output, shape index: {}]  }
   0x1   :  { %s2515_s20 = smov 0   ;;  %s2517_s21 = smov 0  }
   0x2   :  { %s2519_s22 = smov 0  }
   0x3 LB: > { %s27_s23 = sadd.s32 1, %s2473_s21  ;;  %p50_p1 = scmp.ne.s32.totalorder %s2465_s19, %s2461_s18  ;;  %s2477_s22 = sphi %s2519_s22, %s15_s22   ;;  %s2473_s21 = sphi %s2517_s21, %s2773_s21   ;;  %s2469_s20 = sphi %s2515_s20, %s2772_s20   ;;  %s2465_s19 = sphi %s2513_s19, %s2771_s19   ;;  %s2461_s18 = sphi %s2511_s18, %s2770_s18  }
   0x4   : > { %p28_p0 = scmp.ge.s32.totalorder %s27_s23, 2  ;;  %p51_p2 = scmp.eq.s32.totalorder %s2477_s22, 0 }
   0x5   : > { %s43_s25 = sadd.s32 1, %s2465_s19  ;;  %p1938_p5 = scmp.ge.s32.totalorder %s2477_s22, 2 }
   0x6   : > { %s2775_s23 = smov (%p28_p0, %s27_s23), 0  ;;  %p52_p3 = por %p51_p2, %p50_p1 }
   0x7   : > { %s39_s24 = ssub.s32 %s2473_s21, %s2775_s23  ;;  %243 = sbr.rel (%p1938_p5) target bundleno = 27 (0x1b), region = 28 }
   0x8   : > { %p41_p4 = scmp.eq.s32.totalorder %s39_s24, 0 }
   0xa   : > { %s2546_s26 = scalar_select %p41_p4, %s2465_s19, %s43_s25  }
   0xe   : > { %246 = sbr.rel (!%p52_p3) target bundleno = 27 (0x1b), region = 32  ;;  %s248_s27 = sand.u32 (%p52_p3), 1, %s2465_s19  }
   0xf   : > { %s2120_s28 = smul.u32 (%p52_p3), 36, %s2473_s21 }
  0x10   : > { %s2157_s29 = smul.u32 (%p52_p3), 108, %s248_s27 }
  0x11   : > { %s256_s7 = scalar_lea.vmem (%p52_p3), %s2764_s0, %s2120_s28 }
  0x12   : > { %v271_v0 = vld [vmem:[%s256_s7] sm:$0xff] (%p52_p3)  ;;  %v273_v1 = vld [vmem:[%s256_s7 + $0x8] sm:$0xff] (%p52_p3)  ;;  %v275_v2 = vld [vmem:[%s256_s7 + $0x10] sm:$0xff] (%p52_p3)  ;;  %s250_s8 = scalar_lea.vmem (%p52_p3), [#allocation3], %s2157_s29 }
  0x13   : > { %272 = vst [vmem:[%s250_s8] sm:$0xff] (%p52_p3), %v271_v0  ;;  %274 = vst [vmem:[%s250_s8 + $0x8] sm:$0xff] (%p52_p3), %v273_v1  ;;  %v277_v3 = vld [vmem:[%s256_s7 + $0x18] sm:$0xff] (%p52_p3)  ;;  %v279_v4 = vld [vmem:[%s256_s7 + $0x48] sm:$0xff] (%p52_p3) }
  0x14   : > { %276 = vst [vmem:[%s250_s8 + $0x10] sm:$0xff] (%p52_p3), %v275_v2  ;;  %v281_v5 = vld [vmem:[%s256_s7 + $0x50] sm:$0xff] (%p52_p3)  ;;  %278 = vst [vmem:[%s250_s8 + $0x18] sm:$0xff] (%p52_p3), %v277_v3  ;;  %v283_v6 = vld [vmem:[%s256_s7 + $0x58] sm:$0xff] (%p52_p3) }
  0x15   : > { %280 = vst [vmem:[%s250_s8 + $0x24] sm:$0xff] %v279_v4  ;;  %282 = vst [vmem:[%s250_s8 + $0x2c] sm:$0xff] %v281_v5  ;;  %v285_v7 = vld [vmem:[%s256_s7 + $0x60] sm:$0xff]  ;;  %v287_v8 = vld [vmem:[%s256_s7 + $0x90] sm:$0xff] }
  0x16   : > { %284 = vst [vmem:[%s250_s8 + $0x34] sm:$0xff] %v283_v6  ;;  %286 = vst [vmem:[%s250_s8 + $0x3c] sm:$0xff] %v285_v7  ;;  %v289_v9 = vld [vmem:[%s256_s7 + $0x98] sm:$0xff]  ;;  %v291_v10 = vld [vmem:[%s256_s7 + $0xa0] sm:$0xff] }
  0x17   : > { %288 = vst [vmem:[%s250_s8 + $0x48] sm:$0xff] %v287_v8  ;;  %v293_v11 = vld [vmem:[%s256_s7 + $0xa8] sm:$0xff]  ;;  %290 = vst [vmem:[%s250_s8 + $0x50] sm:$0xff] %v289_v9  ;;  %v1940_v12 = vld [vmem:[%s256_s7 + $0x20] sm:$0xf] }
  0x18   : > { %292 = vst [vmem:[%s250_s8 + $0x58] sm:$0xff] %v291_v10  ;;  %294 = vst [vmem:[%s250_s8 + $0x60] sm:$0xff] %v293_v11  ;;  %v1942_v13 = vld [vmem:[%s256_s7 + $0x68] sm:$0xf]  ;;  %v1944_v14 = vld [vmem:[%s256_s7 + $0xb0] sm:$0xf] }
  0x19   : > { %1941 = vst [vmem:[%s250_s8 + $0x20] sm:$0xf] %v1940_v12  ;;  %1943 = vst [vmem:[%s250_s8 + $0x44] sm:$0xf] %v1942_v13 }
  0x1a   : > { %1945 = vst [vmem:[%s250_s8 + $0x68] sm:$0xf] %v1944_v14 }
  0x1b PF: > { %p1946_p6 = scmp.ge.s32.totalorder %s2477_s22, 1  ;;  %p327_p7 = scmp.lt.s32.totalorder %s2477_s22, 3 }
  0x1d   : > { %p328_p8 = pnand %p1946_p6, %p327_p7 }
  0x1e   : > { %s334_s9 = sand.u32 (!%p328_p8), 1, %s2461_s18   ;;  %s396_s10 = smul.u32 (!%p328_p8), 144, %s2469_s20 }
  0x1f   : > { %331 = sbr.rel (%p328_p8) target bundleno = 445 (0x1bd), region = 62  ;;  %p1949_p10 = scmp.ne.s32.totalorder (!%p328_p8), %s2469_s20, 0 }
  0x20   : > { %s2158_s11 = smul.u32 (!%p328_p8), 108, %s334_s9  ;;  %p398_p9 = scmp.lt.s32.totalorder (!%p328_p8), %s396_s10, 287 }
  0x22   : > { %s2563_s16 = scalar_lea.vmem (!%p328_p8), [#allocation3], %s2158_s11 }
  0x26   : > { %s2777_s10 = smov (!%p398_p9, %s396_s10), 287  ;;  %446 = sbr.rel (%p1949_p10) target bundleno = 45 (0x2d), region = 70 }
  0x27   : > { %s2121_s12 = sshll.u32 %s2777_s10, 3  ;;  %v2479_v15 = vmov (!%p1949_p10), 0.0  }
  0x28   : > { %s2561_s15 = scalar_lea.vmem %s2765_s1, %s2121_s12  ;;  %447 = vst [vmem:[#allocation2] sm:$0xff] (!%p1949_p10), %v2479_v15  ;;  %448 = vst [vmem:[#allocation2 + $0x8] sm:$0xff] (!%p1949_p10), %v2479_v15 }
  0x29   : > { %449 = vst [vmem:[#allocation2 + $0x10] sm:$0xff] (!%p1949_p10), %v2479_v15  ;;  %450 = vst [vmem:[#allocation2 + $0x18] sm:$0xff] (!%p1949_p10), %v2479_v15 }
  0x2a   : > { %451 = vst [vmem:[#allocation2 + $0x20] sm:$0xff] (!%p1949_p10), %v2479_v15  ;;  %452 = vst [vmem:[#allocation2 + $0x28] sm:$0xff] (!%p1949_p10), %v2479_v15 }
  0x2d PF: > { %v2201_v16 = vld [vmem:[%s2561_s15 + $0x4] ss:$8 sps:$4 sm:$0xff]   ;;  %v2205_v18 = vld [vmem:[%s2561_s15] ss:$8 sps:$4 sm:$0xff]   ;;  %v2207_v20 = vld [vmem:[%s2561_s15 + $0x14] ss:$8 sps:$4 sm:$0xff]  }
  0x2e   : > { %v2203_v17 = vld [vmem:[%s2561_s15 + $0x204] ss:$8 sps:$4 sm:$0xff]   ;;  %1416 = vmatprep.subr.bf16.mxu1 %v2201_v16  ;;  %v2206_v19 = vld [vmem:[%s2561_s15 + $0x200] ss:$8 sps:$4 sm:$0xff]   ;;  %v2209_v21 = vld [vmem:[%s2561_s15 + $0x214] ss:$8 sps:$4 sm:$0xff]  }
  0x2f   : > { %1518 = vmatprep.subr.bf16.mxu0 %v2203_v17  ;;  %1417 = vmatpush1.bf16.msra.mxu1 %v2205_v18  ;;  %v2211_v22 = vld [vmem:[%s2561_s15 + $0x10] ss:$8 sps:$4 sm:$0xff]   ;;  %v2213_v24 = vld [vmem:[%s2561_s15 + $0x24] ss:$8 sps:$4 sm:$0xff]   ;;  %v2217_v26 = vld [vmem:[%s2561_s15 + $0x20] ss:$8 sps:$4 sm:$0xff]  }
  0x30   : > { %1519 = vmatpush1.bf16.msra.mxu0 %v2206_v19  ;;  %1418 = vmatprep.subr.bf16.mxu1 %v2207_v20  ;;  %v2212_v23 = vld [vmem:[%s2561_s15 + $0x210] ss:$8 sps:$4 sm:$0xff]   ;;  %v2215_v25 = vld [vmem:[%s2561_s15 + $0x224] ss:$8 sps:$4 sm:$0xff]   ;;  %v2218_v27 = vld [vmem:[%s2561_s15 + $0x220] ss:$8 sps:$4 sm:$0xff]  }
  0x31   : > { %1520 = vmatprep.subr.bf16.mxu0 %v2209_v21  ;;  %v2219_v28 = vld [vmem:[%s2561_s15 + $0x34] ss:$8 sps:$4 sm:$0xff]   ;;  %v2223_v30 = vld [vmem:[%s2561_s15 + $0x30] ss:$8 sps:$4 sm:$0xff]   ;;  %v2225_v32 = vld [vmem:[%s2561_s15 + $0x44] ss:$8 sps:$4 sm:$0xff]  }
  0x32   : > { %v2221_v29 = vld [vmem:[%s2561_s15 + $0x234] ss:$8 sps:$4 sm:$0xff]   ;;  %v2224_v31 = vld [vmem:[%s2561_s15 + $0x230] ss:$8 sps:$4 sm:$0xff]   ;;  %v2227_v33 = vld [vmem:[%s2561_s15 + $0x244] ss:$8 sps:$4 sm:$0xff]  }
  0x33   : > { %1419 = vmatpush1.bf16.msra.mxu1 %v2211_v22  ;;  %v2229_v34 = vld [vmem:[%s2561_s15 + $0x40] ss:$8 sps:$4 sm:$0xff]   ;;  %v2231_v36 = vld [vmem:[%s2561_s15 + $0x54] ss:$8 sps:$4 sm:$0xff]   ;;  %v2235_v38 = vld [vmem:[%s2561_s15 + $0x50] ss:$8 sps:$4 sm:$0xff]  }
  0x34   : > { %1521 = vmatpush1.bf16.msra.mxu0 %v2212_v23  ;;  %1420 = vmatprep.subr.bf16.mxu1 %v2213_v24  ;;  %v2230_v35 = vld [vmem:[%s2561_s15 + $0x240] ss:$8 sps:$4 sm:$0xff]   ;;  %v2233_v37 = vld [vmem:[%s2561_s15 + $0x254] ss:$8 sps:$4 sm:$0xff]   ;;  %v2236_v39 = vld [vmem:[%s2561_s15 + $0x250] ss:$8 sps:$4 sm:$0xff]  }
  0x35   : > { %1522 = vmatprep.subr.bf16.mxu0 %v2215_v25  ;;  %v2237_v40 = vld [vmem:[%s2561_s15 + $0x64] ss:$8 sps:$4 sm:$0xff]   ;;  %v2241_v42 = vld [vmem:[%s2561_s15 + $0x60] ss:$8 sps:$4 sm:$0xff]   ;;  %v2243_v44 = vld [vmem:[%s2561_s15 + $0x74] ss:$8 sps:$4 sm:$0xff]  }
  0x36   : > { %v2239_v41 = vld [vmem:[%s2561_s15 + $0x264] ss:$8 sps:$4 sm:$0xff]   ;;  %v2242_v43 = vld [vmem:[%s2561_s15 + $0x260] ss:$8 sps:$4 sm:$0xff]   ;;  %v2245_v45 = vld [vmem:[%s2561_s15 + $0x274] ss:$8 sps:$4 sm:$0xff]  }
  0x37   : > { %1421 = vmatpush1.bf16.msra.mxu1 %v2217_v26  ;;  %v2247_v46 = vld [vmem:[%s2561_s15 + $0x70] ss:$8 sps:$4 sm:$0xff]   ;;  %v2249_v48 = vld [vmem:[%s2561_s15 + $0x84] ss:$8 sps:$4 sm:$0xff]   ;;  %v2253_v50 = vld [vmem:[%s2561_s15 + $0x80] ss:$8 sps:$4 sm:$0xff]  }
  0x38   : > { %1523 = vmatpush1.bf16.msra.mxu0 %v2218_v27  ;;  %1422 = vmatprep.subr.bf16.mxu1 %v2219_v28  ;;  %v2248_v47 = vld [vmem:[%s2561_s15 + $0x270] ss:$8 sps:$4 sm:$0xff]   ;;  %v2251_v49 = vld [vmem:[%s2561_s15 + $0x284] ss:$8 sps:$4 sm:$0xff]   ;;  %v2254_v51 = vld [vmem:[%s2561_s15 + $0x280] ss:$8 sps:$4 sm:$0xff]  }
  0x39   : > { %1524 = vmatprep.subr.bf16.mxu0 %v2221_v29  ;;  %v2255_v52 = vld [vmem:[%s2561_s15 + $0x94] ss:$8 sps:$4 sm:$0xff]   ;;  %v2259_v54 = vld [vmem:[%s2561_s15 + $0x90] ss:$8 sps:$4 sm:$0xff]   ;;  %v2261_v56 = vld [vmem:[%s2561_s15 + $0xa4] ss:$8 sps:$4 sm:$0xff]  }
  0x3a   : > { %v2257_v53 = vld [vmem:[%s2561_s15 + $0x294] ss:$8 sps:$4 sm:$0xff]   ;;  %v2260_v55 = vld [vmem:[%s2561_s15 + $0x290] ss:$8 sps:$4 sm:$0xff]   ;;  %v2263_v57 = vld [vmem:[%s2561_s15 + $0x2a4] ss:$8 sps:$4 sm:$0xff]  }
  0x3b   : > { %1423 = vmatpush1.bf16.msra.mxu1 %v2223_v30  ;;  %v2265_v58 = vld [vmem:[%s2561_s15 + $0xa0] ss:$8 sps:$4 sm:$0xff]   ;;  %v2267_v60 = vld [vmem:[%s2561_s15 + $0xb4] ss:$8 sps:$4 sm:$0xff]   ;;  %v2271_v62 = vld [vmem:[%s2561_s15 + $0xb0] ss:$8 sps:$4 sm:$0xff]  }
  0x3c   : > { %1525 = vmatpush1.bf16.msra.mxu0 %v2224_v31  ;;  %1424 = vmatprep.subr.bf16.mxu1 %v2225_v32  ;;  %v2266_v59 = vld [vmem:[%s2561_s15 + $0x2a0] ss:$8 sps:$4 sm:$0xff]   ;;  %v2269_v61 = vld [vmem:[%s2561_s15 + $0x2b4] ss:$8 sps:$4 sm:$0xff]   ;;  %v2272_v63 = vld [vmem:[%s2561_s15 + $0x2b0] ss:$8 sps:$4 sm:$0xff]  }
  0x3d   : > { %1526 = vmatprep.subr.bf16.mxu0 %v2227_v33  ;;  %v2299_v0 = vld [vmem:[%s2563_s16 + $0x4] ss:$36 sps:$4 sm:$0xff]   ;;  %v2305_v3 = vld [vmem:[%s2563_s16 + $0x14] ss:$36 sps:$4 sm:$0xff]   ;;  %p2112_p11 = scmp.ne.s32.totalorder %s2469_s20, 1 }
  0x3e   : > { %v2273_v1 = vld [vmem:[%s2561_s15 + $0xc4] ss:$8 sps:$4 sm:$0xff]   ;;  %1448 = vmatprep.mubr.bf16.mxu1 %v2299_v0  ;;  %v2277_v4 = vld [vmem:[%s2561_s15 + $0xc0] ss:$8 sps:$4 sm:$0xff]   ;;  %v2279_v6 = vld [vmem:[%s2561_s15 + $0xd4] ss:$8 sps:$4 sm:$0xff]   ;;  %1550 = vmatprep.mubr.bf16.mxu0 %v2305_v3 }
  0x3f   : > { %1425 = vmatpush1.bf16.msra.mxu1 %v2229_v34  ;;  %v2275_v2 = vld [vmem:[%s2561_s15 + $0x2c4] ss:$8 sps:$4 sm:$0xff]   ;;  %v2278_v5 = vld [vmem:[%s2561_s15 + $0x2c0] ss:$8 sps:$4 sm:$0xff]   ;;  %v2281_v7 = vld [vmem:[%s2561_s15 + $0x2d4] ss:$8 sps:$4 sm:$0xff]  }
  0x40   : > { %1527 = vmatpush1.bf16.msra.mxu0 %v2230_v35  ;;  %1426 = vmatprep.subr.bf16.mxu1 %v2231_v36  ;;  %v2283_v8 = vld [vmem:[%s2561_s15 + $0xd0] ss:$8 sps:$4 sm:$0xff]   ;;  %v2285_v10 = vld [vmem:[%s2561_s15 + $0xe4] ss:$8 sps:$4 sm:$0xff]   ;;  %v2289_v12 = vld [vmem:[%s2561_s15 + $0xe0] ss:$8 sps:$4 sm:$0xff]  }
  0x41   : > { %1528 = vmatprep.subr.bf16.mxu0 %v2233_v37  ;;  %v2284_v9 = vld [vmem:[%s2561_s15 + $0x2d0] ss:$8 sps:$4 sm:$0xff]   ;;  %v2287_v11 = vld [vmem:[%s2561_s15 + $0x2e4] ss:$8 sps:$4 sm:$0xff]   ;;  %v2290_v13 = vld [vmem:[%s2561_s15 + $0x2e0] ss:$8 sps:$4 sm:$0xff]  }
  0x42   : > { %v2291_v14 = vld [vmem:[%s2561_s15 + $0xf4] ss:$8 sps:$4 sm:$0xff]   ;;  %v2295_v16 = vld [vmem:[%s2561_s15 + $0xf0] ss:$8 sps:$4 sm:$0xff]   ;;  %v2302_v18 = vld [vmem:[%s2561_s15 + $0x104] ss:$8 sps:$4 sm:$0xff]  }
  0x43   : > { %1427 = vmatpush1.bf16.msra.mxu1 %v2235_v38  ;;  %v2293_v15 = vld [vmem:[%s2561_s15 + $0x2f4] ss:$8 sps:$4 sm:$0xff]   ;;  %v2296_v17 = vld [vmem:[%s2561_s15 + $0x2f0] ss:$8 sps:$4 sm:$0xff]   ;;  %v2308_v19 = vld [vmem:[%s2561_s15 + $0x304] ss:$8 sps:$4 sm:$0xff]  }
  0x44   : > { %1529 = vmatpush1.bf16.msra.mxu0 %v2236_v39  ;;  %1428 = vmatprep.subr.bf16.mxu1 %v2237_v40  ;;  %v2297_v20 = vld [vmem:[%s2563_s16] ss:$36 sps:$4 sm:$0xff]   ;;  %v2303_v22 = vld [vmem:[%s2563_s16 + $0x10] ss:$36 sps:$4 sm:$0xff]  }
  0x45   : > { %1530 = vmatprep.subr.bf16.mxu0 %v2239_v41  ;;  %v2300_v21 = vld [vmem:[%s2561_s15 + $0x100] ss:$8 sps:$4 sm:$0xff]   ;;  %v2311_v24 = vld [vmem:[%s2561_s15 + $0x114] ss:$8 sps:$4 sm:$0xff]   ;;  %v2309_v26 = vld [vmem:[%s2561_s15 + $0x110] ss:$8 sps:$4 sm:$0xff]  }
  0x46   : > { %v2306_v23 = vld [vmem:[%s2561_s15 + $0x300] ss:$8 sps:$4 sm:$0xff]   ;;  %v2314_v25 = vld [vmem:[%s2561_s15 + $0x314] ss:$8 sps:$4 sm:$0xff]   ;;  %v2312_v27 = vld [vmem:[%s2561_s15 + $0x310] ss:$8 sps:$4 sm:$0xff]  }
  0x47   : > { %1429 = vmatpush1.bf16.msra.mxu1 %v2241_v42  ;;  %v2317_v28 = vld [vmem:[%s2561_s15 + $0x124] ss:$8 sps:$4 sm:$0xff]   ;;  %v2315_v30 = vld [vmem:[%s2561_s15 + $0x120] ss:$8 sps:$4 sm:$0xff]   ;;  %v2323_v32 = vld [vmem:[%s2561_s15 + $0x134] ss:$8 sps:$4 sm:$0xff]  }
  0x48   : > { %1531 = vmatpush1.bf16.msra.mxu0 %v2242_v43  ;;  %1430 = vmatprep.subr.bf16.mxu1 %v2243_v44  ;;  %v2320_v29 = vld [vmem:[%s2561_s15 + $0x324] ss:$8 sps:$4 sm:$0xff]   ;;  %v2318_v31 = vld [vmem:[%s2561_s15 + $0x320] ss:$8 sps:$4 sm:$0xff]   ;;  %v2326_v33 = vld [vmem:[%s2561_s15 + $0x334] ss:$8 sps:$4 sm:$0xff]  }
  0x49   : > { %1532 = vmatprep.subr.bf16.mxu0 %v2245_v45  ;;  %v2321_v34 = vld [vmem:[%s2561_s15 + $0x130] ss:$8 sps:$4 sm:$0xff]   ;;  %v2329_v36 = vld [vmem:[%s2561_s15 + $0x144] ss:$8 sps:$4 sm:$0xff]   ;;  %v2327_v38 = vld [vmem:[%s2561_s15 + $0x140] ss:$8 sps:$4 sm:$0xff]  }
  0x4a   : > { %v2324_v35 = vld [vmem:[%s2561_s15 + $0x330] ss:$8 sps:$4 sm:$0xff]   ;;  %v2332_v37 = vld [vmem:[%s2561_s15 + $0x344] ss:$8 sps:$4 sm:$0xff]   ;;  %v2330_v39 = vld [vmem:[%s2561_s15 + $0x340] ss:$8 sps:$4 sm:$0xff]  }
  0x4b   : > { %1431 = vmatpush1.bf16.msra.mxu1 %v2247_v46  ;;  %v2335_v40 = vld [vmem:[%s2561_s15 + $0x154] ss:$8 sps:$4 sm:$0xff]   ;;  %v2333_v46 = vld [vmem:[%s2561_s15 + $0x150] ss:$8 sps:$4 sm:$0xff]  }
  0x4c   : > { %1533 = vmatpush1.bf16.msra.mxu0 %v2248_v47  ;;  %1432 = vmatprep.subr.bf16.mxu1 %v2249_v48  ;;  %v2338_v41 = vld [vmem:[%s2561_s15 + $0x354] ss:$8 sps:$4 sm:$0xff]   ;;  %v2336_v47 = vld [vmem:[%s2561_s15 + $0x350] ss:$8 sps:$4 sm:$0xff]  }
  0x4d   : > { %1534 = vmatprep.subr.bf16.mxu0 %v2251_v49  ;;  %v471_v42 = vld [vmem:[%s2563_s16 + $0x58] sm:$0xff]  ;;  %v469_v45 = vld [vmem:[%s2563_s16 + $0x48] sm:$0xff] }
  0x4e   : > { %v1964_v43 = vcombine.high %v471_v42, %v471_v42  ;;  %v1963_v44 = vcombine.low %v471_v42, %v471_v42  ;;  %v1960_v48 = vcombine.high %v469_v45, %v469_v45  ;;  %v1959_v49 = vcombine.low %v469_v45, %v469_v45  ;;  %v2359_v0 = vld [vmem:[%s2561_s15 + $0x194] ss:$8 sps:$4 sm:$0xff]   ;;  %v2360_v3 = vld [vmem:[%s2561_s15 + $0x390] ss:$8 sps:$4 sm:$0xff]  }
  0x4f   : > { %1433 = vmatpush1.bf16.msra.mxu1 %v2253_v50  ;;  %v2341_v50 = vld [vmem:[%s2561_s15 + $0x164] ss:$8 sps:$4 sm:$0xff]   ;;  %v2424_v42 = vld [vmem:[%s2561_s15 + $0x434] ss:$8 sps:$4 sm:$0xff]   ;;  %v2480_v45 = vmov 0  }
  0x50   : > { %1535 = vmatpush1.bf16.msra.mxu0 %v2254_v51  ;;  %1434 = vmatprep.subr.bf16.mxu1 %v2255_v52  ;;  %v2344_v51 = vld [vmem:[%s2561_s15 + $0x364] ss:$8 sps:$4 sm:$0xff]   ;;  %v2339_v52 = vld [vmem:[%s2561_s15 + $0x160] ss:$8 sps:$4 sm:$0xff]  }
  0x51   : > { %1536 = vmatprep.subr.bf16.mxu0 %v2257_v53  ;;  %v2342_v53 = vld [vmem:[%s2561_s15 + $0x360] ss:$8 sps:$4 sm:$0xff]  }
  0x53   : > { %1435 = vmatpush1.bf16.msra.mxu1 %v2259_v54  ;;  %v2347_v54 = vld [vmem:[%s2561_s15 + $0x174] ss:$8 sps:$4 sm:$0xff]  }
  0x54   : > { %1537 = vmatpush1.bf16.msra.mxu0 %v2260_v55  ;;  %1436 = vmatprep.subr.bf16.mxu1 %v2261_v56  ;;  %v2350_v55 = vld [vmem:[%s2561_s15 + $0x374] ss:$8 sps:$4 sm:$0xff]  }
  0x55   : > { %1538 = vmatprep.subr.bf16.mxu0 %v2263_v57  ;;  %v2405_v56 = vld [vmem:[%s2563_s16 + $0xc] ss:$36 sps:$4 sm:$0xff]   ;;  %v2408_v57 = vld [vmem:[%s2563_s16 + $0x1c] ss:$36 sps:$4 sm:$0xff]  }
  0x57   : > { %1437 = vmatpush1.bf16.msra.mxu1 %v2265_v58  ;;  %v2345_v58 = vld [vmem:[%s2561_s15 + $0x170] ss:$8 sps:$4 sm:$0xff]  }
  0x58   : > { %1539 = vmatpush1.bf16.msra.mxu0 %v2266_v59  ;;  %1438 = vmatprep.subr.bf16.mxu1 %v2267_v60  ;;  %v2348_v59 = vld [vmem:[%s2561_s15 + $0x370] ss:$8 sps:$4 sm:$0xff]   ;;  %v2353_v60 = vld [vmem:[%s2561_s15 + $0x184] ss:$8 sps:$4 sm:$0xff]  }
  0x59   : > { %1540 = vmatprep.subr.bf16.mxu0 %v2269_v61  ;;  %v2356_v61 = vld [vmem:[%s2561_s15 + $0x384] ss:$8 sps:$4 sm:$0xff]  }
  0x5b   : > { %1439 = vmatpush1.bf16.msra.mxu1 %v2271_v62  ;;  %v2351_v62 = vld [vmem:[%s2561_s15 + $0x180] ss:$8 sps:$4 sm:$0xff]  }
  0x5c   : > { %1541 = vmatpush1.bf16.msra.mxu0 %v2272_v63  ;;  %1440 = vmatprep.subr.bf16.mxu1 %v2273_v1  ;;  %v2354_v63 = vld [vmem:[%s2561_s15 + $0x380] ss:$8 sps:$4 sm:$0xff]   ;;  %v2362_v1 = vld [vmem:[%s2561_s15 + $0x394] ss:$8 sps:$4 sm:$0xff]  }
  0x5d   : > { %1542 = vmatprep.subr.bf16.mxu0 %v2275_v2  ;;  %v2357_v2 = vld [vmem:[%s2561_s15 + $0x190] ss:$8 sps:$4 sm:$0xff]  }
  0x5f   : > { %1441 = vmatpush1.bf16.msra.mxu1 %v2277_v4  ;;  %v2365_v4 = vld [vmem:[%s2561_s15 + $0x1a4] ss:$8 sps:$4 sm:$0xff]  }
  0x60   : > { %1543 = vmatpush1.bf16.msra.mxu0 %v2278_v5  ;;  %1442 = vmatprep.subr.bf16.mxu1 %v2279_v6  ;;  %v2368_v5 = vld [vmem:[%s2561_s15 + $0x3a4] ss:$8 sps:$4 sm:$0xff]   ;;  %v2363_v6 = vld [vmem:[%s2561_s15 + $0x1a0] ss:$8 sps:$4 sm:$0xff]  }
  0x61   : > { %1544 = vmatprep.subr.bf16.mxu0 %v2281_v7  ;;  %v2366_v7 = vld [vmem:[%s2561_s15 + $0x3a0] ss:$8 sps:$4 sm:$0xff]  }
  0x63   : > { %1443 = vmatpush1.bf16.msra.mxu1 %v2283_v8  ;;  %v2371_v8 = vld [vmem:[%s2561_s15 + $0x1b4] ss:$8 sps:$4 sm:$0xff]  }
  0x64   : > { %1545 = vmatpush1.bf16.msra.mxu0 %v2284_v9  ;;  %1444 = vmatprep.subr.bf16.mxu1 %v2285_v10  ;;  %v2374_v9 = vld [vmem:[%s2561_s15 + $0x3b4] ss:$8 sps:$4 sm:$0xff]   ;;  %v2369_v10 = vld [vmem:[%s2561_s15 + $0x1b0] ss:$8 sps:$4 sm:$0xff]  }
  0x65   : > { %1546 = vmatprep.subr.bf16.mxu0 %v2287_v11  ;;  %v2372_v11 = vld [vmem:[%s2561_s15 + $0x3b0] ss:$8 sps:$4 sm:$0xff]  }
  0x67   : > { %1445 = vmatpush1.bf16.msra.mxu1 %v2289_v12  ;;  %v2377_v12 = vld [vmem:[%s2561_s15 + $0x1c4] ss:$8 sps:$4 sm:$0xff]  }
  0x68   : > { %1547 = vmatpush1.bf16.msra.mxu0 %v2290_v13  ;;  %1446 = vmatprep.subr.bf16.mxu1 %v2291_v14  ;;  %v2380_v13 = vld [vmem:[%s2561_s15 + $0x3c4] ss:$8 sps:$4 sm:$0xff]   ;;  %v2375_v14 = vld [vmem:[%s2561_s15 + $0x1c0] ss:$8 sps:$4 sm:$0xff]  }
  0x69   : > { %1548 = vmatprep.subr.bf16.mxu0 %v2293_v15  ;;  %v2378_v15 = vld [vmem:[%s2561_s15 + $0x3c0] ss:$8 sps:$4 sm:$0xff]  }
  0x6b   : > { %1447 = vmatpush1.bf16.msra.mxu1 %v2295_v16  ;;  %v2383_v16 = vld [vmem:[%s2561_s15 + $0x1d4] ss:$8 sps:$4 sm:$0xff]  }
  0x6c   : > { %1549 = vmatpush1.bf16.msra.mxu0 %v2296_v17  ;;  %1467 = vmatprep.subr.bf16.mxu1 %v2302_v18  ;;  %v2386_v17 = vld [vmem:[%s2561_s15 + $0x3d4] ss:$8 sps:$4 sm:$0xff]   ;;  %v2381_v18 = vld [vmem:[%s2561_s15 + $0x1d0] ss:$8 sps:$4 sm:$0xff]  }
  0x6d   : > { %1569 = vmatprep.subr.bf16.mxu0 %v2308_v19  ;;  %v2384_v19 = vld [vmem:[%s2561_s15 + $0x3d0] ss:$8 sps:$4 sm:$0xff]  }
  0x6e   : > { %1449 = vmatmul.mubr.bf16.vlgmr.msra.gmra.mrb[0].mxu1 %v2297_v20  ;;  %v2393_v20 = vld [vmem:[%s2561_s15 + $0x1e4] ss:$8 sps:$4 sm:$0xff]  }
  0x6f   : > { %1551 = vmatmul.mubr.bf16.vlgmr.msra.gmra.mrb[0].mxu0 %v2303_v22  ;;  %1468 = vmatpush1.bf16.msra.mxu1 %v2300_v21  ;;  %v2396_v21 = vld [vmem:[%s2561_s15 + $0x3e4] ss:$8 sps:$4 sm:$0xff]   ;;  %v2391_v22 = vld [vmem:[%s2561_s15 + $0x1e0] ss:$8 sps:$4 sm:$0xff]  }
  0x70   : > { %1570 = vmatpush1.bf16.msra.mxu0 %v2306_v23  ;;  %1469 = vmatprep.subr.bf16.mxu1 %v2311_v24  ;;  %v2394_v23 = vld [vmem:[%s2561_s15 + $0x3e0] ss:$8 sps:$4 sm:$0xff]   ;;  %v2399_v24 = vld [vmem:[%s2561_s15 + $0x1f4] ss:$8 sps:$4 sm:$0xff]  }
  0x71   : > { %1571 = vmatprep.subr.bf16.mxu0 %v2314_v25  ;;  %1560 = vmatprep.mubr.bf16.mxu0 %v1964_v43  ;;  %v2402_v25 = vld [vmem:[%s2561_s15 + $0x3f4] ss:$8 sps:$4 sm:$0xff]   ;;  %v2422_v43 = vld [vmem:[%s2561_s15 + $0x430] ss:$8 sps:$4 sm:$0xff]  }
  0x72   : > { %1458 = vmatprep.mubr.bf16.mxu1 %v1960_v48  ;;  %v2428_v48 = vld [vmem:[%s2561_s15 + $0x450] ss:$8 sps:$4 sm:$0xff]  }
  0x73   : > { %1470 = vmatpush1.bf16.msra.mxu1 %v2309_v26  ;;  %v2397_v26 = vld [vmem:[%s2561_s15 + $0x1f0] ss:$8 sps:$4 sm:$0xff]  }
  0x74   : > { %1572 = vmatpush1.bf16.msra.mxu0 %v2312_v27  ;;  %1471 = vmatprep.subr.bf16.mxu1 %v2317_v28  ;;  %v2400_v27 = vld [vmem:[%s2561_s15 + $0x3f0] ss:$8 sps:$4 sm:$0xff]   ;;  %v2411_v28 = vld [vmem:[%s2561_s15 + $0x404] ss:$8 sps:$4 sm:$0xff]  }
  0x75   : > { %1573 = vmatprep.subr.bf16.mxu0 %v2320_v29  ;;  %v2403_v29 = vld [vmem:[%s2563_s16 + $0x8] ss:$36 sps:$4 sm:$0xff]  }
  0x76   : > { %1459 = vmatmul.mubr.bf16.gmra.mrb[4].mxu1 %v1959_v49  ;;  %v2433_v49 = vld [vmem:[%s2561_s15 + $0x464] ss:$8 sps:$4 sm:$0xff]  }
  0x77   : > { %1472 = vmatpush1.bf16.msra.mxu1 %v2315_v30  ;;  %1561 = vmatmul.mubr.bf16.gmra.mrb[4].mxu0 %v1963_v44  ;;  %v2406_v30 = vld [vmem:[%s2563_s16 + $0x18] ss:$36 sps:$4 sm:$0xff]  }
  0x78   : > { %1574 = vmatpush1.bf16.msra.mxu0 %v2318_v31  ;;  %1473 = vmatprep.subr.bf16.mxu1 %v2323_v32  ;;  %v470_v31 = vld [vmem:[%s2563_s16 + $0x50] sm:$0xff]  ;;  %v472_v32 = vld [vmem:[%s2563_s16 + $0x60] sm:$0xff] }
  0x79   : > { %1575 = vmatprep.subr.bf16.mxu0 %v2326_v33  ;;  %1499 = vmatprep.mubr.bf16.mxu1 %v2405_v56  ;;  %v2409_v33 = vld [vmem:[%s2561_s15 + $0x400] ss:$8 sps:$4 sm:$0xff]   ;;  %v2427_v44 = vld [vmem:[%s2561_s15 + $0x444] ss:$8 sps:$4 sm:$0xff]  }
  0x7a   : > { %1601 = vmatprep.mubr.bf16.mxu0 %v2408_v57 }
  0x7b   : > { %1474 = vmatpush1.bf16.msra.mxu1 %v2321_v34  ;;  %v2414_v34 = vld [vmem:[%s2561_s15 + $0x414] ss:$8 sps:$4 sm:$0xff]  }
  0x7c   : > { %1576 = vmatpush1.bf16.msra.mxu0 %v2324_v35  ;;  %1475 = vmatprep.subr.bf16.mxu1 %v2329_v36  ;;  %v1962_v35 = vcombine.high %v470_v31, %v470_v31  ;;  %v1966_v36 = vcombine.high %v472_v32, %v472_v32 }
  0x7d   : > { %1577 = vmatprep.subr.bf16.mxu0 %v2332_v37  ;;  %v2412_v37 = vld [vmem:[%s2561_s15 + $0x410] ss:$8 sps:$4 sm:$0xff]  }
  0x7f   : > { %1476 = vmatpush1.bf16.msra.mxu1 %v2327_v38  ;;  %v2419_v38 = vld [vmem:[%s2561_s15 + $0x424] ss:$8 sps:$4 sm:$0xff]  }
  0x80   : > { %1578 = vmatpush1.bf16.msra.mxu0 %v2330_v39  ;;  %1477 = vmatprep.subr.bf16.mxu1 %v2335_v40  ;;  %v1961_v39 = vcombine.low %v470_v31, %v470_v31  ;;  %v1965_v40 = vcombine.low %v472_v32, %v472_v32 }
  0x81   : > { %1579 = vmatprep.subr.bf16.mxu0 %v2338_v41  ;;  %v2417_v41 = vld [vmem:[%s2561_s15 + $0x420] ss:$8 sps:$4 sm:$0xff]  }
  0x83   : > { %1478 = vmatpush1.bf16.msra.mxu1 %v2333_v46  ;;  %v2425_v46 = vld [vmem:[%s2561_s15 + $0x440] ss:$8 sps:$4 sm:$0xff]  }
  0x84   : > { %1580 = vmatpush1.bf16.msra.mxu0 %v2336_v47  ;;  %1479 = vmatprep.subr.bf16.mxu1 %v2341_v50  ;;  %v2430_v47 = vld [vmem:[%s2561_s15 + $0x454] ss:$8 sps:$4 sm:$0xff]   ;;  %v2431_v50 = vld [vmem:[%s2561_s15 + $0x460] ss:$8 sps:$4 sm:$0xff]  }
  0x85   : > { %1581 = vmatprep.subr.bf16.mxu0 %v2344_v51  ;;  %v2436_v51 = vld [vmem:[%s2561_s15 + $0x474] ss:$8 sps:$4 sm:$0xff]  }
  0x87   : > { %1480 = vmatpush1.bf16.msra.mxu1 %v2339_v52  ;;  %v2434_v52 = vld [vmem:[%s2561_s15 + $0x470] ss:$8 sps:$4 sm:$0xff]  }
  0x88   : > { %1582 = vmatpush1.bf16.msra.mxu0 %v2342_v53  ;;  %1481 = vmatprep.subr.bf16.mxu1 %v2347_v54  ;;  %v2437_v53 = vld [vmem:[%s2563_s16 + $0x20] ss:$36 sps:$4 sm:$0xff]   ;;  %v2438_v54 = vld [vmem:[%s2563_s16 + $0x68] ss:$0 sps:$4 sm:$0xff]  }
  0x89   : > { %1583 = vmatprep.subr.bf16.mxu0 %v2350_v55 }
  0x8b   : > { %1482 = vmatpush1.bf16.msra.mxu1 %v2345_v58 }
  0x8c   : > { %1584 = vmatpush1.bf16.msra.mxu0 %v2348_v59  ;;  %1483 = vmatprep.subr.bf16.mxu1 %v2353_v60 }
  0x8d   : > { %1585 = vmatprep.subr.bf16.mxu0 %v2356_v61 }
  0x8f   : > { %1484 = vmatpush1.bf16.msra.mxu1 %v2351_v62 }
  0x90   : > { %1586 = vmatpush1.bf16.msra.mxu0 %v2354_v63  ;;  %1485 = vmatprep.subr.bf16.mxu1 %v2359_v0 }
  0x91   : > { %1587 = vmatprep.subr.bf16.mxu0 %v2362_v1 }
  0x93   : > { %1486 = vmatpush1.bf16.msra.mxu1 %v2357_v2 }
  0x94   : > { %1588 = vmatpush1.bf16.msra.mxu0 %v2360_v3  ;;  %1487 = vmatprep.subr.bf16.mxu1 %v2365_v4 }
  0x95   : > { %1589 = vmatprep.subr.bf16.mxu0 %v2368_v5 }
  0x97   : > { %1488 = vmatpush1.bf16.msra.mxu1 %v2363_v6 }
  0x98   : > { %1590 = vmatpush1.bf16.msra.mxu0 %v2366_v7  ;;  %1489 = vmatprep.subr.bf16.mxu1 %v2371_v8 }
  0x99   : > { %1591 = vmatprep.subr.bf16.mxu0 %v2374_v9 }
  0x9b   : > { %1490 = vmatpush1.bf16.msra.mxu1 %v2369_v10 }
  0x9c   : > { %1592 = vmatpush1.bf16.msra.mxu0 %v2372_v11  ;;  %1491 = vmatprep.subr.bf16.mxu1 %v2377_v12 }
  0x9d   : > { %1593 = vmatprep.subr.bf16.mxu0 %v2380_v13 }
  0x9f   : > { %1492 = vmatpush1.bf16.msra.mxu1 %v2375_v14 }
  0xa0   : > { %1594 = vmatpush1.bf16.msra.mxu0 %v2378_v15  ;;  %1493 = vmatprep.subr.bf16.mxu1 %v2383_v16 }
  0xa1   : > { %1595 = vmatprep.subr.bf16.mxu0 %v2386_v17  ;;  %v453_v17 = vld [vmem:[#allocation2] sm:$0xff] }
  0xa3   : > { %1494 = vmatpush1.bf16.msra.mxu1 %v2381_v18 }
  0xa4   : > { %1596 = vmatpush1.bf16.msra.mxu0 %v2384_v19  ;;  %1495 = vmatprep.subr.bf16.mxu1 %v2393_v20  ;;  %v457_v19 = vld [vmem:[#allocation2 + $0x20] sm:$0xff] }
  0xa5   : > { %1597 = vmatprep.subr.bf16.mxu0 %v2396_v21 }
  0xa7   : > { %1496 = vmatpush1.bf16.msra.mxu1 %v2391_v22 }
  0xa8   : > { %1598 = vmatpush1.bf16.msra.mxu0 %v2394_v23  ;;  %1497 = vmatprep.subr.bf16.mxu1 %v2399_v24  ;;  %v454_v23 = vld [vmem:[#allocation2 + $0x8] sm:$0xff] }
  0xa9   : > { %1599 = vmatprep.subr.bf16.mxu0 %v2402_v25  ;;  %v458_v25 = vld [vmem:[#allocation2 + $0x28] sm:$0xff] }
  0xab   : > { %1498 = vmatpush1.bf16.msra.mxu1 %v2397_v26 }
  0xac   : > { %1600 = vmatpush1.bf16.msra.mxu0 %v2400_v27  ;;  %2125 = vmatprep.subr.bf16.mxu1 %v2411_v28 }
  0xad   : > { %1620 = vmatprep.subr.bf16.mxu0 %v2411_v28 }
  0xae   : > { %1500 = vmatmul.mubr.bf16.vlgmr.msra.gmra.mrb[0].mxu1 %v2403_v29  ;;  %v455_v29 = vld [vmem:[#allocation2 + $0x10] sm:$0xff] }
  0xaf   : > { %1602 = vmatmul.mubr.bf16.vlgmr.msra.gmra.mrb[0].mxu0 %v2406_v30  ;;  %2133 = vmatpush1.bf16.msra.mxu1 %v2409_v33 }
  0xb0   : > { %1621 = vmatpush1.bf16.msra.mxu0 %v2409_v33  ;;  %2126 = vmatprep.subr.bf16.mxu1 %v2414_v34 }
  0xb1   : > { %1622 = vmatprep.subr.bf16.mxu0 %v2414_v34  ;;  %1509 = vmatprep.mubr.bf16.mxu1 %v1962_v35  ;;  %v456_v35 = vld [vmem:[#allocation2 + $0x18] sm:$0xff] }
  0xb2   : > { %1611 = vmatprep.mubr.bf16.mxu0 %v1966_v36 }
  0xb3   : > { %2134 = vmatpush1.bf16.msra.mxu1 %v2412_v37 }
  0xb4   : > { %1623 = vmatpush1.bf16.msra.mxu0 %v2412_v37  ;;  %2127 = vmatprep.subr.bf16.mxu1 %v2419_v38 }
  0xb5   : > { %1624 = vmatprep.subr.bf16.mxu0 %v2419_v38 }
  0xb6   : > { %1510 = vmatmul.mubr.bf16.gmra.mrb[8].mxu1 %v1961_v39 }
  0xb7   : > { %1612 = vmatmul.mubr.bf16.gmra.mrb[8].mxu0 %v1965_v40  ;;  %2135 = vmatpush1.bf16.msra.mxu1 %v2417_v41 }
  0xb8   : > { %1625 = vmatpush1.bf16.msra.mxu0 %v2417_v41  ;;  %2128 = vmatprep.subr.bf16.mxu1 %v2424_v42 }
  0xb9   : > { %1626 = vmatprep.subr.bf16.mxu0 %v2424_v42  ;;  %1652 = vmatprep.mubr.bf16.mxu0 %v2480_v45 }
  0xba   : > { %1662 = vmatprep.mubr.bf16.mxu1 %v2480_v45  ;;  %v1693_v45 = vld [vmem:[%s2766_s2] sm:$0x3] (!%p2112_p11) }
  0xbb   : > { %2136 = vmatpush1.bf16.msra.mxu1 %v2422_v43 }
  0xbc   : > { %1627 = vmatpush1.bf16.msra.mxu0 %v2422_v43  ;;  %2129 = vmatprep.subr.bf16.mxu1 %v2427_v44  ;;  %v1695_v43 = vlaneseq (!%p2112_p11) }
  0xbd   : > { %1628 = vmatprep.subr.bf16.mxu0 %v2427_v44 }
  0xbe   : > { %v1696_v44 = vshrl.u32 (!%p2112_p11), %v1695_v43, 7 }
  0xbf   : > { %2137 = vmatpush1.bf16.msra.mxu1 %v2425_v46 }
  0xc0   : > { %1629 = vmatpush1.bf16.msra.mxu0 %v2425_v46  ;;  %2130 = vmatprep.subr.bf16.mxu1 %v2430_v47  ;;  %v1711_v46 = vld [vmem:[%s2767_s3] sm:$0x3] (!%p2112_p11) }
  0xc1   : > { %1630 = vmatprep.subr.bf16.mxu0 %v2430_v47 }
  0xc3   : > { %2138 = vmatpush1.bf16.msra.mxu1 %v2428_v48 }
  0xc4   : > { %1631 = vmatpush1.bf16.msra.mxu0 %v2428_v48  ;;  %2131 = vmatprep.subr.bf16.mxu1 %v2433_v49  ;;  %v1697_v48 = vsub.s32 (!%p2112_p11), 0, %v1696_v44 }
  0xc5   : > { %1632 = vmatprep.subr.bf16.mxu0 %v2433_v49  ;;  %v1701_v49 = vsub.s32 (!%p2112_p11), 1, %v1696_v44 }
  0xc7   : > { %2139 = vmatpush1.bf16.msra.mxu1 %v2431_v50 }
  0xc8   : > { %1633 = vmatpush1.bf16.msra.mxu0 %v2431_v50  ;;  %2132 = vmatprep.subr.bf16.mxu1 %v2436_v51  ;;  %v1729_v50 = vld [vmem:[%s2768_s4] sm:$0xff] (!%p2112_p11) }
  0xc9   : > { %1634 = vmatprep.subr.bf16.mxu0 %v2436_v51  ;;  %v1730_v51 = vld [vmem:[%s2768_s4 + $0x8] sm:$0xff] (!%p2112_p11) }
  0xcb   : > { %2140 = vmatpush1.bf16.msra.mxu1 %v2434_v52 }
  0xcc   : > { %1635 = vmatpush1.bf16.msra.mxu0 %v2434_v52 }
  0xce   : > { %1663 = vmatmul.mubr.bf16.vlgmr.msra.gmra.mrb[12].mxu1 %v2438_v54 }
  0xcf   : > { %1653 = vmatmul.mubr.bf16.vlgmr.msra.gmra.mrb[0].mxu0 %v2437_v53 }
 0x149   : > { %v1460_v56 = vpop.f32.mrb[4].mxu1 }
 0x14a   : > { %v1562_v55 = vpop.f32.mrb[4].mxu0  ;;  %v1462_v58 = vpop.f32.mrb[5].mxu1 }
 0x14b   : > { %v1564_v57 = vpop.f32.mrb[5].mxu0  ;;  %v1464_v60 = vpop.f32.mrb[6].mxu1 }
 0x14c   : > { %v1566_v59 = vpop.f32.mrb[6].mxu0  ;;  %v1465_v62 = vpop.f32.mrb[7].mxu1 }
 0x14d   : > { %v1567_v61 = vpop.f32.mrb[7].mxu0  ;;  %v1732_v62 = vunpack.c.l.bf16 (!%p2112_p11), %v1729_v50 }
 0x14e   : > { %v1731_v61 = vld [vmem:[%s2768_s4 + $0x10] sm:$0xff] (!%p2112_p11) }
 0x181   : > { %v1501_v63 = vpop.f32.mrb[0].mxu1 }
 0x182   : > { %v1503_v0 = vpop.f32.mrb[1].mxu1 }
 0x183   : > { %v1505_v1 = vpop.f32.mrb[2].mxu1 }
 0x184   : > { %v1507_v2 = vpop.f32.mrb[3].mxu1 }
 0x189   : > { %v1511_v3 = vpop.f32.mrb[8].mxu1 }
 0x18a   : > { %v1613_v4 = vpop.f32.mrb[8].mxu0  ;;  %v1512_v5 = vadd.f32 %v1511_v3, %v1460_v56  ;;  %v1513_v6 = vpop.f32.mrb[9].mxu1  ;;  %v1702_v56 = vrot.slane (!%p2112_p11), %v1693_v45, %v1701_v49 }
 0x18b   : > { %v1615_v7 = vpop.f32.mrb[9].mxu0  ;;  %v1514_v8 = vadd.f32 %v1513_v6, %v1462_v58  ;;  %v1515_v10 = vpop.f32.mrb[10].mxu1  ;;  %v1720_v58 = vrot.slane (!%p2112_p11), %v1711_v46, %v1701_v49 }
 0x18c   : > { %v1617_v9 = vpop.f32.mrb[10].mxu0  ;;  %v1563_v11 = vadd.f32 %v1562_v55, %v1512_v5  ;;  %v1516_v13 = vpop.f32.mrb[11].mxu1  ;;  %v1698_v55 = vrot.slane (!%p2112_p11), %v1693_v45, %v1697_v48 }
 0x18d   : > { %v1618_v12 = vpop.f32.mrb[11].mxu0  ;;  %v1565_v14 = vadd.f32 %v1564_v57, %v1514_v8  ;;  %v1716_v57 = vrot.slane (!%p2112_p11), %v1711_v46, %v1697_v48  ;;  %v1736_v8 = vunpack.c.l.bf16 (!%p2112_p11), %v1731_v61  ;;  %v1737_v9 = vunpack.c.h.bf16 (!%p2112_p11), %v1731_v61 }
 0x18e   : > { %v1614_v15 = vadd.f32 %v1613_v4, %v1563_v11 }
 0x18f   : > { %v1616_v16 = vadd.f32 %v1615_v7, %v1565_v14 }
 0x1a1   : > { %v1664_v20 = vpop.f32.mrb[12].mxu1 }
 0x1a2   : > { %v1654_v18 = vpop.f32.mrb[0].mxu0  ;;  %v1665_v22 = vadd.f32 %v1664_v20, %v1614_v15  ;;  %v1666_v26 = vpop.f32.mrb[13].mxu1 }
 0x1a3   : > { %v2141_v21 = vadd.f32 %v1654_v18, %v1501_v63  ;;  %v1656_v24 = vpop.f32.mrb[1].mxu0  ;;  %v1667_v28 = vadd.f32 %v1666_v26, %v1616_v16  ;;  %v1668_v31 = vpop.f32.mrb[14].mxu1  ;;  %v1733_v63 = vunpack.c.h.bf16 (!%p2112_p11), %v1729_v50 }
 0x1a4   : > { %v2142_v27 = vadd.f32 %v1656_v24, %v1503_v0  ;;  %v1658_v30 = vpop.f32.mrb[2].mxu0  ;;  %v1675_v33 = vadd.f32 %v1665_v22, %v457_v19  ;;  %v1669_v37 = vpop.f32.mrb[15].mxu1  ;;  %1686 = sbr.rel (%p2112_p11) target bundleno = 445 (0x1bd), region = 74  ;;  %v1734_v0 = vunpack.c.l.bf16 (!%p2112_p11), %v1730_v51 }
 0x1a5   : > { %v1671_v32 = vadd.f32 %v2141_v21, %v453_v17  ;;  %v2143_v34 = vadd.f32 %v1658_v30, %v1505_v1  ;;  %v1660_v36 = vpop.f32.mrb[3].mxu0  ;;  %v1676_v39 = vadd.f32 %v1667_v28, %v458_v25  ;;  %v1735_v1 = vunpack.c.h.bf16 (!%p2112_p11), %v1730_v51 }
 0x1a6   : > { %v1672_v38 = vadd.f32 %v2142_v27, %v454_v23  ;;  %v2144_v40 = vadd.f32 %v1660_v36, %v1507_v2  ;;  %1681 = vst [vmem:[#allocation2 + $0x20] sm:$0xff] %v1675_v33 }
 0x1a7   : > { %1677 = vst [vmem:[#allocation2] sm:$0xff] %v1671_v32  ;;  %v1673_v41 = vadd.f32 %v2143_v34, %v455_v29  ;;  %1682 = vst [vmem:[#allocation2 + $0x28] sm:$0xff] %v1676_v39 }
 0x1a8   : > { %1678 = vst [vmem:[#allocation2 + $0x8] sm:$0xff] %v1672_v38  ;;  %v1674_v42 = vadd.f32 %v2144_v40, %v456_v35 }
 0x1a9   : > { %1679 = vst [vmem:[#allocation2 + $0x10] sm:$0xff] %v1673_v41 }
 0x1aa   : > { %1680 = vst [vmem:[#allocation2 + $0x18] sm:$0xff] %v1674_v42 }
 0x1ad   : > { %v1691_v59 = vld [vmem:[#allocation2 + $0x20] sm:$0xff] }
 0x1ae   : > { %v1687_v47 = vld [vmem:[#allocation2] sm:$0xff]  ;;  %v1692_v60 = vld [vmem:[#allocation2 + $0x28] sm:$0xff]  ;;  %v1709_v6 = vmul.f32 %v1698_v55, %v1691_v59 }
 0x1af   : > { %v1688_v52 = vld [vmem:[#allocation2 + $0x8] sm:$0xff]  ;;  %v1705_v2 = vmul.f32 %v1698_v55, %v1687_v47  ;;  %v1710_v7 = vmul.f32 %v1702_v56, %v1692_v60 }
 0x1b0   : > { %v1689_v53 = vld [vmem:[#allocation2 + $0x10] sm:$0xff]  ;;  %v1706_v3 = vmul.f32 %v1702_v56, %v1688_v52  ;;  %v1727_v14 = vadd.f32 %v1716_v57, %v1709_v6 }
 0x1b1   : > { %v1690_v54 = vld [vmem:[#allocation2 + $0x18] sm:$0xff]  ;;  %v1707_v4 = vmul.f32 %v1698_v55, %v1689_v53  ;;  %v1723_v10 = vadd.f32 %v1716_v57, %v1705_v2  ;;  %v1728_v15 = vadd.f32 %v1720_v58, %v1710_v7 }
 0x1b2   : > { %v1708_v5 = vmul.f32 %v1702_v56, %v1690_v54  ;;  %v1724_v11 = vadd.f32 %v1720_v58, %v1706_v3  ;;  %v1742_v20 = vadd.f32 %v1736_v8, %v1727_v14 }
 0x1b3   : > { %v1725_v12 = vadd.f32 %v1716_v57, %v1707_v4  ;;  %v1738_v16 = vadd.f32 %v1732_v62, %v1723_v10  ;;  %v1743_v21 = vadd.f32 %v1737_v9, %v1728_v15 }
 0x1b4   : > { %v1726_v13 = vadd.f32 %v1720_v58, %v1708_v5  ;;  %v1739_v17 = vadd.f32 %v1733_v63, %v1724_v11  ;;  %v1748_v26 = vmax.f32 %v1742_v20, 0.0 }
 0x1b5   : > { %v1740_v18 = vadd.f32 %v1734_v0, %v1725_v12  ;;  %v1744_v22 = vmax.f32 %v1738_v16, 0.0  ;;  %v1749_v27 = vmax.f32 %v1743_v21, 0.0 }
 0x1b6   : > { %v1741_v19 = vadd.f32 %v1735_v1, %v1726_v13  ;;  %v1745_v23 = vmax.f32 %v1739_v17, 0.0 }
 0x1b7   : > { %v1746_v24 = vmax.f32 %v1740_v18, 0.0  ;;  %v2124_v30 = vpack.c.bf16 %v1749_v27, %v1748_v26 }
 0x1b8   : > { %v1747_v25 = vmax.f32 %v1741_v19, 0.0  ;;  %v2122_v28 = vpack.c.bf16 %v1745_v23, %v1744_v22 }
 0x1b9   : > { %1772 = vst [vmem:[%s2769_s5 + $0x10] sm:$0xff] %v2124_v30 }
 0x1ba   : > { %v2123_v29 = vpack.c.bf16 %v1747_v25, %v1746_v24  ;;  %1770 = vst [vmem:[%s2769_s5] sm:$0xff] %v2122_v28 }
 0x1bc   : > { %1771 = vst [vmem:[%s2769_s5 + $0x8] sm:$0xff] %v2123_v29 }
 0x1bd PF: > { %s15_s22 = sadd.s32 1, %s2477_s22   ;;  %s2770_s18 = smov %s2465_s19 }
 0x1be   : > { %p12_p12 = scmp.ge.s32.totalorder %s15_s22, 4   ;;  %s2771_s19 = smov %s2546_s26 }
 0x1bf   : > { %s2772_s20 = smov %s2473_s21  ;;  %s2773_s21 = smov %s2775_s23 }
 0x1c0   :  { %14 = sbr.rel (!%p12_p12) target bundleno = 3 (0x3), region = 127 }

// kernel: resnet18_forward.21
= control target key start
LH: loop header
LB: loop body
LE: loop exit
PB: predicated region body
PF: predicated region fallthrough
CT: control target
= control target key end

     0   :  { %s992_s1 = inlined_call_operand.vmem [shape: bf16[256,512], index: 1, kind: input, shape index: {}]   ;;  %s993_s0 = inlined_call_operand.vmem [shape: bf16[8,256], index: 0, kind: input, shape index: {}]   ;;  %s994_s2 = inlined_call_operand.vmem [shape: f32[1,512], index: 2, kind: input, shape index: {}]   ;;  %s995_s3 = inlined_call_operand.vmem [shape: f32[1,512], index: 3, kind: input, shape index: {}]   ;;  %s996_s4 = inlined_call_operand.vmem [shape: bf16[8,512], index: 4, kind: output, shape index: {}]  }
   0x1   :  { %v662_v0 = vld [vmem:[%s992_s1 + $0x4] ss:$16 sps:$4 sm:$0xff]   ;;  %v664_v1 = vld [vmem:[%s992_s1 + $0xc] ss:$16 sps:$4 sm:$0xff]   ;;  %v666_v2 = vld [vmem:[%s992_s1] ss:$16 sps:$4 sm:$0xff]  }
   0x2   :  { %421 = vmatprep.subr.bf16.mxu0 %v662_v0  ;;  %v667_v3 = vld [vmem:[%s992_s1 + $0x8] ss:$16 sps:$4 sm:$0xff]   ;;  %462 = vmatprep.subr.bf16.mxu1 %v664_v1  ;;  %v668_v4 = vld [vmem:[%s992_s1 + $0x24] ss:$16 sps:$4 sm:$0xff]   ;;  %v670_v5 = vld [vmem:[%s992_s1 + $0x2c] ss:$16 sps:$4 sm:$0xff]  }
   0x3   :  { %422 = vmatpush1.bf16.msra.mxu0 %v666_v2  ;;  %463 = vmatpush1.bf16.msra.mxu1 %v667_v3  ;;  %v672_v6 = vld [vmem:[%s992_s1 + $0x20] ss:$16 sps:$4 sm:$0xff]   ;;  %v673_v7 = vld [vmem:[%s992_s1 + $0x28] ss:$16 sps:$4 sm:$0xff]   ;;  %v674_v8 = vld [vmem:[%s992_s1 + $0x44] ss:$16 sps:$4 sm:$0xff]   ;;  %v520_v3 = vlaneseq }
   0x4   :  { %423 = vmatprep.subr.bf16.mxu0 %v668_v4  ;;  %464 = vmatprep.subr.bf16.mxu1 %v670_v5  ;;  %v676_v9 = vld [vmem:[%s992_s1 + $0x4c] ss:$16 sps:$4 sm:$0xff]   ;;  %v678_v10 = vld [vmem:[%s992_s1 + $0x40] ss:$16 sps:$4 sm:$0xff]   ;;  %v679_v11 = vld [vmem:[%s992_s1 + $0x48] ss:$16 sps:$4 sm:$0xff]  }
   0x5   :  { %v680_v12 = vld [vmem:[%s992_s1 + $0x64] ss:$16 sps:$4 sm:$0xff]   ;;  %v682_v13 = vld [vmem:[%s992_s1 + $0x6c] ss:$16 sps:$4 sm:$0xff]   ;;  %v684_v14 = vld [vmem:[%s992_s1 + $0x60] ss:$16 sps:$4 sm:$0xff]  }
   0x6   :  { %v685_v15 = vld [vmem:[%s992_s1 + $0x68] ss:$16 sps:$4 sm:$0xff]   ;;  %v686_v16 = vld [vmem:[%s992_s1 + $0x84] ss:$16 sps:$4 sm:$0xff]   ;;  %v688_v17 = vld [vmem:[%s992_s1 + $0x8c] ss:$16 sps:$4 sm:$0xff]  }
   0x7   :  { %424 = vmatpush1.bf16.msra.mxu0 %v672_v6  ;;  %465 = vmatpush1.bf16.msra.mxu1 %v673_v7  ;;  %v690_v18 = vld [vmem:[%s992_s1 + $0x80] ss:$16 sps:$4 sm:$0xff]   ;;  %v691_v19 = vld [vmem:[%s992_s1 + $0x88] ss:$16 sps:$4 sm:$0xff]   ;;  %v692_v20 = vld [vmem:[%s992_s1 + $0xa4] ss:$16 sps:$4 sm:$0xff]  }
   0x8   :  { %425 = vmatprep.subr.bf16.mxu0 %v674_v8  ;;  %466 = vmatprep.subr.bf16.mxu1 %v676_v9  ;;  %v694_v21 = vld [vmem:[%s992_s1 + $0xac] ss:$16 sps:$4 sm:$0xff]   ;;  %v696_v22 = vld [vmem:[%s992_s1 + $0xa0] ss:$16 sps:$4 sm:$0xff]   ;;  %v697_v23 = vld [vmem:[%s992_s1 + $0xa8] ss:$16 sps:$4 sm:$0xff]  }
   0x9   :  { %v698_v24 = vld [vmem:[%s992_s1 + $0xc4] ss:$16 sps:$4 sm:$0xff]   ;;  %v700_v25 = vld [vmem:[%s992_s1 + $0xcc] ss:$16 sps:$4 sm:$0xff]   ;;  %v702_v26 = vld [vmem:[%s992_s1 + $0xc0] ss:$16 sps:$4 sm:$0xff]  }
   0xa   :  { %v703_v27 = vld [vmem:[%s992_s1 + $0xc8] ss:$16 sps:$4 sm:$0xff]   ;;  %v704_v28 = vld [vmem:[%s992_s1 + $0xe4] ss:$16 sps:$4 sm:$0xff]   ;;  %v706_v29 = vld [vmem:[%s992_s1 + $0xec] ss:$16 sps:$4 sm:$0xff]  }
   0xb   :  { %426 = vmatpush1.bf16.msra.mxu0 %v678_v10  ;;  %467 = vmatpush1.bf16.msra.mxu1 %v679_v11  ;;  %v708_v30 = vld [vmem:[%s992_s1 + $0xe0] ss:$16 sps:$4 sm:$0xff]   ;;  %v709_v31 = vld [vmem:[%s992_s1 + $0xe8] ss:$16 sps:$4 sm:$0xff]   ;;  %v710_v32 = vld [vmem:[%s992_s1 + $0x104] ss:$16 sps:$4 sm:$0xff]  }
   0xc   :  { %427 = vmatprep.subr.bf16.mxu0 %v680_v12  ;;  %468 = vmatprep.subr.bf16.mxu1 %v682_v13  ;;  %v712_v33 = vld [vmem:[%s992_s1 + $0x10c] ss:$16 sps:$4 sm:$0xff]   ;;  %v714_v34 = vld [vmem:[%s992_s1 + $0x100] ss:$16 sps:$4 sm:$0xff]   ;;  %v715_v35 = vld [vmem:[%s992_s1 + $0x108] ss:$16 sps:$4 sm:$0xff]  }
   0xd   :  { %v716_v36 = vld [vmem:[%s992_s1 + $0x124] ss:$16 sps:$4 sm:$0xff]   ;;  %v718_v37 = vld [vmem:[%s992_s1 + $0x12c] ss:$16 sps:$4 sm:$0xff]   ;;  %v720_v38 = vld [vmem:[%s992_s1 + $0x120] ss:$16 sps:$4 sm:$0xff]  }
   0xe   :  { %v721_v39 = vld [vmem:[%s992_s1 + $0x128] ss:$16 sps:$4 sm:$0xff]   ;;  %v722_v40 = vld [vmem:[%s992_s1 + $0x144] ss:$16 sps:$4 sm:$0xff]   ;;  %v724_v41 = vld [vmem:[%s992_s1 + $0x14c] ss:$16 sps:$4 sm:$0xff]  }
   0xf   :  { %428 = vmatpush1.bf16.msra.mxu0 %v684_v14  ;;  %469 = vmatpush1.bf16.msra.mxu1 %v685_v15  ;;  %v726_v42 = vld [vmem:[%s992_s1 + $0x140] ss:$16 sps:$4 sm:$0xff]   ;;  %v727_v43 = vld [vmem:[%s992_s1 + $0x148] ss:$16 sps:$4 sm:$0xff]   ;;  %v728_v44 = vld [vmem:[%s992_s1 + $0x164] ss:$16 sps:$4 sm:$0xff]  }
  0x10   :  { %429 = vmatprep.subr.bf16.mxu0 %v686_v16  ;;  %470 = vmatprep.subr.bf16.mxu1 %v688_v17  ;;  %v730_v45 = vld [vmem:[%s992_s1 + $0x16c] ss:$16 sps:$4 sm:$0xff]   ;;  %v29_v46 = vld [vmem:[%s993_s0] sm:$0xff]  ;;  %v733_v49 = vld [vmem:[%s992_s1 + $0x168] ss:$16 sps:$4 sm:$0xff]   ;;  %v521_v4 = vshrl.u32 %v520_v3, 7 }
  0x11   :  { %v593_v47 = vcombine.high %v29_v46, %v29_v46  ;;  %v732_v48 = vld [vmem:[%s992_s1 + $0x160] ss:$16 sps:$4 sm:$0xff]   ;;  %v734_v50 = vld [vmem:[%s992_s1 + $0x184] ss:$16 sps:$4 sm:$0xff]   ;;  %v736_v51 = vld [vmem:[%s992_s1 + $0x18c] ss:$16 sps:$4 sm:$0xff]   ;;  %v592_v2 = vcombine.low %v29_v46, %v29_v46 }
  0x12   :  { %v738_v52 = vld [vmem:[%s992_s1 + $0x180] ss:$16 sps:$4 sm:$0xff]   ;;  %v739_v53 = vld [vmem:[%s992_s1 + $0x188] ss:$16 sps:$4 sm:$0xff]   ;;  %v740_v54 = vld [vmem:[%s992_s1 + $0x1a4] ss:$16 sps:$4 sm:$0xff]  }
  0x13   :  { %430 = vmatpush1.bf16.msra.mxu0 %v690_v18  ;;  %471 = vmatpush1.bf16.msra.mxu1 %v691_v19  ;;  %v742_v55 = vld [vmem:[%s992_s1 + $0x1ac] ss:$16 sps:$4 sm:$0xff]   ;;  %v744_v56 = vld [vmem:[%s992_s1 + $0x1a0] ss:$16 sps:$4 sm:$0xff]   ;;  %v745_v57 = vld [vmem:[%s992_s1 + $0x1a8] ss:$16 sps:$4 sm:$0xff]  }
  0x14   :  { %431 = vmatprep.subr.bf16.mxu0 %v692_v20  ;;  %472 = vmatprep.subr.bf16.mxu1 %v694_v21  ;;  %v746_v58 = vld [vmem:[%s992_s1 + $0x1c4] ss:$16 sps:$4 sm:$0xff]   ;;  %v748_v59 = vld [vmem:[%s992_s1 + $0x1cc] ss:$16 sps:$4 sm:$0xff]   ;;  %v750_v60 = vld [vmem:[%s992_s1 + $0x1c0] ss:$16 sps:$4 sm:$0xff]  }
  0x15   :  { %453 = vmatprep.mubr.bf16.mxu0 %v593_v47  ;;  %494 = vmatprep.mubr.bf16.mxu1 %v593_v47  ;;  %v751_v61 = vld [vmem:[%s992_s1 + $0x1c8] ss:$16 sps:$4 sm:$0xff]   ;;  %v752_v62 = vld [vmem:[%s992_s1 + $0x1e4] ss:$16 sps:$4 sm:$0xff]   ;;  %v754_v63 = vld [vmem:[%s992_s1 + $0x1ec] ss:$16 sps:$4 sm:$0xff]  }
  0x16   :  { %v756_v0 = vld [vmem:[%s992_s1 + $0x1e0] ss:$16 sps:$4 sm:$0xff]   ;;  %v757_v1 = vld [vmem:[%s992_s1 + $0x1e8] ss:$16 sps:$4 sm:$0xff]   ;;  %v522_v5 = vsub.s32 0, %v521_v4  ;;  %v530_v6 = vsub.s32 2, %v521_v4 }
  0x17   :  { %432 = vmatpush1.bf16.msra.mxu0 %v696_v22  ;;  %473 = vmatpush1.bf16.msra.mxu1 %v697_v23  ;;  %v518_v7 = vld [vmem:[%s994_s2] sm:$0xf]  ;;  %v526_v8 = vsub.s32 1, %v521_v4  ;;  %v534_v9 = vsub.s32 3, %v521_v4 }
  0x18   :  { %433 = vmatprep.subr.bf16.mxu0 %v698_v24  ;;  %474 = vmatprep.subr.bf16.mxu1 %v700_v25  ;;  %v544_v10 = vld [vmem:[%s995_s3] sm:$0xf]  ;;  %v523_v11 = vrot.slane %v518_v7, %v522_v5  ;;  %v531_v12 = vrot.slane %v518_v7, %v530_v6 }
  0x19   :  { %v527_v13 = vrot.slane %v518_v7, %v526_v8  ;;  %v535_v14 = vrot.slane %v518_v7, %v534_v9  ;;  %v549_v15 = vrot.slane %v544_v10, %v522_v5  ;;  %v557_v16 = vrot.slane %v544_v10, %v530_v6 }
  0x1a   :  { %v553_v19 = vrot.slane %v544_v10, %v526_v8  ;;  %v561_v20 = vrot.slane %v544_v10, %v534_v9 }
  0x1b   :  { %434 = vmatpush1.bf16.msra.mxu0 %v702_v26  ;;  %475 = vmatpush1.bf16.msra.mxu1 %v703_v27 }
  0x1c   :  { %435 = vmatprep.subr.bf16.mxu0 %v704_v28  ;;  %476 = vmatprep.subr.bf16.mxu1 %v706_v29 }
  0x1f   :  { %436 = vmatpush1.bf16.msra.mxu0 %v708_v30  ;;  %477 = vmatpush1.bf16.msra.mxu1 %v709_v31 }
  0x20   :  { %437 = vmatprep.subr.bf16.mxu0 %v710_v32  ;;  %478 = vmatprep.subr.bf16.mxu1 %v712_v33 }
  0x23   :  { %438 = vmatpush1.bf16.msra.mxu0 %v714_v34  ;;  %479 = vmatpush1.bf16.msra.mxu1 %v715_v35 }
  0x24   :  { %439 = vmatprep.subr.bf16.mxu0 %v716_v36  ;;  %480 = vmatprep.subr.bf16.mxu1 %v718_v37 }
  0x27   :  { %440 = vmatpush1.bf16.msra.mxu0 %v720_v38  ;;  %481 = vmatpush1.bf16.msra.mxu1 %v721_v39 }
  0x28   :  { %441 = vmatprep.subr.bf16.mxu0 %v722_v40  ;;  %482 = vmatprep.subr.bf16.mxu1 %v724_v41 }
  0x2b   :  { %442 = vmatpush1.bf16.msra.mxu0 %v726_v42  ;;  %483 = vmatpush1.bf16.msra.mxu1 %v727_v43 }
  0x2c   :  { %443 = vmatprep.subr.bf16.mxu0 %v728_v44  ;;  %484 = vmatprep.subr.bf16.mxu1 %v730_v45 }
  0x2f   :  { %444 = vmatpush1.bf16.msra.mxu0 %v732_v48  ;;  %485 = vmatpush1.bf16.msra.mxu1 %v733_v49 }
  0x30   :  { %445 = vmatprep.subr.bf16.mxu0 %v734_v50  ;;  %486 = vmatprep.subr.bf16.mxu1 %v736_v51 }
  0x33   :  { %446 = vmatpush1.bf16.msra.mxu0 %v738_v52  ;;  %487 = vmatpush1.bf16.msra.mxu1 %v739_v53 }
  0x34   :  { %447 = vmatprep.subr.bf16.mxu0 %v740_v54  ;;  %488 = vmatprep.subr.bf16.mxu1 %v742_v55 }
  0x37   :  { %448 = vmatpush1.bf16.msra.mxu0 %v744_v56  ;;  %489 = vmatpush1.bf16.msra.mxu1 %v745_v57 }
  0x38   :  { %449 = vmatprep.subr.bf16.mxu0 %v746_v58  ;;  %490 = vmatprep.subr.bf16.mxu1 %v748_v59 }
  0x3b   :  { %450 = vmatpush1.bf16.msra.mxu0 %v750_v60  ;;  %491 = vmatpush1.bf16.msra.mxu1 %v751_v61 }
  0x3c   :  { %451 = vmatprep.subr.bf16.mxu0 %v752_v62  ;;  %492 = vmatprep.subr.bf16.mxu1 %v754_v63 }
  0x3f   :  { %452 = vmatpush1.bf16.msra.mxu0 %v756_v0  ;;  %493 = vmatpush1.bf16.msra.mxu1 %v757_v1 }
  0x42   :  { %454 = vmatmul.mubr.bf16.vlgmr.msra.gmra.mrb[0].mxu0 %v592_v2  ;;  %495 = vmatmul.mubr.bf16.vlgmr.msra.gmra.mrb[0].mxu1 %v592_v2 }
 0x115   :  { %v455_v17 = vpop.f32.mrb[0].mxu0  ;;  %v496_v18 = vpop.f32.mrb[0].mxu1 }
 0x116   :  { %v540_v21 = vmul.f32 %v523_v11, %v455_v17  ;;  %v542_v22 = vmul.f32 %v531_v12, %v496_v18  ;;  %v457_v23 = vpop.f32.mrb[1].mxu0  ;;  %v498_v24 = vpop.f32.mrb[1].mxu1 }
 0x117   :  { %v541_v25 = vmul.f32 %v527_v13, %v457_v23  ;;  %v543_v26 = vmul.f32 %v535_v14, %v498_v24  ;;  %v459_v27 = vpop.f32.mrb[2].mxu0  ;;  %v500_v28 = vpop.f32.mrb[2].mxu1 }
 0x118   :  { %v566_v29 = vadd.f32 %v549_v15, %v540_v21  ;;  %v568_v30 = vadd.f32 %v557_v16, %v542_v22  ;;  %v460_v31 = vpop.f32.mrb[3].mxu0  ;;  %v501_v32 = vpop.f32.mrb[3].mxu1 }
 0x119   :  { %v567_v33 = vadd.f32 %v553_v19, %v541_v25  ;;  %v569_v34 = vadd.f32 %v561_v20, %v543_v26 }
 0x11b   :  { %v660_v35 = vpack.c.bf16 %v567_v33, %v566_v29  ;;  %v661_v36 = vpack.c.bf16 %v569_v34, %v568_v30 }
 0x11d   :  { %586 = vst [vmem:[%s996_s4] sm:$0xff] %v660_v35  ;;  %587 = vst [vmem:[%s996_s4 + $0x8] sm:$0xff] %v661_v36 }

// kernel: resnet18_forward.20
= control target key start
LH: loop header
LB: loop body
LE: loop exit
PB: predicated region body
PF: predicated region fallthrough
CT: control target
= control target key end

     0   :  { %s3565_s15 = smov 0   ;;  %s3567_s16 = smov 0   ;;  %s3963_s0 = inlined_call_operand.vmem [shape: bf16[8,2304], index: 0, kind: input, shape index: {}]   ;;  %s3964_s1 = inlined_call_operand.vmem [shape: bf16[2304,512], index: 1, kind: input, shape index: {}]   ;;  %s3965_s2 = inlined_call_operand.vmem [shape: f32[1,512], index: 2, kind: input, shape index: {}]   ;;  %s3966_s3 = inlined_call_operand.vmem [shape: f32[1,512], index: 3, kind: input, shape index: {}]   ;;  %s3967_s4 = inlined_call_operand.vmem [shape: bf16[8,512], index: 4, kind: output, shape index: {}]  }
   0x1   :  { %s3569_s17 = smov 0  }
   0x2 LB: > { %s26_s18 = sadd.s32 1, %s3532_s16  ;;  %p2735_p0 = scmp.ge.s32.totalorder %s3536_s17, 1  ;;  %s3536_s17 = sphi %s3569_s17, %s14_s17   ;;  %s3532_s16 = sphi %s3567_s16, %s3969_s16   ;;  %s3528_s15 = sphi %s3565_s15, %s3968_s15  }
   0x3   : > { %p27_p1 = scmp.ge.s32.totalorder %s26_s18, 2  ;;  %p229_p2 = scmp.lt.s32.totalorder %s3536_s17, 3 }
   0x5   : > { %s3971_s18 = smov (%p27_p1, %s26_s18), 0  ;;  %p230_p3 = pnand %p2735_p0, %p229_p2 }
   0x6   : > { %s281_s19 = smul.u32 (!%p230_p3), 9, %s3528_s15  ;;  %p2739_p6 = scmp.ne.s32.totalorder (!%p230_p3), %s3528_s15, 0 }
   0x7   : > { %233 = sbr.rel (%p230_p3) target bundleno = 549 (0x225), region = 36 }
   0x8   : > { %s291_s20 = smul.u32 (!%p230_p3), 144, %s3528_s15  ;;  %p284_p4 = scmp.lt.s32.totalorder (!%p230_p3), %s281_s19, 17 }
   0xa   : > { %p293_p5 = scmp.lt.s32.totalorder (!%p230_p3), %s291_s20, 287 }
   0xe   : > { %s3973_s19 = smov (!%p284_p4, %s281_s19), 17  ;;  %s3975_s20 = smov (!%p293_p5, %s291_s20), 287 }
   0xf   : > { %s2736_s21 = sshll.u32 %s3973_s19, 2  ;;  %s3044_s25 = sshll.u32 %s3975_s20, 4  ;;  %v3538_v0 = vmov (!%p2739_p6), 0.0  }
  0x10   : > { %s3590_s24 = scalar_lea.vmem %s3963_s0, %s2736_s21  ;;  %s3595_s28 = scalar_lea.vmem %s3964_s1, %s3044_s25  ;;  %328 = vst [vmem:[#allocation2] sm:$0xff] (!%p2739_p6), %v3538_v0  ;;  %329 = vst [vmem:[#allocation2 + $0x8] sm:$0xff] (!%p2739_p6), %v3538_v0 }
  0x11   : > { %327 = sbr.rel (%p2739_p6) target bundleno = 24 (0x18), region = 40  ;;  %330 = vst [vmem:[#allocation2 + $0x10] sm:$0xff] (!%p2739_p6), %v3538_v0  ;;  %331 = vst [vmem:[#allocation2 + $0x18] sm:$0xff] (!%p2739_p6), %v3538_v0 }
  0x18 PF: > { %v3073_v1 = vld [vmem:[%s3595_s28 + $0x4] ss:$16 sps:$4 sm:$0xff]   ;;  %v3077_v3 = vld [vmem:[%s3595_s28] ss:$16 sps:$4 sm:$0xff]   ;;  %v337_v49 = vld [vmem:[%s3590_s24 + $0x8] sm:$0xff]  ;;  %p3037_p7 = scmp.ne.s32.totalorder %s3528_s15, 1 }
  0x19   : > { %v3075_v2 = vld [vmem:[%s3595_s28 + $0x204] ss:$16 sps:$4 sm:$0xff]   ;;  %2101 = vmatprep.subr.bf16.mxu0 %v3073_v1  ;;  %v3078_v4 = vld [vmem:[%s3595_s28 + $0x200] ss:$16 sps:$4 sm:$0xff]   ;;  %v3650_v52 = vcombine.high %v337_v49, %v337_v49 }
  0x1a   : > { %2142 = vmatprep.subr.bf16.mxu1 %v3075_v2  ;;  %v3079_v5 = vld [vmem:[%s3595_s28 + $0x24] ss:$16 sps:$4 sm:$0xff]   ;;  %2102 = vmatpush1.bf16.msra.mxu0 %v3077_v3  ;;  %v3083_v7 = vld [vmem:[%s3595_s28 + $0x20] ss:$16 sps:$4 sm:$0xff]  }
  0x1b   : > { %2143 = vmatpush1.bf16.msra.mxu1 %v3078_v4  ;;  %v3081_v6 = vld [vmem:[%s3595_s28 + $0x224] ss:$16 sps:$4 sm:$0xff]   ;;  %2103 = vmatprep.subr.bf16.mxu0 %v3079_v5  ;;  %v3084_v8 = vld [vmem:[%s3595_s28 + $0x220] ss:$16 sps:$4 sm:$0xff]  }
  0x1c   : > { %2144 = vmatprep.subr.bf16.mxu1 %v3081_v6  ;;  %v3085_v9 = vld [vmem:[%s3595_s28 + $0x44] ss:$16 sps:$4 sm:$0xff]   ;;  %v3089_v11 = vld [vmem:[%s3595_s28 + $0x40] ss:$16 sps:$4 sm:$0xff]   ;;  %2174 = vmatprep.mubr.bf16.mxu1 %v3650_v52 }
  0x1d   : > { %v3087_v10 = vld [vmem:[%s3595_s28 + $0x244] ss:$16 sps:$4 sm:$0xff]   ;;  %v3090_v12 = vld [vmem:[%s3595_s28 + $0x240] ss:$16 sps:$4 sm:$0xff]  }
  0x1e   : > { %2104 = vmatpush1.bf16.msra.mxu0 %v3083_v7  ;;  %v3091_v13 = vld [vmem:[%s3595_s28 + $0x64] ss:$16 sps:$4 sm:$0xff]   ;;  %v3095_v15 = vld [vmem:[%s3595_s28 + $0x60] ss:$16 sps:$4 sm:$0xff]  }
  0x1f   : > { %2145 = vmatpush1.bf16.msra.mxu1 %v3084_v8  ;;  %2105 = vmatprep.subr.bf16.mxu0 %v3085_v9  ;;  %v3093_v14 = vld [vmem:[%s3595_s28 + $0x264] ss:$16 sps:$4 sm:$0xff]   ;;  %v3096_v16 = vld [vmem:[%s3595_s28 + $0x260] ss:$16 sps:$4 sm:$0xff]   ;;  %v3674_v8 = vcombine.low %v337_v49, %v337_v49 }
  0x20   : > { %2146 = vmatprep.subr.bf16.mxu1 %v3087_v10  ;;  %v3097_v17 = vld [vmem:[%s3595_s28 + $0x84] ss:$16 sps:$4 sm:$0xff]   ;;  %v3101_v19 = vld [vmem:[%s3595_s28 + $0x80] ss:$16 sps:$4 sm:$0xff]  }
  0x21   : > { %v3099_v18 = vld [vmem:[%s3595_s28 + $0x284] ss:$16 sps:$4 sm:$0xff]   ;;  %v3102_v20 = vld [vmem:[%s3595_s28 + $0x280] ss:$16 sps:$4 sm:$0xff]  }
  0x22   : > { %2106 = vmatpush1.bf16.msra.mxu0 %v3089_v11  ;;  %v3103_v21 = vld [vmem:[%s3595_s28 + $0xa4] ss:$16 sps:$4 sm:$0xff]   ;;  %v3107_v23 = vld [vmem:[%s3595_s28 + $0xa0] ss:$16 sps:$4 sm:$0xff]  }
  0x23   : > { %2147 = vmatpush1.bf16.msra.mxu1 %v3090_v12  ;;  %2107 = vmatprep.subr.bf16.mxu0 %v3091_v13  ;;  %v3105_v22 = vld [vmem:[%s3595_s28 + $0x2a4] ss:$16 sps:$4 sm:$0xff]   ;;  %v3108_v24 = vld [vmem:[%s3595_s28 + $0x2a0] ss:$16 sps:$4 sm:$0xff]  }
  0x24   : > { %2148 = vmatprep.subr.bf16.mxu1 %v3093_v14  ;;  %v3109_v25 = vld [vmem:[%s3595_s28 + $0xc4] ss:$16 sps:$4 sm:$0xff]   ;;  %v3113_v27 = vld [vmem:[%s3595_s28 + $0xc0] ss:$16 sps:$4 sm:$0xff]  }
  0x25   : > { %v3111_v26 = vld [vmem:[%s3595_s28 + $0x2c4] ss:$16 sps:$4 sm:$0xff]   ;;  %v3114_v28 = vld [vmem:[%s3595_s28 + $0x2c0] ss:$16 sps:$4 sm:$0xff]  }
  0x26   : > { %2108 = vmatpush1.bf16.msra.mxu0 %v3095_v15  ;;  %v3115_v29 = vld [vmem:[%s3595_s28 + $0xe4] ss:$16 sps:$4 sm:$0xff]   ;;  %v3119_v31 = vld [vmem:[%s3595_s28 + $0xe0] ss:$16 sps:$4 sm:$0xff]  }
  0x27   : > { %2149 = vmatpush1.bf16.msra.mxu1 %v3096_v16  ;;  %2109 = vmatprep.subr.bf16.mxu0 %v3097_v17  ;;  %v3117_v30 = vld [vmem:[%s3595_s28 + $0x2e4] ss:$16 sps:$4 sm:$0xff]   ;;  %v3120_v32 = vld [vmem:[%s3595_s28 + $0x2e0] ss:$16 sps:$4 sm:$0xff]  }
  0x28   : > { %2150 = vmatprep.subr.bf16.mxu1 %v3099_v18  ;;  %v3121_v33 = vld [vmem:[%s3595_s28 + $0x104] ss:$16 sps:$4 sm:$0xff]   ;;  %v3125_v35 = vld [vmem:[%s3595_s28 + $0x100] ss:$16 sps:$4 sm:$0xff]  }
  0x29   : > { %v3123_v34 = vld [vmem:[%s3595_s28 + $0x304] ss:$16 sps:$4 sm:$0xff]   ;;  %v3126_v36 = vld [vmem:[%s3595_s28 + $0x300] ss:$16 sps:$4 sm:$0xff]  }
  0x2a   : > { %2110 = vmatpush1.bf16.msra.mxu0 %v3101_v19  ;;  %v3127_v37 = vld [vmem:[%s3595_s28 + $0x124] ss:$16 sps:$4 sm:$0xff]   ;;  %v3131_v39 = vld [vmem:[%s3595_s28 + $0x120] ss:$16 sps:$4 sm:$0xff]  }
  0x2b   : > { %2151 = vmatpush1.bf16.msra.mxu1 %v3102_v20  ;;  %2111 = vmatprep.subr.bf16.mxu0 %v3103_v21  ;;  %v3129_v38 = vld [vmem:[%s3595_s28 + $0x324] ss:$16 sps:$4 sm:$0xff]   ;;  %v3132_v40 = vld [vmem:[%s3595_s28 + $0x320] ss:$16 sps:$4 sm:$0xff]  }
  0x2c   : > { %2152 = vmatprep.subr.bf16.mxu1 %v3105_v22  ;;  %v3133_v41 = vld [vmem:[%s3595_s28 + $0x144] ss:$16 sps:$4 sm:$0xff]   ;;  %v3137_v43 = vld [vmem:[%s3595_s28 + $0x140] ss:$16 sps:$4 sm:$0xff]  }
  0x2d   : > { %v3135_v42 = vld [vmem:[%s3595_s28 + $0x344] ss:$16 sps:$4 sm:$0xff]   ;;  %v3138_v44 = vld [vmem:[%s3595_s28 + $0x340] ss:$16 sps:$4 sm:$0xff]  }
  0x2e   : > { %2112 = vmatpush1.bf16.msra.mxu0 %v3107_v23  ;;  %v3139_v45 = vld [vmem:[%s3595_s28 + $0x164] ss:$16 sps:$4 sm:$0xff]   ;;  %v3143_v50 = vld [vmem:[%s3595_s28 + $0x160] ss:$16 sps:$4 sm:$0xff]  }
  0x2f   : > { %2153 = vmatpush1.bf16.msra.mxu1 %v3108_v24  ;;  %2113 = vmatprep.subr.bf16.mxu0 %v3109_v25  ;;  %v3141_v46 = vld [vmem:[%s3595_s28 + $0x364] ss:$16 sps:$4 sm:$0xff]   ;;  %v3144_v51 = vld [vmem:[%s3595_s28 + $0x360] ss:$16 sps:$4 sm:$0xff]  }
  0x30   : > { %2154 = vmatprep.subr.bf16.mxu1 %v3111_v26  ;;  %v336_v47 = vld [vmem:[%s3590_s24] sm:$0xff] }
  0x31   : > { %v3645_v48 = vcombine.high %v336_v47, %v336_v47  ;;  %v3145_v53 = vld [vmem:[%s3595_s28 + $0x184] ss:$16 sps:$4 sm:$0xff]   ;;  %v3149_v55 = vld [vmem:[%s3595_s28 + $0x180] ss:$16 sps:$4 sm:$0xff]   ;;  %v3672_v7 = vcombine.low %v336_v47, %v336_v47 }
  0x32   : > { %2114 = vmatpush1.bf16.msra.mxu0 %v3113_v27  ;;  %v3147_v54 = vld [vmem:[%s3595_s28 + $0x384] ss:$16 sps:$4 sm:$0xff]   ;;  %v3150_v56 = vld [vmem:[%s3595_s28 + $0x380] ss:$16 sps:$4 sm:$0xff]  }
  0x33   : > { %2155 = vmatpush1.bf16.msra.mxu1 %v3114_v28  ;;  %2115 = vmatprep.subr.bf16.mxu0 %v3115_v29  ;;  %v3151_v57 = vld [vmem:[%s3595_s28 + $0x1a4] ss:$16 sps:$4 sm:$0xff]   ;;  %v3155_v59 = vld [vmem:[%s3595_s28 + $0x1a0] ss:$16 sps:$4 sm:$0xff]  }
  0x34   : > { %2156 = vmatprep.subr.bf16.mxu1 %v3117_v30  ;;  %2133 = vmatprep.mubr.bf16.mxu0 %v3645_v48  ;;  %v3153_v58 = vld [vmem:[%s3595_s28 + $0x3a4] ss:$16 sps:$4 sm:$0xff]   ;;  %v3156_v60 = vld [vmem:[%s3595_s28 + $0x3a0] ss:$16 sps:$4 sm:$0xff]  }
  0x35   : > { %v3157_v61 = vld [vmem:[%s3595_s28 + $0x1c4] ss:$16 sps:$4 sm:$0xff]   ;;  %v3161_v63 = vld [vmem:[%s3595_s28 + $0x1c0] ss:$16 sps:$4 sm:$0xff]  }
  0x36   : > { %2116 = vmatpush1.bf16.msra.mxu0 %v3119_v31  ;;  %v3159_v62 = vld [vmem:[%s3595_s28 + $0x3c4] ss:$16 sps:$4 sm:$0xff]   ;;  %v3162_v0 = vld [vmem:[%s3595_s28 + $0x3c0] ss:$16 sps:$4 sm:$0xff]  }
  0x37   : > { %2157 = vmatpush1.bf16.msra.mxu1 %v3120_v32  ;;  %2117 = vmatprep.subr.bf16.mxu0 %v3121_v33  ;;  %v3163_v1 = vld [vmem:[%s3595_s28 + $0x1e4] ss:$16 sps:$4 sm:$0xff]   ;;  %v3167_v3 = vld [vmem:[%s3595_s28 + $0x1e0] ss:$16 sps:$4 sm:$0xff]  }
  0x38   : > { %2158 = vmatprep.subr.bf16.mxu1 %v3123_v34  ;;  %v3165_v2 = vld [vmem:[%s3595_s28 + $0x3e4] ss:$16 sps:$4 sm:$0xff]   ;;  %v3168_v4 = vld [vmem:[%s3595_s28 + $0x3e0] ss:$16 sps:$4 sm:$0xff]   ;;  %v3706_v34 = vld [vmem:[%s3590_s24 + $0x18] sm:$0xff] }
  0x39   : > { %v3175_v5 = vld [vmem:[%s3595_s28 + $0x404] ss:$16 sps:$4 sm:$0xff]   ;;  %v3173_v9 = vld [vmem:[%s3595_s28 + $0x400] ss:$16 sps:$4 sm:$0xff]  }
  0x3a   : > { %2118 = vmatpush1.bf16.msra.mxu0 %v3125_v35  ;;  %v3178_v6 = vld [vmem:[%s3595_s28 + $0x604] ss:$16 sps:$4 sm:$0xff]   ;;  %v3176_v10 = vld [vmem:[%s3595_s28 + $0x600] ss:$16 sps:$4 sm:$0xff]  }
  0x3b   : > { %2159 = vmatpush1.bf16.msra.mxu1 %v3126_v36  ;;  %2119 = vmatprep.subr.bf16.mxu0 %v3127_v37  ;;  %v3181_v11 = vld [vmem:[%s3595_s28 + $0x424] ss:$16 sps:$4 sm:$0xff]   ;;  %v3179_v13 = vld [vmem:[%s3595_s28 + $0x420] ss:$16 sps:$4 sm:$0xff]  }
  0x3c   : > { %2160 = vmatprep.subr.bf16.mxu1 %v3129_v38  ;;  %v3184_v12 = vld [vmem:[%s3595_s28 + $0x624] ss:$16 sps:$4 sm:$0xff]   ;;  %v3182_v14 = vld [vmem:[%s3595_s28 + $0x620] ss:$16 sps:$4 sm:$0xff]   ;;  %v3716_v38 = vcombine.high %v3706_v34, %v3706_v34 }
  0x3d   : > { %v3187_v15 = vld [vmem:[%s3595_s28 + $0x444] ss:$16 sps:$4 sm:$0xff]   ;;  %v3185_v17 = vld [vmem:[%s3595_s28 + $0x440] ss:$16 sps:$4 sm:$0xff]  }
  0x3e   : > { %2120 = vmatpush1.bf16.msra.mxu0 %v3131_v39  ;;  %v3190_v16 = vld [vmem:[%s3595_s28 + $0x644] ss:$16 sps:$4 sm:$0xff]   ;;  %v3188_v18 = vld [vmem:[%s3595_s28 + $0x640] ss:$16 sps:$4 sm:$0xff]  }
  0x3f   : > { %2161 = vmatpush1.bf16.msra.mxu1 %v3132_v40  ;;  %2121 = vmatprep.subr.bf16.mxu0 %v3133_v41  ;;  %v3193_v19 = vld [vmem:[%s3595_s28 + $0x464] ss:$16 sps:$4 sm:$0xff]   ;;  %v3191_v21 = vld [vmem:[%s3595_s28 + $0x460] ss:$16 sps:$4 sm:$0xff]  }
  0x40   : > { %2162 = vmatprep.subr.bf16.mxu1 %v3135_v42  ;;  %v3196_v20 = vld [vmem:[%s3595_s28 + $0x664] ss:$16 sps:$4 sm:$0xff]   ;;  %v3194_v22 = vld [vmem:[%s3595_s28 + $0x660] ss:$16 sps:$4 sm:$0xff]  }
  0x41   : > { %v3199_v23 = vld [vmem:[%s3595_s28 + $0x484] ss:$16 sps:$4 sm:$0xff]   ;;  %v3197_v25 = vld [vmem:[%s3595_s28 + $0x480] ss:$16 sps:$4 sm:$0xff]  }
  0x42   : > { %2122 = vmatpush1.bf16.msra.mxu0 %v3137_v43  ;;  %v3202_v24 = vld [vmem:[%s3595_s28 + $0x684] ss:$16 sps:$4 sm:$0xff]   ;;  %v3200_v26 = vld [vmem:[%s3595_s28 + $0x680] ss:$16 sps:$4 sm:$0xff]  }
  0x43   : > { %2163 = vmatpush1.bf16.msra.mxu1 %v3138_v44  ;;  %2123 = vmatprep.subr.bf16.mxu0 %v3139_v45  ;;  %v3205_v27 = vld [vmem:[%s3595_s28 + $0x4a4] ss:$16 sps:$4 sm:$0xff]   ;;  %v3203_v29 = vld [vmem:[%s3595_s28 + $0x4a0] ss:$16 sps:$4 sm:$0xff]  }
  0x44   : > { %2164 = vmatprep.subr.bf16.mxu1 %v3141_v46  ;;  %v3208_v28 = vld [vmem:[%s3595_s28 + $0x6a4] ss:$16 sps:$4 sm:$0xff]   ;;  %v3206_v30 = vld [vmem:[%s3595_s28 + $0x6a0] ss:$16 sps:$4 sm:$0xff]  }
  0x45   : > { %v3211_v31 = vld [vmem:[%s3595_s28 + $0x4c4] ss:$16 sps:$4 sm:$0xff]   ;;  %v3209_v35 = vld [vmem:[%s3595_s28 + $0x4c0] ss:$16 sps:$4 sm:$0xff]  }
  0x46   : > { %2124 = vmatpush1.bf16.msra.mxu0 %v3143_v50  ;;  %v3214_v32 = vld [vmem:[%s3595_s28 + $0x6c4] ss:$16 sps:$4 sm:$0xff]   ;;  %v3212_v36 = vld [vmem:[%s3595_s28 + $0x6c0] ss:$16 sps:$4 sm:$0xff]  }
  0x47   : > { %2165 = vmatpush1.bf16.msra.mxu1 %v3144_v51  ;;  %2125 = vmatprep.subr.bf16.mxu0 %v3145_v53  ;;  %v3703_v33 = vld [vmem:[%s3590_s24 + $0x10] sm:$0xff] }
  0x48   : > { %2166 = vmatprep.subr.bf16.mxu1 %v3147_v54  ;;  %v3712_v37 = vcombine.high %v3703_v33, %v3703_v33  ;;  %v3217_v39 = vld [vmem:[%s3595_s28 + $0x4e4] ss:$16 sps:$4 sm:$0xff]   ;;  %v3215_v41 = vld [vmem:[%s3595_s28 + $0x4e0] ss:$16 sps:$4 sm:$0xff]  }
  0x49   : > { %v3220_v40 = vld [vmem:[%s3595_s28 + $0x6e4] ss:$16 sps:$4 sm:$0xff]   ;;  %v3218_v42 = vld [vmem:[%s3595_s28 + $0x6e0] ss:$16 sps:$4 sm:$0xff]  }
  0x4a   : > { %2126 = vmatpush1.bf16.msra.mxu0 %v3149_v55  ;;  %v3223_v43 = vld [vmem:[%s3595_s28 + $0x504] ss:$16 sps:$4 sm:$0xff]   ;;  %v3221_v45 = vld [vmem:[%s3595_s28 + $0x500] ss:$16 sps:$4 sm:$0xff]  }
  0x4b   : > { %2167 = vmatpush1.bf16.msra.mxu1 %v3150_v56  ;;  %2127 = vmatprep.subr.bf16.mxu0 %v3151_v57  ;;  %v3226_v44 = vld [vmem:[%s3595_s28 + $0x704] ss:$16 sps:$4 sm:$0xff]   ;;  %v3224_v46 = vld [vmem:[%s3595_s28 + $0x700] ss:$16 sps:$4 sm:$0xff]  }
  0x4c   : > { %2168 = vmatprep.subr.bf16.mxu1 %v3153_v58  ;;  %v3229_v47 = vld [vmem:[%s3595_s28 + $0x524] ss:$16 sps:$4 sm:$0xff]   ;;  %v3227_v50 = vld [vmem:[%s3595_s28 + $0x520] ss:$16 sps:$4 sm:$0xff]  }
  0x4d   : > { %v3232_v49 = vld [vmem:[%s3595_s28 + $0x724] ss:$16 sps:$4 sm:$0xff]   ;;  %v3230_v51 = vld [vmem:[%s3595_s28 + $0x720] ss:$16 sps:$4 sm:$0xff]  }
  0x4e   : > { %2128 = vmatpush1.bf16.msra.mxu0 %v3155_v59  ;;  %v3235_v53 = vld [vmem:[%s3595_s28 + $0x544] ss:$16 sps:$4 sm:$0xff]   ;;  %v3233_v55 = vld [vmem:[%s3595_s28 + $0x540] ss:$16 sps:$4 sm:$0xff]  }
  0x4f   : > { %2169 = vmatpush1.bf16.msra.mxu1 %v3156_v60  ;;  %2129 = vmatprep.subr.bf16.mxu0 %v3157_v61  ;;  %v3238_v54 = vld [vmem:[%s3595_s28 + $0x744] ss:$16 sps:$4 sm:$0xff]   ;;  %v3236_v56 = vld [vmem:[%s3595_s28 + $0x740] ss:$16 sps:$4 sm:$0xff]  }
  0x50   : > { %2170 = vmatprep.subr.bf16.mxu1 %v3159_v62  ;;  %v3241_v57 = vld [vmem:[%s3595_s28 + $0x564] ss:$16 sps:$4 sm:$0xff]   ;;  %v3239_v59 = vld [vmem:[%s3595_s28 + $0x560] ss:$16 sps:$4 sm:$0xff]  }
  0x51   : > { %v3244_v58 = vld [vmem:[%s3595_s28 + $0x764] ss:$16 sps:$4 sm:$0xff]   ;;  %v3242_v60 = vld [vmem:[%s3595_s28 + $0x760] ss:$16 sps:$4 sm:$0xff]  }
  0x52   : > { %2130 = vmatpush1.bf16.msra.mxu0 %v3161_v63  ;;  %v3247_v61 = vld [vmem:[%s3595_s28 + $0x584] ss:$16 sps:$4 sm:$0xff]   ;;  %v3245_v63 = vld [vmem:[%s3595_s28 + $0x580] ss:$16 sps:$4 sm:$0xff]  }
  0x53   : > { %2171 = vmatpush1.bf16.msra.mxu1 %v3162_v0  ;;  %2131 = vmatprep.subr.bf16.mxu0 %v3163_v1  ;;  %v3250_v62 = vld [vmem:[%s3595_s28 + $0x784] ss:$16 sps:$4 sm:$0xff]   ;;  %v3248_v0 = vld [vmem:[%s3595_s28 + $0x780] ss:$16 sps:$4 sm:$0xff]  }
  0x54   : > { %2172 = vmatprep.subr.bf16.mxu1 %v3165_v2  ;;  %v3253_v1 = vld [vmem:[%s3595_s28 + $0x5a4] ss:$16 sps:$4 sm:$0xff]  }
  0x55   : > { %v3256_v2 = vld [vmem:[%s3595_s28 + $0x7a4] ss:$16 sps:$4 sm:$0xff]  }
  0x56   : > { %2132 = vmatpush1.bf16.msra.mxu0 %v3167_v3  ;;  %v3251_v3 = vld [vmem:[%s3595_s28 + $0x5a0] ss:$16 sps:$4 sm:$0xff]  }
  0x57   : > { %2173 = vmatpush1.bf16.msra.mxu1 %v3168_v4  ;;  %2183 = vmatprep.subr.bf16.mxu0 %v3175_v5  ;;  %v3254_v4 = vld [vmem:[%s3595_s28 + $0x7a0] ss:$16 sps:$4 sm:$0xff]   ;;  %v3259_v5 = vld [vmem:[%s3595_s28 + $0x5c4] ss:$16 sps:$4 sm:$0xff]  }
  0x58   : > { %2224 = vmatprep.subr.bf16.mxu1 %v3178_v6  ;;  %v3262_v6 = vld [vmem:[%s3595_s28 + $0x7c4] ss:$16 sps:$4 sm:$0xff]  }
  0x59   : > { %2134 = vmatmul.mubr.bf16.vlgmr.msra.gmra.mrb[0].mxu0 %v3672_v7 }
  0x5a   : > { %2175 = vmatmul.mubr.bf16.vlgmr.msra.gmra.mrb[0].mxu1 %v3674_v8  ;;  %2184 = vmatpush1.bf16.msra.mxu0 %v3173_v9  ;;  %v3257_v9 = vld [vmem:[%s3595_s28 + $0x5c0] ss:$16 sps:$4 sm:$0xff]  }
  0x5b   : > { %2225 = vmatpush1.bf16.msra.mxu1 %v3176_v10  ;;  %2185 = vmatprep.subr.bf16.mxu0 %v3181_v11  ;;  %v3260_v10 = vld [vmem:[%s3595_s28 + $0x7c0] ss:$16 sps:$4 sm:$0xff]   ;;  %v3265_v11 = vld [vmem:[%s3595_s28 + $0x5e4] ss:$16 sps:$4 sm:$0xff]  }
  0x5c   : > { %2226 = vmatprep.subr.bf16.mxu1 %v3184_v12  ;;  %2215 = vmatprep.mubr.bf16.mxu0 %v3712_v37  ;;  %v3268_v12 = vld [vmem:[%s3595_s28 + $0x7e4] ss:$16 sps:$4 sm:$0xff]  }
  0x5d   : > { %2256 = vmatprep.mubr.bf16.mxu1 %v3716_v38 }
  0x5e   : > { %2186 = vmatpush1.bf16.msra.mxu0 %v3179_v13  ;;  %v3263_v13 = vld [vmem:[%s3595_s28 + $0x5e0] ss:$16 sps:$4 sm:$0xff]  }
  0x5f   : > { %2227 = vmatpush1.bf16.msra.mxu1 %v3182_v14  ;;  %2187 = vmatprep.subr.bf16.mxu0 %v3187_v15  ;;  %v3266_v14 = vld [vmem:[%s3595_s28 + $0x7e0] ss:$16 sps:$4 sm:$0xff]   ;;  %v3275_v15 = vld [vmem:[%s3595_s28 + $0x804] ss:$16 sps:$4 sm:$0xff]  }
  0x60   : > { %2228 = vmatprep.subr.bf16.mxu1 %v3190_v16  ;;  %v3278_v16 = vld [vmem:[%s3595_s28 + $0xc] ss:$16 sps:$4 sm:$0xff]  }
  0x62   : > { %2188 = vmatpush1.bf16.msra.mxu0 %v3185_v17  ;;  %v3760_v17 = vcombine.low %v3703_v33, %v3703_v33  ;;  %v3294_v33 = vld [vmem:[%s3595_s28 + $0x68] ss:$16 sps:$4 sm:$0xff]  }
  0x63   : > { %2229 = vmatpush1.bf16.msra.mxu1 %v3188_v18  ;;  %2189 = vmatprep.subr.bf16.mxu0 %v3193_v19  ;;  %v3764_v18 = vcombine.low %v3706_v34, %v3706_v34  ;;  %v3273_v19 = vld [vmem:[%s3595_s28 + $0x800] ss:$16 sps:$4 sm:$0xff]   ;;  %v3302_v34 = vld [vmem:[%s3595_s28 + $0x8c] ss:$16 sps:$4 sm:$0xff]  }
  0x64   : > { %2230 = vmatprep.subr.bf16.mxu1 %v3196_v20  ;;  %v3276_v20 = vld [vmem:[%s3595_s28 + $0x8] ss:$16 sps:$4 sm:$0xff]  }
  0x66   : > { %2190 = vmatpush1.bf16.msra.mxu0 %v3191_v21  ;;  %v3281_v21 = vld [vmem:[%s3595_s28 + $0x824] ss:$16 sps:$4 sm:$0xff]  }
  0x67   : > { %2231 = vmatpush1.bf16.msra.mxu1 %v3194_v22  ;;  %2191 = vmatprep.subr.bf16.mxu0 %v3199_v23  ;;  %v3284_v22 = vld [vmem:[%s3595_s28 + $0x2c] ss:$16 sps:$4 sm:$0xff]   ;;  %v3279_v23 = vld [vmem:[%s3595_s28 + $0x820] ss:$16 sps:$4 sm:$0xff]  }
  0x68   : > { %2232 = vmatprep.subr.bf16.mxu1 %v3202_v24  ;;  %v3282_v24 = vld [vmem:[%s3595_s28 + $0x28] ss:$16 sps:$4 sm:$0xff]  }
  0x6a   : > { %2192 = vmatpush1.bf16.msra.mxu0 %v3197_v25  ;;  %v3287_v25 = vld [vmem:[%s3595_s28 + $0x844] ss:$16 sps:$4 sm:$0xff]  }
  0x6b   : > { %2233 = vmatpush1.bf16.msra.mxu1 %v3200_v26  ;;  %2193 = vmatprep.subr.bf16.mxu0 %v3205_v27  ;;  %v3290_v26 = vld [vmem:[%s3595_s28 + $0x4c] ss:$16 sps:$4 sm:$0xff]   ;;  %v3539_v27 = vmov 0  }
  0x6c   : > { %2234 = vmatprep.subr.bf16.mxu1 %v3208_v28  ;;  %v3285_v28 = vld [vmem:[%s3595_s28 + $0x840] ss:$16 sps:$4 sm:$0xff]  }
  0x6e   : > { %2194 = vmatpush1.bf16.msra.mxu0 %v3203_v29  ;;  %v3288_v29 = vld [vmem:[%s3595_s28 + $0x48] ss:$16 sps:$4 sm:$0xff]  }
  0x6f   : > { %2235 = vmatpush1.bf16.msra.mxu1 %v3206_v30  ;;  %2195 = vmatprep.subr.bf16.mxu0 %v3211_v31  ;;  %v3293_v30 = vld [vmem:[%s3595_s28 + $0x864] ss:$16 sps:$4 sm:$0xff]   ;;  %v3296_v31 = vld [vmem:[%s3595_s28 + $0x6c] ss:$16 sps:$4 sm:$0xff]  }
  0x70   : > { %2236 = vmatprep.subr.bf16.mxu1 %v3214_v32  ;;  %v3291_v32 = vld [vmem:[%s3595_s28 + $0x860] ss:$16 sps:$4 sm:$0xff]  }
  0x72   : > { %2196 = vmatpush1.bf16.msra.mxu0 %v3209_v35  ;;  %v3297_v35 = vld [vmem:[%s3595_s28 + $0x880] ss:$16 sps:$4 sm:$0xff]  }
  0x73   : > { %2237 = vmatpush1.bf16.msra.mxu1 %v3212_v36  ;;  %2197 = vmatprep.subr.bf16.mxu0 %v3217_v39  ;;  %v3300_v36 = vld [vmem:[%s3595_s28 + $0x88] ss:$16 sps:$4 sm:$0xff]   ;;  %v3305_v39 = vld [vmem:[%s3595_s28 + $0x8a4] ss:$16 sps:$4 sm:$0xff]  }
  0x74   : > { %2238 = vmatprep.subr.bf16.mxu1 %v3220_v40  ;;  %v3308_v40 = vld [vmem:[%s3595_s28 + $0xac] ss:$16 sps:$4 sm:$0xff]  }
  0x76   : > { %2198 = vmatpush1.bf16.msra.mxu0 %v3215_v41  ;;  %v3303_v41 = vld [vmem:[%s3595_s28 + $0x8a0] ss:$16 sps:$4 sm:$0xff]  }
  0x77   : > { %2239 = vmatpush1.bf16.msra.mxu1 %v3218_v42  ;;  %2199 = vmatprep.subr.bf16.mxu0 %v3223_v43  ;;  %v3306_v42 = vld [vmem:[%s3595_s28 + $0xa8] ss:$16 sps:$4 sm:$0xff]   ;;  %v3311_v43 = vld [vmem:[%s3595_s28 + $0x8c4] ss:$16 sps:$4 sm:$0xff]  }
  0x78   : > { %2240 = vmatprep.subr.bf16.mxu1 %v3226_v44  ;;  %v3314_v44 = vld [vmem:[%s3595_s28 + $0xcc] ss:$16 sps:$4 sm:$0xff]  }
  0x7a   : > { %2200 = vmatpush1.bf16.msra.mxu0 %v3221_v45  ;;  %v3309_v45 = vld [vmem:[%s3595_s28 + $0x8c0] ss:$16 sps:$4 sm:$0xff]  }
  0x7b   : > { %2241 = vmatpush1.bf16.msra.mxu1 %v3224_v46  ;;  %2201 = vmatprep.subr.bf16.mxu0 %v3229_v47  ;;  %v3312_v46 = vld [vmem:[%s3595_s28 + $0xc8] ss:$16 sps:$4 sm:$0xff]   ;;  %v3317_v47 = vld [vmem:[%s3595_s28 + $0x8e4] ss:$16 sps:$4 sm:$0xff]  }
  0x7c   : > { %2242 = vmatprep.subr.bf16.mxu1 %v3232_v49  ;;  %v3320_v49 = vld [vmem:[%s3595_s28 + $0xec] ss:$16 sps:$4 sm:$0xff]  }
  0x7e   : > { %2202 = vmatpush1.bf16.msra.mxu0 %v3227_v50  ;;  %v3315_v50 = vld [vmem:[%s3595_s28 + $0x8e0] ss:$16 sps:$4 sm:$0xff]  }
  0x7f   : > { %2243 = vmatpush1.bf16.msra.mxu1 %v3230_v51  ;;  %2203 = vmatprep.subr.bf16.mxu0 %v3235_v53  ;;  %v3318_v51 = vld [vmem:[%s3595_s28 + $0xe8] ss:$16 sps:$4 sm:$0xff]   ;;  %v3324_v53 = vld [vmem:[%s3595_s28 + $0x10c] ss:$16 sps:$4 sm:$0xff]  }
  0x80   : > { %2244 = vmatprep.subr.bf16.mxu1 %v3238_v54  ;;  %v3327_v54 = vld [vmem:[%s3595_s28 + $0x20c] ss:$16 sps:$4 sm:$0xff]  }
  0x82   : > { %2204 = vmatpush1.bf16.msra.mxu0 %v3233_v55  ;;  %v3803_v55 = vld [vmem:[%s3590_s24 + $0x20] ss:$0 sps:$4 sm:$0xff]  }
  0x83   : > { %2245 = vmatpush1.bf16.msra.mxu1 %v3236_v56  ;;  %2205 = vmatprep.subr.bf16.mxu0 %v3241_v57  ;;  %v3322_v56 = vld [vmem:[%s3595_s28 + $0x108] ss:$16 sps:$4 sm:$0xff]  }
  0x84   : > { %2246 = vmatprep.subr.bf16.mxu1 %v3244_v58  ;;  %v3325_v57 = vld [vmem:[%s3595_s28 + $0x208] ss:$16 sps:$4 sm:$0xff]   ;;  %v3330_v58 = vld [vmem:[%s3595_s28 + $0x12c] ss:$16 sps:$4 sm:$0xff]  }
  0x86   : > { %2206 = vmatpush1.bf16.msra.mxu0 %v3239_v59  ;;  %v3333_v59 = vld [vmem:[%s3595_s28 + $0x22c] ss:$16 sps:$4 sm:$0xff]  }
  0x87   : > { %2247 = vmatpush1.bf16.msra.mxu1 %v3242_v60  ;;  %2207 = vmatprep.subr.bf16.mxu0 %v3247_v61  ;;  %v3328_v60 = vld [vmem:[%s3595_s28 + $0x128] ss:$16 sps:$4 sm:$0xff]  }
  0x88   : > { %2248 = vmatprep.subr.bf16.mxu1 %v3250_v62  ;;  %v3331_v61 = vld [vmem:[%s3595_s28 + $0x228] ss:$16 sps:$4 sm:$0xff]   ;;  %v3336_v62 = vld [vmem:[%s3595_s28 + $0x14c] ss:$16 sps:$4 sm:$0xff]  }
  0x8a   : > { %2208 = vmatpush1.bf16.msra.mxu0 %v3245_v63  ;;  %v3339_v63 = vld [vmem:[%s3595_s28 + $0x24c] ss:$16 sps:$4 sm:$0xff]  }
  0x8b   : > { %2249 = vmatpush1.bf16.msra.mxu1 %v3248_v0  ;;  %2209 = vmatprep.subr.bf16.mxu0 %v3253_v1  ;;  %v3334_v0 = vld [vmem:[%s3595_s28 + $0x148] ss:$16 sps:$4 sm:$0xff]  }
  0x8c   : > { %2250 = vmatprep.subr.bf16.mxu1 %v3256_v2  ;;  %v3337_v1 = vld [vmem:[%s3595_s28 + $0x248] ss:$16 sps:$4 sm:$0xff]   ;;  %v3342_v2 = vld [vmem:[%s3595_s28 + $0x16c] ss:$16 sps:$4 sm:$0xff]  }
  0x8e   : > { %2210 = vmatpush1.bf16.msra.mxu0 %v3251_v3  ;;  %v3345_v3 = vld [vmem:[%s3595_s28 + $0x26c] ss:$16 sps:$4 sm:$0xff]  }
  0x8f   : > { %2251 = vmatpush1.bf16.msra.mxu1 %v3254_v4  ;;  %2211 = vmatprep.subr.bf16.mxu0 %v3259_v5  ;;  %v3340_v4 = vld [vmem:[%s3595_s28 + $0x168] ss:$16 sps:$4 sm:$0xff]  }
  0x90   : > { %2252 = vmatprep.subr.bf16.mxu1 %v3262_v6  ;;  %v3343_v5 = vld [vmem:[%s3595_s28 + $0x268] ss:$16 sps:$4 sm:$0xff]   ;;  %v3351_v6 = vld [vmem:[%s3595_s28 + $0x28c] ss:$16 sps:$4 sm:$0xff]  }
  0x92   : > { %2212 = vmatpush1.bf16.msra.mxu0 %v3257_v9  ;;  %v3346_v9 = vld [vmem:[%s3595_s28 + $0x188] ss:$16 sps:$4 sm:$0xff]  }
  0x93   : > { %2253 = vmatpush1.bf16.msra.mxu1 %v3260_v10  ;;  %2213 = vmatprep.subr.bf16.mxu0 %v3265_v11  ;;  %v3349_v10 = vld [vmem:[%s3595_s28 + $0x288] ss:$16 sps:$4 sm:$0xff]   ;;  %v3354_v11 = vld [vmem:[%s3595_s28 + $0x1ac] ss:$16 sps:$4 sm:$0xff]  }
  0x94   : > { %2254 = vmatprep.subr.bf16.mxu1 %v3268_v12  ;;  %v3357_v12 = vld [vmem:[%s3595_s28 + $0x2ac] ss:$16 sps:$4 sm:$0xff]  }
  0x96   : > { %2214 = vmatpush1.bf16.msra.mxu0 %v3263_v13  ;;  %v3352_v13 = vld [vmem:[%s3595_s28 + $0x1a8] ss:$16 sps:$4 sm:$0xff]  }
  0x97   : > { %2255 = vmatpush1.bf16.msra.mxu1 %v3266_v14  ;;  %2265 = vmatprep.subr.bf16.mxu0 %v3275_v15  ;;  %v3355_v14 = vld [vmem:[%s3595_s28 + $0x2a8] ss:$16 sps:$4 sm:$0xff]   ;;  %v3360_v15 = vld [vmem:[%s3595_s28 + $0x1cc] ss:$16 sps:$4 sm:$0xff]  }
  0x98   : > { %2306 = vmatprep.subr.bf16.mxu1 %v3278_v16  ;;  %v3363_v16 = vld [vmem:[%s3595_s28 + $0x2cc] ss:$16 sps:$4 sm:$0xff]  }
  0x99   : > { %2216 = vmatmul.mubr.bf16.vlgmr.msra.gmra.mrb[4].mxu0 %v3760_v17 }
  0x9a   : > { %2257 = vmatmul.mubr.bf16.vlgmr.msra.gmra.mrb[4].mxu1 %v3764_v18  ;;  %2266 = vmatpush1.bf16.msra.mxu0 %v3273_v19  ;;  %v3358_v19 = vld [vmem:[%s3595_s28 + $0x1c8] ss:$16 sps:$4 sm:$0xff]  }
  0x9b   : > { %2307 = vmatpush1.bf16.msra.mxu1 %v3276_v20  ;;  %2267 = vmatprep.subr.bf16.mxu0 %v3281_v21  ;;  %v3361_v20 = vld [vmem:[%s3595_s28 + $0x2c8] ss:$16 sps:$4 sm:$0xff]   ;;  %v3366_v21 = vld [vmem:[%s3595_s28 + $0x1ec] ss:$16 sps:$4 sm:$0xff]  }
  0x9c   : > { %2308 = vmatprep.subr.bf16.mxu1 %v3284_v22  ;;  %2297 = vmatprep.mubr.bf16.mxu0 %v3539_v27  ;;  %v3369_v22 = vld [vmem:[%s3595_s28 + $0x2ec] ss:$16 sps:$4 sm:$0xff]  }
  0x9d   : > { %2338 = vmatprep.mubr.bf16.mxu1 %v3645_v48  ;;  %v3299_v48 = vld [vmem:[%s3595_s28 + $0x884] ss:$16 sps:$4 sm:$0xff]  }
  0x9e   : > { %2268 = vmatpush1.bf16.msra.mxu0 %v3279_v23  ;;  %v3364_v23 = vld [vmem:[%s3595_s28 + $0x1e8] ss:$16 sps:$4 sm:$0xff]  }
  0x9f   : > { %2309 = vmatpush1.bf16.msra.mxu1 %v3282_v24  ;;  %2269 = vmatprep.subr.bf16.mxu0 %v3287_v25  ;;  %v3367_v24 = vld [vmem:[%s3595_s28 + $0x2e8] ss:$16 sps:$4 sm:$0xff]   ;;  %v3372_v25 = vld [vmem:[%s3595_s28 + $0x30c] ss:$16 sps:$4 sm:$0xff]  }
  0xa0   : > { %2310 = vmatprep.subr.bf16.mxu1 %v3290_v26  ;;  %v3375_v26 = vld [vmem:[%s3595_s28 + $0x40c] ss:$16 sps:$4 sm:$0xff]  }
  0xa2   : > { %2270 = vmatpush1.bf16.msra.mxu0 %v3285_v28  ;;  %v3370_v28 = vld [vmem:[%s3595_s28 + $0x308] ss:$16 sps:$4 sm:$0xff]  }
  0xa3   : > { %2311 = vmatpush1.bf16.msra.mxu1 %v3288_v29  ;;  %2271 = vmatprep.subr.bf16.mxu0 %v3293_v30  ;;  %v3373_v29 = vld [vmem:[%s3595_s28 + $0x408] ss:$16 sps:$4 sm:$0xff]   ;;  %v3378_v30 = vld [vmem:[%s3595_s28 + $0x32c] ss:$16 sps:$4 sm:$0xff]  }
  0xa4   : > { %2312 = vmatprep.subr.bf16.mxu1 %v3296_v31  ;;  %v3381_v31 = vld [vmem:[%s3595_s28 + $0x42c] ss:$16 sps:$4 sm:$0xff]  }
  0xa6   : > { %2272 = vmatpush1.bf16.msra.mxu0 %v3291_v32  ;;  %v3376_v32 = vld [vmem:[%s3595_s28 + $0x328] ss:$16 sps:$4 sm:$0xff]  }
  0xa7   : > { %2313 = vmatpush1.bf16.msra.mxu1 %v3294_v33  ;;  %2273 = vmatprep.subr.bf16.mxu0 %v3299_v48  ;;  %v3379_v33 = vld [vmem:[%s3595_s28 + $0x428] ss:$16 sps:$4 sm:$0xff]   ;;  %v3384_v48 = vld [vmem:[%s3595_s28 + $0x34c] ss:$16 sps:$4 sm:$0xff]  }
  0xa8   : > { %2314 = vmatprep.subr.bf16.mxu1 %v3302_v34  ;;  %v3387_v34 = vld [vmem:[%s3595_s28 + $0x44c] ss:$16 sps:$4 sm:$0xff]  }
  0xaa   : > { %2274 = vmatpush1.bf16.msra.mxu0 %v3297_v35  ;;  %v3382_v35 = vld [vmem:[%s3595_s28 + $0x348] ss:$16 sps:$4 sm:$0xff]  }
  0xab   : > { %2315 = vmatpush1.bf16.msra.mxu1 %v3300_v36  ;;  %2275 = vmatprep.subr.bf16.mxu0 %v3305_v39  ;;  %v3390_v36 = vld [vmem:[%s3595_s28 + $0x36c] ss:$16 sps:$4 sm:$0xff]  }
  0xac   : > { %2316 = vmatprep.subr.bf16.mxu1 %v3308_v40  ;;  %v3393_v39 = vld [vmem:[%s3595_s28 + $0x46c] ss:$16 sps:$4 sm:$0xff]   ;;  %v3388_v40 = vld [vmem:[%s3595_s28 + $0x368] ss:$16 sps:$4 sm:$0xff]  }
  0xae   : > { %2276 = vmatpush1.bf16.msra.mxu0 %v3303_v41  ;;  %v3391_v41 = vld [vmem:[%s3595_s28 + $0x468] ss:$16 sps:$4 sm:$0xff]  }
  0xaf   : > { %2317 = vmatpush1.bf16.msra.mxu1 %v3306_v42  ;;  %2277 = vmatprep.subr.bf16.mxu0 %v3311_v43  ;;  %v3399_v42 = vld [vmem:[%s3595_s28 + $0x48c] ss:$16 sps:$4 sm:$0xff]   ;;  %v3394_v43 = vld [vmem:[%s3595_s28 + $0x388] ss:$16 sps:$4 sm:$0xff]  }
  0xb0   : > { %2318 = vmatprep.subr.bf16.mxu1 %v3314_v44  ;;  %v3397_v44 = vld [vmem:[%s3595_s28 + $0x488] ss:$16 sps:$4 sm:$0xff]  }
  0xb2   : > { %2278 = vmatpush1.bf16.msra.mxu0 %v3309_v45  ;;  %v3402_v45 = vld [vmem:[%s3595_s28 + $0x3ac] ss:$16 sps:$4 sm:$0xff]  }
  0xb3   : > { %2319 = vmatpush1.bf16.msra.mxu1 %v3312_v46  ;;  %2279 = vmatprep.subr.bf16.mxu0 %v3317_v47  ;;  %v3405_v46 = vld [vmem:[%s3595_s28 + $0x4ac] ss:$16 sps:$4 sm:$0xff]   ;;  %v3400_v47 = vld [vmem:[%s3595_s28 + $0x3a8] ss:$16 sps:$4 sm:$0xff]  }
  0xb4   : > { %2320 = vmatprep.subr.bf16.mxu1 %v3320_v49  ;;  %v3403_v49 = vld [vmem:[%s3595_s28 + $0x4a8] ss:$16 sps:$4 sm:$0xff]  }
  0xb6   : > { %2280 = vmatpush1.bf16.msra.mxu0 %v3315_v50  ;;  %v3408_v50 = vld [vmem:[%s3595_s28 + $0x3cc] ss:$16 sps:$4 sm:$0xff]  }
  0xb7   : > { %2321 = vmatpush1.bf16.msra.mxu1 %v3318_v51  ;;  %2347 = vmatprep.subr.bf16.mxu0 %v3327_v54  ;;  %v3411_v51 = vld [vmem:[%s3595_s28 + $0x4cc] ss:$16 sps:$4 sm:$0xff]   ;;  %v3409_v54 = vld [vmem:[%s3595_s28 + $0x4c8] ss:$16 sps:$4 sm:$0xff]  }
  0xb8   : > { %2322 = vmatprep.subr.bf16.mxu1 %v3324_v53  ;;  %v3406_v53 = vld [vmem:[%s3595_s28 + $0x3c8] ss:$16 sps:$4 sm:$0xff]  }
  0xb9   : > { %2298 = vmatmul.mubr.bf16.vlgmr.msra.gmra.mrb[8].mxu0 %v3803_v55 }
  0xba   : > { %2348 = vmatpush1.bf16.msra.mxu0 %v3325_v57  ;;  %2379 = vmatprep.mubr.bf16.mxu0 %v3650_v52  ;;  %v3348_v52 = vld [vmem:[%s3595_s28 + $0x18c] ss:$16 sps:$4 sm:$0xff]  }
  0xbb   : > { %2323 = vmatpush1.bf16.msra.mxu1 %v3322_v56  ;;  %2349 = vmatprep.subr.bf16.mxu0 %v3333_v59  ;;  %v3414_v56 = vld [vmem:[%s3595_s28 + $0x3ec] ss:$16 sps:$4 sm:$0xff]   ;;  %v3415_v59 = vld [vmem:[%s3595_s28 + $0x4e8] ss:$16 sps:$4 sm:$0xff]  }
  0xbc   : > { %2324 = vmatprep.subr.bf16.mxu1 %v3330_v58  ;;  %v3417_v57 = vld [vmem:[%s3595_s28 + $0x4ec] ss:$16 sps:$4 sm:$0xff]   ;;  %v3412_v58 = vld [vmem:[%s3595_s28 + $0x3e8] ss:$16 sps:$4 sm:$0xff]  }
  0xbe   : > { %2350 = vmatpush1.bf16.msra.mxu0 %v3331_v61  ;;  %v3423_v61 = vld [vmem:[%s3595_s28 + $0x60c] ss:$16 sps:$4 sm:$0xff]  }
  0xbf   : > { %2325 = vmatpush1.bf16.msra.mxu1 %v3328_v60  ;;  %2351 = vmatprep.subr.bf16.mxu0 %v3339_v63  ;;  %v3420_v60 = vld [vmem:[%s3595_s28 + $0x50c] ss:$16 sps:$4 sm:$0xff]   ;;  %v3421_v63 = vld [vmem:[%s3595_s28 + $0x608] ss:$16 sps:$4 sm:$0xff]  }
  0xc0   : > { %2326 = vmatprep.subr.bf16.mxu1 %v3336_v62  ;;  %v3418_v62 = vld [vmem:[%s3595_s28 + $0x508] ss:$16 sps:$4 sm:$0xff]  }
  0xc2   : > { %2352 = vmatpush1.bf16.msra.mxu0 %v3337_v1  ;;  %v3429_v1 = vld [vmem:[%s3595_s28 + $0x62c] ss:$16 sps:$4 sm:$0xff]  }
  0xc3   : > { %2327 = vmatpush1.bf16.msra.mxu1 %v3334_v0  ;;  %2353 = vmatprep.subr.bf16.mxu0 %v3345_v3  ;;  %v3426_v0 = vld [vmem:[%s3595_s28 + $0x52c] ss:$16 sps:$4 sm:$0xff]   ;;  %v3427_v3 = vld [vmem:[%s3595_s28 + $0x628] ss:$16 sps:$4 sm:$0xff]  }
  0xc4   : > { %2328 = vmatprep.subr.bf16.mxu1 %v3342_v2  ;;  %v3424_v2 = vld [vmem:[%s3595_s28 + $0x528] ss:$16 sps:$4 sm:$0xff]  }
  0xc6   : > { %2354 = vmatpush1.bf16.msra.mxu0 %v3343_v5  ;;  %v3435_v5 = vld [vmem:[%s3595_s28 + $0x64c] ss:$16 sps:$4 sm:$0xff]  }
  0xc7   : > { %2329 = vmatpush1.bf16.msra.mxu1 %v3340_v4  ;;  %2355 = vmatprep.subr.bf16.mxu0 %v3351_v6  ;;  %v3432_v4 = vld [vmem:[%s3595_s28 + $0x54c] ss:$16 sps:$4 sm:$0xff]  }
  0xc8   : > { %2330 = vmatprep.subr.bf16.mxu1 %v3348_v52  ;;  %v3430_v52 = vld [vmem:[%s3595_s28 + $0x548] ss:$16 sps:$4 sm:$0xff]   ;;  %v3438_v6 = vld [vmem:[%s3595_s28 + $0x56c] ss:$16 sps:$4 sm:$0xff]  }
  0xca   : > { %2356 = vmatpush1.bf16.msra.mxu0 %v3349_v10  ;;  %v3436_v10 = vld [vmem:[%s3595_s28 + $0x568] ss:$16 sps:$4 sm:$0xff]  }
  0xcb   : > { %2331 = vmatpush1.bf16.msra.mxu1 %v3346_v9  ;;  %2357 = vmatprep.subr.bf16.mxu0 %v3357_v12  ;;  %v3441_v9 = vld [vmem:[%s3595_s28 + $0x66c] ss:$16 sps:$4 sm:$0xff]  }
  0xcc   : > { %2332 = vmatprep.subr.bf16.mxu1 %v3354_v11  ;;  %v3439_v11 = vld [vmem:[%s3595_s28 + $0x668] ss:$16 sps:$4 sm:$0xff]   ;;  %v3447_v12 = vld [vmem:[%s3595_s28 + $0x68c] ss:$16 sps:$4 sm:$0xff]  }
  0xce   : > { %2358 = vmatpush1.bf16.msra.mxu0 %v3355_v14  ;;  %v3445_v14 = vld [vmem:[%s3595_s28 + $0x688] ss:$16 sps:$4 sm:$0xff]  }
  0xcf   : > { %2333 = vmatpush1.bf16.msra.mxu1 %v3352_v13  ;;  %2359 = vmatprep.subr.bf16.mxu0 %v3363_v16  ;;  %v3442_v13 = vld [vmem:[%s3595_s28 + $0x588] ss:$16 sps:$4 sm:$0xff]   ;;  %v3453_v16 = vld [vmem:[%s3595_s28 + $0x6ac] ss:$16 sps:$4 sm:$0xff]  }
  0xd0   : > { %2334 = vmatprep.subr.bf16.mxu1 %v3360_v15  ;;  %v3450_v15 = vld [vmem:[%s3595_s28 + $0x5ac] ss:$16 sps:$4 sm:$0xff]  }
  0xd2   : > { %2360 = vmatpush1.bf16.msra.mxu0 %v3361_v20  ;;  %v3451_v20 = vld [vmem:[%s3595_s28 + $0x6a8] ss:$16 sps:$4 sm:$0xff]  }
  0xd3   : > { %2335 = vmatpush1.bf16.msra.mxu1 %v3358_v19  ;;  %2361 = vmatprep.subr.bf16.mxu0 %v3369_v22  ;;  %v3448_v19 = vld [vmem:[%s3595_s28 + $0x5a8] ss:$16 sps:$4 sm:$0xff]   ;;  %v3459_v22 = vld [vmem:[%s3595_s28 + $0x6cc] ss:$16 sps:$4 sm:$0xff]  }
  0xd4   : > { %2336 = vmatprep.subr.bf16.mxu1 %v3366_v21  ;;  %v3456_v21 = vld [vmem:[%s3595_s28 + $0x5cc] ss:$16 sps:$4 sm:$0xff]  }
  0xd6   : > { %2362 = vmatpush1.bf16.msra.mxu0 %v3367_v24  ;;  %v3457_v24 = vld [vmem:[%s3595_s28 + $0x6c8] ss:$16 sps:$4 sm:$0xff]  }
  0xd7   : > { %2337 = vmatpush1.bf16.msra.mxu1 %v3364_v23  ;;  %2363 = vmatprep.subr.bf16.mxu0 %v3372_v25  ;;  %v3454_v23 = vld [vmem:[%s3595_s28 + $0x5c8] ss:$16 sps:$4 sm:$0xff]   ;;  %v3462_v25 = vld [vmem:[%s3595_s28 + $0x5ec] ss:$16 sps:$4 sm:$0xff]  }
  0xd8   : > { %2388 = vmatprep.subr.bf16.mxu1 %v3375_v26  ;;  %v3465_v26 = vld [vmem:[%s3595_s28 + $0x6ec] ss:$16 sps:$4 sm:$0xff]  }
  0xda   : > { %2339 = vmatmul.mubr.bf16.vlgmr.msra.gmra.mrb[8].mxu1 %v3672_v7  ;;  %2364 = vmatpush1.bf16.msra.mxu0 %v3370_v28  ;;  %v3385_v7 = vld [vmem:[%s3595_s28 + $0x448] ss:$16 sps:$4 sm:$0xff]  }
  0xdb   : > { %2389 = vmatpush1.bf16.msra.mxu1 %v3373_v29  ;;  %2365 = vmatprep.subr.bf16.mxu0 %v3378_v30  ;;  %v3460_v28 = vld [vmem:[%s3595_s28 + $0x5e8] ss:$16 sps:$4 sm:$0xff]   ;;  %v3468_v30 = vld [vmem:[%s3595_s28 + $0x70c] ss:$16 sps:$4 sm:$0xff]  }
  0xdc   : > { %2390 = vmatprep.subr.bf16.mxu1 %v3381_v31  ;;  %2420 = vmatprep.mubr.bf16.mxu1 %v3712_v37  ;;  %v3396_v37 = vld [vmem:[%s3595_s28 + $0x38c] ss:$16 sps:$4 sm:$0xff]   ;;  %v3463_v29 = vld [vmem:[%s3595_s28 + $0x6e8] ss:$16 sps:$4 sm:$0xff]  }
  0xdd   : > { %v3471_v31 = vld [vmem:[%s3595_s28 + $0x80c] ss:$16 sps:$4 sm:$0xff]  }
  0xde   : > { %2366 = vmatpush1.bf16.msra.mxu0 %v3376_v32  ;;  %v3466_v32 = vld [vmem:[%s3595_s28 + $0x708] ss:$16 sps:$4 sm:$0xff]  }
  0xdf   : > { %2391 = vmatpush1.bf16.msra.mxu1 %v3379_v33  ;;  %2367 = vmatprep.subr.bf16.mxu0 %v3384_v48  ;;  %v3469_v33 = vld [vmem:[%s3595_s28 + $0x808] ss:$16 sps:$4 sm:$0xff]   ;;  %v3474_v48 = vld [vmem:[%s3595_s28 + $0x72c] ss:$16 sps:$4 sm:$0xff]  }
  0xe0   : > { %2392 = vmatprep.subr.bf16.mxu1 %v3387_v34  ;;  %v3477_v34 = vld [vmem:[%s3595_s28 + $0x82c] ss:$16 sps:$4 sm:$0xff]  }
  0xe2   : > { %2368 = vmatpush1.bf16.msra.mxu0 %v3382_v35  ;;  %v3472_v35 = vld [vmem:[%s3595_s28 + $0x728] ss:$16 sps:$4 sm:$0xff]  }
  0xe3   : > { %2393 = vmatpush1.bf16.msra.mxu1 %v3385_v7  ;;  %2369 = vmatprep.subr.bf16.mxu0 %v3390_v36  ;;  %v3475_v7 = vld [vmem:[%s3595_s28 + $0x828] ss:$16 sps:$4 sm:$0xff]   ;;  %v3480_v36 = vld [vmem:[%s3595_s28 + $0x74c] ss:$16 sps:$4 sm:$0xff]  }
  0xe4   : > { %2394 = vmatprep.subr.bf16.mxu1 %v3393_v39  ;;  %v3483_v39 = vld [vmem:[%s3595_s28 + $0x84c] ss:$16 sps:$4 sm:$0xff]  }
  0xe6   : > { %2370 = vmatpush1.bf16.msra.mxu0 %v3388_v40  ;;  %v3478_v40 = vld [vmem:[%s3595_s28 + $0x748] ss:$16 sps:$4 sm:$0xff]  }
  0xe7   : > { %2395 = vmatpush1.bf16.msra.mxu1 %v3391_v41  ;;  %2371 = vmatprep.subr.bf16.mxu0 %v3396_v37  ;;  %v3486_v41 = vld [vmem:[%s3595_s28 + $0x76c] ss:$16 sps:$4 sm:$0xff]  }
  0xe8   : > { %2396 = vmatprep.subr.bf16.mxu1 %v3399_v42  ;;  %v3489_v37 = vld [vmem:[%s3595_s28 + $0x86c] ss:$16 sps:$4 sm:$0xff]   ;;  %v3484_v42 = vld [vmem:[%s3595_s28 + $0x768] ss:$16 sps:$4 sm:$0xff]  }
  0xea   : > { %2372 = vmatpush1.bf16.msra.mxu0 %v3394_v43  ;;  %v3487_v43 = vld [vmem:[%s3595_s28 + $0x868] ss:$16 sps:$4 sm:$0xff]  }
  0xeb   : > { %2397 = vmatpush1.bf16.msra.mxu1 %v3397_v44  ;;  %2373 = vmatprep.subr.bf16.mxu0 %v3402_v45  ;;  %v3495_v44 = vld [vmem:[%s3595_s28 + $0x88c] ss:$16 sps:$4 sm:$0xff]   ;;  %v3490_v45 = vld [vmem:[%s3595_s28 + $0x788] ss:$16 sps:$4 sm:$0xff]  }
  0xec   : > { %2398 = vmatprep.subr.bf16.mxu1 %v3405_v46  ;;  %v3493_v46 = vld [vmem:[%s3595_s28 + $0x888] ss:$16 sps:$4 sm:$0xff]  }
  0xee   : > { %2374 = vmatpush1.bf16.msra.mxu0 %v3400_v47  ;;  %v3498_v47 = vld [vmem:[%s3595_s28 + $0x7ac] ss:$16 sps:$4 sm:$0xff]  }
  0xef   : > { %2399 = vmatpush1.bf16.msra.mxu1 %v3403_v49  ;;  %2375 = vmatprep.subr.bf16.mxu0 %v3408_v50  ;;  %v3501_v49 = vld [vmem:[%s3595_s28 + $0x8ac] ss:$16 sps:$4 sm:$0xff]   ;;  %v3496_v50 = vld [vmem:[%s3595_s28 + $0x7a8] ss:$16 sps:$4 sm:$0xff]  }
  0xf0   : > { %2400 = vmatprep.subr.bf16.mxu1 %v3411_v51  ;;  %v3499_v51 = vld [vmem:[%s3595_s28 + $0x8a8] ss:$16 sps:$4 sm:$0xff]  }
  0xf2   : > { %2376 = vmatpush1.bf16.msra.mxu0 %v3406_v53  ;;  %v3504_v53 = vld [vmem:[%s3595_s28 + $0x7cc] ss:$16 sps:$4 sm:$0xff]  }
  0xf3   : > { %2401 = vmatpush1.bf16.msra.mxu1 %v3409_v54  ;;  %2377 = vmatprep.subr.bf16.mxu0 %v3414_v56  ;;  %v3507_v54 = vld [vmem:[%s3595_s28 + $0x8cc] ss:$16 sps:$4 sm:$0xff]  }
  0xf4   : > { %2402 = vmatprep.subr.bf16.mxu1 %v3417_v57 }
  0xf6   : > { %2378 = vmatpush1.bf16.msra.mxu0 %v3412_v58 }
  0xf7   : > { %2403 = vmatpush1.bf16.msra.mxu1 %v3415_v59  ;;  %2429 = vmatprep.subr.bf16.mxu0 %v3423_v61 }
  0xf8   : > { %2404 = vmatprep.subr.bf16.mxu1 %v3420_v60 }
  0xf9   : > { %2380 = vmatmul.mubr.bf16.vlgmr.msra.gmra.mrb[12].mxu0 %v3674_v8  ;;  %v3433_v8 = vld [vmem:[%s3595_s28 + $0x648] ss:$16 sps:$4 sm:$0xff]  }
  0xfa   : > { %2430 = vmatpush1.bf16.msra.mxu0 %v3421_v63  ;;  %2461 = vmatprep.mubr.bf16.mxu0 %v3716_v38  ;;  %v3444_v38 = vld [vmem:[%s3595_s28 + $0x58c] ss:$16 sps:$4 sm:$0xff]  }
  0xfb   : > { %2405 = vmatpush1.bf16.msra.mxu1 %v3418_v62  ;;  %2431 = vmatprep.subr.bf16.mxu0 %v3429_v1  ;;  %v3505_v1 = vld [vmem:[%s3595_s28 + $0x8c8] ss:$16 sps:$4 sm:$0xff]  }
  0xfc   : > { %2406 = vmatprep.subr.bf16.mxu1 %v3426_v0  ;;  %v3502_v0 = vld [vmem:[%s3595_s28 + $0x7c8] ss:$16 sps:$4 sm:$0xff]  }
  0xfe   : > { %2432 = vmatpush1.bf16.msra.mxu0 %v3427_v3 }
  0xff   : > { %2407 = vmatpush1.bf16.msra.mxu1 %v3424_v2  ;;  %2433 = vmatprep.subr.bf16.mxu0 %v3435_v5  ;;  %v3513_v5 = vld [vmem:[%s3595_s28 + $0x8ec] ss:$16 sps:$4 sm:$0xff]  }
 0x100   : > { %2408 = vmatprep.subr.bf16.mxu1 %v3432_v4  ;;  %v3510_v4 = vld [vmem:[%s3595_s28 + $0x7ec] ss:$16 sps:$4 sm:$0xff]  }
 0x102   : > { %2434 = vmatpush1.bf16.msra.mxu0 %v3433_v8  ;;  %v3511_v8 = vld [vmem:[%s3595_s28 + $0x8e8] ss:$16 sps:$4 sm:$0xff]  }
 0x103   : > { %2409 = vmatpush1.bf16.msra.mxu1 %v3430_v52  ;;  %2435 = vmatprep.subr.bf16.mxu0 %v3441_v9  ;;  %v3508_v52 = vld [vmem:[%s3595_s28 + $0x7e8] ss:$16 sps:$4 sm:$0xff]  }
 0x104   : > { %2410 = vmatprep.subr.bf16.mxu1 %v3438_v6 }
 0x106   : > { %2436 = vmatpush1.bf16.msra.mxu0 %v3439_v11 }
 0x107   : > { %2411 = vmatpush1.bf16.msra.mxu1 %v3436_v10  ;;  %2437 = vmatprep.subr.bf16.mxu0 %v3447_v12 }
 0x108   : > { %2412 = vmatprep.subr.bf16.mxu1 %v3444_v38 }
 0x10a   : > { %2438 = vmatpush1.bf16.msra.mxu0 %v3445_v14 }
 0x10b   : > { %2413 = vmatpush1.bf16.msra.mxu1 %v3442_v13  ;;  %2439 = vmatprep.subr.bf16.mxu0 %v3453_v16 }
 0x10c   : > { %2414 = vmatprep.subr.bf16.mxu1 %v3450_v15 }
 0x10e   : > { %2440 = vmatpush1.bf16.msra.mxu0 %v3451_v20 }
 0x10f   : > { %2415 = vmatpush1.bf16.msra.mxu1 %v3448_v19  ;;  %2441 = vmatprep.subr.bf16.mxu0 %v3459_v22 }
 0x110   : > { %2416 = vmatprep.subr.bf16.mxu1 %v3456_v21  ;;  %v332_v21 = vld [vmem:[#allocation2] sm:$0xff] }
 0x112   : > { %2442 = vmatpush1.bf16.msra.mxu0 %v3457_v24  ;;  %v333_v24 = vld [vmem:[#allocation2 + $0x8] sm:$0xff] }
 0x113   : > { %2417 = vmatpush1.bf16.msra.mxu1 %v3454_v23  ;;  %2443 = vmatprep.subr.bf16.mxu0 %v3465_v26 }
 0x114   : > { %2418 = vmatprep.subr.bf16.mxu1 %v3462_v25 }
 0x116   : > { %2444 = vmatpush1.bf16.msra.mxu0 %v3463_v29 }
 0x117   : > { %2419 = vmatpush1.bf16.msra.mxu1 %v3460_v28  ;;  %2445 = vmatprep.subr.bf16.mxu0 %v3468_v30 }
 0x118   : > { %2470 = vmatprep.subr.bf16.mxu1 %v3471_v31 }
 0x11a   : > { %2421 = vmatmul.mubr.bf16.vlgmr.msra.gmra.mrb[12].mxu1 %v3760_v17  ;;  %2446 = vmatpush1.bf16.msra.mxu0 %v3466_v32  ;;  %v3481_v17 = vld [vmem:[%s3595_s28 + $0x848] ss:$16 sps:$4 sm:$0xff]  }
 0x11b   : > { %2471 = vmatpush1.bf16.msra.mxu1 %v3469_v33  ;;  %2447 = vmatprep.subr.bf16.mxu0 %v3474_v48 }
 0x11c   : > { %2472 = vmatprep.subr.bf16.mxu1 %v3477_v34  ;;  %2502 = vmatprep.mubr.bf16.mxu1 %v3539_v27  ;;  %v3492_v27 = vld [vmem:[%s3595_s28 + $0x78c] ss:$16 sps:$4 sm:$0xff]  }
 0x11e   : > { %2448 = vmatpush1.bf16.msra.mxu0 %v3472_v35 }
 0x11f   : > { %2473 = vmatpush1.bf16.msra.mxu1 %v3475_v7  ;;  %2449 = vmatprep.subr.bf16.mxu0 %v3480_v36 }
 0x120   : > { %2474 = vmatprep.subr.bf16.mxu1 %v3483_v39 }
 0x122   : > { %2450 = vmatpush1.bf16.msra.mxu0 %v3478_v40 }
 0x123   : > { %2475 = vmatpush1.bf16.msra.mxu1 %v3481_v17  ;;  %2451 = vmatprep.subr.bf16.mxu0 %v3486_v41 }
 0x124   : > { %2476 = vmatprep.subr.bf16.mxu1 %v3489_v37 }
 0x126   : > { %2452 = vmatpush1.bf16.msra.mxu0 %v3484_v42 }
 0x127   : > { %2477 = vmatpush1.bf16.msra.mxu1 %v3487_v43  ;;  %2453 = vmatprep.subr.bf16.mxu0 %v3492_v27 }
 0x128   : > { %2478 = vmatprep.subr.bf16.mxu1 %v3495_v44 }
 0x12a   : > { %2454 = vmatpush1.bf16.msra.mxu0 %v3490_v45 }
 0x12b   : > { %2479 = vmatpush1.bf16.msra.mxu1 %v3493_v46  ;;  %2455 = vmatprep.subr.bf16.mxu0 %v3498_v47 }
 0x12c   : > { %2480 = vmatprep.subr.bf16.mxu1 %v3501_v49  ;;  %v2135_v56 = vpop.f32.mrb[0].mxu0  ;;  %v334_v49 = vld [vmem:[#allocation2 + $0x10] sm:$0xff] }
 0x12d   : > { %v2176_v57 = vpop.f32.mrb[0].mxu1  ;;  %v2137_v59 = vpop.f32.mrb[1].mxu0 }
 0x12e   : > { %v2177_v58 = vadd.f32 %v2176_v57, %v2135_v56  ;;  %v2178_v60 = vpop.f32.mrb[1].mxu1  ;;  %v2139_v62 = vpop.f32.mrb[2].mxu0  ;;  %2456 = vmatpush1.bf16.msra.mxu0 %v3496_v50  ;;  %v335_v56 = vld [vmem:[#allocation2 + $0x18] sm:$0xff] }
 0x12f   : > { %v2179_v61 = vadd.f32 %v2178_v60, %v2137_v59  ;;  %v2180_v63 = vpop.f32.mrb[2].mxu1  ;;  %2481 = vmatpush1.bf16.msra.mxu1 %v3499_v51  ;;  %v2140_v2 = vpop.f32.mrb[3].mxu0  ;;  %2457 = vmatprep.subr.bf16.mxu0 %v3504_v53  ;;  %v2529_v62 = vlaneseq (!%p3037_p7) }
 0x130   : > { %v2181_v3 = vpop.f32.mrb[3].mxu1  ;;  %2482 = vmatprep.subr.bf16.mxu1 %v3507_v54 }
 0x131   : > { %v2530_v63 = vshrl.u32 (!%p3037_p7), %v2529_v62, 7 }
 0x132   : > { %2458 = vmatpush1.bf16.msra.mxu0 %v3502_v0  ;;  %v2527_v0 = vld [vmem:[%s3965_s2] sm:$0xf] (!%p3037_p7) }
 0x133   : > { %2483 = vmatpush1.bf16.msra.mxu1 %v3505_v1  ;;  %2459 = vmatprep.subr.bf16.mxu0 %v3510_v4  ;;  %v2553_v1 = vld [vmem:[%s3966_s3] sm:$0xf] (!%p3037_p7)  ;;  %v2531_v2 = vsub.s32 (!%p3037_p7), 0, %v2530_v63  ;;  %v2535_v3 = vsub.s32 (!%p3037_p7), 1, %v2530_v63  ;;  %v2539_v4 = vsub.s32 (!%p3037_p7), 2, %v2530_v63 }
 0x134   : > { %2484 = vmatprep.subr.bf16.mxu1 %v3513_v5  ;;  %v2543_v5 = vsub.s32 (!%p3037_p7), 3, %v2530_v63 }
 0x136   : > { %2460 = vmatpush1.bf16.msra.mxu0 %v3508_v52 }
 0x137   : > { %2485 = vmatpush1.bf16.msra.mxu1 %v3511_v8 }
 0x139   : > { %2462 = vmatmul.mubr.bf16.vlgmr.msra.gmra.mrb[16].mxu0 %v3764_v18 }
 0x13a   : > { %2503 = vmatmul.mubr.bf16.vlgmr.msra.gmra.mrb[16].mxu1 %v3803_v55 }
 0x16c   : > { %v2217_v6 = vpop.f32.mrb[4].mxu0 }
 0x16d   : > { %v2258_v9 = vpop.f32.mrb[4].mxu1  ;;  %v2218_v10 = vadd.f32 %v2217_v6, %v2177_v58  ;;  %v2219_v11 = vpop.f32.mrb[5].mxu0  ;;  %v2532_v6 = vrot.slane (!%p3037_p7), %v2527_v0, %v2531_v2 }
 0x16e   : > { %v2260_v38 = vpop.f32.mrb[5].mxu1  ;;  %v2220_v12 = vadd.f32 %v2219_v11, %v2179_v61  ;;  %v2221_v13 = vpop.f32.mrb[6].mxu0  ;;  %v2562_v11 = vrot.slane (!%p3037_p7), %v2553_v1, %v2535_v3 }
 0x16f   : > { %v2262_v14 = vpop.f32.mrb[6].mxu1  ;;  %v2259_v15 = vadd.f32 %v2258_v9, %v2218_v10  ;;  %v2222_v16 = vpop.f32.mrb[7].mxu0  ;;  %v2536_v9 = vrot.slane (!%p3037_p7), %v2527_v0, %v2535_v3  ;;  %v2558_v10 = vrot.slane (!%p3037_p7), %v2553_v1, %v2531_v2  ;;  %v2540_v13 = vrot.slane (!%p3037_p7), %v2527_v0, %v2539_v4 }
 0x170   : > { %v2263_v19 = vpop.f32.mrb[7].mxu1  ;;  %v2261_v20 = vadd.f32 %v2260_v38, %v2220_v12  ;;  %v2544_v14 = vrot.slane (!%p3037_p7), %v2527_v0, %v2543_v5  ;;  %v2570_v16 = vrot.slane (!%p3037_p7), %v2553_v1, %v2543_v5 }
 0x18c   : > { %v2299_v22 = vpop.f32.mrb[8].mxu0 }
 0x18d   : > { %v2300_v23 = vadd.f32 %v2299_v22, %v2259_v15  ;;  %v2301_v25 = vpop.f32.mrb[9].mxu0  ;;  %v2566_v15 = vrot.slane (!%p3037_p7), %v2553_v1, %v2539_v4 }
 0x18e   : > { %v2302_v18 = vadd.f32 %v2301_v25, %v2261_v20  ;;  %v2303_v26 = vpop.f32.mrb[10].mxu0 }
 0x18f   : > { %v2511_v55 = vadd.f32 %v2300_v23, %v332_v21  ;;  %v2304_v28 = vpop.f32.mrb[11].mxu0 }
 0x190   : > { %v2512_v29 = vadd.f32 %v2302_v18, %v333_v24 }
 0x191   : > { %2515 = vst [vmem:[#allocation2] sm:$0xff] %v2511_v55 }
 0x192   : > { %2516 = vst [vmem:[#allocation2 + $0x8] sm:$0xff] %v2512_v29 }
 0x198   : > { %v2523_v52 = vld [vmem:[#allocation2] sm:$0xff] (!%p3037_p7) }
 0x199   : > { %v2524_v8 = vld [vmem:[#allocation2 + $0x8] sm:$0xff] (!%p3037_p7)  ;;  %v2549_v19 = vmul.f32 (!%p3037_p7), %v2532_v6, %v2523_v52 }
 0x19a   : > { %v2550_v20 = vmul.f32 (!%p3037_p7), %v2536_v9, %v2524_v8 }
 0x19b   : > { %v2575_v23 = vadd.f32 (!%p3037_p7), %v2558_v10, %v2549_v19 }
 0x19c   : > { %v2576_v24 = vadd.f32 (!%p3037_p7), %v2562_v11, %v2550_v20 }
 0x19d   : > { %v2579_v26 = vmax.f32 (!%p3037_p7), %v2575_v23, 0.0 }
 0x19e   : > { %v2580_v55 = vmax.f32 (!%p3037_p7), %v2576_v24, 0.0 }
 0x1ad   : > { %v2340_v30 = vpop.f32.mrb[8].mxu1 }
 0x1ae   : > { %v2342_v31 = vpop.f32.mrb[9].mxu1 }
 0x1af   : > { %v2344_v32 = vpop.f32.mrb[10].mxu1 }
 0x1b0   : > { %v2345_v33 = vpop.f32.mrb[11].mxu1 }
 0x1cc   : > { %v2381_v48 = vpop.f32.mrb[12].mxu0 }
 0x1cd   : > { %v2382_v34 = vadd.f32 %v2381_v48, %v2340_v30  ;;  %v2383_v35 = vpop.f32.mrb[13].mxu0  ;;  %v3045_v30 = vpack.c.bf16 (!%p3037_p7), %v2580_v55, %v2579_v26 }
 0x1ce   : > { %v2384_v7 = vadd.f32 %v2383_v35, %v2342_v31  ;;  %v2385_v36 = vpop.f32.mrb[14].mxu0 }
 0x1cf   : > { %v2386_v39 = vpop.f32.mrb[15].mxu0  ;;  %2599 = vst [vmem:[%s3967_s4] sm:$0xff] (!%p3037_p7), %v3045_v30 }
 0x1ed   : > { %v2422_v40 = vpop.f32.mrb[12].mxu1 }
 0x1ee   : > { %v2423_v17 = vadd.f32 %v2422_v40, %v2382_v34  ;;  %v2424_v41 = vpop.f32.mrb[13].mxu1 }
 0x1ef   : > { %v2425_v37 = vadd.f32 %v2424_v41, %v2384_v7  ;;  %v2426_v42 = vpop.f32.mrb[14].mxu1 }
 0x1f0   : > { %v2427_v43 = vpop.f32.mrb[15].mxu1 }
 0x20c   : > { %v2463_v27 = vpop.f32.mrb[16].mxu0 }
 0x20d   : > { %v2504_v44 = vpop.f32.mrb[16].mxu1  ;;  %v2464_v45 = vadd.f32 %v2463_v27, %v2423_v17  ;;  %v2465_v46 = vpop.f32.mrb[17].mxu0 }
 0x20e   : > { %v2506_v47 = vpop.f32.mrb[17].mxu1  ;;  %v2466_v50 = vadd.f32 %v2465_v46, %v2425_v37  ;;  %v2467_v51 = vpop.f32.mrb[18].mxu0  ;;  %2522 = sbr.rel (%p3037_p7) target bundleno = 549 (0x225), region = 44 }
 0x20f   : > { %v2508_v53 = vpop.f32.mrb[18].mxu1  ;;  %v2505_v54 = vadd.f32 %v2504_v44, %v2464_v45  ;;  %v2468_v57 = vpop.f32.mrb[19].mxu0 }
 0x210   : > { %v2509_v58 = vpop.f32.mrb[19].mxu1  ;;  %v2507_v59 = vadd.f32 %v2506_v47, %v2466_v50 }
 0x211   : > { %v2513_v60 = vadd.f32 %v2505_v54, %v334_v49 }
 0x212   : > { %v2514_v61 = vadd.f32 %v2507_v59, %v335_v56 }
 0x213   : > { %2517 = vst [vmem:[#allocation2 + $0x10] sm:$0xff] %v2513_v60 }
 0x214   : > { %2518 = vst [vmem:[#allocation2 + $0x18] sm:$0xff] %v2514_v61 }
 0x21a   : > { %v2525_v38 = vld [vmem:[#allocation2 + $0x10] sm:$0xff] }
 0x21b   : > { %v2526_v12 = vld [vmem:[#allocation2 + $0x18] sm:$0xff]  ;;  %v2551_v21 = vmul.f32 %v2540_v13, %v2525_v38 }
 0x21c   : > { %v2552_v22 = vmul.f32 %v2544_v14, %v2526_v12 }
 0x21d   : > { %v2577_v25 = vadd.f32 %v2566_v15, %v2551_v21 }
 0x21e   : > { %v2578_v18 = vadd.f32 %v2570_v16, %v2552_v22 }
 0x21f   : > { %v2581_v28 = vmax.f32 %v2577_v25, 0.0 }
 0x220   : > { %v2582_v29 = vmax.f32 %v2578_v18, 0.0 }
 0x222   : > { %v3046_v31 = vpack.c.bf16 %v2582_v29, %v2581_v28 }
 0x224   : > { %2600 = vst [vmem:[%s3967_s4 + $0x8] sm:$0xff] %v3046_v31 }
 0x225 PF: > { %s14_s17 = sadd.s32 1, %s3536_s17   ;;  %s3968_s15 = smov %s3532_s16 }
 0x226   : > { %p11_p8 = scmp.ge.s32.totalorder %s14_s17, 4   ;;  %s3969_s16 = smov %s3971_s18 }
 0x228   :  { %13 = sbr.rel (!%p11_p8) target bundleno = 2 (0x2), region = 83 }

// kernel: resnet18_forward.23
= control target key start
LH: loop header
LB: loop body
LE: loop exit
PB: predicated region body
PF: predicated region fallthrough
CT: control target
= control target key end

     0   :  { %s4477_s15 = smov 0   ;;  %s4479_s16 = smov 0   ;;  %s5006_s0 = inlined_call_operand.vmem [shape: bf16[8,4608], index: 0, kind: input, shape index: {}]   ;;  %s5007_s1 = inlined_call_operand.vmem [shape: bf16[4608,512], index: 1, kind: input, shape index: {}]   ;;  %s5008_s2 = inlined_call_operand.vmem [shape: f32[1,512], index: 2, kind: input, shape index: {}]   ;;  %s5009_s3 = inlined_call_operand.vmem [shape: f32[1,512], index: 3, kind: input, shape index: {}]   ;;  %s5010_s4 = inlined_call_operand.vmem [shape: bf16[8,512], index: 4, kind: output, shape index: {}]  }
   0x1   :  { %s4481_s17 = smov 0  }
   0x2 LB: > { %s26_s18 = sadd.s32 1, %s4445_s16  ;;  %p3403_p0 = scmp.ge.s32.totalorder %s4449_s17, 1  ;;  %s4449_s17 = sphi %s4481_s17, %s14_s17   ;;  %s4445_s16 = sphi %s4479_s16, %s5012_s16   ;;  %s4441_s15 = sphi %s4477_s15, %s5011_s15  }
   0x3   : > { %p27_p1 = scmp.ge.s32.totalorder %s26_s18, 3  ;;  %p229_p2 = scmp.lt.s32.totalorder %s4449_s17, 4 }
   0x5   : > { %s5014_s18 = smov (%p27_p1, %s26_s18), 0  ;;  %p230_p3 = pnand %p3403_p0, %p229_p2 }
   0x6   : > { %s281_s19 = smul.u32 (!%p230_p3), 12, %s4441_s15  ;;  %p3407_p6 = scmp.ne.s32.totalorder (!%p230_p3), %s4441_s15, 0 }
   0x7   : > { %233 = sbr.rel (%p230_p3) target bundleno = 645 (0x285), region = 36 }
   0x8   : > { %s291_s20 = smul.u32 (!%p230_p3), 192, %s4441_s15  ;;  %p284_p4 = scmp.lt.s32.totalorder (!%p230_p3), %s281_s19, 35 }
   0xa   : > { %p293_p5 = scmp.lt.s32.totalorder (!%p230_p3), %s291_s20, 575 }
   0xe   : > { %s5016_s19 = smov (!%p284_p4, %s281_s19), 35  ;;  %s5018_s20 = smov (!%p293_p5, %s291_s20), 575 }
   0xf   : > { %s3404_s21 = sshll.u32 %s5016_s19, 2  ;;  %s3811_s25 = sshll.u32 %s5018_s20, 4  ;;  %v4451_v0 = vmov (!%p3407_p6), 0.0  }
  0x10   : > { %s4502_s24 = scalar_lea.vmem %s5006_s0, %s3404_s21  ;;  %s4507_s28 = scalar_lea.vmem %s5007_s1, %s3811_s25  ;;  %327 = vst [vmem:[#allocation2] sm:$0xff] (!%p3407_p6), %v4451_v0  ;;  %328 = vst [vmem:[#allocation2 + $0x8] sm:$0xff] (!%p3407_p6), %v4451_v0 }
  0x11   : > { %326 = sbr.rel (%p3407_p6) target bundleno = 24 (0x18), region = 40  ;;  %329 = vst [vmem:[#allocation2 + $0x10] sm:$0xff] (!%p3407_p6), %v4451_v0  ;;  %330 = vst [vmem:[#allocation2 + $0x18] sm:$0xff] (!%p3407_p6), %v4451_v0 }
  0x18 PF: > { %v3839_v1 = vld [vmem:[%s4507_s28 + $0x4] ss:$16 sps:$4 sm:$0xff]   ;;  %v3843_v3 = vld [vmem:[%s4507_s28] ss:$16 sps:$4 sm:$0xff]   ;;  %v336_v49 = vld [vmem:[%s4502_s24 + $0x8] sm:$0xff]  ;;  %p3804_p7 = scmp.ne.s32.totalorder %s4441_s15, 2 }
  0x19   : > { %v3841_v2 = vld [vmem:[%s4507_s28 + $0x204] ss:$16 sps:$4 sm:$0xff]   ;;  %2687 = vmatprep.subr.bf16.mxu0 %v3839_v1  ;;  %v3844_v4 = vld [vmem:[%s4507_s28 + $0x200] ss:$16 sps:$4 sm:$0xff]   ;;  %v4562_v52 = vcombine.high %v336_v49, %v336_v49 }
  0x1a   : > { %2728 = vmatprep.subr.bf16.mxu1 %v3841_v2  ;;  %v3845_v5 = vld [vmem:[%s4507_s28 + $0x24] ss:$16 sps:$4 sm:$0xff]   ;;  %2688 = vmatpush1.bf16.msra.mxu0 %v3843_v3  ;;  %v3849_v7 = vld [vmem:[%s4507_s28 + $0x20] ss:$16 sps:$4 sm:$0xff]  }
  0x1b   : > { %2729 = vmatpush1.bf16.msra.mxu1 %v3844_v4  ;;  %v3847_v6 = vld [vmem:[%s4507_s28 + $0x224] ss:$16 sps:$4 sm:$0xff]   ;;  %2689 = vmatprep.subr.bf16.mxu0 %v3845_v5  ;;  %v3850_v8 = vld [vmem:[%s4507_s28 + $0x220] ss:$16 sps:$4 sm:$0xff]  }
  0x1c   : > { %2730 = vmatprep.subr.bf16.mxu1 %v3847_v6  ;;  %v3851_v9 = vld [vmem:[%s4507_s28 + $0x44] ss:$16 sps:$4 sm:$0xff]   ;;  %v3855_v11 = vld [vmem:[%s4507_s28 + $0x40] ss:$16 sps:$4 sm:$0xff]   ;;  %2760 = vmatprep.mubr.bf16.mxu1 %v4562_v52 }
  0x1d   : > { %v3853_v10 = vld [vmem:[%s4507_s28 + $0x244] ss:$16 sps:$4 sm:$0xff]   ;;  %v3856_v12 = vld [vmem:[%s4507_s28 + $0x240] ss:$16 sps:$4 sm:$0xff]  }
  0x1e   : > { %2690 = vmatpush1.bf16.msra.mxu0 %v3849_v7  ;;  %v3857_v13 = vld [vmem:[%s4507_s28 + $0x64] ss:$16 sps:$4 sm:$0xff]   ;;  %v3861_v15 = vld [vmem:[%s4507_s28 + $0x60] ss:$16 sps:$4 sm:$0xff]  }
  0x1f   : > { %2731 = vmatpush1.bf16.msra.mxu1 %v3850_v8  ;;  %2691 = vmatprep.subr.bf16.mxu0 %v3851_v9  ;;  %v3859_v14 = vld [vmem:[%s4507_s28 + $0x264] ss:$16 sps:$4 sm:$0xff]   ;;  %v3862_v16 = vld [vmem:[%s4507_s28 + $0x260] ss:$16 sps:$4 sm:$0xff]   ;;  %v4586_v8 = vcombine.low %v336_v49, %v336_v49 }
  0x20   : > { %2732 = vmatprep.subr.bf16.mxu1 %v3853_v10  ;;  %v3863_v17 = vld [vmem:[%s4507_s28 + $0x84] ss:$16 sps:$4 sm:$0xff]   ;;  %v3867_v19 = vld [vmem:[%s4507_s28 + $0x80] ss:$16 sps:$4 sm:$0xff]  }
  0x21   : > { %v3865_v18 = vld [vmem:[%s4507_s28 + $0x284] ss:$16 sps:$4 sm:$0xff]   ;;  %v3868_v20 = vld [vmem:[%s4507_s28 + $0x280] ss:$16 sps:$4 sm:$0xff]  }
  0x22   : > { %2692 = vmatpush1.bf16.msra.mxu0 %v3855_v11  ;;  %v3869_v21 = vld [vmem:[%s4507_s28 + $0xa4] ss:$16 sps:$4 sm:$0xff]   ;;  %v3873_v23 = vld [vmem:[%s4507_s28 + $0xa0] ss:$16 sps:$4 sm:$0xff]  }
  0x23   : > { %2733 = vmatpush1.bf16.msra.mxu1 %v3856_v12  ;;  %2693 = vmatprep.subr.bf16.mxu0 %v3857_v13  ;;  %v3871_v22 = vld [vmem:[%s4507_s28 + $0x2a4] ss:$16 sps:$4 sm:$0xff]   ;;  %v3874_v24 = vld [vmem:[%s4507_s28 + $0x2a0] ss:$16 sps:$4 sm:$0xff]  }
  0x24   : > { %2734 = vmatprep.subr.bf16.mxu1 %v3859_v14  ;;  %v3875_v25 = vld [vmem:[%s4507_s28 + $0xc4] ss:$16 sps:$4 sm:$0xff]   ;;  %v3879_v27 = vld [vmem:[%s4507_s28 + $0xc0] ss:$16 sps:$4 sm:$0xff]  }
  0x25   : > { %v3877_v26 = vld [vmem:[%s4507_s28 + $0x2c4] ss:$16 sps:$4 sm:$0xff]   ;;  %v3880_v28 = vld [vmem:[%s4507_s28 + $0x2c0] ss:$16 sps:$4 sm:$0xff]  }
  0x26   : > { %2694 = vmatpush1.bf16.msra.mxu0 %v3861_v15  ;;  %v3881_v29 = vld [vmem:[%s4507_s28 + $0xe4] ss:$16 sps:$4 sm:$0xff]   ;;  %v3885_v31 = vld [vmem:[%s4507_s28 + $0xe0] ss:$16 sps:$4 sm:$0xff]  }
  0x27   : > { %2735 = vmatpush1.bf16.msra.mxu1 %v3862_v16  ;;  %2695 = vmatprep.subr.bf16.mxu0 %v3863_v17  ;;  %v3883_v30 = vld [vmem:[%s4507_s28 + $0x2e4] ss:$16 sps:$4 sm:$0xff]   ;;  %v3886_v32 = vld [vmem:[%s4507_s28 + $0x2e0] ss:$16 sps:$4 sm:$0xff]  }
  0x28   : > { %2736 = vmatprep.subr.bf16.mxu1 %v3865_v18  ;;  %v3887_v33 = vld [vmem:[%s4507_s28 + $0x104] ss:$16 sps:$4 sm:$0xff]   ;;  %v3891_v35 = vld [vmem:[%s4507_s28 + $0x100] ss:$16 sps:$4 sm:$0xff]  }
  0x29   : > { %v3889_v34 = vld [vmem:[%s4507_s28 + $0x304] ss:$16 sps:$4 sm:$0xff]   ;;  %v3892_v36 = vld [vmem:[%s4507_s28 + $0x300] ss:$16 sps:$4 sm:$0xff]  }
  0x2a   : > { %2696 = vmatpush1.bf16.msra.mxu0 %v3867_v19  ;;  %v3893_v37 = vld [vmem:[%s4507_s28 + $0x124] ss:$16 sps:$4 sm:$0xff]   ;;  %v3897_v39 = vld [vmem:[%s4507_s28 + $0x120] ss:$16 sps:$4 sm:$0xff]  }
  0x2b   : > { %2737 = vmatpush1.bf16.msra.mxu1 %v3868_v20  ;;  %2697 = vmatprep.subr.bf16.mxu0 %v3869_v21  ;;  %v3895_v38 = vld [vmem:[%s4507_s28 + $0x324] ss:$16 sps:$4 sm:$0xff]   ;;  %v3898_v40 = vld [vmem:[%s4507_s28 + $0x320] ss:$16 sps:$4 sm:$0xff]  }
  0x2c   : > { %2738 = vmatprep.subr.bf16.mxu1 %v3871_v22  ;;  %v3899_v41 = vld [vmem:[%s4507_s28 + $0x144] ss:$16 sps:$4 sm:$0xff]   ;;  %v3903_v43 = vld [vmem:[%s4507_s28 + $0x140] ss:$16 sps:$4 sm:$0xff]  }
  0x2d   : > { %v3901_v42 = vld [vmem:[%s4507_s28 + $0x344] ss:$16 sps:$4 sm:$0xff]   ;;  %v3904_v44 = vld [vmem:[%s4507_s28 + $0x340] ss:$16 sps:$4 sm:$0xff]  }
  0x2e   : > { %2698 = vmatpush1.bf16.msra.mxu0 %v3873_v23  ;;  %v3905_v45 = vld [vmem:[%s4507_s28 + $0x164] ss:$16 sps:$4 sm:$0xff]   ;;  %v3909_v50 = vld [vmem:[%s4507_s28 + $0x160] ss:$16 sps:$4 sm:$0xff]  }
  0x2f   : > { %2739 = vmatpush1.bf16.msra.mxu1 %v3874_v24  ;;  %2699 = vmatprep.subr.bf16.mxu0 %v3875_v25  ;;  %v3907_v46 = vld [vmem:[%s4507_s28 + $0x364] ss:$16 sps:$4 sm:$0xff]   ;;  %v3910_v51 = vld [vmem:[%s4507_s28 + $0x360] ss:$16 sps:$4 sm:$0xff]  }
  0x30   : > { %2740 = vmatprep.subr.bf16.mxu1 %v3877_v26  ;;  %v335_v47 = vld [vmem:[%s4502_s24] sm:$0xff] }
  0x31   : > { %v4557_v48 = vcombine.high %v335_v47, %v335_v47  ;;  %v3911_v53 = vld [vmem:[%s4507_s28 + $0x184] ss:$16 sps:$4 sm:$0xff]   ;;  %v3915_v55 = vld [vmem:[%s4507_s28 + $0x180] ss:$16 sps:$4 sm:$0xff]   ;;  %v4584_v7 = vcombine.low %v335_v47, %v335_v47 }
  0x32   : > { %2700 = vmatpush1.bf16.msra.mxu0 %v3879_v27  ;;  %v3913_v54 = vld [vmem:[%s4507_s28 + $0x384] ss:$16 sps:$4 sm:$0xff]   ;;  %v3916_v56 = vld [vmem:[%s4507_s28 + $0x380] ss:$16 sps:$4 sm:$0xff]  }
  0x33   : > { %2741 = vmatpush1.bf16.msra.mxu1 %v3880_v28  ;;  %2701 = vmatprep.subr.bf16.mxu0 %v3881_v29  ;;  %v3917_v57 = vld [vmem:[%s4507_s28 + $0x1a4] ss:$16 sps:$4 sm:$0xff]   ;;  %v3921_v59 = vld [vmem:[%s4507_s28 + $0x1a0] ss:$16 sps:$4 sm:$0xff]  }
  0x34   : > { %2742 = vmatprep.subr.bf16.mxu1 %v3883_v30  ;;  %2719 = vmatprep.mubr.bf16.mxu0 %v4557_v48  ;;  %v3919_v58 = vld [vmem:[%s4507_s28 + $0x3a4] ss:$16 sps:$4 sm:$0xff]   ;;  %v3922_v60 = vld [vmem:[%s4507_s28 + $0x3a0] ss:$16 sps:$4 sm:$0xff]  }
  0x35   : > { %v3923_v61 = vld [vmem:[%s4507_s28 + $0x1c4] ss:$16 sps:$4 sm:$0xff]   ;;  %v3927_v63 = vld [vmem:[%s4507_s28 + $0x1c0] ss:$16 sps:$4 sm:$0xff]  }
  0x36   : > { %2702 = vmatpush1.bf16.msra.mxu0 %v3885_v31  ;;  %v3925_v62 = vld [vmem:[%s4507_s28 + $0x3c4] ss:$16 sps:$4 sm:$0xff]   ;;  %v3928_v0 = vld [vmem:[%s4507_s28 + $0x3c0] ss:$16 sps:$4 sm:$0xff]  }
  0x37   : > { %2743 = vmatpush1.bf16.msra.mxu1 %v3886_v32  ;;  %2703 = vmatprep.subr.bf16.mxu0 %v3887_v33  ;;  %v3929_v1 = vld [vmem:[%s4507_s28 + $0x1e4] ss:$16 sps:$4 sm:$0xff]   ;;  %v3933_v3 = vld [vmem:[%s4507_s28 + $0x1e0] ss:$16 sps:$4 sm:$0xff]  }
  0x38   : > { %2744 = vmatprep.subr.bf16.mxu1 %v3889_v34  ;;  %v3931_v2 = vld [vmem:[%s4507_s28 + $0x3e4] ss:$16 sps:$4 sm:$0xff]   ;;  %v3934_v4 = vld [vmem:[%s4507_s28 + $0x3e0] ss:$16 sps:$4 sm:$0xff]   ;;  %v4618_v34 = vld [vmem:[%s4502_s24 + $0x18] sm:$0xff] }
  0x39   : > { %v3941_v5 = vld [vmem:[%s4507_s28 + $0x404] ss:$16 sps:$4 sm:$0xff]   ;;  %v3939_v9 = vld [vmem:[%s4507_s28 + $0x400] ss:$16 sps:$4 sm:$0xff]  }
  0x3a   : > { %2704 = vmatpush1.bf16.msra.mxu0 %v3891_v35  ;;  %v3944_v6 = vld [vmem:[%s4507_s28 + $0x604] ss:$16 sps:$4 sm:$0xff]   ;;  %v3942_v10 = vld [vmem:[%s4507_s28 + $0x600] ss:$16 sps:$4 sm:$0xff]  }
  0x3b   : > { %2745 = vmatpush1.bf16.msra.mxu1 %v3892_v36  ;;  %2705 = vmatprep.subr.bf16.mxu0 %v3893_v37  ;;  %v3947_v11 = vld [vmem:[%s4507_s28 + $0x424] ss:$16 sps:$4 sm:$0xff]   ;;  %v3945_v13 = vld [vmem:[%s4507_s28 + $0x420] ss:$16 sps:$4 sm:$0xff]  }
  0x3c   : > { %2746 = vmatprep.subr.bf16.mxu1 %v3895_v38  ;;  %v3950_v12 = vld [vmem:[%s4507_s28 + $0x624] ss:$16 sps:$4 sm:$0xff]   ;;  %v3948_v14 = vld [vmem:[%s4507_s28 + $0x620] ss:$16 sps:$4 sm:$0xff]   ;;  %v4628_v38 = vcombine.high %v4618_v34, %v4618_v34 }
  0x3d   : > { %v3953_v15 = vld [vmem:[%s4507_s28 + $0x444] ss:$16 sps:$4 sm:$0xff]   ;;  %v3951_v17 = vld [vmem:[%s4507_s28 + $0x440] ss:$16 sps:$4 sm:$0xff]  }
  0x3e   : > { %2706 = vmatpush1.bf16.msra.mxu0 %v3897_v39  ;;  %v3956_v16 = vld [vmem:[%s4507_s28 + $0x644] ss:$16 sps:$4 sm:$0xff]   ;;  %v3954_v18 = vld [vmem:[%s4507_s28 + $0x640] ss:$16 sps:$4 sm:$0xff]  }
  0x3f   : > { %2747 = vmatpush1.bf16.msra.mxu1 %v3898_v40  ;;  %2707 = vmatprep.subr.bf16.mxu0 %v3899_v41  ;;  %v3959_v19 = vld [vmem:[%s4507_s28 + $0x464] ss:$16 sps:$4 sm:$0xff]   ;;  %v3957_v21 = vld [vmem:[%s4507_s28 + $0x460] ss:$16 sps:$4 sm:$0xff]  }
  0x40   : > { %2748 = vmatprep.subr.bf16.mxu1 %v3901_v42  ;;  %v3962_v20 = vld [vmem:[%s4507_s28 + $0x664] ss:$16 sps:$4 sm:$0xff]   ;;  %v3960_v22 = vld [vmem:[%s4507_s28 + $0x660] ss:$16 sps:$4 sm:$0xff]  }
  0x41   : > { %v3965_v23 = vld [vmem:[%s4507_s28 + $0x484] ss:$16 sps:$4 sm:$0xff]   ;;  %v3963_v25 = vld [vmem:[%s4507_s28 + $0x480] ss:$16 sps:$4 sm:$0xff]  }
  0x42   : > { %2708 = vmatpush1.bf16.msra.mxu0 %v3903_v43  ;;  %v3968_v24 = vld [vmem:[%s4507_s28 + $0x684] ss:$16 sps:$4 sm:$0xff]   ;;  %v3966_v26 = vld [vmem:[%s4507_s28 + $0x680] ss:$16 sps:$4 sm:$0xff]  }
  0x43   : > { %2749 = vmatpush1.bf16.msra.mxu1 %v3904_v44  ;;  %2709 = vmatprep.subr.bf16.mxu0 %v3905_v45  ;;  %v3971_v27 = vld [vmem:[%s4507_s28 + $0x4a4] ss:$16 sps:$4 sm:$0xff]   ;;  %v3969_v29 = vld [vmem:[%s4507_s28 + $0x4a0] ss:$16 sps:$4 sm:$0xff]  }
  0x44   : > { %2750 = vmatprep.subr.bf16.mxu1 %v3907_v46  ;;  %v3974_v28 = vld [vmem:[%s4507_s28 + $0x6a4] ss:$16 sps:$4 sm:$0xff]   ;;  %v3972_v30 = vld [vmem:[%s4507_s28 + $0x6a0] ss:$16 sps:$4 sm:$0xff]  }
  0x45   : > { %v3977_v31 = vld [vmem:[%s4507_s28 + $0x4c4] ss:$16 sps:$4 sm:$0xff]   ;;  %v3975_v35 = vld [vmem:[%s4507_s28 + $0x4c0] ss:$16 sps:$4 sm:$0xff]  }
  0x46   : > { %2710 = vmatpush1.bf16.msra.mxu0 %v3909_v50  ;;  %v3980_v32 = vld [vmem:[%s4507_s28 + $0x6c4] ss:$16 sps:$4 sm:$0xff]   ;;  %v3978_v36 = vld [vmem:[%s4507_s28 + $0x6c0] ss:$16 sps:$4 sm:$0xff]  }
  0x47   : > { %2751 = vmatpush1.bf16.msra.mxu1 %v3910_v51  ;;  %2711 = vmatprep.subr.bf16.mxu0 %v3911_v53  ;;  %v4615_v33 = vld [vmem:[%s4502_s24 + $0x10] sm:$0xff] }
  0x48   : > { %2752 = vmatprep.subr.bf16.mxu1 %v3913_v54  ;;  %v4624_v37 = vcombine.high %v4615_v33, %v4615_v33  ;;  %v3983_v39 = vld [vmem:[%s4507_s28 + $0x4e4] ss:$16 sps:$4 sm:$0xff]   ;;  %v3981_v41 = vld [vmem:[%s4507_s28 + $0x4e0] ss:$16 sps:$4 sm:$0xff]  }
  0x49   : > { %v3986_v40 = vld [vmem:[%s4507_s28 + $0x6e4] ss:$16 sps:$4 sm:$0xff]   ;;  %v3984_v42 = vld [vmem:[%s4507_s28 + $0x6e0] ss:$16 sps:$4 sm:$0xff]  }
  0x4a   : > { %2712 = vmatpush1.bf16.msra.mxu0 %v3915_v55  ;;  %v3989_v43 = vld [vmem:[%s4507_s28 + $0x504] ss:$16 sps:$4 sm:$0xff]   ;;  %v3987_v45 = vld [vmem:[%s4507_s28 + $0x500] ss:$16 sps:$4 sm:$0xff]  }
  0x4b   : > { %2753 = vmatpush1.bf16.msra.mxu1 %v3916_v56  ;;  %2713 = vmatprep.subr.bf16.mxu0 %v3917_v57  ;;  %v3992_v44 = vld [vmem:[%s4507_s28 + $0x704] ss:$16 sps:$4 sm:$0xff]   ;;  %v3990_v46 = vld [vmem:[%s4507_s28 + $0x700] ss:$16 sps:$4 sm:$0xff]  }
  0x4c   : > { %2754 = vmatprep.subr.bf16.mxu1 %v3919_v58  ;;  %v3995_v47 = vld [vmem:[%s4507_s28 + $0x524] ss:$16 sps:$4 sm:$0xff]   ;;  %v3993_v50 = vld [vmem:[%s4507_s28 + $0x520] ss:$16 sps:$4 sm:$0xff]  }
  0x4d   : > { %v3998_v49 = vld [vmem:[%s4507_s28 + $0x724] ss:$16 sps:$4 sm:$0xff]   ;;  %v3996_v51 = vld [vmem:[%s4507_s28 + $0x720] ss:$16 sps:$4 sm:$0xff]  }
  0x4e   : > { %2714 = vmatpush1.bf16.msra.mxu0 %v3921_v59  ;;  %v4001_v53 = vld [vmem:[%s4507_s28 + $0x544] ss:$16 sps:$4 sm:$0xff]   ;;  %v3999_v55 = vld [vmem:[%s4507_s28 + $0x540] ss:$16 sps:$4 sm:$0xff]  }
  0x4f   : > { %2755 = vmatpush1.bf16.msra.mxu1 %v3922_v60  ;;  %2715 = vmatprep.subr.bf16.mxu0 %v3923_v61  ;;  %v4004_v54 = vld [vmem:[%s4507_s28 + $0x744] ss:$16 sps:$4 sm:$0xff]   ;;  %v4002_v56 = vld [vmem:[%s4507_s28 + $0x740] ss:$16 sps:$4 sm:$0xff]  }
  0x50   : > { %2756 = vmatprep.subr.bf16.mxu1 %v3925_v62  ;;  %v4007_v57 = vld [vmem:[%s4507_s28 + $0x564] ss:$16 sps:$4 sm:$0xff]   ;;  %v4005_v59 = vld [vmem:[%s4507_s28 + $0x560] ss:$16 sps:$4 sm:$0xff]  }
  0x51   : > { %v4010_v58 = vld [vmem:[%s4507_s28 + $0x764] ss:$16 sps:$4 sm:$0xff]   ;;  %v4008_v60 = vld [vmem:[%s4507_s28 + $0x760] ss:$16 sps:$4 sm:$0xff]  }
  0x52   : > { %2716 = vmatpush1.bf16.msra.mxu0 %v3927_v63  ;;  %v4013_v61 = vld [vmem:[%s4507_s28 + $0x584] ss:$16 sps:$4 sm:$0xff]   ;;  %v4011_v63 = vld [vmem:[%s4507_s28 + $0x580] ss:$16 sps:$4 sm:$0xff]  }
  0x53   : > { %2757 = vmatpush1.bf16.msra.mxu1 %v3928_v0  ;;  %2717 = vmatprep.subr.bf16.mxu0 %v3929_v1  ;;  %v4016_v62 = vld [vmem:[%s4507_s28 + $0x784] ss:$16 sps:$4 sm:$0xff]   ;;  %v4014_v0 = vld [vmem:[%s4507_s28 + $0x780] ss:$16 sps:$4 sm:$0xff]  }
  0x54   : > { %2758 = vmatprep.subr.bf16.mxu1 %v3931_v2  ;;  %v4019_v1 = vld [vmem:[%s4507_s28 + $0x5a4] ss:$16 sps:$4 sm:$0xff]  }
  0x55   : > { %v4022_v2 = vld [vmem:[%s4507_s28 + $0x7a4] ss:$16 sps:$4 sm:$0xff]  }
  0x56   : > { %2718 = vmatpush1.bf16.msra.mxu0 %v3933_v3  ;;  %v4017_v3 = vld [vmem:[%s4507_s28 + $0x5a0] ss:$16 sps:$4 sm:$0xff]  }
  0x57   : > { %2759 = vmatpush1.bf16.msra.mxu1 %v3934_v4  ;;  %2769 = vmatprep.subr.bf16.mxu0 %v3941_v5  ;;  %v4020_v4 = vld [vmem:[%s4507_s28 + $0x7a0] ss:$16 sps:$4 sm:$0xff]   ;;  %v4025_v5 = vld [vmem:[%s4507_s28 + $0x5c4] ss:$16 sps:$4 sm:$0xff]  }
  0x58   : > { %2810 = vmatprep.subr.bf16.mxu1 %v3944_v6  ;;  %v4028_v6 = vld [vmem:[%s4507_s28 + $0x7c4] ss:$16 sps:$4 sm:$0xff]  }
  0x59   : > { %2720 = vmatmul.mubr.bf16.vlgmr.msra.gmra.mrb[0].mxu0 %v4584_v7 }
  0x5a   : > { %2761 = vmatmul.mubr.bf16.vlgmr.msra.gmra.mrb[0].mxu1 %v4586_v8  ;;  %2770 = vmatpush1.bf16.msra.mxu0 %v3939_v9  ;;  %v4023_v9 = vld [vmem:[%s4507_s28 + $0x5c0] ss:$16 sps:$4 sm:$0xff]  }
  0x5b   : > { %2811 = vmatpush1.bf16.msra.mxu1 %v3942_v10  ;;  %2771 = vmatprep.subr.bf16.mxu0 %v3947_v11  ;;  %v4026_v10 = vld [vmem:[%s4507_s28 + $0x7c0] ss:$16 sps:$4 sm:$0xff]   ;;  %v4031_v11 = vld [vmem:[%s4507_s28 + $0x5e4] ss:$16 sps:$4 sm:$0xff]  }
  0x5c   : > { %2812 = vmatprep.subr.bf16.mxu1 %v3950_v12  ;;  %2801 = vmatprep.mubr.bf16.mxu0 %v4624_v37  ;;  %v4034_v12 = vld [vmem:[%s4507_s28 + $0x7e4] ss:$16 sps:$4 sm:$0xff]  }
  0x5d   : > { %2842 = vmatprep.mubr.bf16.mxu1 %v4628_v38 }
  0x5e   : > { %2772 = vmatpush1.bf16.msra.mxu0 %v3945_v13  ;;  %v4029_v13 = vld [vmem:[%s4507_s28 + $0x5e0] ss:$16 sps:$4 sm:$0xff]  }
  0x5f   : > { %2813 = vmatpush1.bf16.msra.mxu1 %v3948_v14  ;;  %2773 = vmatprep.subr.bf16.mxu0 %v3953_v15  ;;  %v4032_v14 = vld [vmem:[%s4507_s28 + $0x7e0] ss:$16 sps:$4 sm:$0xff]   ;;  %v4041_v15 = vld [vmem:[%s4507_s28 + $0x804] ss:$16 sps:$4 sm:$0xff]  }
  0x60   : > { %2814 = vmatprep.subr.bf16.mxu1 %v3956_v16  ;;  %v4044_v16 = vld [vmem:[%s4507_s28 + $0xa04] ss:$16 sps:$4 sm:$0xff]  }
  0x62   : > { %2774 = vmatpush1.bf16.msra.mxu0 %v3951_v17  ;;  %v4672_v17 = vcombine.low %v4615_v33, %v4615_v33  ;;  %v4059_v33 = vld [vmem:[%s4507_s28 + $0x864] ss:$16 sps:$4 sm:$0xff]  }
  0x63   : > { %2815 = vmatpush1.bf16.msra.mxu1 %v3954_v18  ;;  %2775 = vmatprep.subr.bf16.mxu0 %v3959_v19  ;;  %v4676_v18 = vcombine.low %v4618_v34, %v4618_v34  ;;  %v4039_v19 = vld [vmem:[%s4507_s28 + $0x800] ss:$16 sps:$4 sm:$0xff]   ;;  %v4062_v34 = vld [vmem:[%s4507_s28 + $0xa64] ss:$16 sps:$4 sm:$0xff]  }
  0x64   : > { %2816 = vmatprep.subr.bf16.mxu1 %v3962_v20  ;;  %v4042_v20 = vld [vmem:[%s4507_s28 + $0xa00] ss:$16 sps:$4 sm:$0xff]  }
  0x66   : > { %2776 = vmatpush1.bf16.msra.mxu0 %v3957_v21  ;;  %v4047_v21 = vld [vmem:[%s4507_s28 + $0x824] ss:$16 sps:$4 sm:$0xff]  }
  0x67   : > { %2817 = vmatpush1.bf16.msra.mxu1 %v3960_v22  ;;  %2777 = vmatprep.subr.bf16.mxu0 %v3965_v23  ;;  %v4050_v22 = vld [vmem:[%s4507_s28 + $0xa24] ss:$16 sps:$4 sm:$0xff]  }
  0x68   : > { %2818 = vmatprep.subr.bf16.mxu1 %v3968_v24  ;;  %v4683_v23 = vld [vmem:[%s4502_s24 + $0x20] sm:$0xff]  ;;  %v4686_v24 = vld [vmem:[%s4502_s24 + $0x28] sm:$0xff] }
  0x6a   : > { %2778 = vmatpush1.bf16.msra.mxu0 %v3963_v25  ;;  %v4690_v25 = vcombine.high %v4683_v23, %v4683_v23 }
  0x6b   : > { %2819 = vmatpush1.bf16.msra.mxu1 %v3966_v26  ;;  %2779 = vmatprep.subr.bf16.mxu0 %v3971_v27  ;;  %v4694_v26 = vcombine.high %v4686_v24, %v4686_v24  ;;  %v4045_v27 = vld [vmem:[%s4507_s28 + $0x820] ss:$16 sps:$4 sm:$0xff]  }
  0x6c   : > { %2820 = vmatprep.subr.bf16.mxu1 %v3974_v28  ;;  %v4048_v28 = vld [vmem:[%s4507_s28 + $0xa20] ss:$16 sps:$4 sm:$0xff]  }
  0x6e   : > { %2780 = vmatpush1.bf16.msra.mxu0 %v3969_v29  ;;  %v4053_v29 = vld [vmem:[%s4507_s28 + $0x844] ss:$16 sps:$4 sm:$0xff]  }
  0x6f   : > { %2821 = vmatpush1.bf16.msra.mxu1 %v3972_v30  ;;  %2781 = vmatprep.subr.bf16.mxu0 %v3977_v31  ;;  %v4056_v30 = vld [vmem:[%s4507_s28 + $0xa44] ss:$16 sps:$4 sm:$0xff]   ;;  %v4051_v31 = vld [vmem:[%s4507_s28 + $0x840] ss:$16 sps:$4 sm:$0xff]  }
  0x70   : > { %2822 = vmatprep.subr.bf16.mxu1 %v3980_v32  ;;  %v4054_v32 = vld [vmem:[%s4507_s28 + $0xa40] ss:$16 sps:$4 sm:$0xff]  }
  0x72   : > { %2782 = vmatpush1.bf16.msra.mxu0 %v3975_v35  ;;  %v4057_v35 = vld [vmem:[%s4507_s28 + $0x860] ss:$16 sps:$4 sm:$0xff]  }
  0x73   : > { %2823 = vmatpush1.bf16.msra.mxu1 %v3978_v36  ;;  %2783 = vmatprep.subr.bf16.mxu0 %v3983_v39  ;;  %v4060_v36 = vld [vmem:[%s4507_s28 + $0xa60] ss:$16 sps:$4 sm:$0xff]   ;;  %v4065_v39 = vld [vmem:[%s4507_s28 + $0x884] ss:$16 sps:$4 sm:$0xff]  }
  0x74   : > { %2824 = vmatprep.subr.bf16.mxu1 %v3986_v40  ;;  %v4068_v40 = vld [vmem:[%s4507_s28 + $0xa84] ss:$16 sps:$4 sm:$0xff]  }
  0x76   : > { %2784 = vmatpush1.bf16.msra.mxu0 %v3981_v41  ;;  %v4063_v41 = vld [vmem:[%s4507_s28 + $0x880] ss:$16 sps:$4 sm:$0xff]  }
  0x77   : > { %2825 = vmatpush1.bf16.msra.mxu1 %v3984_v42  ;;  %2785 = vmatprep.subr.bf16.mxu0 %v3989_v43  ;;  %v4066_v42 = vld [vmem:[%s4507_s28 + $0xa80] ss:$16 sps:$4 sm:$0xff]   ;;  %v4071_v43 = vld [vmem:[%s4507_s28 + $0x8a4] ss:$16 sps:$4 sm:$0xff]  }
  0x78   : > { %2826 = vmatprep.subr.bf16.mxu1 %v3992_v44  ;;  %v4074_v44 = vld [vmem:[%s4507_s28 + $0xaa4] ss:$16 sps:$4 sm:$0xff]  }
  0x7a   : > { %2786 = vmatpush1.bf16.msra.mxu0 %v3987_v45  ;;  %v4069_v45 = vld [vmem:[%s4507_s28 + $0x8a0] ss:$16 sps:$4 sm:$0xff]  }
  0x7b   : > { %2827 = vmatpush1.bf16.msra.mxu1 %v3990_v46  ;;  %2787 = vmatprep.subr.bf16.mxu0 %v3995_v47  ;;  %v4072_v46 = vld [vmem:[%s4507_s28 + $0xaa0] ss:$16 sps:$4 sm:$0xff]   ;;  %v4077_v47 = vld [vmem:[%s4507_s28 + $0x8c4] ss:$16 sps:$4 sm:$0xff]  }
  0x7c   : > { %2828 = vmatprep.subr.bf16.mxu1 %v3998_v49  ;;  %v4080_v49 = vld [vmem:[%s4507_s28 + $0xac4] ss:$16 sps:$4 sm:$0xff]  }
  0x7e   : > { %2788 = vmatpush1.bf16.msra.mxu0 %v3993_v50  ;;  %v4075_v50 = vld [vmem:[%s4507_s28 + $0x8c0] ss:$16 sps:$4 sm:$0xff]  }
  0x7f   : > { %2829 = vmatpush1.bf16.msra.mxu1 %v3996_v51  ;;  %2789 = vmatprep.subr.bf16.mxu0 %v4001_v53  ;;  %v4078_v51 = vld [vmem:[%s4507_s28 + $0xac0] ss:$16 sps:$4 sm:$0xff]   ;;  %v4083_v53 = vld [vmem:[%s4507_s28 + $0x8e4] ss:$16 sps:$4 sm:$0xff]  }
  0x80   : > { %2830 = vmatprep.subr.bf16.mxu1 %v4004_v54  ;;  %v4086_v54 = vld [vmem:[%s4507_s28 + $0xae4] ss:$16 sps:$4 sm:$0xff]  }
  0x82   : > { %2790 = vmatpush1.bf16.msra.mxu0 %v3999_v55  ;;  %v4081_v55 = vld [vmem:[%s4507_s28 + $0x8e0] ss:$16 sps:$4 sm:$0xff]  }
  0x83   : > { %2831 = vmatpush1.bf16.msra.mxu1 %v4002_v56  ;;  %2791 = vmatprep.subr.bf16.mxu0 %v4007_v57  ;;  %v4084_v56 = vld [vmem:[%s4507_s28 + $0xae0] ss:$16 sps:$4 sm:$0xff]   ;;  %v4089_v57 = vld [vmem:[%s4507_s28 + $0x904] ss:$16 sps:$4 sm:$0xff]  }
  0x84   : > { %2832 = vmatprep.subr.bf16.mxu1 %v4010_v58  ;;  %v4092_v58 = vld [vmem:[%s4507_s28 + $0xb04] ss:$16 sps:$4 sm:$0xff]  }
  0x86   : > { %2792 = vmatpush1.bf16.msra.mxu0 %v4005_v59  ;;  %v4087_v59 = vld [vmem:[%s4507_s28 + $0x900] ss:$16 sps:$4 sm:$0xff]  }
  0x87   : > { %2833 = vmatpush1.bf16.msra.mxu1 %v4008_v60  ;;  %2793 = vmatprep.subr.bf16.mxu0 %v4013_v61  ;;  %v4090_v60 = vld [vmem:[%s4507_s28 + $0xb00] ss:$16 sps:$4 sm:$0xff]   ;;  %v4095_v61 = vld [vmem:[%s4507_s28 + $0x924] ss:$16 sps:$4 sm:$0xff]  }
  0x88   : > { %2834 = vmatprep.subr.bf16.mxu1 %v4016_v62  ;;  %v4098_v62 = vld [vmem:[%s4507_s28 + $0xb24] ss:$16 sps:$4 sm:$0xff]  }
  0x8a   : > { %2794 = vmatpush1.bf16.msra.mxu0 %v4011_v63  ;;  %v4093_v63 = vld [vmem:[%s4507_s28 + $0x920] ss:$16 sps:$4 sm:$0xff]  }
  0x8b   : > { %2835 = vmatpush1.bf16.msra.mxu1 %v4014_v0  ;;  %2795 = vmatprep.subr.bf16.mxu0 %v4019_v1  ;;  %v4096_v0 = vld [vmem:[%s4507_s28 + $0xb20] ss:$16 sps:$4 sm:$0xff]   ;;  %v4101_v1 = vld [vmem:[%s4507_s28 + $0x944] ss:$16 sps:$4 sm:$0xff]  }
  0x8c   : > { %2836 = vmatprep.subr.bf16.mxu1 %v4022_v2  ;;  %v4104_v2 = vld [vmem:[%s4507_s28 + $0xb44] ss:$16 sps:$4 sm:$0xff]  }
  0x8e   : > { %2796 = vmatpush1.bf16.msra.mxu0 %v4017_v3  ;;  %v4099_v3 = vld [vmem:[%s4507_s28 + $0x940] ss:$16 sps:$4 sm:$0xff]  }
  0x8f   : > { %2837 = vmatpush1.bf16.msra.mxu1 %v4020_v4  ;;  %2797 = vmatprep.subr.bf16.mxu0 %v4025_v5  ;;  %v4102_v4 = vld [vmem:[%s4507_s28 + $0xb40] ss:$16 sps:$4 sm:$0xff]   ;;  %v4107_v5 = vld [vmem:[%s4507_s28 + $0x964] ss:$16 sps:$4 sm:$0xff]  }
  0x90   : > { %2838 = vmatprep.subr.bf16.mxu1 %v4028_v6  ;;  %v4110_v6 = vld [vmem:[%s4507_s28 + $0xb64] ss:$16 sps:$4 sm:$0xff]  }
  0x92   : > { %2798 = vmatpush1.bf16.msra.mxu0 %v4023_v9  ;;  %v4105_v9 = vld [vmem:[%s4507_s28 + $0x960] ss:$16 sps:$4 sm:$0xff]  }
  0x93   : > { %2839 = vmatpush1.bf16.msra.mxu1 %v4026_v10  ;;  %2799 = vmatprep.subr.bf16.mxu0 %v4031_v11  ;;  %v4108_v10 = vld [vmem:[%s4507_s28 + $0xb60] ss:$16 sps:$4 sm:$0xff]   ;;  %v4113_v11 = vld [vmem:[%s4507_s28 + $0x984] ss:$16 sps:$4 sm:$0xff]  }
  0x94   : > { %2840 = vmatprep.subr.bf16.mxu1 %v4034_v12  ;;  %v4116_v12 = vld [vmem:[%s4507_s28 + $0xb84] ss:$16 sps:$4 sm:$0xff]  }
  0x96   : > { %2800 = vmatpush1.bf16.msra.mxu0 %v4029_v13  ;;  %v4111_v13 = vld [vmem:[%s4507_s28 + $0x980] ss:$16 sps:$4 sm:$0xff]  }
  0x97   : > { %2841 = vmatpush1.bf16.msra.mxu1 %v4032_v14  ;;  %2851 = vmatprep.subr.bf16.mxu0 %v4041_v15  ;;  %v4114_v14 = vld [vmem:[%s4507_s28 + $0xb80] ss:$16 sps:$4 sm:$0xff]   ;;  %v4119_v15 = vld [vmem:[%s4507_s28 + $0x9a4] ss:$16 sps:$4 sm:$0xff]  }
  0x98   : > { %2892 = vmatprep.subr.bf16.mxu1 %v4044_v16  ;;  %v4122_v16 = vld [vmem:[%s4507_s28 + $0xba4] ss:$16 sps:$4 sm:$0xff]  }
  0x99   : > { %2802 = vmatmul.mubr.bf16.vlgmr.msra.gmra.mrb[4].mxu0 %v4672_v17 }
  0x9a   : > { %2843 = vmatmul.mubr.bf16.vlgmr.msra.gmra.mrb[4].mxu1 %v4676_v18  ;;  %2852 = vmatpush1.bf16.msra.mxu0 %v4039_v19  ;;  %v4117_v19 = vld [vmem:[%s4507_s28 + $0x9a0] ss:$16 sps:$4 sm:$0xff]  }
  0x9b   : > { %2893 = vmatpush1.bf16.msra.mxu1 %v4042_v20  ;;  %2853 = vmatprep.subr.bf16.mxu0 %v4047_v21  ;;  %v4120_v20 = vld [vmem:[%s4507_s28 + $0xba0] ss:$16 sps:$4 sm:$0xff]   ;;  %v4125_v21 = vld [vmem:[%s4507_s28 + $0x9c4] ss:$16 sps:$4 sm:$0xff]  }
  0x9c   : > { %2894 = vmatprep.subr.bf16.mxu1 %v4050_v22  ;;  %2883 = vmatprep.mubr.bf16.mxu0 %v4690_v25  ;;  %v4128_v22 = vld [vmem:[%s4507_s28 + $0xbc4] ss:$16 sps:$4 sm:$0xff]  }
  0x9d   : > { %2924 = vmatprep.mubr.bf16.mxu1 %v4694_v26 }
  0x9e   : > { %2854 = vmatpush1.bf16.msra.mxu0 %v4045_v27  ;;  %v4123_v27 = vld [vmem:[%s4507_s28 + $0x9c0] ss:$16 sps:$4 sm:$0xff]  }
  0x9f   : > { %2895 = vmatpush1.bf16.msra.mxu1 %v4048_v28  ;;  %2855 = vmatprep.subr.bf16.mxu0 %v4053_v29  ;;  %v4126_v28 = vld [vmem:[%s4507_s28 + $0xbc0] ss:$16 sps:$4 sm:$0xff]   ;;  %v4131_v29 = vld [vmem:[%s4507_s28 + $0x9e4] ss:$16 sps:$4 sm:$0xff]  }
  0xa0   : > { %2896 = vmatprep.subr.bf16.mxu1 %v4056_v30  ;;  %v4134_v30 = vld [vmem:[%s4507_s28 + $0xbe4] ss:$16 sps:$4 sm:$0xff]  }
  0xa2   : > { %2856 = vmatpush1.bf16.msra.mxu0 %v4051_v31  ;;  %v4129_v31 = vld [vmem:[%s4507_s28 + $0x9e0] ss:$16 sps:$4 sm:$0xff]  }
  0xa3   : > { %2897 = vmatpush1.bf16.msra.mxu1 %v4054_v32  ;;  %2857 = vmatprep.subr.bf16.mxu0 %v4059_v33  ;;  %v4132_v32 = vld [vmem:[%s4507_s28 + $0xbe0] ss:$16 sps:$4 sm:$0xff]   ;;  %v4141_v33 = vld [vmem:[%s4507_s28 + $0xc] ss:$16 sps:$4 sm:$0xff]  }
  0xa4   : > { %2898 = vmatprep.subr.bf16.mxu1 %v4062_v34  ;;  %v4144_v34 = vld [vmem:[%s4507_s28 + $0x20c] ss:$16 sps:$4 sm:$0xff]  }
  0xa6   : > { %2858 = vmatpush1.bf16.msra.mxu0 %v4057_v35  ;;  %v4762_v35 = vcombine.low %v4683_v23, %v4683_v23  ;;  %v4145_v23 = vld [vmem:[%s4507_s28 + $0x28] ss:$16 sps:$4 sm:$0xff]  }
  0xa7   : > { %2899 = vmatpush1.bf16.msra.mxu1 %v4060_v36  ;;  %2859 = vmatprep.subr.bf16.mxu0 %v4065_v39  ;;  %v4766_v36 = vcombine.low %v4686_v24, %v4686_v24  ;;  %v4139_v39 = vld [vmem:[%s4507_s28 + $0x8] ss:$16 sps:$4 sm:$0xff]  }
  0xa8   : > { %2900 = vmatprep.subr.bf16.mxu1 %v4068_v40  ;;  %v4142_v40 = vld [vmem:[%s4507_s28 + $0x208] ss:$16 sps:$4 sm:$0xff]  }
  0xa9   : > { %v4148_v24 = vld [vmem:[%s4507_s28 + $0x228] ss:$16 sps:$4 sm:$0xff]  }
  0xaa   : > { %2860 = vmatpush1.bf16.msra.mxu0 %v4063_v41  ;;  %v4147_v41 = vld [vmem:[%s4507_s28 + $0x2c] ss:$16 sps:$4 sm:$0xff]  }
  0xab   : > { %2901 = vmatpush1.bf16.msra.mxu1 %v4066_v42  ;;  %2861 = vmatprep.subr.bf16.mxu0 %v4071_v43  ;;  %v4150_v42 = vld [vmem:[%s4507_s28 + $0x22c] ss:$16 sps:$4 sm:$0xff]  }
  0xac   : > { %2902 = vmatprep.subr.bf16.mxu1 %v4074_v44  ;;  %v4153_v43 = vld [vmem:[%s4507_s28 + $0x4c] ss:$16 sps:$4 sm:$0xff]  }
  0xad   : > { %v4156_v44 = vld [vmem:[%s4507_s28 + $0x24c] ss:$16 sps:$4 sm:$0xff]  }
  0xae   : > { %2862 = vmatpush1.bf16.msra.mxu0 %v4069_v45  ;;  %v4151_v45 = vld [vmem:[%s4507_s28 + $0x48] ss:$16 sps:$4 sm:$0xff]  }
  0xaf   : > { %2903 = vmatpush1.bf16.msra.mxu1 %v4072_v46  ;;  %2863 = vmatprep.subr.bf16.mxu0 %v4077_v47  ;;  %v4154_v46 = vld [vmem:[%s4507_s28 + $0x248] ss:$16 sps:$4 sm:$0xff]   ;;  %v4159_v47 = vld [vmem:[%s4507_s28 + $0x6c] ss:$16 sps:$4 sm:$0xff]  }
  0xb0   : > { %2904 = vmatprep.subr.bf16.mxu1 %v4080_v49  ;;  %v4162_v49 = vld [vmem:[%s4507_s28 + $0x26c] ss:$16 sps:$4 sm:$0xff]  }
  0xb2   : > { %2864 = vmatpush1.bf16.msra.mxu0 %v4075_v50  ;;  %v4157_v50 = vld [vmem:[%s4507_s28 + $0x68] ss:$16 sps:$4 sm:$0xff]  }
  0xb3   : > { %2905 = vmatpush1.bf16.msra.mxu1 %v4078_v51  ;;  %2865 = vmatprep.subr.bf16.mxu0 %v4083_v53  ;;  %v4168_v51 = vld [vmem:[%s4507_s28 + $0x28c] ss:$16 sps:$4 sm:$0xff]   ;;  %v4163_v53 = vld [vmem:[%s4507_s28 + $0x88] ss:$16 sps:$4 sm:$0xff]  }
  0xb4   : > { %2906 = vmatprep.subr.bf16.mxu1 %v4086_v54  ;;  %v4166_v54 = vld [vmem:[%s4507_s28 + $0x288] ss:$16 sps:$4 sm:$0xff]  }
  0xb6   : > { %2866 = vmatpush1.bf16.msra.mxu0 %v4081_v55  ;;  %v4171_v55 = vld [vmem:[%s4507_s28 + $0xac] ss:$16 sps:$4 sm:$0xff]  }
  0xb7   : > { %2907 = vmatpush1.bf16.msra.mxu1 %v4084_v56  ;;  %2867 = vmatprep.subr.bf16.mxu0 %v4089_v57  ;;  %v4174_v56 = vld [vmem:[%s4507_s28 + $0x2ac] ss:$16 sps:$4 sm:$0xff]   ;;  %v4169_v57 = vld [vmem:[%s4507_s28 + $0xa8] ss:$16 sps:$4 sm:$0xff]  }
  0xb8   : > { %2908 = vmatprep.subr.bf16.mxu1 %v4092_v58  ;;  %v4172_v58 = vld [vmem:[%s4507_s28 + $0x2a8] ss:$16 sps:$4 sm:$0xff]  }
  0xba   : > { %2868 = vmatpush1.bf16.msra.mxu0 %v4087_v59  ;;  %v4177_v59 = vld [vmem:[%s4507_s28 + $0xcc] ss:$16 sps:$4 sm:$0xff]  }
  0xbb   : > { %2909 = vmatpush1.bf16.msra.mxu1 %v4090_v60  ;;  %2869 = vmatprep.subr.bf16.mxu0 %v4095_v61  ;;  %v4180_v60 = vld [vmem:[%s4507_s28 + $0x2cc] ss:$16 sps:$4 sm:$0xff]   ;;  %v4175_v61 = vld [vmem:[%s4507_s28 + $0xc8] ss:$16 sps:$4 sm:$0xff]  }
  0xbc   : > { %2910 = vmatprep.subr.bf16.mxu1 %v4098_v62  ;;  %v4178_v62 = vld [vmem:[%s4507_s28 + $0x2c8] ss:$16 sps:$4 sm:$0xff]  }
  0xbe   : > { %2870 = vmatpush1.bf16.msra.mxu0 %v4093_v63  ;;  %v4183_v63 = vld [vmem:[%s4507_s28 + $0xec] ss:$16 sps:$4 sm:$0xff]  }
  0xbf   : > { %2911 = vmatpush1.bf16.msra.mxu1 %v4096_v0  ;;  %2871 = vmatprep.subr.bf16.mxu0 %v4101_v1  ;;  %v4186_v0 = vld [vmem:[%s4507_s28 + $0x2ec] ss:$16 sps:$4 sm:$0xff]   ;;  %v4181_v1 = vld [vmem:[%s4507_s28 + $0xe8] ss:$16 sps:$4 sm:$0xff]  }
  0xc0   : > { %2912 = vmatprep.subr.bf16.mxu1 %v4104_v2  ;;  %v4184_v2 = vld [vmem:[%s4507_s28 + $0x2e8] ss:$16 sps:$4 sm:$0xff]  }
  0xc2   : > { %2872 = vmatpush1.bf16.msra.mxu0 %v4099_v3  ;;  %v4189_v3 = vld [vmem:[%s4507_s28 + $0x10c] ss:$16 sps:$4 sm:$0xff]  }
  0xc3   : > { %2913 = vmatpush1.bf16.msra.mxu1 %v4102_v4  ;;  %2873 = vmatprep.subr.bf16.mxu0 %v4107_v5  ;;  %v4192_v4 = vld [vmem:[%s4507_s28 + $0x30c] ss:$16 sps:$4 sm:$0xff]   ;;  %v4187_v5 = vld [vmem:[%s4507_s28 + $0x108] ss:$16 sps:$4 sm:$0xff]  }
  0xc4   : > { %2914 = vmatprep.subr.bf16.mxu1 %v4110_v6  ;;  %v4190_v6 = vld [vmem:[%s4507_s28 + $0x308] ss:$16 sps:$4 sm:$0xff]  }
  0xc6   : > { %2874 = vmatpush1.bf16.msra.mxu0 %v4105_v9  ;;  %v4195_v9 = vld [vmem:[%s4507_s28 + $0x12c] ss:$16 sps:$4 sm:$0xff]  }
  0xc7   : > { %2915 = vmatpush1.bf16.msra.mxu1 %v4108_v10  ;;  %2875 = vmatprep.subr.bf16.mxu0 %v4113_v11  ;;  %v4198_v10 = vld [vmem:[%s4507_s28 + $0x32c] ss:$16 sps:$4 sm:$0xff]   ;;  %v4193_v11 = vld [vmem:[%s4507_s28 + $0x128] ss:$16 sps:$4 sm:$0xff]  }
  0xc8   : > { %2916 = vmatprep.subr.bf16.mxu1 %v4116_v12  ;;  %v4196_v12 = vld [vmem:[%s4507_s28 + $0x328] ss:$16 sps:$4 sm:$0xff]  }
  0xca   : > { %2876 = vmatpush1.bf16.msra.mxu0 %v4111_v13  ;;  %v4201_v13 = vld [vmem:[%s4507_s28 + $0x14c] ss:$16 sps:$4 sm:$0xff]  }
  0xcb   : > { %2917 = vmatpush1.bf16.msra.mxu1 %v4114_v14  ;;  %2877 = vmatprep.subr.bf16.mxu0 %v4119_v15  ;;  %v4204_v14 = vld [vmem:[%s4507_s28 + $0x34c] ss:$16 sps:$4 sm:$0xff]   ;;  %v4199_v15 = vld [vmem:[%s4507_s28 + $0x148] ss:$16 sps:$4 sm:$0xff]  }
  0xcc   : > { %2918 = vmatprep.subr.bf16.mxu1 %v4122_v16  ;;  %v4202_v16 = vld [vmem:[%s4507_s28 + $0x348] ss:$16 sps:$4 sm:$0xff]  }
  0xce   : > { %2878 = vmatpush1.bf16.msra.mxu0 %v4117_v19  ;;  %v4207_v19 = vld [vmem:[%s4507_s28 + $0x16c] ss:$16 sps:$4 sm:$0xff]  }
  0xcf   : > { %2919 = vmatpush1.bf16.msra.mxu1 %v4120_v20  ;;  %2879 = vmatprep.subr.bf16.mxu0 %v4125_v21  ;;  %v4210_v20 = vld [vmem:[%s4507_s28 + $0x36c] ss:$16 sps:$4 sm:$0xff]   ;;  %v4205_v21 = vld [vmem:[%s4507_s28 + $0x168] ss:$16 sps:$4 sm:$0xff]  }
  0xd0   : > { %2920 = vmatprep.subr.bf16.mxu1 %v4128_v22  ;;  %v4208_v22 = vld [vmem:[%s4507_s28 + $0x368] ss:$16 sps:$4 sm:$0xff]  }
  0xd2   : > { %2880 = vmatpush1.bf16.msra.mxu0 %v4123_v27  ;;  %v4213_v27 = vld [vmem:[%s4507_s28 + $0x18c] ss:$16 sps:$4 sm:$0xff]  }
  0xd3   : > { %2921 = vmatpush1.bf16.msra.mxu1 %v4126_v28  ;;  %2881 = vmatprep.subr.bf16.mxu0 %v4131_v29  ;;  %v4216_v28 = vld [vmem:[%s4507_s28 + $0x38c] ss:$16 sps:$4 sm:$0xff]   ;;  %v4211_v29 = vld [vmem:[%s4507_s28 + $0x188] ss:$16 sps:$4 sm:$0xff]  }
  0xd4   : > { %2922 = vmatprep.subr.bf16.mxu1 %v4134_v30  ;;  %v4214_v30 = vld [vmem:[%s4507_s28 + $0x388] ss:$16 sps:$4 sm:$0xff]  }
  0xd6   : > { %2882 = vmatpush1.bf16.msra.mxu0 %v4129_v31  ;;  %v4219_v31 = vld [vmem:[%s4507_s28 + $0x1ac] ss:$16 sps:$4 sm:$0xff]  }
  0xd7   : > { %2923 = vmatpush1.bf16.msra.mxu1 %v4132_v32  ;;  %2933 = vmatprep.subr.bf16.mxu0 %v4141_v33  ;;  %v4222_v32 = vld [vmem:[%s4507_s28 + $0x3ac] ss:$16 sps:$4 sm:$0xff]   ;;  %v4217_v33 = vld [vmem:[%s4507_s28 + $0x1a8] ss:$16 sps:$4 sm:$0xff]  }
  0xd8   : > { %2974 = vmatprep.subr.bf16.mxu1 %v4144_v34  ;;  %v4220_v34 = vld [vmem:[%s4507_s28 + $0x3a8] ss:$16 sps:$4 sm:$0xff]  }
  0xd9   : > { %2884 = vmatmul.mubr.bf16.vlgmr.msra.gmra.mrb[8].mxu0 %v4762_v35 }
  0xda   : > { %2925 = vmatmul.mubr.bf16.vlgmr.msra.gmra.mrb[8].mxu1 %v4766_v36  ;;  %2934 = vmatpush1.bf16.msra.mxu0 %v4139_v39  ;;  %v4225_v39 = vld [vmem:[%s4507_s28 + $0x1cc] ss:$16 sps:$4 sm:$0xff]  }
  0xdb   : > { %2975 = vmatpush1.bf16.msra.mxu1 %v4142_v40  ;;  %2935 = vmatprep.subr.bf16.mxu0 %v4147_v41  ;;  %v4228_v40 = vld [vmem:[%s4507_s28 + $0x3cc] ss:$16 sps:$4 sm:$0xff]   ;;  %v4223_v41 = vld [vmem:[%s4507_s28 + $0x1c8] ss:$16 sps:$4 sm:$0xff]  }
  0xdc   : > { %2976 = vmatprep.subr.bf16.mxu1 %v4150_v42  ;;  %2965 = vmatprep.mubr.bf16.mxu0 %v4557_v48  ;;  %v4160_v48 = vld [vmem:[%s4507_s28 + $0x268] ss:$16 sps:$4 sm:$0xff]  }
  0xdd   : > { %3006 = vmatprep.mubr.bf16.mxu1 %v4562_v52  ;;  %v4165_v52 = vld [vmem:[%s4507_s28 + $0x8c] ss:$16 sps:$4 sm:$0xff]   ;;  %v4226_v42 = vld [vmem:[%s4507_s28 + $0x3c8] ss:$16 sps:$4 sm:$0xff]  }
  0xde   : > { %2936 = vmatpush1.bf16.msra.mxu0 %v4145_v23  ;;  %v4231_v23 = vld [vmem:[%s4507_s28 + $0x1ec] ss:$16 sps:$4 sm:$0xff]  }
  0xdf   : > { %2977 = vmatpush1.bf16.msra.mxu1 %v4148_v24  ;;  %2937 = vmatprep.subr.bf16.mxu0 %v4153_v43  ;;  %v4234_v24 = vld [vmem:[%s4507_s28 + $0x3ec] ss:$16 sps:$4 sm:$0xff]   ;;  %v4229_v43 = vld [vmem:[%s4507_s28 + $0x1e8] ss:$16 sps:$4 sm:$0xff]  }
  0xe0   : > { %2978 = vmatprep.subr.bf16.mxu1 %v4156_v44  ;;  %v4232_v44 = vld [vmem:[%s4507_s28 + $0x3e8] ss:$16 sps:$4 sm:$0xff]  }
  0xe2   : > { %2938 = vmatpush1.bf16.msra.mxu0 %v4151_v45  ;;  %v4237_v45 = vld [vmem:[%s4507_s28 + $0x40c] ss:$16 sps:$4 sm:$0xff]  }
  0xe3   : > { %2979 = vmatpush1.bf16.msra.mxu1 %v4154_v46  ;;  %2939 = vmatprep.subr.bf16.mxu0 %v4159_v47  ;;  %v4240_v46 = vld [vmem:[%s4507_s28 + $0x60c] ss:$16 sps:$4 sm:$0xff]   ;;  %v4235_v47 = vld [vmem:[%s4507_s28 + $0x408] ss:$16 sps:$4 sm:$0xff]  }
  0xe4   : > { %2980 = vmatprep.subr.bf16.mxu1 %v4162_v49  ;;  %v4238_v49 = vld [vmem:[%s4507_s28 + $0x608] ss:$16 sps:$4 sm:$0xff]  }
  0xe6   : > { %2940 = vmatpush1.bf16.msra.mxu0 %v4157_v50  ;;  %v4243_v50 = vld [vmem:[%s4507_s28 + $0x42c] ss:$16 sps:$4 sm:$0xff]  }
  0xe7   : > { %2981 = vmatpush1.bf16.msra.mxu1 %v4160_v48  ;;  %2941 = vmatprep.subr.bf16.mxu0 %v4165_v52  ;;  %v4246_v48 = vld [vmem:[%s4507_s28 + $0x62c] ss:$16 sps:$4 sm:$0xff]   ;;  %v4241_v52 = vld [vmem:[%s4507_s28 + $0x428] ss:$16 sps:$4 sm:$0xff]  }
  0xe8   : > { %2982 = vmatprep.subr.bf16.mxu1 %v4168_v51  ;;  %v4244_v51 = vld [vmem:[%s4507_s28 + $0x628] ss:$16 sps:$4 sm:$0xff]  }
  0xea   : > { %2942 = vmatpush1.bf16.msra.mxu0 %v4163_v53  ;;  %v4249_v53 = vld [vmem:[%s4507_s28 + $0x44c] ss:$16 sps:$4 sm:$0xff]  }
  0xeb   : > { %2983 = vmatpush1.bf16.msra.mxu1 %v4166_v54  ;;  %2943 = vmatprep.subr.bf16.mxu0 %v4171_v55  ;;  %v4252_v54 = vld [vmem:[%s4507_s28 + $0x64c] ss:$16 sps:$4 sm:$0xff]  }
  0xec   : > { %2984 = vmatprep.subr.bf16.mxu1 %v4174_v56  ;;  %v4255_v55 = vld [vmem:[%s4507_s28 + $0x46c] ss:$16 sps:$4 sm:$0xff]  }
  0xed   : > { %v4258_v56 = vld [vmem:[%s4507_s28 + $0x66c] ss:$16 sps:$4 sm:$0xff]  }
  0xee   : > { %2944 = vmatpush1.bf16.msra.mxu0 %v4169_v57  ;;  %v4253_v57 = vld [vmem:[%s4507_s28 + $0x468] ss:$16 sps:$4 sm:$0xff]  }
  0xef   : > { %2985 = vmatpush1.bf16.msra.mxu1 %v4172_v58  ;;  %2945 = vmatprep.subr.bf16.mxu0 %v4177_v59  ;;  %v4264_v58 = vld [vmem:[%s4507_s28 + $0x68c] ss:$16 sps:$4 sm:$0xff]   ;;  %v4259_v59 = vld [vmem:[%s4507_s28 + $0x488] ss:$16 sps:$4 sm:$0xff]  }
  0xf0   : > { %2986 = vmatprep.subr.bf16.mxu1 %v4180_v60  ;;  %v4262_v60 = vld [vmem:[%s4507_s28 + $0x688] ss:$16 sps:$4 sm:$0xff]  }
  0xf2   : > { %2946 = vmatpush1.bf16.msra.mxu0 %v4175_v61  ;;  %v4267_v61 = vld [vmem:[%s4507_s28 + $0x4ac] ss:$16 sps:$4 sm:$0xff]  }
  0xf3   : > { %2987 = vmatpush1.bf16.msra.mxu1 %v4178_v62  ;;  %2947 = vmatprep.subr.bf16.mxu0 %v4183_v63  ;;  %v4270_v62 = vld [vmem:[%s4507_s28 + $0x6ac] ss:$16 sps:$4 sm:$0xff]   ;;  %v4265_v63 = vld [vmem:[%s4507_s28 + $0x4a8] ss:$16 sps:$4 sm:$0xff]  }
  0xf4   : > { %2988 = vmatprep.subr.bf16.mxu1 %v4186_v0  ;;  %v4268_v0 = vld [vmem:[%s4507_s28 + $0x6a8] ss:$16 sps:$4 sm:$0xff]  }
  0xf6   : > { %2948 = vmatpush1.bf16.msra.mxu0 %v4181_v1  ;;  %v4273_v1 = vld [vmem:[%s4507_s28 + $0x4cc] ss:$16 sps:$4 sm:$0xff]  }
  0xf7   : > { %2989 = vmatpush1.bf16.msra.mxu1 %v4184_v2  ;;  %2949 = vmatprep.subr.bf16.mxu0 %v4189_v3  ;;  %v4276_v2 = vld [vmem:[%s4507_s28 + $0x6cc] ss:$16 sps:$4 sm:$0xff]  }
  0xf8   : > { %2990 = vmatprep.subr.bf16.mxu1 %v4192_v4 }
  0xfa   : > { %2950 = vmatpush1.bf16.msra.mxu0 %v4187_v5 }
  0xfb   : > { %2991 = vmatpush1.bf16.msra.mxu1 %v4190_v6  ;;  %2951 = vmatprep.subr.bf16.mxu0 %v4195_v9 }
  0xfc   : > { %2992 = vmatprep.subr.bf16.mxu1 %v4198_v10 }
  0xfe   : > { %2952 = vmatpush1.bf16.msra.mxu0 %v4193_v11 }
  0xff   : > { %2993 = vmatpush1.bf16.msra.mxu1 %v4196_v12  ;;  %2953 = vmatprep.subr.bf16.mxu0 %v4201_v13  ;;  %v4271_v13 = vld [vmem:[%s4507_s28 + $0x4c8] ss:$16 sps:$4 sm:$0xff]  }
 0x100   : > { %2994 = vmatprep.subr.bf16.mxu1 %v4204_v14  ;;  %v4274_v14 = vld [vmem:[%s4507_s28 + $0x6c8] ss:$16 sps:$4 sm:$0xff]  }
 0x102   : > { %2954 = vmatpush1.bf16.msra.mxu0 %v4199_v15 }
 0x103   : > { %2995 = vmatpush1.bf16.msra.mxu1 %v4202_v16  ;;  %2955 = vmatprep.subr.bf16.mxu0 %v4207_v19  ;;  %v4279_v19 = vld [vmem:[%s4507_s28 + $0x4ec] ss:$16 sps:$4 sm:$0xff]  }
 0x104   : > { %2996 = vmatprep.subr.bf16.mxu1 %v4210_v20  ;;  %v4282_v20 = vld [vmem:[%s4507_s28 + $0x6ec] ss:$16 sps:$4 sm:$0xff]  }
 0x106   : > { %2956 = vmatpush1.bf16.msra.mxu0 %v4205_v21  ;;  %v4277_v21 = vld [vmem:[%s4507_s28 + $0x4e8] ss:$16 sps:$4 sm:$0xff]  }
 0x107   : > { %2997 = vmatpush1.bf16.msra.mxu1 %v4208_v22  ;;  %2957 = vmatprep.subr.bf16.mxu0 %v4213_v27  ;;  %v4280_v22 = vld [vmem:[%s4507_s28 + $0x6e8] ss:$16 sps:$4 sm:$0xff]   ;;  %v4285_v27 = vld [vmem:[%s4507_s28 + $0x50c] ss:$16 sps:$4 sm:$0xff]  }
 0x108   : > { %2998 = vmatprep.subr.bf16.mxu1 %v4216_v28  ;;  %v4288_v28 = vld [vmem:[%s4507_s28 + $0x70c] ss:$16 sps:$4 sm:$0xff]  }
 0x10a   : > { %2958 = vmatpush1.bf16.msra.mxu0 %v4211_v29  ;;  %v4283_v29 = vld [vmem:[%s4507_s28 + $0x508] ss:$16 sps:$4 sm:$0xff]  }
 0x10b   : > { %2999 = vmatpush1.bf16.msra.mxu1 %v4214_v30  ;;  %2959 = vmatprep.subr.bf16.mxu0 %v4219_v31  ;;  %v4286_v30 = vld [vmem:[%s4507_s28 + $0x708] ss:$16 sps:$4 sm:$0xff]   ;;  %v4291_v31 = vld [vmem:[%s4507_s28 + $0x52c] ss:$16 sps:$4 sm:$0xff]  }
 0x10c   : > { %3000 = vmatprep.subr.bf16.mxu1 %v4222_v32  ;;  %v4294_v32 = vld [vmem:[%s4507_s28 + $0x72c] ss:$16 sps:$4 sm:$0xff]  }
 0x10e   : > { %2960 = vmatpush1.bf16.msra.mxu0 %v4217_v33  ;;  %v4289_v33 = vld [vmem:[%s4507_s28 + $0x528] ss:$16 sps:$4 sm:$0xff]  }
 0x10f   : > { %3001 = vmatpush1.bf16.msra.mxu1 %v4220_v34  ;;  %2961 = vmatprep.subr.bf16.mxu0 %v4225_v39  ;;  %v4292_v34 = vld [vmem:[%s4507_s28 + $0x728] ss:$16 sps:$4 sm:$0xff]   ;;  %v4297_v39 = vld [vmem:[%s4507_s28 + $0x54c] ss:$16 sps:$4 sm:$0xff]  }
 0x110   : > { %3002 = vmatprep.subr.bf16.mxu1 %v4228_v40  ;;  %v4300_v40 = vld [vmem:[%s4507_s28 + $0x74c] ss:$16 sps:$4 sm:$0xff]  }
 0x112   : > { %2962 = vmatpush1.bf16.msra.mxu0 %v4223_v41  ;;  %v4295_v41 = vld [vmem:[%s4507_s28 + $0x548] ss:$16 sps:$4 sm:$0xff]  }
 0x113   : > { %3003 = vmatpush1.bf16.msra.mxu1 %v4226_v42  ;;  %2963 = vmatprep.subr.bf16.mxu0 %v4231_v23  ;;  %v4298_v42 = vld [vmem:[%s4507_s28 + $0x748] ss:$16 sps:$4 sm:$0xff]   ;;  %v4303_v23 = vld [vmem:[%s4507_s28 + $0x56c] ss:$16 sps:$4 sm:$0xff]  }
 0x114   : > { %3004 = vmatprep.subr.bf16.mxu1 %v4234_v24  ;;  %v4306_v24 = vld [vmem:[%s4507_s28 + $0x76c] ss:$16 sps:$4 sm:$0xff]  }
 0x116   : > { %2964 = vmatpush1.bf16.msra.mxu0 %v4229_v43  ;;  %v4301_v43 = vld [vmem:[%s4507_s28 + $0x568] ss:$16 sps:$4 sm:$0xff]  }
 0x117   : > { %3005 = vmatpush1.bf16.msra.mxu1 %v4232_v44  ;;  %3015 = vmatprep.subr.bf16.mxu0 %v4237_v45  ;;  %v4304_v44 = vld [vmem:[%s4507_s28 + $0x768] ss:$16 sps:$4 sm:$0xff]   ;;  %v4309_v45 = vld [vmem:[%s4507_s28 + $0x58c] ss:$16 sps:$4 sm:$0xff]  }
 0x118   : > { %3056 = vmatprep.subr.bf16.mxu1 %v4240_v46  ;;  %v4312_v46 = vld [vmem:[%s4507_s28 + $0x78c] ss:$16 sps:$4 sm:$0xff]  }
 0x119   : > { %2966 = vmatmul.mubr.bf16.vlgmr.msra.gmra.mrb[12].mxu0 %v4584_v7  ;;  %v4247_v7 = vld [vmem:[%s4507_s28 + $0x448] ss:$16 sps:$4 sm:$0xff]  }
 0x11a   : > { %3007 = vmatmul.mubr.bf16.vlgmr.msra.gmra.mrb[12].mxu1 %v4586_v8  ;;  %3016 = vmatpush1.bf16.msra.mxu0 %v4235_v47  ;;  %v4250_v8 = vld [vmem:[%s4507_s28 + $0x648] ss:$16 sps:$4 sm:$0xff]  }
 0x11b   : > { %3057 = vmatpush1.bf16.msra.mxu1 %v4238_v49  ;;  %3017 = vmatprep.subr.bf16.mxu0 %v4243_v50  ;;  %v4307_v47 = vld [vmem:[%s4507_s28 + $0x588] ss:$16 sps:$4 sm:$0xff]   ;;  %v4315_v50 = vld [vmem:[%s4507_s28 + $0x5ac] ss:$16 sps:$4 sm:$0xff]  }
 0x11c   : > { %3058 = vmatprep.subr.bf16.mxu1 %v4246_v48  ;;  %3047 = vmatprep.mubr.bf16.mxu0 %v4624_v37  ;;  %v4256_v37 = vld [vmem:[%s4507_s28 + $0x668] ss:$16 sps:$4 sm:$0xff]   ;;  %v4318_v48 = vld [vmem:[%s4507_s28 + $0x7ac] ss:$16 sps:$4 sm:$0xff]  }
 0x11d   : > { %3088 = vmatprep.mubr.bf16.mxu1 %v4628_v38  ;;  %v4261_v38 = vld [vmem:[%s4507_s28 + $0x48c] ss:$16 sps:$4 sm:$0xff]   ;;  %v4310_v49 = vld [vmem:[%s4507_s28 + $0x788] ss:$16 sps:$4 sm:$0xff]  }
 0x11e   : > { %3018 = vmatpush1.bf16.msra.mxu0 %v4241_v52  ;;  %v4313_v52 = vld [vmem:[%s4507_s28 + $0x5a8] ss:$16 sps:$4 sm:$0xff]  }
 0x11f   : > { %3059 = vmatpush1.bf16.msra.mxu1 %v4244_v51  ;;  %3019 = vmatprep.subr.bf16.mxu0 %v4249_v53  ;;  %v4316_v51 = vld [vmem:[%s4507_s28 + $0x7a8] ss:$16 sps:$4 sm:$0xff]   ;;  %v4321_v53 = vld [vmem:[%s4507_s28 + $0x5cc] ss:$16 sps:$4 sm:$0xff]  }
 0x120   : > { %3060 = vmatprep.subr.bf16.mxu1 %v4252_v54  ;;  %v4324_v54 = vld [vmem:[%s4507_s28 + $0x7cc] ss:$16 sps:$4 sm:$0xff]  }
 0x122   : > { %3020 = vmatpush1.bf16.msra.mxu0 %v4247_v7  ;;  %v4319_v7 = vld [vmem:[%s4507_s28 + $0x5c8] ss:$16 sps:$4 sm:$0xff]  }
 0x123   : > { %3061 = vmatpush1.bf16.msra.mxu1 %v4250_v8  ;;  %3021 = vmatprep.subr.bf16.mxu0 %v4255_v55  ;;  %v4322_v8 = vld [vmem:[%s4507_s28 + $0x7c8] ss:$16 sps:$4 sm:$0xff]   ;;  %v4327_v55 = vld [vmem:[%s4507_s28 + $0x5ec] ss:$16 sps:$4 sm:$0xff]  }
 0x124   : > { %3062 = vmatprep.subr.bf16.mxu1 %v4258_v56  ;;  %v4330_v56 = vld [vmem:[%s4507_s28 + $0x7ec] ss:$16 sps:$4 sm:$0xff]  }
 0x126   : > { %3022 = vmatpush1.bf16.msra.mxu0 %v4253_v57  ;;  %v4325_v57 = vld [vmem:[%s4507_s28 + $0x5e8] ss:$16 sps:$4 sm:$0xff]  }
 0x127   : > { %3063 = vmatpush1.bf16.msra.mxu1 %v4256_v37  ;;  %3023 = vmatprep.subr.bf16.mxu0 %v4261_v38  ;;  %v4328_v37 = vld [vmem:[%s4507_s28 + $0x7e8] ss:$16 sps:$4 sm:$0xff]   ;;  %v4333_v38 = vld [vmem:[%s4507_s28 + $0x80c] ss:$16 sps:$4 sm:$0xff]  }
 0x128   : > { %3064 = vmatprep.subr.bf16.mxu1 %v4264_v58  ;;  %v4336_v58 = vld [vmem:[%s4507_s28 + $0xa0c] ss:$16 sps:$4 sm:$0xff]  }
 0x12a   : > { %3024 = vmatpush1.bf16.msra.mxu0 %v4259_v59  ;;  %v4331_v59 = vld [vmem:[%s4507_s28 + $0x808] ss:$16 sps:$4 sm:$0xff]  }
 0x12b   : > { %3065 = vmatpush1.bf16.msra.mxu1 %v4262_v60  ;;  %3025 = vmatprep.subr.bf16.mxu0 %v4267_v61  ;;  %v4334_v60 = vld [vmem:[%s4507_s28 + $0xa08] ss:$16 sps:$4 sm:$0xff]   ;;  %v4339_v61 = vld [vmem:[%s4507_s28 + $0x82c] ss:$16 sps:$4 sm:$0xff]  }
 0x12c   : > { %3066 = vmatprep.subr.bf16.mxu1 %v4270_v62  ;;  %v2721_v3 = vpop.f32.mrb[0].mxu0  ;;  %v4342_v62 = vld [vmem:[%s4507_s28 + $0xa2c] ss:$16 sps:$4 sm:$0xff]  }
 0x12d   : > { %v2762_v4 = vpop.f32.mrb[0].mxu1  ;;  %v2723_v6 = vpop.f32.mrb[1].mxu0 }
 0x12e   : > { %v4864_v5 = vadd.f32 %v2762_v4, %v2721_v3  ;;  %v2764_v9 = vpop.f32.mrb[1].mxu1  ;;  %v2725_v11 = vpop.f32.mrb[2].mxu0  ;;  %3026 = vmatpush1.bf16.msra.mxu0 %v4265_v63  ;;  %v4337_v63 = vld [vmem:[%s4507_s28 + $0x828] ss:$16 sps:$4 sm:$0xff]   ;;  %v4351_v3 = vld [vmem:[%s4507_s28 + $0x86c] ss:$16 sps:$4 sm:$0xff]  }
 0x12f   : > { %v4866_v10 = vadd.f32 %v2764_v9, %v2723_v6  ;;  %v2766_v12 = vpop.f32.mrb[2].mxu1  ;;  %3067 = vmatpush1.bf16.msra.mxu1 %v4268_v0  ;;  %v2726_v15 = vpop.f32.mrb[3].mxu0  ;;  %3027 = vmatprep.subr.bf16.mxu0 %v4273_v1  ;;  %v4340_v0 = vld [vmem:[%s4507_s28 + $0xa28] ss:$16 sps:$4 sm:$0xff]   ;;  %v4345_v1 = vld [vmem:[%s4507_s28 + $0x84c] ss:$16 sps:$4 sm:$0xff]  }
 0x130   : > { %v2767_v16 = vpop.f32.mrb[3].mxu1  ;;  %3068 = vmatprep.subr.bf16.mxu1 %v4276_v2  ;;  %v4348_v2 = vld [vmem:[%s4507_s28 + $0xa4c] ss:$16 sps:$4 sm:$0xff]   ;;  %v4349_v6 = vld [vmem:[%s4507_s28 + $0x868] ss:$16 sps:$4 sm:$0xff]  }
 0x131   : > { %v4354_v4 = vld [vmem:[%s4507_s28 + $0xa6c] ss:$16 sps:$4 sm:$0xff]   ;;  %v4355_v11 = vld [vmem:[%s4507_s28 + $0x888] ss:$16 sps:$4 sm:$0xff]  }
 0x132   : > { %3028 = vmatpush1.bf16.msra.mxu0 %v4271_v13  ;;  %v4360_v9 = vld [vmem:[%s4507_s28 + $0xa8c] ss:$16 sps:$4 sm:$0xff]   ;;  %v4358_v12 = vld [vmem:[%s4507_s28 + $0xa88] ss:$16 sps:$4 sm:$0xff]  }
 0x133   : > { %3069 = vmatpush1.bf16.msra.mxu1 %v4274_v14  ;;  %3029 = vmatprep.subr.bf16.mxu0 %v4279_v19  ;;  %v4363_v13 = vld [vmem:[%s4507_s28 + $0x8ac] ss:$16 sps:$4 sm:$0xff]   ;;  %v4361_v15 = vld [vmem:[%s4507_s28 + $0x8a8] ss:$16 sps:$4 sm:$0xff]  }
 0x134   : > { %3070 = vmatprep.subr.bf16.mxu1 %v4282_v20  ;;  %v4366_v14 = vld [vmem:[%s4507_s28 + $0xaac] ss:$16 sps:$4 sm:$0xff]   ;;  %v4364_v16 = vld [vmem:[%s4507_s28 + $0xaa8] ss:$16 sps:$4 sm:$0xff]  }
 0x135   : > { %v4369_v19 = vld [vmem:[%s4507_s28 + $0x8cc] ss:$16 sps:$4 sm:$0xff]  }
 0x136   : > { %3030 = vmatpush1.bf16.msra.mxu0 %v4277_v21  ;;  %v4372_v20 = vld [vmem:[%s4507_s28 + $0xacc] ss:$16 sps:$4 sm:$0xff]  }
 0x137   : > { %3071 = vmatpush1.bf16.msra.mxu1 %v4280_v22  ;;  %3031 = vmatprep.subr.bf16.mxu0 %v4285_v27 }
 0x138   : > { %3072 = vmatprep.subr.bf16.mxu1 %v4288_v28 }
 0x13a   : > { %3032 = vmatpush1.bf16.msra.mxu0 %v4283_v29 }
 0x13b   : > { %3073 = vmatpush1.bf16.msra.mxu1 %v4286_v30  ;;  %3033 = vmatprep.subr.bf16.mxu0 %v4291_v31 }
 0x13c   : > { %3074 = vmatprep.subr.bf16.mxu1 %v4294_v32 }
 0x13e   : > { %3034 = vmatpush1.bf16.msra.mxu0 %v4289_v33  ;;  %v4367_v33 = vld [vmem:[%s4507_s28 + $0x8c8] ss:$16 sps:$4 sm:$0xff]  }
 0x13f   : > { %3075 = vmatpush1.bf16.msra.mxu1 %v4292_v34  ;;  %3035 = vmatprep.subr.bf16.mxu0 %v4297_v39  ;;  %v4370_v34 = vld [vmem:[%s4507_s28 + $0xac8] ss:$16 sps:$4 sm:$0xff]  }
 0x140   : > { %3076 = vmatprep.subr.bf16.mxu1 %v4300_v40 }
 0x142   : > { %3036 = vmatpush1.bf16.msra.mxu0 %v4295_v41 }
 0x143   : > { %3077 = vmatpush1.bf16.msra.mxu1 %v4298_v42  ;;  %3037 = vmatprep.subr.bf16.mxu0 %v4303_v23  ;;  %v4373_v23 = vld [vmem:[%s4507_s28 + $0x8e8] ss:$16 sps:$4 sm:$0xff]  }
 0x144   : > { %3078 = vmatprep.subr.bf16.mxu1 %v4306_v24  ;;  %v4376_v24 = vld [vmem:[%s4507_s28 + $0xae8] ss:$16 sps:$4 sm:$0xff]  }
 0x146   : > { %3038 = vmatpush1.bf16.msra.mxu0 %v4301_v43  ;;  %v4381_v43 = vld [vmem:[%s4507_s28 + $0x90c] ss:$16 sps:$4 sm:$0xff]  }
 0x147   : > { %3079 = vmatpush1.bf16.msra.mxu1 %v4304_v44  ;;  %3039 = vmatprep.subr.bf16.mxu0 %v4309_v45  ;;  %v4384_v44 = vld [vmem:[%s4507_s28 + $0xb0c] ss:$16 sps:$4 sm:$0xff]   ;;  %v4379_v45 = vld [vmem:[%s4507_s28 + $0x908] ss:$16 sps:$4 sm:$0xff]  }
 0x148   : > { %3080 = vmatprep.subr.bf16.mxu1 %v4312_v46  ;;  %v4382_v46 = vld [vmem:[%s4507_s28 + $0xb08] ss:$16 sps:$4 sm:$0xff]  }
 0x14a   : > { %3040 = vmatpush1.bf16.msra.mxu0 %v4307_v47  ;;  %v4387_v47 = vld [vmem:[%s4507_s28 + $0x92c] ss:$16 sps:$4 sm:$0xff]  }
 0x14b   : > { %3081 = vmatpush1.bf16.msra.mxu1 %v4310_v49  ;;  %3041 = vmatprep.subr.bf16.mxu0 %v4315_v50  ;;  %v4390_v49 = vld [vmem:[%s4507_s28 + $0xb2c] ss:$16 sps:$4 sm:$0xff]   ;;  %v4385_v50 = vld [vmem:[%s4507_s28 + $0x928] ss:$16 sps:$4 sm:$0xff]  }
 0x14c   : > { %3082 = vmatprep.subr.bf16.mxu1 %v4318_v48  ;;  %v4388_v48 = vld [vmem:[%s4507_s28 + $0xb28] ss:$16 sps:$4 sm:$0xff]  }
 0x14e   : > { %3042 = vmatpush1.bf16.msra.mxu0 %v4313_v52  ;;  %v4393_v52 = vld [vmem:[%s4507_s28 + $0x94c] ss:$16 sps:$4 sm:$0xff]  }
 0x14f   : > { %3083 = vmatpush1.bf16.msra.mxu1 %v4316_v51  ;;  %3043 = vmatprep.subr.bf16.mxu0 %v4321_v53  ;;  %v4396_v51 = vld [vmem:[%s4507_s28 + $0xb4c] ss:$16 sps:$4 sm:$0xff]   ;;  %v4391_v53 = vld [vmem:[%s4507_s28 + $0x948] ss:$16 sps:$4 sm:$0xff]  }
 0x150   : > { %3084 = vmatprep.subr.bf16.mxu1 %v4324_v54  ;;  %v4394_v54 = vld [vmem:[%s4507_s28 + $0xb48] ss:$16 sps:$4 sm:$0xff]  }
 0x152   : > { %3044 = vmatpush1.bf16.msra.mxu0 %v4319_v7  ;;  %v4399_v7 = vld [vmem:[%s4507_s28 + $0x96c] ss:$16 sps:$4 sm:$0xff]  }
 0x153   : > { %3085 = vmatpush1.bf16.msra.mxu1 %v4322_v8  ;;  %3045 = vmatprep.subr.bf16.mxu0 %v4327_v55  ;;  %v4402_v8 = vld [vmem:[%s4507_s28 + $0xb6c] ss:$16 sps:$4 sm:$0xff]   ;;  %v4397_v55 = vld [vmem:[%s4507_s28 + $0x968] ss:$16 sps:$4 sm:$0xff]  }
 0x154   : > { %3086 = vmatprep.subr.bf16.mxu1 %v4330_v56  ;;  %v4400_v56 = vld [vmem:[%s4507_s28 + $0xb68] ss:$16 sps:$4 sm:$0xff]  }
 0x156   : > { %3046 = vmatpush1.bf16.msra.mxu0 %v4325_v57  ;;  %v4405_v57 = vld [vmem:[%s4507_s28 + $0x98c] ss:$16 sps:$4 sm:$0xff]  }
 0x157   : > { %3087 = vmatpush1.bf16.msra.mxu1 %v4328_v37  ;;  %3097 = vmatprep.subr.bf16.mxu0 %v4333_v38  ;;  %v4408_v37 = vld [vmem:[%s4507_s28 + $0xb8c] ss:$16 sps:$4 sm:$0xff]   ;;  %v4403_v38 = vld [vmem:[%s4507_s28 + $0x988] ss:$16 sps:$4 sm:$0xff]  }
 0x158   : > { %3138 = vmatprep.subr.bf16.mxu1 %v4336_v58  ;;  %v4406_v58 = vld [vmem:[%s4507_s28 + $0xb88] ss:$16 sps:$4 sm:$0xff]  }
 0x159   : > { %3048 = vmatmul.mubr.bf16.vlgmr.msra.gmra.mrb[16].mxu0 %v4672_v17  ;;  %v4343_v17 = vld [vmem:[%s4507_s28 + $0x848] ss:$16 sps:$4 sm:$0xff]  }
 0x15a   : > { %3089 = vmatmul.mubr.bf16.vlgmr.msra.gmra.mrb[16].mxu1 %v4676_v18  ;;  %3098 = vmatpush1.bf16.msra.mxu0 %v4331_v59  ;;  %v4346_v18 = vld [vmem:[%s4507_s28 + $0xa48] ss:$16 sps:$4 sm:$0xff]   ;;  %v4411_v59 = vld [vmem:[%s4507_s28 + $0x9ac] ss:$16 sps:$4 sm:$0xff]  }
 0x15b   : > { %3139 = vmatpush1.bf16.msra.mxu1 %v4334_v60  ;;  %3099 = vmatprep.subr.bf16.mxu0 %v4339_v61  ;;  %v4414_v60 = vld [vmem:[%s4507_s28 + $0xbac] ss:$16 sps:$4 sm:$0xff]   ;;  %v4409_v61 = vld [vmem:[%s4507_s28 + $0x9a8] ss:$16 sps:$4 sm:$0xff]  }
 0x15c   : > { %3140 = vmatprep.subr.bf16.mxu1 %v4342_v62  ;;  %3129 = vmatprep.mubr.bf16.mxu0 %v4690_v25  ;;  %v4352_v25 = vld [vmem:[%s4507_s28 + $0xa68] ss:$16 sps:$4 sm:$0xff]  }
 0x15d   : > { %3170 = vmatprep.mubr.bf16.mxu1 %v4694_v26  ;;  %v4357_v26 = vld [vmem:[%s4507_s28 + $0x88c] ss:$16 sps:$4 sm:$0xff]   ;;  %v4412_v62 = vld [vmem:[%s4507_s28 + $0xba8] ss:$16 sps:$4 sm:$0xff]  }
 0x15e   : > { %3100 = vmatpush1.bf16.msra.mxu0 %v4337_v63  ;;  %v4417_v63 = vld [vmem:[%s4507_s28 + $0x9cc] ss:$16 sps:$4 sm:$0xff]  }
 0x15f   : > { %3141 = vmatpush1.bf16.msra.mxu1 %v4340_v0  ;;  %3101 = vmatprep.subr.bf16.mxu0 %v4345_v1  ;;  %v4420_v0 = vld [vmem:[%s4507_s28 + $0xbcc] ss:$16 sps:$4 sm:$0xff]   ;;  %v4415_v1 = vld [vmem:[%s4507_s28 + $0x9c8] ss:$16 sps:$4 sm:$0xff]  }
 0x160   : > { %3142 = vmatprep.subr.bf16.mxu1 %v4348_v2  ;;  %v4418_v2 = vld [vmem:[%s4507_s28 + $0xbc8] ss:$16 sps:$4 sm:$0xff]  }
 0x162   : > { %3102 = vmatpush1.bf16.msra.mxu0 %v4343_v17  ;;  %v4423_v17 = vld [vmem:[%s4507_s28 + $0x9ec] ss:$16 sps:$4 sm:$0xff]  }
 0x163   : > { %3143 = vmatpush1.bf16.msra.mxu1 %v4346_v18  ;;  %3103 = vmatprep.subr.bf16.mxu0 %v4351_v3  ;;  %v4426_v18 = vld [vmem:[%s4507_s28 + $0xbec] ss:$16 sps:$4 sm:$0xff]   ;;  %v4421_v3 = vld [vmem:[%s4507_s28 + $0x9e8] ss:$16 sps:$4 sm:$0xff]  }
 0x164   : > { %3144 = vmatprep.subr.bf16.mxu1 %v4354_v4  ;;  %v4424_v4 = vld [vmem:[%s4507_s28 + $0xbe8] ss:$16 sps:$4 sm:$0xff]  }
 0x166   : > { %3104 = vmatpush1.bf16.msra.mxu0 %v4349_v6 }
 0x167   : > { %3145 = vmatpush1.bf16.msra.mxu1 %v4352_v25  ;;  %3105 = vmatprep.subr.bf16.mxu0 %v4357_v26 }
 0x168   : > { %3146 = vmatprep.subr.bf16.mxu1 %v4360_v9 }
 0x16a   : > { %3106 = vmatpush1.bf16.msra.mxu0 %v4355_v11 }
 0x16b   : > { %3147 = vmatpush1.bf16.msra.mxu1 %v4358_v12  ;;  %3107 = vmatprep.subr.bf16.mxu0 %v4363_v13  ;;  %v331_v12 = vld [vmem:[#allocation2] sm:$0xff] }
 0x16c   : > { %3148 = vmatprep.subr.bf16.mxu1 %v4366_v14  ;;  %v2803_v21 = vpop.f32.mrb[4].mxu0 }
 0x16d   : > { %v2844_v22 = vpop.f32.mrb[4].mxu1  ;;  %v2804_v27 = vadd.f32 %v2803_v21, %v4864_v5  ;;  %v2805_v28 = vpop.f32.mrb[5].mxu0  ;;  %v4375_v5 = vld [vmem:[%s4507_s28 + $0x8ec] ss:$16 sps:$4 sm:$0xff]  }
 0x16e   : > { %v2846_v29 = vpop.f32.mrb[5].mxu1  ;;  %v2806_v30 = vadd.f32 %v2805_v28, %v4866_v10  ;;  %v2807_v31 = vpop.f32.mrb[6].mxu0  ;;  %3108 = vmatpush1.bf16.msra.mxu0 %v4361_v15  ;;  %v4378_v10 = vld [vmem:[%s4507_s28 + $0xaec] ss:$16 sps:$4 sm:$0xff]  }
 0x16f   : > { %v2848_v32 = vpop.f32.mrb[6].mxu1  ;;  %3149 = vmatpush1.bf16.msra.mxu1 %v4364_v16  ;;  %v4940_v39 = vadd.f32 %v2844_v22, %v2804_v27  ;;  %v2808_v40 = vpop.f32.mrb[7].mxu0  ;;  %3109 = vmatprep.subr.bf16.mxu0 %v4369_v19  ;;  %v332_v19 = vld [vmem:[#allocation2 + $0x8] sm:$0xff] }
 0x170   : > { %v2849_v41 = vpop.f32.mrb[7].mxu1  ;;  %3150 = vmatprep.subr.bf16.mxu1 %v4372_v20  ;;  %v4944_v42 = vadd.f32 %v2846_v29, %v2806_v30 }
 0x172   : > { %3110 = vmatpush1.bf16.msra.mxu0 %v4367_v33 }
 0x173   : > { %3151 = vmatpush1.bf16.msra.mxu1 %v4370_v34  ;;  %3111 = vmatprep.subr.bf16.mxu0 %v4375_v5 }
 0x174   : > { %3152 = vmatprep.subr.bf16.mxu1 %v4378_v10 }
 0x176   : > { %3112 = vmatpush1.bf16.msra.mxu0 %v4373_v23 }
 0x177   : > { %3153 = vmatpush1.bf16.msra.mxu1 %v4376_v24  ;;  %3113 = vmatprep.subr.bf16.mxu0 %v4381_v43 }
 0x178   : > { %3154 = vmatprep.subr.bf16.mxu1 %v4384_v44 }
 0x17a   : > { %3114 = vmatpush1.bf16.msra.mxu0 %v4379_v45 }
 0x17b   : > { %3155 = vmatpush1.bf16.msra.mxu1 %v4382_v46  ;;  %3115 = vmatprep.subr.bf16.mxu0 %v4387_v47 }
 0x17c   : > { %3156 = vmatprep.subr.bf16.mxu1 %v4390_v49 }
 0x17e   : > { %3116 = vmatpush1.bf16.msra.mxu0 %v4385_v50 }
 0x17f   : > { %3157 = vmatpush1.bf16.msra.mxu1 %v4388_v48  ;;  %3117 = vmatprep.subr.bf16.mxu0 %v4393_v52 }
 0x180   : > { %3158 = vmatprep.subr.bf16.mxu1 %v4396_v51 }
 0x182   : > { %3118 = vmatpush1.bf16.msra.mxu0 %v4391_v53 }
 0x183   : > { %3159 = vmatpush1.bf16.msra.mxu1 %v4394_v54  ;;  %3119 = vmatprep.subr.bf16.mxu0 %v4399_v7  ;;  %v333_v54 = vld [vmem:[#allocation2 + $0x10] sm:$0xff] }
 0x184   : > { %3160 = vmatprep.subr.bf16.mxu1 %v4402_v8 }
 0x186   : > { %3120 = vmatpush1.bf16.msra.mxu0 %v4397_v55 }
 0x187   : > { %3161 = vmatpush1.bf16.msra.mxu1 %v4400_v56  ;;  %3121 = vmatprep.subr.bf16.mxu0 %v4405_v57  ;;  %v334_v57 = vld [vmem:[#allocation2 + $0x18] sm:$0xff] }
 0x188   : > { %3162 = vmatprep.subr.bf16.mxu1 %v4408_v37 }
 0x18a   : > { %3122 = vmatpush1.bf16.msra.mxu0 %v4403_v38 }
 0x18b   : > { %3163 = vmatpush1.bf16.msra.mxu1 %v4406_v58  ;;  %3123 = vmatprep.subr.bf16.mxu0 %v4411_v59 }
 0x18c   : > { %3164 = vmatprep.subr.bf16.mxu1 %v4414_v60 }
 0x18e   : > { %3124 = vmatpush1.bf16.msra.mxu0 %v4409_v61  ;;  %v3197_v61 = vlaneseq (!%p3804_p7) }
 0x18f   : > { %3165 = vmatpush1.bf16.msra.mxu1 %v4412_v62  ;;  %3125 = vmatprep.subr.bf16.mxu0 %v4417_v63  ;;  %v3195_v63 = vld [vmem:[%s5008_s2] sm:$0xf] (!%p3804_p7) }
 0x190   : > { %3166 = vmatprep.subr.bf16.mxu1 %v4420_v0  ;;  %v3198_v62 = vshrl.u32 (!%p3804_p7), %v3197_v61, 7  ;;  %v3221_v0 = vld [vmem:[%s5009_s3] sm:$0xf] (!%p3804_p7) }
 0x192   : > { %3126 = vmatpush1.bf16.msra.mxu0 %v4415_v1  ;;  %v3199_v1 = vsub.s32 (!%p3804_p7), 0, %v3198_v62 }
 0x193   : > { %3167 = vmatpush1.bf16.msra.mxu1 %v4418_v2  ;;  %3127 = vmatprep.subr.bf16.mxu0 %v4423_v17  ;;  %v3203_v2 = vsub.s32 (!%p3804_p7), 1, %v3198_v62  ;;  %v3207_v17 = vsub.s32 (!%p3804_p7), 2, %v3198_v62 }
 0x194   : > { %3168 = vmatprep.subr.bf16.mxu1 %v4426_v18  ;;  %v3211_v18 = vsub.s32 (!%p3804_p7), 3, %v3198_v62 }
 0x196   : > { %3128 = vmatpush1.bf16.msra.mxu0 %v4421_v3 }
 0x197   : > { %3169 = vmatpush1.bf16.msra.mxu1 %v4424_v4 }
 0x199   : > { %3130 = vmatmul.mubr.bf16.vlgmr.msra.gmra.mrb[20].mxu0 %v4762_v35 }
 0x19a   : > { %3171 = vmatmul.mubr.bf16.vlgmr.msra.gmra.mrb[20].mxu1 %v4766_v36 }
 0x1ac   : > { %v2885_v6 = vpop.f32.mrb[8].mxu0 }
 0x1ad   : > { %v2926_v25 = vpop.f32.mrb[8].mxu1  ;;  %v2886_v26 = vadd.f32 %v2885_v6, %v4940_v39  ;;  %v2887_v9 = vpop.f32.mrb[9].mxu0  ;;  %v3200_v6 = vrot.slane (!%p3804_p7), %v3195_v63, %v3199_v1 }
 0x1ae   : > { %v2928_v11 = vpop.f32.mrb[9].mxu1  ;;  %v2888_v13 = vadd.f32 %v2887_v9, %v4944_v42  ;;  %v2889_v14 = vpop.f32.mrb[10].mxu0  ;;  %v3230_v9 = vrot.slane (!%p3804_p7), %v3221_v0, %v3203_v2 }
 0x1af   : > { %v2930_v15 = vpop.f32.mrb[10].mxu1  ;;  %v2927_v16 = vadd.f32 %v2926_v25, %v2886_v26  ;;  %v2890_v20 = vpop.f32.mrb[11].mxu0  ;;  %v3204_v25 = vrot.slane (!%p3804_p7), %v3195_v63, %v3203_v2  ;;  %v3226_v26 = vrot.slane (!%p3804_p7), %v3221_v0, %v3199_v1  ;;  %v3212_v14 = vrot.slane (!%p3804_p7), %v3195_v63, %v3211_v18 }
 0x1b0   : > { %v2931_v21 = vpop.f32.mrb[11].mxu1  ;;  %v2929_v22 = vadd.f32 %v2928_v11, %v2888_v13  ;;  %v3208_v13 = vrot.slane (!%p3804_p7), %v3195_v63, %v3207_v17  ;;  %v3234_v15 = vrot.slane (!%p3804_p7), %v3221_v0, %v3207_v17 }
 0x1b1   : > { %v3179_v27 = vadd.f32 %v2927_v16, %v331_v12  ;;  %v3238_v16 = vrot.slane (!%p3804_p7), %v3221_v0, %v3211_v18 }
 0x1b2   : > { %v3180_v35 = vadd.f32 %v2929_v22, %v332_v19 }
 0x1b3   : > { %3183 = vst [vmem:[#allocation2] sm:$0xff] %v3179_v27 }
 0x1b4   : > { %3184 = vst [vmem:[#allocation2 + $0x8] sm:$0xff] %v3180_v35 }
 0x1ba   : > { %v3191_v3 = vld [vmem:[#allocation2] sm:$0xff] (!%p3804_p7) }
 0x1bb   : > { %v3192_v4 = vld [vmem:[#allocation2 + $0x8] sm:$0xff] (!%p3804_p7)  ;;  %v3217_v19 = vmul.f32 (!%p3804_p7), %v3200_v6, %v3191_v3 }
 0x1bc   : > { %v3218_v20 = vmul.f32 (!%p3804_p7), %v3204_v25, %v3192_v4 }
 0x1bd   : > { %v3243_v27 = vadd.f32 (!%p3804_p7), %v3226_v26, %v3217_v19 }
 0x1be   : > { %v3244_v35 = vadd.f32 (!%p3804_p7), %v3230_v9, %v3218_v20 }
 0x1ec   : > { %v2967_v36 = vpop.f32.mrb[12].mxu0 }
 0x1ed   : > { %v3008_v28 = vpop.f32.mrb[12].mxu1  ;;  %v2969_v30 = vpop.f32.mrb[13].mxu0 }
 0x1ee   : > { %v3009_v29 = vadd.f32 %v3008_v28, %v2967_v36  ;;  %v3010_v31 = vpop.f32.mrb[13].mxu1  ;;  %v2971_v33 = vpop.f32.mrb[14].mxu0 }
 0x1ef   : > { %v3011_v32 = vadd.f32 %v3010_v31, %v2969_v30  ;;  %v3012_v34 = vpop.f32.mrb[14].mxu1  ;;  %v2972_v39 = vpop.f32.mrb[15].mxu0  ;;  %v3248_v30 = vmax.f32 (!%p3804_p7), %v3244_v35, 0.0 }
 0x1f0   : > { %v3013_v40 = vpop.f32.mrb[15].mxu1 }
 0x22c   : > { %v3049_v41 = vpop.f32.mrb[16].mxu0 }
 0x22d   : > { %v3090_v5 = vpop.f32.mrb[16].mxu1  ;;  %v3050_v10 = vadd.f32 %v3049_v41, %v3009_v29  ;;  %v3051_v42 = vpop.f32.mrb[17].mxu0  ;;  %v3247_v29 = vmax.f32 (!%p3804_p7), %v3243_v27, 0.0 }
 0x22e   : > { %v3092_v23 = vpop.f32.mrb[17].mxu1  ;;  %v3052_v24 = vadd.f32 %v3051_v42, %v3011_v32  ;;  %v3053_v43 = vpop.f32.mrb[18].mxu0 }
 0x22f   : > { %v3094_v44 = vpop.f32.mrb[18].mxu1  ;;  %v3091_v45 = vadd.f32 %v3090_v5, %v3050_v10  ;;  %v3054_v46 = vpop.f32.mrb[19].mxu0  ;;  %v3812_v33 = vpack.c.bf16 (!%p3804_p7), %v3248_v30, %v3247_v29 }
 0x230   : > { %v3095_v47 = vpop.f32.mrb[19].mxu1  ;;  %v3093_v49 = vadd.f32 %v3092_v23, %v3052_v24 }
 0x231   : > { %3267 = vst [vmem:[%s5010_s4] sm:$0xff] (!%p3804_p7), %v3812_v33 }
 0x26c   : > { %v3131_v50 = vpop.f32.mrb[20].mxu0 }
 0x26d   : > { %v3172_v48 = vpop.f32.mrb[20].mxu1  ;;  %v3132_v52 = vadd.f32 %v3131_v50, %v3091_v45  ;;  %v3133_v51 = vpop.f32.mrb[21].mxu0 }
 0x26e   : > { %v3174_v53 = vpop.f32.mrb[21].mxu1  ;;  %v3134_v7 = vadd.f32 %v3133_v51, %v3093_v49  ;;  %v3135_v8 = vpop.f32.mrb[22].mxu0  ;;  %3190 = sbr.rel (%p3804_p7) target bundleno = 645 (0x285), region = 44 }
 0x26f   : > { %v3176_v55 = vpop.f32.mrb[22].mxu1  ;;  %v3173_v56 = vadd.f32 %v3172_v48, %v3132_v52  ;;  %v3136_v37 = vpop.f32.mrb[23].mxu0 }
 0x270   : > { %v3177_v38 = vpop.f32.mrb[23].mxu1  ;;  %v3175_v58 = vadd.f32 %v3174_v53, %v3134_v7 }
 0x271   : > { %v3181_v59 = vadd.f32 %v3173_v56, %v333_v54 }
 0x272   : > { %v3182_v60 = vadd.f32 %v3175_v58, %v334_v57 }
 0x273   : > { %3185 = vst [vmem:[#allocation2 + $0x10] sm:$0xff] %v3181_v59 }
 0x274   : > { %3186 = vst [vmem:[#allocation2 + $0x18] sm:$0xff] %v3182_v60 }
 0x27a   : > { %v3193_v11 = vld [vmem:[#allocation2 + $0x10] sm:$0xff] }
 0x27b   : > { %v3194_v12 = vld [vmem:[#allocation2 + $0x18] sm:$0xff]  ;;  %v3219_v21 = vmul.f32 %v3208_v13, %v3193_v11 }
 0x27c   : > { %v3220_v22 = vmul.f32 %v3212_v14, %v3194_v12 }
 0x27d   : > { %v3245_v36 = vadd.f32 %v3234_v15, %v3219_v21 }
 0x27e   : > { %v3246_v28 = vadd.f32 %v3238_v16, %v3220_v22 }
 0x27f   : > { %v3249_v31 = vmax.f32 %v3245_v36, 0.0 }
 0x280   : > { %v3250_v32 = vmax.f32 %v3246_v28, 0.0 }
 0x282   : > { %v3813_v34 = vpack.c.bf16 %v3250_v32, %v3249_v31 }
 0x284   : > { %3268 = vst [vmem:[%s5010_s4 + $0x8] sm:$0xff] %v3813_v34 }
 0x285 PF: > { %s14_s17 = sadd.s32 1, %s4449_s17   ;;  %s5011_s15 = smov %s4445_s16 }
 0x286   : > { %p11_p8 = scmp.ge.s32.totalorder %s14_s17, 5   ;;  %s5012_s16 = smov %s5014_s18 }
 0x288   :  { %13 = sbr.rel (!%p11_p8) target bundleno = 2 (0x2), region = 83 }

// kernel: resnet18_forward.25
= control target key start
LH: loop header
LB: loop body
LE: loop exit
PB: predicated region body
PF: predicated region fallthrough
CT: control target
= control target key end

     0   :  { %vm33_vm0 = vcmask 1043456   ;;  %s757_s0 = inlined_call_operand.vmem [shape: bf16[2,4,512], index: 0, kind: input, shape index: {}]   ;;  %s758_s1 = inlined_call_operand.vmem [shape: f32[512,128], index: 1, kind: input, shape index: {}]   ;;  %s759_s2 = inlined_call_operand.vmem [shape: f32[1,128], index: 2, kind: input, shape index: {}]   ;;  %s760_s3 = inlined_call_operand.hbm [shape: f32[2,128], index: 3, kind: output, shape index: {}]  }
   0x1   :  { %v115_v0 = vld [vmem:[%s758_s1 + $0x80] sm:$0xff]  ;;  %v116_v1 = vld [vmem:[%s758_s1 + $0x88] sm:$0xff]  ;;  %v117_v11 = vld [vmem:[%s758_s1 + $0x90] sm:$0xff] }
   0x2   :  { %v99_v2 = vld [vmem:[%s758_s1] sm:$0xff]  ;;  %v413_v3 = vpack.c.bf16 %v116_v1, %v115_v0  ;;  %v100_v4 = vld [vmem:[%s758_s1 + $0x8] sm:$0xff]  ;;  %v118_v13 = vld [vmem:[%s758_s1 + $0x98] sm:$0xff] }
   0x3   :  { %v147_v5 = vld [vmem:[%s758_s1 + $0x180] sm:$0xff]  ;;  %v148_v6 = vld [vmem:[%s758_s1 + $0x188] sm:$0xff]  ;;  %v415_v7 = vpack.c.bf16 %v100_v4, %v99_v2  ;;  %v101_v14 = vld [vmem:[%s758_s1 + $0x10] sm:$0xff]  ;;  %v417_v16 = vpack.c.bf16 %v118_v13, %v117_v11 }
   0x4   :  { %v445_v8 = vpack.c.bf16 %v148_v6, %v147_v5  ;;  %v131_v9 = vld [vmem:[%s758_s1 + $0x100] sm:$0xff]  ;;  %v132_v10 = vld [vmem:[%s758_s1 + $0x108] sm:$0xff]  ;;  %414 = vmatprep.subr.bf16.mxu0 %v413_v3  ;;  %v102_v15 = vld [vmem:[%s758_s1 + $0x18] sm:$0xff] }
   0x5   :  { %v447_v12 = vpack.c.bf16 %v132_v10, %v131_v9  ;;  %416 = vmatpush3.bf16.msra.mxu0 %v415_v7  ;;  %v419_v17 = vpack.c.bf16 %v102_v15, %v101_v14  ;;  %v149_v18 = vld [vmem:[%s758_s1 + $0x190] sm:$0xff]  ;;  %v150_v19 = vld [vmem:[%s758_s1 + $0x198] sm:$0xff]  ;;  %v119_v23 = vld [vmem:[%s758_s1 + $0xa0] sm:$0xff] }
   0x6   :  { %446 = vmatprep.subr.bf16.mxu1 %v445_v8  ;;  %v133_v20 = vld [vmem:[%s758_s1 + $0x110] sm:$0xff]  ;;  %v449_v21 = vpack.c.bf16 %v150_v19, %v149_v18  ;;  %v134_v22 = vld [vmem:[%s758_s1 + $0x118] sm:$0xff]  ;;  %v120_v24 = vld [vmem:[%s758_s1 + $0xa8] sm:$0xff]  ;;  %418 = vmatprep.subr.bf16.mxu0 %v417_v16 }
   0x7   :  { %448 = vmatpush3.bf16.msra.mxu1 %v447_v12  ;;  %v451_v25 = vpack.c.bf16 %v134_v22, %v133_v20  ;;  %v421_v26 = vpack.c.bf16 %v120_v24, %v119_v23  ;;  %v103_v27 = vld [vmem:[%s758_s1 + $0x20] sm:$0xff]  ;;  %v104_v28 = vld [vmem:[%s758_s1 + $0x28] sm:$0xff]  ;;  %v121_v35 = vld [vmem:[%s758_s1 + $0xb0] sm:$0xff] }
   0x8   :  { %v151_v29 = vld [vmem:[%s758_s1 + $0x1a0] sm:$0xff]  ;;  %450 = vmatprep.subr.bf16.mxu1 %v449_v21  ;;  %v152_v30 = vld [vmem:[%s758_s1 + $0x1a8] sm:$0xff]  ;;  %v423_v33 = vpack.c.bf16 %v104_v28, %v103_v27  ;;  %v122_v36 = vld [vmem:[%s758_s1 + $0xb8] sm:$0xff] }
   0x9   :  { %v135_v31 = vld [vmem:[%s758_s1 + $0x120] sm:$0xff]  ;;  %v136_v32 = vld [vmem:[%s758_s1 + $0x128] sm:$0xff]  ;;  %420 = vmatpush3.bf16.msra.mxu0 %v419_v17  ;;  %v453_v34 = vpack.c.bf16 %v152_v30, %v151_v29  ;;  %v105_v37 = vld [vmem:[%s758_s1 + $0x30] sm:$0xff]  ;;  %v425_v39 = vpack.c.bf16 %v122_v36, %v121_v35 }
   0xa   :  { %422 = vmatprep.subr.bf16.mxu0 %v421_v26  ;;  %v455_v38 = vpack.c.bf16 %v136_v32, %v135_v31  ;;  %v106_v40 = vld [vmem:[%s758_s1 + $0x38] sm:$0xff]  ;;  %v153_v41 = vld [vmem:[%s758_s1 + $0x1b0] sm:$0xff]  ;;  %v123_v46 = vld [vmem:[%s758_s1 + $0xc0] sm:$0xff] }
   0xb   :  { %452 = vmatpush3.bf16.msra.mxu1 %v451_v25  ;;  %v154_v42 = vld [vmem:[%s758_s1 + $0x1b8] sm:$0xff]  ;;  %v137_v44 = vld [vmem:[%s758_s1 + $0x130] sm:$0xff]  ;;  %v124_v47 = vld [vmem:[%s758_s1 + $0xc8] sm:$0xff]  ;;  %v427_v48 = vpack.c.bf16 %v106_v40, %v105_v37 }
   0xc   :  { %454 = vmatprep.subr.bf16.mxu1 %v453_v34  ;;  %v457_v43 = vpack.c.bf16 %v154_v42, %v153_v41  ;;  %v138_v45 = vld [vmem:[%s758_s1 + $0x138] sm:$0xff]  ;;  %v107_v49 = vld [vmem:[%s758_s1 + $0x40] sm:$0xff]  ;;  %v156_v51 = vld [vmem:[%s758_s1 + $0x1c8] sm:$0xff]  ;;  %v429_v53 = vpack.c.bf16 %v124_v47, %v123_v46 }
   0xd   :  { %424 = vmatpush3.bf16.msra.mxu0 %v423_v33  ;;  %v155_v50 = vld [vmem:[%s758_s1 + $0x1c0] sm:$0xff]  ;;  %v459_v52 = vpack.c.bf16 %v138_v45, %v137_v44  ;;  %v108_v54 = vld [vmem:[%s758_s1 + $0x48] sm:$0xff]  ;;  %v125_v58 = vld [vmem:[%s758_s1 + $0xd0] sm:$0xff] }
   0xe   :  { %426 = vmatprep.subr.bf16.mxu0 %v425_v39  ;;  %v139_v55 = vld [vmem:[%s758_s1 + $0x140] sm:$0xff]  ;;  %v140_v56 = vld [vmem:[%s758_s1 + $0x148] sm:$0xff]  ;;  %v461_v57 = vpack.c.bf16 %v156_v51, %v155_v50  ;;  %v126_v59 = vld [vmem:[%s758_s1 + $0xd8] sm:$0xff]  ;;  %v431_v2 = vpack.c.bf16 %v108_v54, %v107_v49 }
   0xf   :  { %456 = vmatpush3.bf16.msra.mxu1 %v455_v38  ;;  %v157_v60 = vld [vmem:[%s758_s1 + $0x1d0] sm:$0xff]  ;;  %v110_v62 = vld [vmem:[%s758_s1 + $0x58] sm:$0xff]  ;;  %v127_v3 = vld [vmem:[%s758_s1 + $0xe0] sm:$0xff]  ;;  %v463_v6 = vpack.c.bf16 %v140_v56, %v139_v55  ;;  %v433_v7 = vpack.c.bf16 %v126_v59, %v125_v58 }
  0x10   :  { %458 = vmatprep.subr.bf16.mxu1 %v457_v43  ;;  %v109_v61 = vld [vmem:[%s758_s1 + $0x50] sm:$0xff]  ;;  %v158_v63 = vld [vmem:[%s758_s1 + $0x1d8] sm:$0xff]  ;;  %v128_v4 = vld [vmem:[%s758_s1 + $0xe8] sm:$0xff] }
  0x11   :  { %v141_v0 = vld [vmem:[%s758_s1 + $0x150] sm:$0xff]  ;;  %v142_v1 = vld [vmem:[%s758_s1 + $0x158] sm:$0xff]  ;;  %428 = vmatpush3.bf16.msra.mxu0 %v427_v48  ;;  %v111_v5 = vld [vmem:[%s758_s1 + $0x60] sm:$0xff]  ;;  %v465_v11 = vpack.c.bf16 %v158_v63, %v157_v60  ;;  %v435_v18 = vpack.c.bf16 %v110_v62, %v109_v61  ;;  %v437_v20 = vpack.c.bf16 %v128_v4, %v127_v3 }
  0x12   :  { %430 = vmatprep.subr.bf16.mxu0 %v429_v53  ;;  %v112_v8 = vld [vmem:[%s758_s1 + $0x68] sm:$0xff]  ;;  %v159_v9 = vld [vmem:[%s758_s1 + $0x1e0] sm:$0xff]  ;;  %v129_v14 = vld [vmem:[%s758_s1 + $0xf0] sm:$0xff]  ;;  %v467_v19 = vpack.c.bf16 %v142_v1, %v141_v0 }
  0x13   :  { %460 = vmatpush3.bf16.msra.mxu1 %v459_v52  ;;  %v160_v10 = vld [vmem:[%s758_s1 + $0x1e8] sm:$0xff]  ;;  %v143_v12 = vld [vmem:[%s758_s1 + $0x160] sm:$0xff]  ;;  %v130_v15 = vld [vmem:[%s758_s1 + $0xf8] sm:$0xff]  ;;  %v439_v24 = vpack.c.bf16 %v112_v8, %v111_v5 }
  0x14   :  { %462 = vmatprep.subr.bf16.mxu1 %v461_v57  ;;  %v144_v13 = vld [vmem:[%s758_s1 + $0x168] sm:$0xff]  ;;  %v700_v16 = vld [vmem:[%s758_s1 + $0x70] sm:$0xff]  ;;  %v705_v17 = vld [vmem:[%s758_s1 + $0x78] sm:$0xff]  ;;  %v469_v25 = vpack.c.bf16 %v160_v10, %v159_v9  ;;  %v441_v30 = vpack.c.bf16 %v130_v15, %v129_v14 }
  0x15   :  { %432 = vmatpush3.bf16.msra.mxu0 %v431_v2  ;;  %v161_v21 = vld [vmem:[%s758_s1 + $0x1f0] sm:$0xff]  ;;  %v162_v22 = vld [vmem:[%s758_s1 + $0x1f8] sm:$0xff]  ;;  %v471_v26 = vpack.c.bf16 %v144_v13, %v143_v12  ;;  %v15_v28 = vld [vmem:[%s757_s0] sm:$0xff] }
  0x16   :  { %v716_v23 = vld [vmem:[%s758_s1 + $0x170] sm:$0xff]  ;;  %434 = vmatprep.subr.bf16.mxu0 %v433_v7  ;;  %v146_v27 = vld [vmem:[%s758_s1 + $0x178] sm:$0xff]  ;;  %v16_v29 = vld [vmem:[%s757_s0 + $0x8] sm:$0xff]  ;;  %v17_v31 = vunpack.c.l.bf16 %v15_v28  ;;  %v18_v33 = vunpack.c.h.bf16 %v15_v28 }
  0x17   :  { %464 = vmatpush3.bf16.msra.mxu1 %v463_v6  ;;  %v19_v32 = vunpack.c.l.bf16 %v16_v29 }
  0x18   :  { %466 = vmatprep.subr.bf16.mxu1 %v465_v11 }
  0x19   :  { %8 = vsyncpa [#allocation3], 0  ;;  %v443_v34 = vpack.c.bf16 %v705_v17, %v700_v16  ;;  %v473_v35 = vpack.c.bf16 %v162_v22, %v161_v21  ;;  %v475_v36 = vpack.c.bf16 %v146_v27, %v716_v23  ;;  %v20_v37 = vunpack.c.h.bf16 %v16_v29  ;;  %436 = vmatpush3.bf16.msra.mxu0 %v435_v18  ;;  %s502_s9 = smov [#allocation2]  }
  0x1a   :  { %v25_v38 = vcombine.high %v17_v31, %v17_v31  ;;  %v27_v39 = vcombine.high %v19_v32, %v19_v32  ;;  %v34_v40 = vsel %vm33_vm0, %v17_v31, 0.0  ;;  %v62_v41 = vsel %vm33_vm0, %v19_v32, 0.0  ;;  %438 = vmatprep.subr.bf16.mxu0 %v437_v20  ;;  %s334_s10 = sshll.u32 %s502_s9, 4  ;;  %s335_s10 = int_to_ptr.vmem [resolvable:$true] %s334_s10 }
  0x1b   :  { %468 = vmatpush3.bf16.msra.mxu1 %v467_v19  ;;  %v35_v42 = vrot.slane %v34_v40, 4  ;;  %v63_v43 = vrot.slane %v62_v41, 4  ;;  %v26_v44 = vcombine.high %v18_v33, %v18_v33  ;;  %v28_v45 = vcombine.high %v20_v37, %v20_v37  ;;  %s478_s11 = scalar_lea.vmem %s335_s10, 32  ;;  %p483_p1 = scmp.lt.s32.totalorder %s335_s10, %s335_s10 }
  0x1c   :  { %470 = vmatprep.subr.bf16.mxu1 %v469_v25  ;;  %v41_v46 = vsel %vm33_vm0, %v25_v38, 0.0  ;;  %v69_v47 = vsel %vm33_vm0, %v27_v39, 0.0  ;;  %v48_v48 = vsel %vm33_vm0, %v18_v33, 0.0  ;;  %v76_v49 = vsel %vm33_vm0, %v20_v37, 0.0  ;;  %p479_p0 = scmp.ne.s32.totalorder %s335_s10, %s478_s11  ;;  %p484_p2 = scmp.lt.s32.totalorder %s478_s11, %s478_s11 }
  0x1d   :  { %v42_v50 = vrot.slane %v41_v46, 4  ;;  %v70_v51 = vrot.slane %v69_v47, 4  ;;  %v36_v52 = vadd.f32 %v35_v42, %v34_v40  ;;  %v64_v53 = vadd.f32 %v63_v43, %v62_v41  ;;  %440 = vmatpush3.bf16.msra.mxu0 %v439_v24 }
  0x1e   :  { %vm178_vm1 = vcmask 1041409   ;;  %v55_v54 = vsel %vm33_vm0, %v26_v44, 0.0  ;;  %v83_v55 = vsel %vm33_vm0, %v28_v45, 0.0  ;;  %v49_v56 = vrot.slane %v48_v48, 4  ;;  %442 = vmatprep.subr.bf16.mxu0 %v441_v30  ;;  %p485_p3 = por %p484_p2, %p483_p1 }
  0x1f   :  { %v77_v57 = vrot.slane %v76_v49, 4  ;;  %472 = vmatpush3.bf16.msra.mxu1 %v471_v26  ;;  %v43_v58 = vadd.f32 %v42_v50, %v41_v46  ;;  %v71_v59 = vadd.f32 %v70_v51, %v69_v47  ;;  %v37_v60 = vrot.slane %v36_v52, 2  ;;  %v342_v47 = vld [vmem:[%s759_s2] ss:$0 sm:$0xff] }
  0x20   :  { %v65_v61 = vrot.slane %v64_v53, 2  ;;  %474 = vmatprep.subr.bf16.mxu1 %v473_v35  ;;  %v56_v62 = vrot.slane %v55_v54, 4  ;;  %v84_v63 = vrot.slane %v83_v55, 4  ;;  %v50_v0 = vadd.f32 %v49_v56, %v48_v48  ;;  %p486_p4 = pnand %p485_p3, %p479_p0 }
  0x21   :  { %v78_v1 = vadd.f32 %v77_v57, %v76_v49  ;;  %v44_v2 = vrot.slane %v43_v58, 2  ;;  %v72_v3 = vrot.slane %v71_v59, 2  ;;  %v38_v4 = vadd.f32 %v37_v60, %v36_v52  ;;  %444 = vmatpush3.bf16.msra.mxu0 %v443_v34 }
  0x22   :  { %v66_v5 = vadd.f32 %v65_v61, %v64_v53  ;;  %v57_v6 = vadd.f32 %v56_v62, %v55_v54  ;;  %v85_v7 = vadd.f32 %v84_v63, %v83_v55  ;;  %v51_v8 = vrot.slane %v50_v0, 2 }
  0x23   :  { %v79_v9 = vrot.slane %v78_v1, 2  ;;  %476 = vmatpush3.bf16.msra.mxu1 %v475_v36  ;;  %v45_v10 = vadd.f32 %v44_v2, %v43_v58  ;;  %v73_v11 = vadd.f32 %v72_v3, %v71_v59  ;;  %v39_v12 = vrot.slane %v38_v4, 1 }
  0x24   :  { %v67_v13 = vrot.slane %v66_v5, 1  ;;  %v58_v14 = vrot.slane %v57_v6, 2  ;;  %v86_v15 = vrot.slane %v85_v7, 2  ;;  %v52_v16 = vadd.f32 %v51_v8, %v50_v0 }
  0x25   :  { %v80_v17 = vadd.f32 %v79_v9, %v78_v1  ;;  %v46_v18 = vrot.slane %v45_v10, 1  ;;  %v74_v19 = vrot.slane %v73_v11, 1  ;;  %v40_v20 = vadd.f32 %v39_v12, %v38_v4 }
  0x26   :  { %v68_v21 = vadd.f32 %v67_v13, %v66_v5  ;;  %v59_v22 = vadd.f32 %v58_v14, %v57_v6  ;;  %v87_v23 = vadd.f32 %v86_v15, %v85_v7  ;;  %v53_v24 = vrot.slane %v52_v16, 1 }
  0x27   :  { %v81_v25 = vrot.slane %v80_v17, 1  ;;  %v47_v26 = vadd.f32 %v46_v18, %v45_v10  ;;  %v75_v27 = vadd.f32 %v74_v19, %v73_v11  ;;  %v91_v28 = vmul.f32 0.25, %v40_v20 }
  0x28   :  { %v95_v29 = vmul.f32 0.25, %v68_v21  ;;  %v60_v30 = vrot.slane %v59_v22, 1  ;;  %v88_v31 = vrot.slane %v87_v23, 1  ;;  %v54_v32 = vadd.f32 %v53_v24, %v52_v16 }
  0x29   :  { %v82_v33 = vadd.f32 %v81_v25, %v80_v17  ;;  %v92_v34 = vmul.f32 0.25, %v47_v26  ;;  %v96_v35 = vmul.f32 0.25, %v75_v27 }
  0x2a   :  { %v179_v36 = vsel %vm178_vm1, %v95_v29, %v91_v28  ;;  %v61_v37 = vadd.f32 %v60_v30, %v59_v22  ;;  %v89_v38 = vadd.f32 %v88_v31, %v87_v23  ;;  %v93_v39 = vmul.f32 0.25, %v54_v32 }
  0x2b   :  { %v97_v40 = vmul.f32 0.25, %v82_v33  ;;  %v180_v41 = vsel %vm178_vm1, %v96_v35, %v92_v34 }
  0x2c   :  { %251 = vmatprep.mubr.f32.mxu0 %v180_v41  ;;  %v94_v42 = vmul.f32 0.25, %v61_v37  ;;  %v98_v43 = vmul.f32 0.25, %v89_v38 }
  0x2d   :  { %252 = vmatmul.mubr.f32.vlgmr.msra.gmra.mrb[0].mxu0 %v179_v36  ;;  %v181_v44 = vsel %vm178_vm1, %v97_v40, %v93_v39 }
  0x2e   :  { %v182_v45 = vsel %vm178_vm1, %v98_v43, %v94_v42 }
  0x2f   :  { %321 = vmatprep.mubr.f32.mxu1 %v182_v45 }
  0x30   :  { %322 = vmatmul.mubr.f32.vlgmr.msra.gmra.mrb[0].mxu1 %v181_v44 }
 0x100   :  { %v375_v46 = vpop.f32.mrb[0].mxu0 }
 0x101   :  { %v376_v48 = vpop.f32.mrb[1].mxu0 }
 0x102   :  { %v377_v49 = vadd.f32 %v376_v48, %v375_v46 }
 0x103   :  { %v410_v50 = vpop.f32.mrb[0].mxu1 }
 0x104   :  { %v254_v51 = vadd.f32 %v377_v49, %v342_v47  ;;  %v411_v52 = vpop.f32.mrb[1].mxu1 }
 0x105   :  { %v412_v53 = vadd.f32 %v411_v52, %v410_v50 }
 0x107   :  { %v324_v54 = vadd.f32 %v412_v53, %v254_v51 }
 0x109   :  { %327 = vst [vmem:[#allocation2] sm:$0x3] %v324_v54 }
 0x10a   :  { %489 = shalt.err (!%p486_p4)
}
 0x10b   :  { %s490_s13 = scalar_lea.hbm %s760_s3, 32 }
 0x10c   :  { %p491_p5 = scmp.ne.s32.totalorder %s760_s3, %s490_s13  ;;  %p494_p6 = scmp.lt.u32.totalorder %s490_s13, %s760_s3 }
 0x10e   :  { %p496_p7 = pnand %p494_p6, %p491_p5 }
 0x110   :  { %499 = shalt.err (!%p496_p7)
}
 0x111   :  { %337 = dma.vmem_to_hbm [thread:$0]  %s335_s10, 32, %s760_s3, [#allocation3]  }
 0x112   :  { %500 = dma.done.wait [#allocation3], 32  }
 0x113   :  { %501 = vsyncadd [#allocation3], 4294967264 }
 0x114   :  { %341 = vsyncpa [#allocation3], 1 }

// kernel: resnet18_forward.22
= control target key start
LH: loop header
LB: loop body
LE: loop exit
PB: predicated region body
PF: predicated region fallthrough
CT: control target
= control target key end

     0   :  { %s4577_s18 = smov 0   ;;  %s4579_s19 = smov 0   ;;  %s5112_s0 = inlined_call_operand.vmem [shape: bf16[8,4608], index: 0, kind: input, shape index: {}]   ;;  %s5113_s1 = inlined_call_operand.vmem [shape: bf16[4608,512], index: 1, kind: input, shape index: {}]   ;;  %s5114_s2 = inlined_call_operand.vmem [shape: f32[1,512], index: 2, kind: input, shape index: {}]   ;;  %s5115_s3 = inlined_call_operand.vmem [shape: f32[1,512], index: 3, kind: input, shape index: {}]   ;;  %s5116_s4 = inlined_call_operand.vmem [shape: bf16[8,512], index: 4, kind: input, shape index: {}]   ;;  %s5117_s5 = inlined_call_operand.vmem [shape: bf16[8,512], index: 5, kind: output, shape index: {}]  }
   0x1   :  { %s4581_s20 = smov 0  }
   0x2 LB: > { %s27_s21 = sadd.s32 1, %s4540_s19  ;;  %p3498_p0 = scmp.ge.s32.totalorder %s4544_s20, 1  ;;  %s4544_s20 = sphi %s4581_s20, %s15_s20   ;;  %s4540_s19 = sphi %s4579_s19, %s5119_s19   ;;  %s4536_s18 = sphi %s4577_s18, %s5118_s18  }
   0x3   : > { %p28_p1 = scmp.ge.s32.totalorder %s27_s21, 3  ;;  %p271_p2 = scmp.lt.s32.totalorder %s4544_s20, 4 }
   0x5   : > { %s5121_s21 = smov (%p28_p1, %s27_s21), 0  ;;  %p272_p3 = pnand %p3498_p0, %p271_p2 }
   0x6   : > { %s334_s22 = smul.u32 (!%p272_p3), 12, %s4536_s18  ;;  %p3502_p6 = scmp.ne.s32.totalorder (!%p272_p3), %s4536_s18, 0 }
   0x7   : > { %275 = sbr.rel (%p272_p3) target bundleno = 647 (0x287), region = 40 }
   0x8   : > { %s344_s23 = smul.u32 (!%p272_p3), 192, %s4536_s18  ;;  %p337_p4 = scmp.lt.s32.totalorder (!%p272_p3), %s334_s22, 35 }
   0xa   : > { %p346_p5 = scmp.lt.s32.totalorder (!%p272_p3), %s344_s23, 575 }
   0xe   : > { %s5123_s22 = smov (!%p337_p4, %s334_s22), 35  ;;  %s5125_s23 = smov (!%p346_p5, %s344_s23), 575 }
   0xf   : > { %s3499_s24 = sshll.u32 %s5123_s22, 2  ;;  %s3906_s28 = sshll.u32 %s5125_s23, 4  ;;  %v4546_v0 = vmov (!%p3502_p6), 0.0  }
  0x10   : > { %s4602_s27 = scalar_lea.vmem %s5112_s0, %s3499_s24  ;;  %s4607_s6 = scalar_lea.vmem %s5113_s1, %s3906_s28  ;;  %390 = vst [vmem:[#allocation2] sm:$0xff] (!%p3502_p6), %v4546_v0  ;;  %391 = vst [vmem:[#allocation2 + $0x8] sm:$0xff] (!%p3502_p6), %v4546_v0 }
  0x11   : > { %389 = sbr.rel (%p3502_p6) target bundleno = 24 (0x18), region = 44  ;;  %392 = vst [vmem:[#allocation2 + $0x10] sm:$0xff] (!%p3502_p6), %v4546_v0  ;;  %393 = vst [vmem:[#allocation2 + $0x18] sm:$0xff] (!%p3502_p6), %v4546_v0 }
  0x18 PF: > { %v3934_v1 = vld [vmem:[%s4607_s6 + $0x4] ss:$16 sps:$4 sm:$0xff]   ;;  %v3938_v3 = vld [vmem:[%s4607_s6] ss:$16 sps:$4 sm:$0xff]   ;;  %v399_v49 = vld [vmem:[%s4602_s27 + $0x8] sm:$0xff]  ;;  %p3899_p7 = scmp.ne.s32.totalorder %s4536_s18, 2 }
  0x19   : > { %v3936_v2 = vld [vmem:[%s4607_s6 + $0x204] ss:$16 sps:$4 sm:$0xff]   ;;  %2750 = vmatprep.subr.bf16.mxu0 %v3934_v1  ;;  %v3939_v4 = vld [vmem:[%s4607_s6 + $0x200] ss:$16 sps:$4 sm:$0xff]   ;;  %v4662_v52 = vcombine.high %v399_v49, %v399_v49 }
  0x1a   : > { %2791 = vmatprep.subr.bf16.mxu1 %v3936_v2  ;;  %v3940_v5 = vld [vmem:[%s4607_s6 + $0x24] ss:$16 sps:$4 sm:$0xff]   ;;  %2751 = vmatpush1.bf16.msra.mxu0 %v3938_v3  ;;  %v3944_v7 = vld [vmem:[%s4607_s6 + $0x20] ss:$16 sps:$4 sm:$0xff]  }
  0x1b   : > { %2792 = vmatpush1.bf16.msra.mxu1 %v3939_v4  ;;  %v3942_v6 = vld [vmem:[%s4607_s6 + $0x224] ss:$16 sps:$4 sm:$0xff]   ;;  %2752 = vmatprep.subr.bf16.mxu0 %v3940_v5  ;;  %v3945_v8 = vld [vmem:[%s4607_s6 + $0x220] ss:$16 sps:$4 sm:$0xff]  }
  0x1c   : > { %2793 = vmatprep.subr.bf16.mxu1 %v3942_v6  ;;  %v3946_v9 = vld [vmem:[%s4607_s6 + $0x44] ss:$16 sps:$4 sm:$0xff]   ;;  %v3950_v11 = vld [vmem:[%s4607_s6 + $0x40] ss:$16 sps:$4 sm:$0xff]   ;;  %2823 = vmatprep.mubr.bf16.mxu1 %v4662_v52 }
  0x1d   : > { %v3948_v10 = vld [vmem:[%s4607_s6 + $0x244] ss:$16 sps:$4 sm:$0xff]   ;;  %v3951_v12 = vld [vmem:[%s4607_s6 + $0x240] ss:$16 sps:$4 sm:$0xff]  }
  0x1e   : > { %2753 = vmatpush1.bf16.msra.mxu0 %v3944_v7  ;;  %v3952_v13 = vld [vmem:[%s4607_s6 + $0x64] ss:$16 sps:$4 sm:$0xff]   ;;  %v3956_v15 = vld [vmem:[%s4607_s6 + $0x60] ss:$16 sps:$4 sm:$0xff]  }
  0x1f   : > { %2794 = vmatpush1.bf16.msra.mxu1 %v3945_v8  ;;  %2754 = vmatprep.subr.bf16.mxu0 %v3946_v9  ;;  %v3954_v14 = vld [vmem:[%s4607_s6 + $0x264] ss:$16 sps:$4 sm:$0xff]   ;;  %v3957_v16 = vld [vmem:[%s4607_s6 + $0x260] ss:$16 sps:$4 sm:$0xff]   ;;  %v4686_v8 = vcombine.low %v399_v49, %v399_v49 }
  0x20   : > { %2795 = vmatprep.subr.bf16.mxu1 %v3948_v10  ;;  %v3958_v17 = vld [vmem:[%s4607_s6 + $0x84] ss:$16 sps:$4 sm:$0xff]   ;;  %v3962_v19 = vld [vmem:[%s4607_s6 + $0x80] ss:$16 sps:$4 sm:$0xff]  }
  0x21   : > { %v3960_v18 = vld [vmem:[%s4607_s6 + $0x284] ss:$16 sps:$4 sm:$0xff]   ;;  %v3963_v20 = vld [vmem:[%s4607_s6 + $0x280] ss:$16 sps:$4 sm:$0xff]  }
  0x22   : > { %2755 = vmatpush1.bf16.msra.mxu0 %v3950_v11  ;;  %v3964_v21 = vld [vmem:[%s4607_s6 + $0xa4] ss:$16 sps:$4 sm:$0xff]   ;;  %v3968_v23 = vld [vmem:[%s4607_s6 + $0xa0] ss:$16 sps:$4 sm:$0xff]  }
  0x23   : > { %2796 = vmatpush1.bf16.msra.mxu1 %v3951_v12  ;;  %2756 = vmatprep.subr.bf16.mxu0 %v3952_v13  ;;  %v3966_v22 = vld [vmem:[%s4607_s6 + $0x2a4] ss:$16 sps:$4 sm:$0xff]   ;;  %v3969_v24 = vld [vmem:[%s4607_s6 + $0x2a0] ss:$16 sps:$4 sm:$0xff]  }
  0x24   : > { %2797 = vmatprep.subr.bf16.mxu1 %v3954_v14  ;;  %v3970_v25 = vld [vmem:[%s4607_s6 + $0xc4] ss:$16 sps:$4 sm:$0xff]   ;;  %v3974_v27 = vld [vmem:[%s4607_s6 + $0xc0] ss:$16 sps:$4 sm:$0xff]  }
  0x25   : > { %v3972_v26 = vld [vmem:[%s4607_s6 + $0x2c4] ss:$16 sps:$4 sm:$0xff]   ;;  %v3975_v28 = vld [vmem:[%s4607_s6 + $0x2c0] ss:$16 sps:$4 sm:$0xff]  }
  0x26   : > { %2757 = vmatpush1.bf16.msra.mxu0 %v3956_v15  ;;  %v3976_v29 = vld [vmem:[%s4607_s6 + $0xe4] ss:$16 sps:$4 sm:$0xff]   ;;  %v3980_v31 = vld [vmem:[%s4607_s6 + $0xe0] ss:$16 sps:$4 sm:$0xff]  }
  0x27   : > { %2798 = vmatpush1.bf16.msra.mxu1 %v3957_v16  ;;  %2758 = vmatprep.subr.bf16.mxu0 %v3958_v17  ;;  %v3978_v30 = vld [vmem:[%s4607_s6 + $0x2e4] ss:$16 sps:$4 sm:$0xff]   ;;  %v3981_v32 = vld [vmem:[%s4607_s6 + $0x2e0] ss:$16 sps:$4 sm:$0xff]  }
  0x28   : > { %2799 = vmatprep.subr.bf16.mxu1 %v3960_v18  ;;  %v3982_v33 = vld [vmem:[%s4607_s6 + $0x104] ss:$16 sps:$4 sm:$0xff]   ;;  %v3986_v35 = vld [vmem:[%s4607_s6 + $0x100] ss:$16 sps:$4 sm:$0xff]  }
  0x29   : > { %v3984_v34 = vld [vmem:[%s4607_s6 + $0x304] ss:$16 sps:$4 sm:$0xff]   ;;  %v3987_v36 = vld [vmem:[%s4607_s6 + $0x300] ss:$16 sps:$4 sm:$0xff]  }
  0x2a   : > { %2759 = vmatpush1.bf16.msra.mxu0 %v3962_v19  ;;  %v3988_v37 = vld [vmem:[%s4607_s6 + $0x124] ss:$16 sps:$4 sm:$0xff]   ;;  %v3992_v39 = vld [vmem:[%s4607_s6 + $0x120] ss:$16 sps:$4 sm:$0xff]  }
  0x2b   : > { %2800 = vmatpush1.bf16.msra.mxu1 %v3963_v20  ;;  %2760 = vmatprep.subr.bf16.mxu0 %v3964_v21  ;;  %v3990_v38 = vld [vmem:[%s4607_s6 + $0x324] ss:$16 sps:$4 sm:$0xff]   ;;  %v3993_v40 = vld [vmem:[%s4607_s6 + $0x320] ss:$16 sps:$4 sm:$0xff]  }
  0x2c   : > { %2801 = vmatprep.subr.bf16.mxu1 %v3966_v22  ;;  %v3994_v41 = vld [vmem:[%s4607_s6 + $0x144] ss:$16 sps:$4 sm:$0xff]   ;;  %v3998_v43 = vld [vmem:[%s4607_s6 + $0x140] ss:$16 sps:$4 sm:$0xff]  }
  0x2d   : > { %v3996_v42 = vld [vmem:[%s4607_s6 + $0x344] ss:$16 sps:$4 sm:$0xff]   ;;  %v3999_v44 = vld [vmem:[%s4607_s6 + $0x340] ss:$16 sps:$4 sm:$0xff]  }
  0x2e   : > { %2761 = vmatpush1.bf16.msra.mxu0 %v3968_v23  ;;  %v4000_v45 = vld [vmem:[%s4607_s6 + $0x164] ss:$16 sps:$4 sm:$0xff]   ;;  %v4004_v50 = vld [vmem:[%s4607_s6 + $0x160] ss:$16 sps:$4 sm:$0xff]  }
  0x2f   : > { %2802 = vmatpush1.bf16.msra.mxu1 %v3969_v24  ;;  %2762 = vmatprep.subr.bf16.mxu0 %v3970_v25  ;;  %v4002_v46 = vld [vmem:[%s4607_s6 + $0x364] ss:$16 sps:$4 sm:$0xff]   ;;  %v4005_v51 = vld [vmem:[%s4607_s6 + $0x360] ss:$16 sps:$4 sm:$0xff]  }
  0x30   : > { %2803 = vmatprep.subr.bf16.mxu1 %v3972_v26  ;;  %v398_v47 = vld [vmem:[%s4602_s27] sm:$0xff] }
  0x31   : > { %v4657_v48 = vcombine.high %v398_v47, %v398_v47  ;;  %v4006_v53 = vld [vmem:[%s4607_s6 + $0x184] ss:$16 sps:$4 sm:$0xff]   ;;  %v4010_v55 = vld [vmem:[%s4607_s6 + $0x180] ss:$16 sps:$4 sm:$0xff]   ;;  %v4684_v7 = vcombine.low %v398_v47, %v398_v47 }
  0x32   : > { %2763 = vmatpush1.bf16.msra.mxu0 %v3974_v27  ;;  %v4008_v54 = vld [vmem:[%s4607_s6 + $0x384] ss:$16 sps:$4 sm:$0xff]   ;;  %v4011_v56 = vld [vmem:[%s4607_s6 + $0x380] ss:$16 sps:$4 sm:$0xff]  }
  0x33   : > { %2804 = vmatpush1.bf16.msra.mxu1 %v3975_v28  ;;  %2764 = vmatprep.subr.bf16.mxu0 %v3976_v29  ;;  %v4012_v57 = vld [vmem:[%s4607_s6 + $0x1a4] ss:$16 sps:$4 sm:$0xff]   ;;  %v4016_v59 = vld [vmem:[%s4607_s6 + $0x1a0] ss:$16 sps:$4 sm:$0xff]  }
  0x34   : > { %2805 = vmatprep.subr.bf16.mxu1 %v3978_v30  ;;  %2782 = vmatprep.mubr.bf16.mxu0 %v4657_v48  ;;  %v4014_v58 = vld [vmem:[%s4607_s6 + $0x3a4] ss:$16 sps:$4 sm:$0xff]   ;;  %v4017_v60 = vld [vmem:[%s4607_s6 + $0x3a0] ss:$16 sps:$4 sm:$0xff]  }
  0x35   : > { %v4018_v61 = vld [vmem:[%s4607_s6 + $0x1c4] ss:$16 sps:$4 sm:$0xff]   ;;  %v4022_v63 = vld [vmem:[%s4607_s6 + $0x1c0] ss:$16 sps:$4 sm:$0xff]  }
  0x36   : > { %2765 = vmatpush1.bf16.msra.mxu0 %v3980_v31  ;;  %v4020_v62 = vld [vmem:[%s4607_s6 + $0x3c4] ss:$16 sps:$4 sm:$0xff]   ;;  %v4023_v0 = vld [vmem:[%s4607_s6 + $0x3c0] ss:$16 sps:$4 sm:$0xff]  }
  0x37   : > { %2806 = vmatpush1.bf16.msra.mxu1 %v3981_v32  ;;  %2766 = vmatprep.subr.bf16.mxu0 %v3982_v33  ;;  %v4024_v1 = vld [vmem:[%s4607_s6 + $0x1e4] ss:$16 sps:$4 sm:$0xff]   ;;  %v4028_v3 = vld [vmem:[%s4607_s6 + $0x1e0] ss:$16 sps:$4 sm:$0xff]  }
  0x38   : > { %2807 = vmatprep.subr.bf16.mxu1 %v3984_v34  ;;  %v4026_v2 = vld [vmem:[%s4607_s6 + $0x3e4] ss:$16 sps:$4 sm:$0xff]   ;;  %v4029_v4 = vld [vmem:[%s4607_s6 + $0x3e0] ss:$16 sps:$4 sm:$0xff]   ;;  %v4718_v34 = vld [vmem:[%s4602_s27 + $0x18] sm:$0xff] }
  0x39   : > { %v4036_v5 = vld [vmem:[%s4607_s6 + $0x404] ss:$16 sps:$4 sm:$0xff]   ;;  %v4034_v9 = vld [vmem:[%s4607_s6 + $0x400] ss:$16 sps:$4 sm:$0xff]  }
  0x3a   : > { %2767 = vmatpush1.bf16.msra.mxu0 %v3986_v35  ;;  %v4039_v6 = vld [vmem:[%s4607_s6 + $0x604] ss:$16 sps:$4 sm:$0xff]   ;;  %v4037_v10 = vld [vmem:[%s4607_s6 + $0x600] ss:$16 sps:$4 sm:$0xff]  }
  0x3b   : > { %2808 = vmatpush1.bf16.msra.mxu1 %v3987_v36  ;;  %2768 = vmatprep.subr.bf16.mxu0 %v3988_v37  ;;  %v4042_v11 = vld [vmem:[%s4607_s6 + $0x424] ss:$16 sps:$4 sm:$0xff]   ;;  %v4040_v13 = vld [vmem:[%s4607_s6 + $0x420] ss:$16 sps:$4 sm:$0xff]  }
  0x3c   : > { %2809 = vmatprep.subr.bf16.mxu1 %v3990_v38  ;;  %v4045_v12 = vld [vmem:[%s4607_s6 + $0x624] ss:$16 sps:$4 sm:$0xff]   ;;  %v4043_v14 = vld [vmem:[%s4607_s6 + $0x620] ss:$16 sps:$4 sm:$0xff]   ;;  %v4728_v38 = vcombine.high %v4718_v34, %v4718_v34 }
  0x3d   : > { %v4048_v15 = vld [vmem:[%s4607_s6 + $0x444] ss:$16 sps:$4 sm:$0xff]   ;;  %v4046_v17 = vld [vmem:[%s4607_s6 + $0x440] ss:$16 sps:$4 sm:$0xff]  }
  0x3e   : > { %2769 = vmatpush1.bf16.msra.mxu0 %v3992_v39  ;;  %v4051_v16 = vld [vmem:[%s4607_s6 + $0x644] ss:$16 sps:$4 sm:$0xff]   ;;  %v4049_v18 = vld [vmem:[%s4607_s6 + $0x640] ss:$16 sps:$4 sm:$0xff]  }
  0x3f   : > { %2810 = vmatpush1.bf16.msra.mxu1 %v3993_v40  ;;  %2770 = vmatprep.subr.bf16.mxu0 %v3994_v41  ;;  %v4054_v19 = vld [vmem:[%s4607_s6 + $0x464] ss:$16 sps:$4 sm:$0xff]   ;;  %v4052_v21 = vld [vmem:[%s4607_s6 + $0x460] ss:$16 sps:$4 sm:$0xff]  }
  0x40   : > { %2811 = vmatprep.subr.bf16.mxu1 %v3996_v42  ;;  %v4057_v20 = vld [vmem:[%s4607_s6 + $0x664] ss:$16 sps:$4 sm:$0xff]   ;;  %v4055_v22 = vld [vmem:[%s4607_s6 + $0x660] ss:$16 sps:$4 sm:$0xff]  }
  0x41   : > { %v4060_v23 = vld [vmem:[%s4607_s6 + $0x484] ss:$16 sps:$4 sm:$0xff]   ;;  %v4058_v25 = vld [vmem:[%s4607_s6 + $0x480] ss:$16 sps:$4 sm:$0xff]  }
  0x42   : > { %2771 = vmatpush1.bf16.msra.mxu0 %v3998_v43  ;;  %v4063_v24 = vld [vmem:[%s4607_s6 + $0x684] ss:$16 sps:$4 sm:$0xff]   ;;  %v4061_v26 = vld [vmem:[%s4607_s6 + $0x680] ss:$16 sps:$4 sm:$0xff]  }
  0x43   : > { %2812 = vmatpush1.bf16.msra.mxu1 %v3999_v44  ;;  %2772 = vmatprep.subr.bf16.mxu0 %v4000_v45  ;;  %v4066_v27 = vld [vmem:[%s4607_s6 + $0x4a4] ss:$16 sps:$4 sm:$0xff]   ;;  %v4064_v29 = vld [vmem:[%s4607_s6 + $0x4a0] ss:$16 sps:$4 sm:$0xff]  }
  0x44   : > { %2813 = vmatprep.subr.bf16.mxu1 %v4002_v46  ;;  %v4069_v28 = vld [vmem:[%s4607_s6 + $0x6a4] ss:$16 sps:$4 sm:$0xff]   ;;  %v4067_v30 = vld [vmem:[%s4607_s6 + $0x6a0] ss:$16 sps:$4 sm:$0xff]  }
  0x45   : > { %v4072_v31 = vld [vmem:[%s4607_s6 + $0x4c4] ss:$16 sps:$4 sm:$0xff]   ;;  %v4070_v35 = vld [vmem:[%s4607_s6 + $0x4c0] ss:$16 sps:$4 sm:$0xff]  }
  0x46   : > { %2773 = vmatpush1.bf16.msra.mxu0 %v4004_v50  ;;  %v4075_v32 = vld [vmem:[%s4607_s6 + $0x6c4] ss:$16 sps:$4 sm:$0xff]   ;;  %v4073_v36 = vld [vmem:[%s4607_s6 + $0x6c0] ss:$16 sps:$4 sm:$0xff]  }
  0x47   : > { %2814 = vmatpush1.bf16.msra.mxu1 %v4005_v51  ;;  %2774 = vmatprep.subr.bf16.mxu0 %v4006_v53  ;;  %v4715_v33 = vld [vmem:[%s4602_s27 + $0x10] sm:$0xff] }
  0x48   : > { %2815 = vmatprep.subr.bf16.mxu1 %v4008_v54  ;;  %v4724_v37 = vcombine.high %v4715_v33, %v4715_v33  ;;  %v4078_v39 = vld [vmem:[%s4607_s6 + $0x4e4] ss:$16 sps:$4 sm:$0xff]   ;;  %v4076_v41 = vld [vmem:[%s4607_s6 + $0x4e0] ss:$16 sps:$4 sm:$0xff]  }
  0x49   : > { %v4081_v40 = vld [vmem:[%s4607_s6 + $0x6e4] ss:$16 sps:$4 sm:$0xff]   ;;  %v4079_v42 = vld [vmem:[%s4607_s6 + $0x6e0] ss:$16 sps:$4 sm:$0xff]  }
  0x4a   : > { %2775 = vmatpush1.bf16.msra.mxu0 %v4010_v55  ;;  %v4084_v43 = vld [vmem:[%s4607_s6 + $0x504] ss:$16 sps:$4 sm:$0xff]   ;;  %v4082_v45 = vld [vmem:[%s4607_s6 + $0x500] ss:$16 sps:$4 sm:$0xff]  }
  0x4b   : > { %2816 = vmatpush1.bf16.msra.mxu1 %v4011_v56  ;;  %2776 = vmatprep.subr.bf16.mxu0 %v4012_v57  ;;  %v4087_v44 = vld [vmem:[%s4607_s6 + $0x704] ss:$16 sps:$4 sm:$0xff]   ;;  %v4085_v46 = vld [vmem:[%s4607_s6 + $0x700] ss:$16 sps:$4 sm:$0xff]  }
  0x4c   : > { %2817 = vmatprep.subr.bf16.mxu1 %v4014_v58  ;;  %v4090_v47 = vld [vmem:[%s4607_s6 + $0x524] ss:$16 sps:$4 sm:$0xff]   ;;  %v4088_v50 = vld [vmem:[%s4607_s6 + $0x520] ss:$16 sps:$4 sm:$0xff]  }
  0x4d   : > { %v4093_v49 = vld [vmem:[%s4607_s6 + $0x724] ss:$16 sps:$4 sm:$0xff]   ;;  %v4091_v51 = vld [vmem:[%s4607_s6 + $0x720] ss:$16 sps:$4 sm:$0xff]  }
  0x4e   : > { %2777 = vmatpush1.bf16.msra.mxu0 %v4016_v59  ;;  %v4096_v53 = vld [vmem:[%s4607_s6 + $0x544] ss:$16 sps:$4 sm:$0xff]   ;;  %v4094_v55 = vld [vmem:[%s4607_s6 + $0x540] ss:$16 sps:$4 sm:$0xff]  }
  0x4f   : > { %2818 = vmatpush1.bf16.msra.mxu1 %v4017_v60  ;;  %2778 = vmatprep.subr.bf16.mxu0 %v4018_v61  ;;  %v4099_v54 = vld [vmem:[%s4607_s6 + $0x744] ss:$16 sps:$4 sm:$0xff]   ;;  %v4097_v56 = vld [vmem:[%s4607_s6 + $0x740] ss:$16 sps:$4 sm:$0xff]  }
  0x50   : > { %2819 = vmatprep.subr.bf16.mxu1 %v4020_v62  ;;  %v4102_v57 = vld [vmem:[%s4607_s6 + $0x564] ss:$16 sps:$4 sm:$0xff]   ;;  %v4100_v59 = vld [vmem:[%s4607_s6 + $0x560] ss:$16 sps:$4 sm:$0xff]  }
  0x51   : > { %v4105_v58 = vld [vmem:[%s4607_s6 + $0x764] ss:$16 sps:$4 sm:$0xff]   ;;  %v4103_v60 = vld [vmem:[%s4607_s6 + $0x760] ss:$16 sps:$4 sm:$0xff]  }
  0x52   : > { %2779 = vmatpush1.bf16.msra.mxu0 %v4022_v63  ;;  %v4108_v61 = vld [vmem:[%s4607_s6 + $0x584] ss:$16 sps:$4 sm:$0xff]   ;;  %v4106_v63 = vld [vmem:[%s4607_s6 + $0x580] ss:$16 sps:$4 sm:$0xff]  }
  0x53   : > { %2820 = vmatpush1.bf16.msra.mxu1 %v4023_v0  ;;  %2780 = vmatprep.subr.bf16.mxu0 %v4024_v1  ;;  %v4111_v62 = vld [vmem:[%s4607_s6 + $0x784] ss:$16 sps:$4 sm:$0xff]   ;;  %v4109_v0 = vld [vmem:[%s4607_s6 + $0x780] ss:$16 sps:$4 sm:$0xff]  }
  0x54   : > { %2821 = vmatprep.subr.bf16.mxu1 %v4026_v2  ;;  %v4114_v1 = vld [vmem:[%s4607_s6 + $0x5a4] ss:$16 sps:$4 sm:$0xff]  }
  0x55   : > { %v4117_v2 = vld [vmem:[%s4607_s6 + $0x7a4] ss:$16 sps:$4 sm:$0xff]  }
  0x56   : > { %2781 = vmatpush1.bf16.msra.mxu0 %v4028_v3  ;;  %v4112_v3 = vld [vmem:[%s4607_s6 + $0x5a0] ss:$16 sps:$4 sm:$0xff]  }
  0x57   : > { %2822 = vmatpush1.bf16.msra.mxu1 %v4029_v4  ;;  %2832 = vmatprep.subr.bf16.mxu0 %v4036_v5  ;;  %v4115_v4 = vld [vmem:[%s4607_s6 + $0x7a0] ss:$16 sps:$4 sm:$0xff]   ;;  %v4120_v5 = vld [vmem:[%s4607_s6 + $0x5c4] ss:$16 sps:$4 sm:$0xff]  }
  0x58   : > { %2873 = vmatprep.subr.bf16.mxu1 %v4039_v6  ;;  %v4123_v6 = vld [vmem:[%s4607_s6 + $0x7c4] ss:$16 sps:$4 sm:$0xff]  }
  0x59   : > { %2783 = vmatmul.mubr.bf16.vlgmr.msra.gmra.mrb[0].mxu0 %v4684_v7 }
  0x5a   : > { %2824 = vmatmul.mubr.bf16.vlgmr.msra.gmra.mrb[0].mxu1 %v4686_v8  ;;  %2833 = vmatpush1.bf16.msra.mxu0 %v4034_v9  ;;  %v4118_v9 = vld [vmem:[%s4607_s6 + $0x5c0] ss:$16 sps:$4 sm:$0xff]  }
  0x5b   : > { %2874 = vmatpush1.bf16.msra.mxu1 %v4037_v10  ;;  %2834 = vmatprep.subr.bf16.mxu0 %v4042_v11  ;;  %v4121_v10 = vld [vmem:[%s4607_s6 + $0x7c0] ss:$16 sps:$4 sm:$0xff]   ;;  %v4126_v11 = vld [vmem:[%s4607_s6 + $0x5e4] ss:$16 sps:$4 sm:$0xff]  }
  0x5c   : > { %2875 = vmatprep.subr.bf16.mxu1 %v4045_v12  ;;  %2864 = vmatprep.mubr.bf16.mxu0 %v4724_v37  ;;  %v4129_v12 = vld [vmem:[%s4607_s6 + $0x7e4] ss:$16 sps:$4 sm:$0xff]  }
  0x5d   : > { %2905 = vmatprep.mubr.bf16.mxu1 %v4728_v38 }
  0x5e   : > { %2835 = vmatpush1.bf16.msra.mxu0 %v4040_v13  ;;  %v4124_v13 = vld [vmem:[%s4607_s6 + $0x5e0] ss:$16 sps:$4 sm:$0xff]  }
  0x5f   : > { %2876 = vmatpush1.bf16.msra.mxu1 %v4043_v14  ;;  %2836 = vmatprep.subr.bf16.mxu0 %v4048_v15  ;;  %v4127_v14 = vld [vmem:[%s4607_s6 + $0x7e0] ss:$16 sps:$4 sm:$0xff]   ;;  %v4136_v15 = vld [vmem:[%s4607_s6 + $0x804] ss:$16 sps:$4 sm:$0xff]  }
  0x60   : > { %2877 = vmatprep.subr.bf16.mxu1 %v4051_v16  ;;  %v4139_v16 = vld [vmem:[%s4607_s6 + $0xa04] ss:$16 sps:$4 sm:$0xff]  }
  0x62   : > { %2837 = vmatpush1.bf16.msra.mxu0 %v4046_v17  ;;  %v4772_v17 = vcombine.low %v4715_v33, %v4715_v33  ;;  %v4154_v33 = vld [vmem:[%s4607_s6 + $0x864] ss:$16 sps:$4 sm:$0xff]  }
  0x63   : > { %2878 = vmatpush1.bf16.msra.mxu1 %v4049_v18  ;;  %2838 = vmatprep.subr.bf16.mxu0 %v4054_v19  ;;  %v4776_v18 = vcombine.low %v4718_v34, %v4718_v34  ;;  %v4134_v19 = vld [vmem:[%s4607_s6 + $0x800] ss:$16 sps:$4 sm:$0xff]   ;;  %v4157_v34 = vld [vmem:[%s4607_s6 + $0xa64] ss:$16 sps:$4 sm:$0xff]  }
  0x64   : > { %2879 = vmatprep.subr.bf16.mxu1 %v4057_v20  ;;  %v4137_v20 = vld [vmem:[%s4607_s6 + $0xa00] ss:$16 sps:$4 sm:$0xff]  }
  0x66   : > { %2839 = vmatpush1.bf16.msra.mxu0 %v4052_v21  ;;  %v4142_v21 = vld [vmem:[%s4607_s6 + $0x824] ss:$16 sps:$4 sm:$0xff]  }
  0x67   : > { %2880 = vmatpush1.bf16.msra.mxu1 %v4055_v22  ;;  %2840 = vmatprep.subr.bf16.mxu0 %v4060_v23  ;;  %v4145_v22 = vld [vmem:[%s4607_s6 + $0xa24] ss:$16 sps:$4 sm:$0xff]  }
  0x68   : > { %2881 = vmatprep.subr.bf16.mxu1 %v4063_v24  ;;  %v4783_v23 = vld [vmem:[%s4602_s27 + $0x20] sm:$0xff]  ;;  %v4786_v24 = vld [vmem:[%s4602_s27 + $0x28] sm:$0xff] }
  0x6a   : > { %2841 = vmatpush1.bf16.msra.mxu0 %v4058_v25  ;;  %v4790_v25 = vcombine.high %v4783_v23, %v4783_v23 }
  0x6b   : > { %2882 = vmatpush1.bf16.msra.mxu1 %v4061_v26  ;;  %2842 = vmatprep.subr.bf16.mxu0 %v4066_v27  ;;  %v4794_v26 = vcombine.high %v4786_v24, %v4786_v24  ;;  %v4140_v27 = vld [vmem:[%s4607_s6 + $0x820] ss:$16 sps:$4 sm:$0xff]  }
  0x6c   : > { %2883 = vmatprep.subr.bf16.mxu1 %v4069_v28  ;;  %v4143_v28 = vld [vmem:[%s4607_s6 + $0xa20] ss:$16 sps:$4 sm:$0xff]  }
  0x6e   : > { %2843 = vmatpush1.bf16.msra.mxu0 %v4064_v29  ;;  %v4148_v29 = vld [vmem:[%s4607_s6 + $0x844] ss:$16 sps:$4 sm:$0xff]  }
  0x6f   : > { %2884 = vmatpush1.bf16.msra.mxu1 %v4067_v30  ;;  %2844 = vmatprep.subr.bf16.mxu0 %v4072_v31  ;;  %v4151_v30 = vld [vmem:[%s4607_s6 + $0xa44] ss:$16 sps:$4 sm:$0xff]   ;;  %v4146_v31 = vld [vmem:[%s4607_s6 + $0x840] ss:$16 sps:$4 sm:$0xff]  }
  0x70   : > { %2885 = vmatprep.subr.bf16.mxu1 %v4075_v32  ;;  %v4149_v32 = vld [vmem:[%s4607_s6 + $0xa40] ss:$16 sps:$4 sm:$0xff]  }
  0x72   : > { %2845 = vmatpush1.bf16.msra.mxu0 %v4070_v35  ;;  %v4152_v35 = vld [vmem:[%s4607_s6 + $0x860] ss:$16 sps:$4 sm:$0xff]  }
  0x73   : > { %2886 = vmatpush1.bf16.msra.mxu1 %v4073_v36  ;;  %2846 = vmatprep.subr.bf16.mxu0 %v4078_v39  ;;  %v4155_v36 = vld [vmem:[%s4607_s6 + $0xa60] ss:$16 sps:$4 sm:$0xff]   ;;  %v4160_v39 = vld [vmem:[%s4607_s6 + $0x884] ss:$16 sps:$4 sm:$0xff]  }
  0x74   : > { %2887 = vmatprep.subr.bf16.mxu1 %v4081_v40  ;;  %v4163_v40 = vld [vmem:[%s4607_s6 + $0xa84] ss:$16 sps:$4 sm:$0xff]  }
  0x76   : > { %2847 = vmatpush1.bf16.msra.mxu0 %v4076_v41  ;;  %v4158_v41 = vld [vmem:[%s4607_s6 + $0x880] ss:$16 sps:$4 sm:$0xff]  }
  0x77   : > { %2888 = vmatpush1.bf16.msra.mxu1 %v4079_v42  ;;  %2848 = vmatprep.subr.bf16.mxu0 %v4084_v43  ;;  %v4161_v42 = vld [vmem:[%s4607_s6 + $0xa80] ss:$16 sps:$4 sm:$0xff]   ;;  %v4166_v43 = vld [vmem:[%s4607_s6 + $0x8a4] ss:$16 sps:$4 sm:$0xff]  }
  0x78   : > { %2889 = vmatprep.subr.bf16.mxu1 %v4087_v44  ;;  %v4169_v44 = vld [vmem:[%s4607_s6 + $0xaa4] ss:$16 sps:$4 sm:$0xff]  }
  0x7a   : > { %2849 = vmatpush1.bf16.msra.mxu0 %v4082_v45  ;;  %v4164_v45 = vld [vmem:[%s4607_s6 + $0x8a0] ss:$16 sps:$4 sm:$0xff]  }
  0x7b   : > { %2890 = vmatpush1.bf16.msra.mxu1 %v4085_v46  ;;  %2850 = vmatprep.subr.bf16.mxu0 %v4090_v47  ;;  %v4167_v46 = vld [vmem:[%s4607_s6 + $0xaa0] ss:$16 sps:$4 sm:$0xff]   ;;  %v4172_v47 = vld [vmem:[%s4607_s6 + $0x8c4] ss:$16 sps:$4 sm:$0xff]  }
  0x7c   : > { %2891 = vmatprep.subr.bf16.mxu1 %v4093_v49  ;;  %v4175_v49 = vld [vmem:[%s4607_s6 + $0xac4] ss:$16 sps:$4 sm:$0xff]  }
  0x7e   : > { %2851 = vmatpush1.bf16.msra.mxu0 %v4088_v50  ;;  %v4170_v50 = vld [vmem:[%s4607_s6 + $0x8c0] ss:$16 sps:$4 sm:$0xff]  }
  0x7f   : > { %2892 = vmatpush1.bf16.msra.mxu1 %v4091_v51  ;;  %2852 = vmatprep.subr.bf16.mxu0 %v4096_v53  ;;  %v4173_v51 = vld [vmem:[%s4607_s6 + $0xac0] ss:$16 sps:$4 sm:$0xff]   ;;  %v4178_v53 = vld [vmem:[%s4607_s6 + $0x8e4] ss:$16 sps:$4 sm:$0xff]  }
  0x80   : > { %2893 = vmatprep.subr.bf16.mxu1 %v4099_v54  ;;  %v4181_v54 = vld [vmem:[%s4607_s6 + $0xae4] ss:$16 sps:$4 sm:$0xff]  }
  0x82   : > { %2853 = vmatpush1.bf16.msra.mxu0 %v4094_v55  ;;  %v4176_v55 = vld [vmem:[%s4607_s6 + $0x8e0] ss:$16 sps:$4 sm:$0xff]  }
  0x83   : > { %2894 = vmatpush1.bf16.msra.mxu1 %v4097_v56  ;;  %2854 = vmatprep.subr.bf16.mxu0 %v4102_v57  ;;  %v4179_v56 = vld [vmem:[%s4607_s6 + $0xae0] ss:$16 sps:$4 sm:$0xff]   ;;  %v4184_v57 = vld [vmem:[%s4607_s6 + $0x904] ss:$16 sps:$4 sm:$0xff]  }
  0x84   : > { %2895 = vmatprep.subr.bf16.mxu1 %v4105_v58  ;;  %v4187_v58 = vld [vmem:[%s4607_s6 + $0xb04] ss:$16 sps:$4 sm:$0xff]  }
  0x86   : > { %2855 = vmatpush1.bf16.msra.mxu0 %v4100_v59  ;;  %v4182_v59 = vld [vmem:[%s4607_s6 + $0x900] ss:$16 sps:$4 sm:$0xff]  }
  0x87   : > { %2896 = vmatpush1.bf16.msra.mxu1 %v4103_v60  ;;  %2856 = vmatprep.subr.bf16.mxu0 %v4108_v61  ;;  %v4185_v60 = vld [vmem:[%s4607_s6 + $0xb00] ss:$16 sps:$4 sm:$0xff]   ;;  %v4190_v61 = vld [vmem:[%s4607_s6 + $0x924] ss:$16 sps:$4 sm:$0xff]  }
  0x88   : > { %2897 = vmatprep.subr.bf16.mxu1 %v4111_v62  ;;  %v4193_v62 = vld [vmem:[%s4607_s6 + $0xb24] ss:$16 sps:$4 sm:$0xff]  }
  0x8a   : > { %2857 = vmatpush1.bf16.msra.mxu0 %v4106_v63  ;;  %v4188_v63 = vld [vmem:[%s4607_s6 + $0x920] ss:$16 sps:$4 sm:$0xff]  }
  0x8b   : > { %2898 = vmatpush1.bf16.msra.mxu1 %v4109_v0  ;;  %2858 = vmatprep.subr.bf16.mxu0 %v4114_v1  ;;  %v4191_v0 = vld [vmem:[%s4607_s6 + $0xb20] ss:$16 sps:$4 sm:$0xff]   ;;  %v4196_v1 = vld [vmem:[%s4607_s6 + $0x944] ss:$16 sps:$4 sm:$0xff]  }
  0x8c   : > { %2899 = vmatprep.subr.bf16.mxu1 %v4117_v2  ;;  %v4199_v2 = vld [vmem:[%s4607_s6 + $0xb44] ss:$16 sps:$4 sm:$0xff]  }
  0x8e   : > { %2859 = vmatpush1.bf16.msra.mxu0 %v4112_v3  ;;  %v4194_v3 = vld [vmem:[%s4607_s6 + $0x940] ss:$16 sps:$4 sm:$0xff]  }
  0x8f   : > { %2900 = vmatpush1.bf16.msra.mxu1 %v4115_v4  ;;  %2860 = vmatprep.subr.bf16.mxu0 %v4120_v5  ;;  %v4197_v4 = vld [vmem:[%s4607_s6 + $0xb40] ss:$16 sps:$4 sm:$0xff]   ;;  %v4202_v5 = vld [vmem:[%s4607_s6 + $0x964] ss:$16 sps:$4 sm:$0xff]  }
  0x90   : > { %2901 = vmatprep.subr.bf16.mxu1 %v4123_v6  ;;  %v4205_v6 = vld [vmem:[%s4607_s6 + $0xb64] ss:$16 sps:$4 sm:$0xff]  }
  0x92   : > { %2861 = vmatpush1.bf16.msra.mxu0 %v4118_v9  ;;  %v4200_v9 = vld [vmem:[%s4607_s6 + $0x960] ss:$16 sps:$4 sm:$0xff]  }
  0x93   : > { %2902 = vmatpush1.bf16.msra.mxu1 %v4121_v10  ;;  %2862 = vmatprep.subr.bf16.mxu0 %v4126_v11  ;;  %v4203_v10 = vld [vmem:[%s4607_s6 + $0xb60] ss:$16 sps:$4 sm:$0xff]   ;;  %v4208_v11 = vld [vmem:[%s4607_s6 + $0x984] ss:$16 sps:$4 sm:$0xff]  }
  0x94   : > { %2903 = vmatprep.subr.bf16.mxu1 %v4129_v12  ;;  %v4211_v12 = vld [vmem:[%s4607_s6 + $0xb84] ss:$16 sps:$4 sm:$0xff]  }
  0x96   : > { %2863 = vmatpush1.bf16.msra.mxu0 %v4124_v13  ;;  %v4206_v13 = vld [vmem:[%s4607_s6 + $0x980] ss:$16 sps:$4 sm:$0xff]  }
  0x97   : > { %2904 = vmatpush1.bf16.msra.mxu1 %v4127_v14  ;;  %2914 = vmatprep.subr.bf16.mxu0 %v4136_v15  ;;  %v4209_v14 = vld [vmem:[%s4607_s6 + $0xb80] ss:$16 sps:$4 sm:$0xff]   ;;  %v4214_v15 = vld [vmem:[%s4607_s6 + $0x9a4] ss:$16 sps:$4 sm:$0xff]  }
  0x98   : > { %2955 = vmatprep.subr.bf16.mxu1 %v4139_v16  ;;  %v4217_v16 = vld [vmem:[%s4607_s6 + $0xba4] ss:$16 sps:$4 sm:$0xff]  }
  0x99   : > { %2865 = vmatmul.mubr.bf16.vlgmr.msra.gmra.mrb[4].mxu0 %v4772_v17 }
  0x9a   : > { %2906 = vmatmul.mubr.bf16.vlgmr.msra.gmra.mrb[4].mxu1 %v4776_v18  ;;  %2915 = vmatpush1.bf16.msra.mxu0 %v4134_v19  ;;  %v4212_v19 = vld [vmem:[%s4607_s6 + $0x9a0] ss:$16 sps:$4 sm:$0xff]  }
  0x9b   : > { %2956 = vmatpush1.bf16.msra.mxu1 %v4137_v20  ;;  %2916 = vmatprep.subr.bf16.mxu0 %v4142_v21  ;;  %v4215_v20 = vld [vmem:[%s4607_s6 + $0xba0] ss:$16 sps:$4 sm:$0xff]   ;;  %v4220_v21 = vld [vmem:[%s4607_s6 + $0x9c4] ss:$16 sps:$4 sm:$0xff]  }
  0x9c   : > { %2957 = vmatprep.subr.bf16.mxu1 %v4145_v22  ;;  %2946 = vmatprep.mubr.bf16.mxu0 %v4790_v25  ;;  %v4223_v22 = vld [vmem:[%s4607_s6 + $0xbc4] ss:$16 sps:$4 sm:$0xff]  }
  0x9d   : > { %2987 = vmatprep.mubr.bf16.mxu1 %v4794_v26 }
  0x9e   : > { %2917 = vmatpush1.bf16.msra.mxu0 %v4140_v27  ;;  %v4218_v27 = vld [vmem:[%s4607_s6 + $0x9c0] ss:$16 sps:$4 sm:$0xff]  }
  0x9f   : > { %2958 = vmatpush1.bf16.msra.mxu1 %v4143_v28  ;;  %2918 = vmatprep.subr.bf16.mxu0 %v4148_v29  ;;  %v4221_v28 = vld [vmem:[%s4607_s6 + $0xbc0] ss:$16 sps:$4 sm:$0xff]   ;;  %v4226_v29 = vld [vmem:[%s4607_s6 + $0x9e4] ss:$16 sps:$4 sm:$0xff]  }
  0xa0   : > { %2959 = vmatprep.subr.bf16.mxu1 %v4151_v30  ;;  %v4229_v30 = vld [vmem:[%s4607_s6 + $0xbe4] ss:$16 sps:$4 sm:$0xff]  }
  0xa2   : > { %2919 = vmatpush1.bf16.msra.mxu0 %v4146_v31  ;;  %v4224_v31 = vld [vmem:[%s4607_s6 + $0x9e0] ss:$16 sps:$4 sm:$0xff]  }
  0xa3   : > { %2960 = vmatpush1.bf16.msra.mxu1 %v4149_v32  ;;  %2920 = vmatprep.subr.bf16.mxu0 %v4154_v33  ;;  %v4227_v32 = vld [vmem:[%s4607_s6 + $0xbe0] ss:$16 sps:$4 sm:$0xff]   ;;  %v4236_v33 = vld [vmem:[%s4607_s6 + $0xc] ss:$16 sps:$4 sm:$0xff]  }
  0xa4   : > { %2961 = vmatprep.subr.bf16.mxu1 %v4157_v34  ;;  %v4239_v34 = vld [vmem:[%s4607_s6 + $0x20c] ss:$16 sps:$4 sm:$0xff]  }
  0xa6   : > { %2921 = vmatpush1.bf16.msra.mxu0 %v4152_v35  ;;  %v4862_v35 = vcombine.low %v4783_v23, %v4783_v23  ;;  %v4240_v23 = vld [vmem:[%s4607_s6 + $0x28] ss:$16 sps:$4 sm:$0xff]  }
  0xa7   : > { %2962 = vmatpush1.bf16.msra.mxu1 %v4155_v36  ;;  %2922 = vmatprep.subr.bf16.mxu0 %v4160_v39  ;;  %v4866_v36 = vcombine.low %v4786_v24, %v4786_v24  ;;  %v4234_v39 = vld [vmem:[%s4607_s6 + $0x8] ss:$16 sps:$4 sm:$0xff]  }
  0xa8   : > { %2963 = vmatprep.subr.bf16.mxu1 %v4163_v40  ;;  %v4237_v40 = vld [vmem:[%s4607_s6 + $0x208] ss:$16 sps:$4 sm:$0xff]  }
  0xa9   : > { %v4243_v24 = vld [vmem:[%s4607_s6 + $0x228] ss:$16 sps:$4 sm:$0xff]  }
  0xaa   : > { %2923 = vmatpush1.bf16.msra.mxu0 %v4158_v41  ;;  %v4242_v41 = vld [vmem:[%s4607_s6 + $0x2c] ss:$16 sps:$4 sm:$0xff]  }
  0xab   : > { %2964 = vmatpush1.bf16.msra.mxu1 %v4161_v42  ;;  %2924 = vmatprep.subr.bf16.mxu0 %v4166_v43  ;;  %v4245_v42 = vld [vmem:[%s4607_s6 + $0x22c] ss:$16 sps:$4 sm:$0xff]  }
  0xac   : > { %2965 = vmatprep.subr.bf16.mxu1 %v4169_v44  ;;  %v4248_v43 = vld [vmem:[%s4607_s6 + $0x4c] ss:$16 sps:$4 sm:$0xff]  }
  0xad   : > { %v4251_v44 = vld [vmem:[%s4607_s6 + $0x24c] ss:$16 sps:$4 sm:$0xff]  }
  0xae   : > { %2925 = vmatpush1.bf16.msra.mxu0 %v4164_v45  ;;  %v4246_v45 = vld [vmem:[%s4607_s6 + $0x48] ss:$16 sps:$4 sm:$0xff]  }
  0xaf   : > { %2966 = vmatpush1.bf16.msra.mxu1 %v4167_v46  ;;  %2926 = vmatprep.subr.bf16.mxu0 %v4172_v47  ;;  %v4249_v46 = vld [vmem:[%s4607_s6 + $0x248] ss:$16 sps:$4 sm:$0xff]   ;;  %v4254_v47 = vld [vmem:[%s4607_s6 + $0x6c] ss:$16 sps:$4 sm:$0xff]  }
  0xb0   : > { %2967 = vmatprep.subr.bf16.mxu1 %v4175_v49  ;;  %v4257_v49 = vld [vmem:[%s4607_s6 + $0x26c] ss:$16 sps:$4 sm:$0xff]  }
  0xb2   : > { %2927 = vmatpush1.bf16.msra.mxu0 %v4170_v50  ;;  %v4252_v50 = vld [vmem:[%s4607_s6 + $0x68] ss:$16 sps:$4 sm:$0xff]  }
  0xb3   : > { %2968 = vmatpush1.bf16.msra.mxu1 %v4173_v51  ;;  %2928 = vmatprep.subr.bf16.mxu0 %v4178_v53  ;;  %v4263_v51 = vld [vmem:[%s4607_s6 + $0x28c] ss:$16 sps:$4 sm:$0xff]   ;;  %v4258_v53 = vld [vmem:[%s4607_s6 + $0x88] ss:$16 sps:$4 sm:$0xff]  }
  0xb4   : > { %2969 = vmatprep.subr.bf16.mxu1 %v4181_v54  ;;  %v4261_v54 = vld [vmem:[%s4607_s6 + $0x288] ss:$16 sps:$4 sm:$0xff]  }
  0xb6   : > { %2929 = vmatpush1.bf16.msra.mxu0 %v4176_v55  ;;  %v4266_v55 = vld [vmem:[%s4607_s6 + $0xac] ss:$16 sps:$4 sm:$0xff]  }
  0xb7   : > { %2970 = vmatpush1.bf16.msra.mxu1 %v4179_v56  ;;  %2930 = vmatprep.subr.bf16.mxu0 %v4184_v57  ;;  %v4269_v56 = vld [vmem:[%s4607_s6 + $0x2ac] ss:$16 sps:$4 sm:$0xff]   ;;  %v4264_v57 = vld [vmem:[%s4607_s6 + $0xa8] ss:$16 sps:$4 sm:$0xff]  }
  0xb8   : > { %2971 = vmatprep.subr.bf16.mxu1 %v4187_v58  ;;  %v4267_v58 = vld [vmem:[%s4607_s6 + $0x2a8] ss:$16 sps:$4 sm:$0xff]  }
  0xba   : > { %2931 = vmatpush1.bf16.msra.mxu0 %v4182_v59  ;;  %v4272_v59 = vld [vmem:[%s4607_s6 + $0xcc] ss:$16 sps:$4 sm:$0xff]  }
  0xbb   : > { %2972 = vmatpush1.bf16.msra.mxu1 %v4185_v60  ;;  %2932 = vmatprep.subr.bf16.mxu0 %v4190_v61  ;;  %v4275_v60 = vld [vmem:[%s4607_s6 + $0x2cc] ss:$16 sps:$4 sm:$0xff]   ;;  %v4270_v61 = vld [vmem:[%s4607_s6 + $0xc8] ss:$16 sps:$4 sm:$0xff]  }
  0xbc   : > { %2973 = vmatprep.subr.bf16.mxu1 %v4193_v62  ;;  %v4273_v62 = vld [vmem:[%s4607_s6 + $0x2c8] ss:$16 sps:$4 sm:$0xff]  }
  0xbe   : > { %2933 = vmatpush1.bf16.msra.mxu0 %v4188_v63  ;;  %v4278_v63 = vld [vmem:[%s4607_s6 + $0xec] ss:$16 sps:$4 sm:$0xff]  }
  0xbf   : > { %2974 = vmatpush1.bf16.msra.mxu1 %v4191_v0  ;;  %2934 = vmatprep.subr.bf16.mxu0 %v4196_v1  ;;  %v4281_v0 = vld [vmem:[%s4607_s6 + $0x2ec] ss:$16 sps:$4 sm:$0xff]   ;;  %v4276_v1 = vld [vmem:[%s4607_s6 + $0xe8] ss:$16 sps:$4 sm:$0xff]  }
  0xc0   : > { %2975 = vmatprep.subr.bf16.mxu1 %v4199_v2  ;;  %v4279_v2 = vld [vmem:[%s4607_s6 + $0x2e8] ss:$16 sps:$4 sm:$0xff]  }
  0xc2   : > { %2935 = vmatpush1.bf16.msra.mxu0 %v4194_v3  ;;  %v4284_v3 = vld [vmem:[%s4607_s6 + $0x10c] ss:$16 sps:$4 sm:$0xff]  }
  0xc3   : > { %2976 = vmatpush1.bf16.msra.mxu1 %v4197_v4  ;;  %2936 = vmatprep.subr.bf16.mxu0 %v4202_v5  ;;  %v4287_v4 = vld [vmem:[%s4607_s6 + $0x30c] ss:$16 sps:$4 sm:$0xff]   ;;  %v4282_v5 = vld [vmem:[%s4607_s6 + $0x108] ss:$16 sps:$4 sm:$0xff]  }
  0xc4   : > { %2977 = vmatprep.subr.bf16.mxu1 %v4205_v6  ;;  %v4285_v6 = vld [vmem:[%s4607_s6 + $0x308] ss:$16 sps:$4 sm:$0xff]  }
  0xc6   : > { %2937 = vmatpush1.bf16.msra.mxu0 %v4200_v9  ;;  %v4290_v9 = vld [vmem:[%s4607_s6 + $0x12c] ss:$16 sps:$4 sm:$0xff]  }
  0xc7   : > { %2978 = vmatpush1.bf16.msra.mxu1 %v4203_v10  ;;  %2938 = vmatprep.subr.bf16.mxu0 %v4208_v11  ;;  %v4293_v10 = vld [vmem:[%s4607_s6 + $0x32c] ss:$16 sps:$4 sm:$0xff]   ;;  %v4288_v11 = vld [vmem:[%s4607_s6 + $0x128] ss:$16 sps:$4 sm:$0xff]  }
  0xc8   : > { %2979 = vmatprep.subr.bf16.mxu1 %v4211_v12  ;;  %v4291_v12 = vld [vmem:[%s4607_s6 + $0x328] ss:$16 sps:$4 sm:$0xff]  }
  0xca   : > { %2939 = vmatpush1.bf16.msra.mxu0 %v4206_v13  ;;  %v4296_v13 = vld [vmem:[%s4607_s6 + $0x14c] ss:$16 sps:$4 sm:$0xff]  }
  0xcb   : > { %2980 = vmatpush1.bf16.msra.mxu1 %v4209_v14  ;;  %2940 = vmatprep.subr.bf16.mxu0 %v4214_v15  ;;  %v4299_v14 = vld [vmem:[%s4607_s6 + $0x34c] ss:$16 sps:$4 sm:$0xff]   ;;  %v4294_v15 = vld [vmem:[%s4607_s6 + $0x148] ss:$16 sps:$4 sm:$0xff]  }
  0xcc   : > { %2981 = vmatprep.subr.bf16.mxu1 %v4217_v16  ;;  %v4297_v16 = vld [vmem:[%s4607_s6 + $0x348] ss:$16 sps:$4 sm:$0xff]  }
  0xce   : > { %2941 = vmatpush1.bf16.msra.mxu0 %v4212_v19  ;;  %v4302_v19 = vld [vmem:[%s4607_s6 + $0x16c] ss:$16 sps:$4 sm:$0xff]  }
  0xcf   : > { %2982 = vmatpush1.bf16.msra.mxu1 %v4215_v20  ;;  %2942 = vmatprep.subr.bf16.mxu0 %v4220_v21  ;;  %v4305_v20 = vld [vmem:[%s4607_s6 + $0x36c] ss:$16 sps:$4 sm:$0xff]   ;;  %v4300_v21 = vld [vmem:[%s4607_s6 + $0x168] ss:$16 sps:$4 sm:$0xff]  }
  0xd0   : > { %2983 = vmatprep.subr.bf16.mxu1 %v4223_v22  ;;  %v4303_v22 = vld [vmem:[%s4607_s6 + $0x368] ss:$16 sps:$4 sm:$0xff]  }
  0xd2   : > { %2943 = vmatpush1.bf16.msra.mxu0 %v4218_v27  ;;  %v4308_v27 = vld [vmem:[%s4607_s6 + $0x18c] ss:$16 sps:$4 sm:$0xff]  }
  0xd3   : > { %2984 = vmatpush1.bf16.msra.mxu1 %v4221_v28  ;;  %2944 = vmatprep.subr.bf16.mxu0 %v4226_v29  ;;  %v4311_v28 = vld [vmem:[%s4607_s6 + $0x38c] ss:$16 sps:$4 sm:$0xff]   ;;  %v4306_v29 = vld [vmem:[%s4607_s6 + $0x188] ss:$16 sps:$4 sm:$0xff]  }
  0xd4   : > { %2985 = vmatprep.subr.bf16.mxu1 %v4229_v30  ;;  %v4309_v30 = vld [vmem:[%s4607_s6 + $0x388] ss:$16 sps:$4 sm:$0xff]  }
  0xd6   : > { %2945 = vmatpush1.bf16.msra.mxu0 %v4224_v31  ;;  %v4314_v31 = vld [vmem:[%s4607_s6 + $0x1ac] ss:$16 sps:$4 sm:$0xff]  }
  0xd7   : > { %2986 = vmatpush1.bf16.msra.mxu1 %v4227_v32  ;;  %2996 = vmatprep.subr.bf16.mxu0 %v4236_v33  ;;  %v4317_v32 = vld [vmem:[%s4607_s6 + $0x3ac] ss:$16 sps:$4 sm:$0xff]   ;;  %v4312_v33 = vld [vmem:[%s4607_s6 + $0x1a8] ss:$16 sps:$4 sm:$0xff]  }
  0xd8   : > { %3037 = vmatprep.subr.bf16.mxu1 %v4239_v34  ;;  %v4315_v34 = vld [vmem:[%s4607_s6 + $0x3a8] ss:$16 sps:$4 sm:$0xff]  }
  0xd9   : > { %2947 = vmatmul.mubr.bf16.vlgmr.msra.gmra.mrb[8].mxu0 %v4862_v35 }
  0xda   : > { %2988 = vmatmul.mubr.bf16.vlgmr.msra.gmra.mrb[8].mxu1 %v4866_v36  ;;  %2997 = vmatpush1.bf16.msra.mxu0 %v4234_v39  ;;  %v4320_v39 = vld [vmem:[%s4607_s6 + $0x1cc] ss:$16 sps:$4 sm:$0xff]  }
  0xdb   : > { %3038 = vmatpush1.bf16.msra.mxu1 %v4237_v40  ;;  %2998 = vmatprep.subr.bf16.mxu0 %v4242_v41  ;;  %v4323_v40 = vld [vmem:[%s4607_s6 + $0x3cc] ss:$16 sps:$4 sm:$0xff]   ;;  %v4318_v41 = vld [vmem:[%s4607_s6 + $0x1c8] ss:$16 sps:$4 sm:$0xff]  }
  0xdc   : > { %3039 = vmatprep.subr.bf16.mxu1 %v4245_v42  ;;  %3028 = vmatprep.mubr.bf16.mxu0 %v4657_v48  ;;  %v4255_v48 = vld [vmem:[%s4607_s6 + $0x268] ss:$16 sps:$4 sm:$0xff]  }
  0xdd   : > { %3069 = vmatprep.mubr.bf16.mxu1 %v4662_v52  ;;  %v4260_v52 = vld [vmem:[%s4607_s6 + $0x8c] ss:$16 sps:$4 sm:$0xff]   ;;  %v4321_v42 = vld [vmem:[%s4607_s6 + $0x3c8] ss:$16 sps:$4 sm:$0xff]  }
  0xde   : > { %2999 = vmatpush1.bf16.msra.mxu0 %v4240_v23  ;;  %v4326_v23 = vld [vmem:[%s4607_s6 + $0x1ec] ss:$16 sps:$4 sm:$0xff]  }
  0xdf   : > { %3040 = vmatpush1.bf16.msra.mxu1 %v4243_v24  ;;  %3000 = vmatprep.subr.bf16.mxu0 %v4248_v43  ;;  %v4329_v24 = vld [vmem:[%s4607_s6 + $0x3ec] ss:$16 sps:$4 sm:$0xff]   ;;  %v4324_v43 = vld [vmem:[%s4607_s6 + $0x1e8] ss:$16 sps:$4 sm:$0xff]  }
  0xe0   : > { %3041 = vmatprep.subr.bf16.mxu1 %v4251_v44  ;;  %v4327_v44 = vld [vmem:[%s4607_s6 + $0x3e8] ss:$16 sps:$4 sm:$0xff]  }
  0xe2   : > { %3001 = vmatpush1.bf16.msra.mxu0 %v4246_v45  ;;  %v4332_v45 = vld [vmem:[%s4607_s6 + $0x40c] ss:$16 sps:$4 sm:$0xff]  }
  0xe3   : > { %3042 = vmatpush1.bf16.msra.mxu1 %v4249_v46  ;;  %3002 = vmatprep.subr.bf16.mxu0 %v4254_v47  ;;  %v4335_v46 = vld [vmem:[%s4607_s6 + $0x60c] ss:$16 sps:$4 sm:$0xff]   ;;  %v4330_v47 = vld [vmem:[%s4607_s6 + $0x408] ss:$16 sps:$4 sm:$0xff]  }
  0xe4   : > { %3043 = vmatprep.subr.bf16.mxu1 %v4257_v49  ;;  %v4333_v49 = vld [vmem:[%s4607_s6 + $0x608] ss:$16 sps:$4 sm:$0xff]  }
  0xe6   : > { %3003 = vmatpush1.bf16.msra.mxu0 %v4252_v50  ;;  %v4338_v50 = vld [vmem:[%s4607_s6 + $0x42c] ss:$16 sps:$4 sm:$0xff]  }
  0xe7   : > { %3044 = vmatpush1.bf16.msra.mxu1 %v4255_v48  ;;  %3004 = vmatprep.subr.bf16.mxu0 %v4260_v52  ;;  %v4341_v48 = vld [vmem:[%s4607_s6 + $0x62c] ss:$16 sps:$4 sm:$0xff]   ;;  %v4336_v52 = vld [vmem:[%s4607_s6 + $0x428] ss:$16 sps:$4 sm:$0xff]  }
  0xe8   : > { %3045 = vmatprep.subr.bf16.mxu1 %v4263_v51  ;;  %v4339_v51 = vld [vmem:[%s4607_s6 + $0x628] ss:$16 sps:$4 sm:$0xff]  }
  0xea   : > { %3005 = vmatpush1.bf16.msra.mxu0 %v4258_v53  ;;  %v4344_v53 = vld [vmem:[%s4607_s6 + $0x44c] ss:$16 sps:$4 sm:$0xff]  }
  0xeb   : > { %3046 = vmatpush1.bf16.msra.mxu1 %v4261_v54  ;;  %3006 = vmatprep.subr.bf16.mxu0 %v4266_v55  ;;  %v4347_v54 = vld [vmem:[%s4607_s6 + $0x64c] ss:$16 sps:$4 sm:$0xff]  }
  0xec   : > { %3047 = vmatprep.subr.bf16.mxu1 %v4269_v56  ;;  %v4350_v55 = vld [vmem:[%s4607_s6 + $0x46c] ss:$16 sps:$4 sm:$0xff]  }
  0xed   : > { %v4353_v56 = vld [vmem:[%s4607_s6 + $0x66c] ss:$16 sps:$4 sm:$0xff]  }
  0xee   : > { %3007 = vmatpush1.bf16.msra.mxu0 %v4264_v57  ;;  %v4348_v57 = vld [vmem:[%s4607_s6 + $0x468] ss:$16 sps:$4 sm:$0xff]  }
  0xef   : > { %3048 = vmatpush1.bf16.msra.mxu1 %v4267_v58  ;;  %3008 = vmatprep.subr.bf16.mxu0 %v4272_v59  ;;  %v4359_v58 = vld [vmem:[%s4607_s6 + $0x68c] ss:$16 sps:$4 sm:$0xff]   ;;  %v4354_v59 = vld [vmem:[%s4607_s6 + $0x488] ss:$16 sps:$4 sm:$0xff]  }
  0xf0   : > { %3049 = vmatprep.subr.bf16.mxu1 %v4275_v60  ;;  %v4357_v60 = vld [vmem:[%s4607_s6 + $0x688] ss:$16 sps:$4 sm:$0xff]  }
  0xf2   : > { %3009 = vmatpush1.bf16.msra.mxu0 %v4270_v61  ;;  %v4362_v61 = vld [vmem:[%s4607_s6 + $0x4ac] ss:$16 sps:$4 sm:$0xff]  }
  0xf3   : > { %3050 = vmatpush1.bf16.msra.mxu1 %v4273_v62  ;;  %3010 = vmatprep.subr.bf16.mxu0 %v4278_v63  ;;  %v4365_v62 = vld [vmem:[%s4607_s6 + $0x6ac] ss:$16 sps:$4 sm:$0xff]   ;;  %v4360_v63 = vld [vmem:[%s4607_s6 + $0x4a8] ss:$16 sps:$4 sm:$0xff]  }
  0xf4   : > { %3051 = vmatprep.subr.bf16.mxu1 %v4281_v0  ;;  %v4363_v0 = vld [vmem:[%s4607_s6 + $0x6a8] ss:$16 sps:$4 sm:$0xff]  }
  0xf6   : > { %3011 = vmatpush1.bf16.msra.mxu0 %v4276_v1  ;;  %v4368_v1 = vld [vmem:[%s4607_s6 + $0x4cc] ss:$16 sps:$4 sm:$0xff]  }
  0xf7   : > { %3052 = vmatpush1.bf16.msra.mxu1 %v4279_v2  ;;  %3012 = vmatprep.subr.bf16.mxu0 %v4284_v3  ;;  %v4371_v2 = vld [vmem:[%s4607_s6 + $0x6cc] ss:$16 sps:$4 sm:$0xff]  }
  0xf8   : > { %3053 = vmatprep.subr.bf16.mxu1 %v4287_v4 }
  0xfa   : > { %3013 = vmatpush1.bf16.msra.mxu0 %v4282_v5 }
  0xfb   : > { %3054 = vmatpush1.bf16.msra.mxu1 %v4285_v6  ;;  %3014 = vmatprep.subr.bf16.mxu0 %v4290_v9 }
  0xfc   : > { %3055 = vmatprep.subr.bf16.mxu1 %v4293_v10 }
  0xfe   : > { %3015 = vmatpush1.bf16.msra.mxu0 %v4288_v11 }
  0xff   : > { %3056 = vmatpush1.bf16.msra.mxu1 %v4291_v12  ;;  %3016 = vmatprep.subr.bf16.mxu0 %v4296_v13  ;;  %v4366_v13 = vld [vmem:[%s4607_s6 + $0x4c8] ss:$16 sps:$4 sm:$0xff]  }
 0x100   : > { %3057 = vmatprep.subr.bf16.mxu1 %v4299_v14  ;;  %v4369_v14 = vld [vmem:[%s4607_s6 + $0x6c8] ss:$16 sps:$4 sm:$0xff]  }
 0x102   : > { %3017 = vmatpush1.bf16.msra.mxu0 %v4294_v15 }
 0x103   : > { %3058 = vmatpush1.bf16.msra.mxu1 %v4297_v16  ;;  %3018 = vmatprep.subr.bf16.mxu0 %v4302_v19  ;;  %v4374_v19 = vld [vmem:[%s4607_s6 + $0x4ec] ss:$16 sps:$4 sm:$0xff]  }
 0x104   : > { %3059 = vmatprep.subr.bf16.mxu1 %v4305_v20  ;;  %v4377_v20 = vld [vmem:[%s4607_s6 + $0x6ec] ss:$16 sps:$4 sm:$0xff]  }
 0x106   : > { %3019 = vmatpush1.bf16.msra.mxu0 %v4300_v21  ;;  %v4372_v21 = vld [vmem:[%s4607_s6 + $0x4e8] ss:$16 sps:$4 sm:$0xff]  }
 0x107   : > { %3060 = vmatpush1.bf16.msra.mxu1 %v4303_v22  ;;  %3020 = vmatprep.subr.bf16.mxu0 %v4308_v27  ;;  %v4375_v22 = vld [vmem:[%s4607_s6 + $0x6e8] ss:$16 sps:$4 sm:$0xff]   ;;  %v4380_v27 = vld [vmem:[%s4607_s6 + $0x50c] ss:$16 sps:$4 sm:$0xff]  }
 0x108   : > { %3061 = vmatprep.subr.bf16.mxu1 %v4311_v28  ;;  %v4383_v28 = vld [vmem:[%s4607_s6 + $0x70c] ss:$16 sps:$4 sm:$0xff]  }
 0x10a   : > { %3021 = vmatpush1.bf16.msra.mxu0 %v4306_v29  ;;  %v4378_v29 = vld [vmem:[%s4607_s6 + $0x508] ss:$16 sps:$4 sm:$0xff]  }
 0x10b   : > { %3062 = vmatpush1.bf16.msra.mxu1 %v4309_v30  ;;  %3022 = vmatprep.subr.bf16.mxu0 %v4314_v31  ;;  %v4381_v30 = vld [vmem:[%s4607_s6 + $0x708] ss:$16 sps:$4 sm:$0xff]   ;;  %v4386_v31 = vld [vmem:[%s4607_s6 + $0x52c] ss:$16 sps:$4 sm:$0xff]  }
 0x10c   : > { %3063 = vmatprep.subr.bf16.mxu1 %v4317_v32  ;;  %v4389_v32 = vld [vmem:[%s4607_s6 + $0x72c] ss:$16 sps:$4 sm:$0xff]  }
 0x10e   : > { %3023 = vmatpush1.bf16.msra.mxu0 %v4312_v33  ;;  %v4384_v33 = vld [vmem:[%s4607_s6 + $0x528] ss:$16 sps:$4 sm:$0xff]  }
 0x10f   : > { %3064 = vmatpush1.bf16.msra.mxu1 %v4315_v34  ;;  %3024 = vmatprep.subr.bf16.mxu0 %v4320_v39  ;;  %v4387_v34 = vld [vmem:[%s4607_s6 + $0x728] ss:$16 sps:$4 sm:$0xff]   ;;  %v4392_v39 = vld [vmem:[%s4607_s6 + $0x54c] ss:$16 sps:$4 sm:$0xff]  }
 0x110   : > { %3065 = vmatprep.subr.bf16.mxu1 %v4323_v40  ;;  %v4395_v40 = vld [vmem:[%s4607_s6 + $0x74c] ss:$16 sps:$4 sm:$0xff]  }
 0x112   : > { %3025 = vmatpush1.bf16.msra.mxu0 %v4318_v41  ;;  %v4390_v41 = vld [vmem:[%s4607_s6 + $0x548] ss:$16 sps:$4 sm:$0xff]  }
 0x113   : > { %3066 = vmatpush1.bf16.msra.mxu1 %v4321_v42  ;;  %3026 = vmatprep.subr.bf16.mxu0 %v4326_v23  ;;  %v4393_v42 = vld [vmem:[%s4607_s6 + $0x748] ss:$16 sps:$4 sm:$0xff]   ;;  %v4398_v23 = vld [vmem:[%s4607_s6 + $0x56c] ss:$16 sps:$4 sm:$0xff]  }
 0x114   : > { %3067 = vmatprep.subr.bf16.mxu1 %v4329_v24  ;;  %v4401_v24 = vld [vmem:[%s4607_s6 + $0x76c] ss:$16 sps:$4 sm:$0xff]  }
 0x116   : > { %3027 = vmatpush1.bf16.msra.mxu0 %v4324_v43  ;;  %v4396_v43 = vld [vmem:[%s4607_s6 + $0x568] ss:$16 sps:$4 sm:$0xff]  }
 0x117   : > { %3068 = vmatpush1.bf16.msra.mxu1 %v4327_v44  ;;  %3078 = vmatprep.subr.bf16.mxu0 %v4332_v45  ;;  %v4399_v44 = vld [vmem:[%s4607_s6 + $0x768] ss:$16 sps:$4 sm:$0xff]   ;;  %v4404_v45 = vld [vmem:[%s4607_s6 + $0x58c] ss:$16 sps:$4 sm:$0xff]  }
 0x118   : > { %3119 = vmatprep.subr.bf16.mxu1 %v4335_v46  ;;  %v4407_v46 = vld [vmem:[%s4607_s6 + $0x78c] ss:$16 sps:$4 sm:$0xff]  }
 0x119   : > { %3029 = vmatmul.mubr.bf16.vlgmr.msra.gmra.mrb[12].mxu0 %v4684_v7  ;;  %v4342_v7 = vld [vmem:[%s4607_s6 + $0x448] ss:$16 sps:$4 sm:$0xff]  }
 0x11a   : > { %3070 = vmatmul.mubr.bf16.vlgmr.msra.gmra.mrb[12].mxu1 %v4686_v8  ;;  %3079 = vmatpush1.bf16.msra.mxu0 %v4330_v47  ;;  %v4345_v8 = vld [vmem:[%s4607_s6 + $0x648] ss:$16 sps:$4 sm:$0xff]  }
 0x11b   : > { %3120 = vmatpush1.bf16.msra.mxu1 %v4333_v49  ;;  %3080 = vmatprep.subr.bf16.mxu0 %v4338_v50  ;;  %v4402_v47 = vld [vmem:[%s4607_s6 + $0x588] ss:$16 sps:$4 sm:$0xff]   ;;  %v4410_v50 = vld [vmem:[%s4607_s6 + $0x5ac] ss:$16 sps:$4 sm:$0xff]  }
 0x11c   : > { %3121 = vmatprep.subr.bf16.mxu1 %v4341_v48  ;;  %3110 = vmatprep.mubr.bf16.mxu0 %v4724_v37  ;;  %v4351_v37 = vld [vmem:[%s4607_s6 + $0x668] ss:$16 sps:$4 sm:$0xff]   ;;  %v4413_v48 = vld [vmem:[%s4607_s6 + $0x7ac] ss:$16 sps:$4 sm:$0xff]  }
 0x11d   : > { %3151 = vmatprep.mubr.bf16.mxu1 %v4728_v38  ;;  %v4356_v38 = vld [vmem:[%s4607_s6 + $0x48c] ss:$16 sps:$4 sm:$0xff]   ;;  %v4405_v49 = vld [vmem:[%s4607_s6 + $0x788] ss:$16 sps:$4 sm:$0xff]  }
 0x11e   : > { %3081 = vmatpush1.bf16.msra.mxu0 %v4336_v52  ;;  %v4408_v52 = vld [vmem:[%s4607_s6 + $0x5a8] ss:$16 sps:$4 sm:$0xff]  }
 0x11f   : > { %3122 = vmatpush1.bf16.msra.mxu1 %v4339_v51  ;;  %3082 = vmatprep.subr.bf16.mxu0 %v4344_v53  ;;  %v4411_v51 = vld [vmem:[%s4607_s6 + $0x7a8] ss:$16 sps:$4 sm:$0xff]   ;;  %v4416_v53 = vld [vmem:[%s4607_s6 + $0x5cc] ss:$16 sps:$4 sm:$0xff]  }
 0x120   : > { %3123 = vmatprep.subr.bf16.mxu1 %v4347_v54  ;;  %v4419_v54 = vld [vmem:[%s4607_s6 + $0x7cc] ss:$16 sps:$4 sm:$0xff]  }
 0x122   : > { %3083 = vmatpush1.bf16.msra.mxu0 %v4342_v7  ;;  %v4414_v7 = vld [vmem:[%s4607_s6 + $0x5c8] ss:$16 sps:$4 sm:$0xff]  }
 0x123   : > { %3124 = vmatpush1.bf16.msra.mxu1 %v4345_v8  ;;  %3084 = vmatprep.subr.bf16.mxu0 %v4350_v55  ;;  %v4417_v8 = vld [vmem:[%s4607_s6 + $0x7c8] ss:$16 sps:$4 sm:$0xff]   ;;  %v4422_v55 = vld [vmem:[%s4607_s6 + $0x5ec] ss:$16 sps:$4 sm:$0xff]  }
 0x124   : > { %3125 = vmatprep.subr.bf16.mxu1 %v4353_v56  ;;  %v4425_v56 = vld [vmem:[%s4607_s6 + $0x7ec] ss:$16 sps:$4 sm:$0xff]  }
 0x126   : > { %3085 = vmatpush1.bf16.msra.mxu0 %v4348_v57  ;;  %v4420_v57 = vld [vmem:[%s4607_s6 + $0x5e8] ss:$16 sps:$4 sm:$0xff]  }
 0x127   : > { %3126 = vmatpush1.bf16.msra.mxu1 %v4351_v37  ;;  %3086 = vmatprep.subr.bf16.mxu0 %v4356_v38  ;;  %v4423_v37 = vld [vmem:[%s4607_s6 + $0x7e8] ss:$16 sps:$4 sm:$0xff]   ;;  %v4428_v38 = vld [vmem:[%s4607_s6 + $0x80c] ss:$16 sps:$4 sm:$0xff]  }
 0x128   : > { %3127 = vmatprep.subr.bf16.mxu1 %v4359_v58  ;;  %v4431_v58 = vld [vmem:[%s4607_s6 + $0xa0c] ss:$16 sps:$4 sm:$0xff]  }
 0x12a   : > { %3087 = vmatpush1.bf16.msra.mxu0 %v4354_v59  ;;  %v4426_v59 = vld [vmem:[%s4607_s6 + $0x808] ss:$16 sps:$4 sm:$0xff]  }
 0x12b   : > { %3128 = vmatpush1.bf16.msra.mxu1 %v4357_v60  ;;  %3088 = vmatprep.subr.bf16.mxu0 %v4362_v61  ;;  %v4429_v60 = vld [vmem:[%s4607_s6 + $0xa08] ss:$16 sps:$4 sm:$0xff]   ;;  %v4434_v61 = vld [vmem:[%s4607_s6 + $0x82c] ss:$16 sps:$4 sm:$0xff]  }
 0x12c   : > { %3129 = vmatprep.subr.bf16.mxu1 %v4365_v62  ;;  %v2784_v3 = vpop.f32.mrb[0].mxu0  ;;  %v4437_v62 = vld [vmem:[%s4607_s6 + $0xa2c] ss:$16 sps:$4 sm:$0xff]  }
 0x12d   : > { %v2825_v4 = vpop.f32.mrb[0].mxu1  ;;  %v2786_v6 = vpop.f32.mrb[1].mxu0 }
 0x12e   : > { %v4964_v5 = vadd.f32 %v2825_v4, %v2784_v3  ;;  %v2827_v9 = vpop.f32.mrb[1].mxu1  ;;  %v2788_v11 = vpop.f32.mrb[2].mxu0  ;;  %3089 = vmatpush1.bf16.msra.mxu0 %v4360_v63  ;;  %v4432_v63 = vld [vmem:[%s4607_s6 + $0x828] ss:$16 sps:$4 sm:$0xff]   ;;  %v4446_v3 = vld [vmem:[%s4607_s6 + $0x86c] ss:$16 sps:$4 sm:$0xff]  }
 0x12f   : > { %v4966_v10 = vadd.f32 %v2827_v9, %v2786_v6  ;;  %v2829_v12 = vpop.f32.mrb[2].mxu1  ;;  %3130 = vmatpush1.bf16.msra.mxu1 %v4363_v0  ;;  %v2789_v15 = vpop.f32.mrb[3].mxu0  ;;  %3090 = vmatprep.subr.bf16.mxu0 %v4368_v1  ;;  %v4435_v0 = vld [vmem:[%s4607_s6 + $0xa28] ss:$16 sps:$4 sm:$0xff]   ;;  %v4440_v1 = vld [vmem:[%s4607_s6 + $0x84c] ss:$16 sps:$4 sm:$0xff]  }
 0x130   : > { %v2830_v16 = vpop.f32.mrb[3].mxu1  ;;  %3131 = vmatprep.subr.bf16.mxu1 %v4371_v2  ;;  %v4443_v2 = vld [vmem:[%s4607_s6 + $0xa4c] ss:$16 sps:$4 sm:$0xff]   ;;  %v4444_v6 = vld [vmem:[%s4607_s6 + $0x868] ss:$16 sps:$4 sm:$0xff]  }
 0x131   : > { %v4449_v4 = vld [vmem:[%s4607_s6 + $0xa6c] ss:$16 sps:$4 sm:$0xff]   ;;  %v4450_v11 = vld [vmem:[%s4607_s6 + $0x888] ss:$16 sps:$4 sm:$0xff]  }
 0x132   : > { %3091 = vmatpush1.bf16.msra.mxu0 %v4366_v13  ;;  %v4455_v9 = vld [vmem:[%s4607_s6 + $0xa8c] ss:$16 sps:$4 sm:$0xff]   ;;  %v4453_v12 = vld [vmem:[%s4607_s6 + $0xa88] ss:$16 sps:$4 sm:$0xff]  }
 0x133   : > { %3132 = vmatpush1.bf16.msra.mxu1 %v4369_v14  ;;  %3092 = vmatprep.subr.bf16.mxu0 %v4374_v19  ;;  %v4458_v13 = vld [vmem:[%s4607_s6 + $0x8ac] ss:$16 sps:$4 sm:$0xff]   ;;  %v4456_v15 = vld [vmem:[%s4607_s6 + $0x8a8] ss:$16 sps:$4 sm:$0xff]  }
 0x134   : > { %3133 = vmatprep.subr.bf16.mxu1 %v4377_v20  ;;  %v4461_v14 = vld [vmem:[%s4607_s6 + $0xaac] ss:$16 sps:$4 sm:$0xff]   ;;  %v4459_v16 = vld [vmem:[%s4607_s6 + $0xaa8] ss:$16 sps:$4 sm:$0xff]  }
 0x135   : > { %v4464_v19 = vld [vmem:[%s4607_s6 + $0x8cc] ss:$16 sps:$4 sm:$0xff]  }
 0x136   : > { %3093 = vmatpush1.bf16.msra.mxu0 %v4372_v21  ;;  %v4467_v20 = vld [vmem:[%s4607_s6 + $0xacc] ss:$16 sps:$4 sm:$0xff]  }
 0x137   : > { %3134 = vmatpush1.bf16.msra.mxu1 %v4375_v22  ;;  %3094 = vmatprep.subr.bf16.mxu0 %v4380_v27 }
 0x138   : > { %3135 = vmatprep.subr.bf16.mxu1 %v4383_v28 }
 0x13a   : > { %3095 = vmatpush1.bf16.msra.mxu0 %v4378_v29 }
 0x13b   : > { %3136 = vmatpush1.bf16.msra.mxu1 %v4381_v30  ;;  %3096 = vmatprep.subr.bf16.mxu0 %v4386_v31 }
 0x13c   : > { %3137 = vmatprep.subr.bf16.mxu1 %v4389_v32 }
 0x13e   : > { %3097 = vmatpush1.bf16.msra.mxu0 %v4384_v33  ;;  %v4462_v33 = vld [vmem:[%s4607_s6 + $0x8c8] ss:$16 sps:$4 sm:$0xff]  }
 0x13f   : > { %3138 = vmatpush1.bf16.msra.mxu1 %v4387_v34  ;;  %3098 = vmatprep.subr.bf16.mxu0 %v4392_v39  ;;  %v4465_v34 = vld [vmem:[%s4607_s6 + $0xac8] ss:$16 sps:$4 sm:$0xff]  }
 0x140   : > { %3139 = vmatprep.subr.bf16.mxu1 %v4395_v40 }
 0x142   : > { %3099 = vmatpush1.bf16.msra.mxu0 %v4390_v41 }
 0x143   : > { %3140 = vmatpush1.bf16.msra.mxu1 %v4393_v42  ;;  %3100 = vmatprep.subr.bf16.mxu0 %v4398_v23  ;;  %v4468_v23 = vld [vmem:[%s4607_s6 + $0x8e8] ss:$16 sps:$4 sm:$0xff]  }
 0x144   : > { %3141 = vmatprep.subr.bf16.mxu1 %v4401_v24  ;;  %v4471_v24 = vld [vmem:[%s4607_s6 + $0xae8] ss:$16 sps:$4 sm:$0xff]  }
 0x146   : > { %3101 = vmatpush1.bf16.msra.mxu0 %v4396_v43  ;;  %v4476_v43 = vld [vmem:[%s4607_s6 + $0x90c] ss:$16 sps:$4 sm:$0xff]  }
 0x147   : > { %3142 = vmatpush1.bf16.msra.mxu1 %v4399_v44  ;;  %3102 = vmatprep.subr.bf16.mxu0 %v4404_v45  ;;  %v4479_v44 = vld [vmem:[%s4607_s6 + $0xb0c] ss:$16 sps:$4 sm:$0xff]   ;;  %v4474_v45 = vld [vmem:[%s4607_s6 + $0x908] ss:$16 sps:$4 sm:$0xff]  }
 0x148   : > { %3143 = vmatprep.subr.bf16.mxu1 %v4407_v46  ;;  %v4477_v46 = vld [vmem:[%s4607_s6 + $0xb08] ss:$16 sps:$4 sm:$0xff]  }
 0x14a   : > { %3103 = vmatpush1.bf16.msra.mxu0 %v4402_v47  ;;  %v4482_v47 = vld [vmem:[%s4607_s6 + $0x92c] ss:$16 sps:$4 sm:$0xff]  }
 0x14b   : > { %3144 = vmatpush1.bf16.msra.mxu1 %v4405_v49  ;;  %3104 = vmatprep.subr.bf16.mxu0 %v4410_v50  ;;  %v4485_v49 = vld [vmem:[%s4607_s6 + $0xb2c] ss:$16 sps:$4 sm:$0xff]   ;;  %v4480_v50 = vld [vmem:[%s4607_s6 + $0x928] ss:$16 sps:$4 sm:$0xff]  }
 0x14c   : > { %3145 = vmatprep.subr.bf16.mxu1 %v4413_v48  ;;  %v4483_v48 = vld [vmem:[%s4607_s6 + $0xb28] ss:$16 sps:$4 sm:$0xff]  }
 0x14e   : > { %3105 = vmatpush1.bf16.msra.mxu0 %v4408_v52  ;;  %v4488_v52 = vld [vmem:[%s4607_s6 + $0x94c] ss:$16 sps:$4 sm:$0xff]  }
 0x14f   : > { %3146 = vmatpush1.bf16.msra.mxu1 %v4411_v51  ;;  %3106 = vmatprep.subr.bf16.mxu0 %v4416_v53  ;;  %v4491_v51 = vld [vmem:[%s4607_s6 + $0xb4c] ss:$16 sps:$4 sm:$0xff]   ;;  %v4486_v53 = vld [vmem:[%s4607_s6 + $0x948] ss:$16 sps:$4 sm:$0xff]  }
 0x150   : > { %3147 = vmatprep.subr.bf16.mxu1 %v4419_v54  ;;  %v4489_v54 = vld [vmem:[%s4607_s6 + $0xb48] ss:$16 sps:$4 sm:$0xff]  }
 0x152   : > { %3107 = vmatpush1.bf16.msra.mxu0 %v4414_v7  ;;  %v4494_v7 = vld [vmem:[%s4607_s6 + $0x96c] ss:$16 sps:$4 sm:$0xff]  }
 0x153   : > { %3148 = vmatpush1.bf16.msra.mxu1 %v4417_v8  ;;  %3108 = vmatprep.subr.bf16.mxu0 %v4422_v55  ;;  %v4497_v8 = vld [vmem:[%s4607_s6 + $0xb6c] ss:$16 sps:$4 sm:$0xff]   ;;  %v4492_v55 = vld [vmem:[%s4607_s6 + $0x968] ss:$16 sps:$4 sm:$0xff]  }
 0x154   : > { %3149 = vmatprep.subr.bf16.mxu1 %v4425_v56  ;;  %v4495_v56 = vld [vmem:[%s4607_s6 + $0xb68] ss:$16 sps:$4 sm:$0xff]  }
 0x156   : > { %3109 = vmatpush1.bf16.msra.mxu0 %v4420_v57  ;;  %v4500_v57 = vld [vmem:[%s4607_s6 + $0x98c] ss:$16 sps:$4 sm:$0xff]  }
 0x157   : > { %3150 = vmatpush1.bf16.msra.mxu1 %v4423_v37  ;;  %3160 = vmatprep.subr.bf16.mxu0 %v4428_v38  ;;  %v4503_v37 = vld [vmem:[%s4607_s6 + $0xb8c] ss:$16 sps:$4 sm:$0xff]   ;;  %v4498_v38 = vld [vmem:[%s4607_s6 + $0x988] ss:$16 sps:$4 sm:$0xff]  }
 0x158   : > { %3201 = vmatprep.subr.bf16.mxu1 %v4431_v58  ;;  %v4501_v58 = vld [vmem:[%s4607_s6 + $0xb88] ss:$16 sps:$4 sm:$0xff]  }
 0x159   : > { %3111 = vmatmul.mubr.bf16.vlgmr.msra.gmra.mrb[16].mxu0 %v4772_v17  ;;  %v4438_v17 = vld [vmem:[%s4607_s6 + $0x848] ss:$16 sps:$4 sm:$0xff]  }
 0x15a   : > { %3152 = vmatmul.mubr.bf16.vlgmr.msra.gmra.mrb[16].mxu1 %v4776_v18  ;;  %3161 = vmatpush1.bf16.msra.mxu0 %v4426_v59  ;;  %v4441_v18 = vld [vmem:[%s4607_s6 + $0xa48] ss:$16 sps:$4 sm:$0xff]   ;;  %v4506_v59 = vld [vmem:[%s4607_s6 + $0x9ac] ss:$16 sps:$4 sm:$0xff]  }
 0x15b   : > { %3202 = vmatpush1.bf16.msra.mxu1 %v4429_v60  ;;  %3162 = vmatprep.subr.bf16.mxu0 %v4434_v61  ;;  %v4509_v60 = vld [vmem:[%s4607_s6 + $0xbac] ss:$16 sps:$4 sm:$0xff]   ;;  %v4504_v61 = vld [vmem:[%s4607_s6 + $0x9a8] ss:$16 sps:$4 sm:$0xff]  }
 0x15c   : > { %3203 = vmatprep.subr.bf16.mxu1 %v4437_v62  ;;  %3192 = vmatprep.mubr.bf16.mxu0 %v4790_v25  ;;  %v4447_v25 = vld [vmem:[%s4607_s6 + $0xa68] ss:$16 sps:$4 sm:$0xff]  }
 0x15d   : > { %3233 = vmatprep.mubr.bf16.mxu1 %v4794_v26  ;;  %v4452_v26 = vld [vmem:[%s4607_s6 + $0x88c] ss:$16 sps:$4 sm:$0xff]   ;;  %v4507_v62 = vld [vmem:[%s4607_s6 + $0xba8] ss:$16 sps:$4 sm:$0xff]  }
 0x15e   : > { %3163 = vmatpush1.bf16.msra.mxu0 %v4432_v63  ;;  %v4512_v63 = vld [vmem:[%s4607_s6 + $0x9cc] ss:$16 sps:$4 sm:$0xff]  }
 0x15f   : > { %3204 = vmatpush1.bf16.msra.mxu1 %v4435_v0  ;;  %3164 = vmatprep.subr.bf16.mxu0 %v4440_v1  ;;  %v4515_v0 = vld [vmem:[%s4607_s6 + $0xbcc] ss:$16 sps:$4 sm:$0xff]   ;;  %v4510_v1 = vld [vmem:[%s4607_s6 + $0x9c8] ss:$16 sps:$4 sm:$0xff]  }
 0x160   : > { %3205 = vmatprep.subr.bf16.mxu1 %v4443_v2  ;;  %v4513_v2 = vld [vmem:[%s4607_s6 + $0xbc8] ss:$16 sps:$4 sm:$0xff]  }
 0x162   : > { %3165 = vmatpush1.bf16.msra.mxu0 %v4438_v17  ;;  %v4518_v17 = vld [vmem:[%s4607_s6 + $0x9ec] ss:$16 sps:$4 sm:$0xff]  }
 0x163   : > { %3206 = vmatpush1.bf16.msra.mxu1 %v4441_v18  ;;  %3166 = vmatprep.subr.bf16.mxu0 %v4446_v3  ;;  %v4521_v18 = vld [vmem:[%s4607_s6 + $0xbec] ss:$16 sps:$4 sm:$0xff]   ;;  %v4516_v3 = vld [vmem:[%s4607_s6 + $0x9e8] ss:$16 sps:$4 sm:$0xff]  }
 0x164   : > { %3207 = vmatprep.subr.bf16.mxu1 %v4449_v4  ;;  %v4519_v4 = vld [vmem:[%s4607_s6 + $0xbe8] ss:$16 sps:$4 sm:$0xff]  }
 0x166   : > { %3167 = vmatpush1.bf16.msra.mxu0 %v4444_v6 }
 0x167   : > { %3208 = vmatpush1.bf16.msra.mxu1 %v4447_v25  ;;  %3168 = vmatprep.subr.bf16.mxu0 %v4452_v26 }
 0x168   : > { %3209 = vmatprep.subr.bf16.mxu1 %v4455_v9 }
 0x16a   : > { %3169 = vmatpush1.bf16.msra.mxu0 %v4450_v11 }
 0x16b   : > { %3210 = vmatpush1.bf16.msra.mxu1 %v4453_v12  ;;  %3170 = vmatprep.subr.bf16.mxu0 %v4458_v13  ;;  %v394_v12 = vld [vmem:[#allocation2] sm:$0xff] }
 0x16c   : > { %3211 = vmatprep.subr.bf16.mxu1 %v4461_v14  ;;  %v2866_v21 = vpop.f32.mrb[4].mxu0 }
 0x16d   : > { %v2907_v22 = vpop.f32.mrb[4].mxu1  ;;  %v2867_v27 = vadd.f32 %v2866_v21, %v4964_v5  ;;  %v2868_v28 = vpop.f32.mrb[5].mxu0  ;;  %v4470_v5 = vld [vmem:[%s4607_s6 + $0x8ec] ss:$16 sps:$4 sm:$0xff]  }
 0x16e   : > { %v2909_v29 = vpop.f32.mrb[5].mxu1  ;;  %v2869_v30 = vadd.f32 %v2868_v28, %v4966_v10  ;;  %v2870_v31 = vpop.f32.mrb[6].mxu0  ;;  %3171 = vmatpush1.bf16.msra.mxu0 %v4456_v15  ;;  %v4473_v10 = vld [vmem:[%s4607_s6 + $0xaec] ss:$16 sps:$4 sm:$0xff]  }
 0x16f   : > { %v2911_v32 = vpop.f32.mrb[6].mxu1  ;;  %3212 = vmatpush1.bf16.msra.mxu1 %v4459_v16  ;;  %v5040_v39 = vadd.f32 %v2907_v22, %v2867_v27  ;;  %v2871_v40 = vpop.f32.mrb[7].mxu0  ;;  %3172 = vmatprep.subr.bf16.mxu0 %v4464_v19  ;;  %v395_v19 = vld [vmem:[#allocation2 + $0x8] sm:$0xff] }
 0x170   : > { %v2912_v41 = vpop.f32.mrb[7].mxu1  ;;  %3213 = vmatprep.subr.bf16.mxu1 %v4467_v20  ;;  %v5044_v42 = vadd.f32 %v2909_v29, %v2869_v30 }
 0x172   : > { %3173 = vmatpush1.bf16.msra.mxu0 %v4462_v33 }
 0x173   : > { %3214 = vmatpush1.bf16.msra.mxu1 %v4465_v34  ;;  %3174 = vmatprep.subr.bf16.mxu0 %v4470_v5 }
 0x174   : > { %3215 = vmatprep.subr.bf16.mxu1 %v4473_v10 }
 0x176   : > { %3175 = vmatpush1.bf16.msra.mxu0 %v4468_v23 }
 0x177   : > { %3216 = vmatpush1.bf16.msra.mxu1 %v4471_v24  ;;  %3176 = vmatprep.subr.bf16.mxu0 %v4476_v43 }
 0x178   : > { %3217 = vmatprep.subr.bf16.mxu1 %v4479_v44 }
 0x17a   : > { %3177 = vmatpush1.bf16.msra.mxu0 %v4474_v45 }
 0x17b   : > { %3218 = vmatpush1.bf16.msra.mxu1 %v4477_v46  ;;  %3178 = vmatprep.subr.bf16.mxu0 %v4482_v47 }
 0x17c   : > { %3219 = vmatprep.subr.bf16.mxu1 %v4485_v49 }
 0x17e   : > { %3179 = vmatpush1.bf16.msra.mxu0 %v4480_v50 }
 0x17f   : > { %3220 = vmatpush1.bf16.msra.mxu1 %v4483_v48  ;;  %3180 = vmatprep.subr.bf16.mxu0 %v4488_v52 }
 0x180   : > { %3221 = vmatprep.subr.bf16.mxu1 %v4491_v51 }
 0x182   : > { %3181 = vmatpush1.bf16.msra.mxu0 %v4486_v53 }
 0x183   : > { %3222 = vmatpush1.bf16.msra.mxu1 %v4489_v54  ;;  %3182 = vmatprep.subr.bf16.mxu0 %v4494_v7  ;;  %v396_v54 = vld [vmem:[#allocation2 + $0x10] sm:$0xff] }
 0x184   : > { %3223 = vmatprep.subr.bf16.mxu1 %v4497_v8 }
 0x186   : > { %3183 = vmatpush1.bf16.msra.mxu0 %v4492_v55 }
 0x187   : > { %3224 = vmatpush1.bf16.msra.mxu1 %v4495_v56  ;;  %3184 = vmatprep.subr.bf16.mxu0 %v4500_v57  ;;  %v397_v57 = vld [vmem:[#allocation2 + $0x18] sm:$0xff] }
 0x188   : > { %3225 = vmatprep.subr.bf16.mxu1 %v4503_v37 }
 0x18a   : > { %3185 = vmatpush1.bf16.msra.mxu0 %v4498_v38 }
 0x18b   : > { %3226 = vmatpush1.bf16.msra.mxu1 %v4501_v58  ;;  %3186 = vmatprep.subr.bf16.mxu0 %v4506_v59 }
 0x18c   : > { %3227 = vmatprep.subr.bf16.mxu1 %v4509_v60 }
 0x18e   : > { %3187 = vmatpush1.bf16.msra.mxu0 %v4504_v61  ;;  %v3260_v61 = vlaneseq (!%p3899_p7) }
 0x18f   : > { %3228 = vmatpush1.bf16.msra.mxu1 %v4507_v62  ;;  %3188 = vmatprep.subr.bf16.mxu0 %v4512_v63  ;;  %v3258_v63 = vld [vmem:[%s5114_s2] sm:$0xf] (!%p3899_p7) }
 0x190   : > { %3229 = vmatprep.subr.bf16.mxu1 %v4515_v0  ;;  %v3261_v62 = vshrl.u32 (!%p3899_p7), %v3260_v61, 7  ;;  %v3284_v0 = vld [vmem:[%s5115_s3] sm:$0xf] (!%p3899_p7) }
 0x192   : > { %3189 = vmatpush1.bf16.msra.mxu0 %v4510_v1  ;;  %v3262_v1 = vsub.s32 (!%p3899_p7), 0, %v3261_v62 }
 0x193   : > { %3230 = vmatpush1.bf16.msra.mxu1 %v4513_v2  ;;  %3190 = vmatprep.subr.bf16.mxu0 %v4518_v17  ;;  %v3266_v2 = vsub.s32 (!%p3899_p7), 1, %v3261_v62  ;;  %v3270_v17 = vsub.s32 (!%p3899_p7), 2, %v3261_v62 }
 0x194   : > { %3231 = vmatprep.subr.bf16.mxu1 %v4521_v18  ;;  %v3274_v18 = vsub.s32 (!%p3899_p7), 3, %v3261_v62 }
 0x196   : > { %3191 = vmatpush1.bf16.msra.mxu0 %v4516_v3 }
 0x197   : > { %3232 = vmatpush1.bf16.msra.mxu1 %v4519_v4 }
 0x199   : > { %3193 = vmatmul.mubr.bf16.vlgmr.msra.gmra.mrb[20].mxu0 %v4862_v35 }
 0x19a   : > { %3234 = vmatmul.mubr.bf16.vlgmr.msra.gmra.mrb[20].mxu1 %v4866_v36 }
 0x1ac   : > { %v2948_v6 = vpop.f32.mrb[8].mxu0 }
 0x1ad   : > { %v2989_v25 = vpop.f32.mrb[8].mxu1  ;;  %v2949_v26 = vadd.f32 %v2948_v6, %v5040_v39  ;;  %v2950_v9 = vpop.f32.mrb[9].mxu0  ;;  %v3310_v6 = vld [vmem:[%s5116_s4] sm:$0xff] (!%p3899_p7) }
 0x1ae   : > { %v2991_v11 = vpop.f32.mrb[9].mxu1  ;;  %v2951_v13 = vadd.f32 %v2950_v9, %v5044_v42  ;;  %v2952_v14 = vpop.f32.mrb[10].mxu0  ;;  %v3289_v9 = vrot.slane (!%p3899_p7), %v3284_v0, %v3262_v1 }
 0x1af   : > { %v2993_v15 = vpop.f32.mrb[10].mxu1  ;;  %v2990_v16 = vadd.f32 %v2989_v25, %v2949_v26  ;;  %v2953_v20 = vpop.f32.mrb[11].mxu0  ;;  %v3263_v25 = vrot.slane (!%p3899_p7), %v3258_v63, %v3262_v1  ;;  %v3267_v26 = vrot.slane (!%p3899_p7), %v3258_v63, %v3266_v2  ;;  %v3311_v14 = vld [vmem:[%s5116_s4 + $0x8] sm:$0xff] (!%p3899_p7) }
 0x1b0   : > { %v2994_v21 = vpop.f32.mrb[11].mxu1  ;;  %v2992_v22 = vadd.f32 %v2991_v11, %v2951_v13  ;;  %v3293_v11 = vrot.slane (!%p3899_p7), %v3284_v0, %v3266_v2  ;;  %v3271_v15 = vrot.slane (!%p3899_p7), %v3258_v63, %v3270_v17  ;;  %v3301_v20 = vrot.slane (!%p3899_p7), %v3284_v0, %v3274_v18 }
 0x1b1   : > { %v3242_v27 = vadd.f32 %v2990_v16, %v394_v12  ;;  %v3275_v16 = vrot.slane (!%p3899_p7), %v3258_v63, %v3274_v18 }
 0x1b2   : > { %v3243_v35 = vadd.f32 %v2992_v22, %v395_v19  ;;  %v3297_v19 = vrot.slane (!%p3899_p7), %v3284_v0, %v3270_v17 }
 0x1b3   : > { %3246 = vst [vmem:[#allocation2] sm:$0xff] %v3242_v27  ;;  %v3312_v27 = vunpack.c.l.bf16 (!%p3899_p7), %v3310_v6 }
 0x1b4   : > { %3247 = vst [vmem:[#allocation2 + $0x8] sm:$0xff] %v3243_v35  ;;  %v3313_v35 = vunpack.c.h.bf16 (!%p3899_p7), %v3310_v6 }
 0x1ba   : > { %v3254_v3 = vld [vmem:[#allocation2] sm:$0xff] (!%p3899_p7) }
 0x1bb   : > { %v3255_v4 = vld [vmem:[#allocation2 + $0x8] sm:$0xff] (!%p3899_p7)  ;;  %v3280_v21 = vmul.f32 (!%p3899_p7), %v3263_v25, %v3254_v3 }
 0x1bc   : > { %v3281_v22 = vmul.f32 (!%p3899_p7), %v3267_v26, %v3255_v4 }
 0x1ec   : > { %v3030_v36 = vpop.f32.mrb[12].mxu0 }
 0x1ed   : > { %v3071_v28 = vpop.f32.mrb[12].mxu1  ;;  %v3032_v30 = vpop.f32.mrb[13].mxu0 }
 0x1ee   : > { %v3072_v29 = vadd.f32 %v3071_v28, %v3030_v36  ;;  %v3073_v31 = vpop.f32.mrb[13].mxu1  ;;  %v3034_v33 = vpop.f32.mrb[14].mxu0 }
 0x1ef   : > { %v3074_v32 = vadd.f32 %v3073_v31, %v3032_v30  ;;  %v3075_v34 = vpop.f32.mrb[14].mxu1  ;;  %v3035_v39 = vpop.f32.mrb[15].mxu0  ;;  %v3315_v30 = vunpack.c.h.bf16 (!%p3899_p7), %v3311_v14  ;;  %v3306_v31 = vadd.f32 (!%p3899_p7), %v3289_v9, %v3280_v21 }
 0x1f0   : > { %v3076_v40 = vpop.f32.mrb[15].mxu1 }
 0x1f1   : > { %v3316_v39 = vadd.f32 (!%p3899_p7), %v3312_v27, %v3306_v31 }
 0x22c   : > { %v3112_v41 = vpop.f32.mrb[16].mxu0 }
 0x22d   : > { %v3153_v5 = vpop.f32.mrb[16].mxu1  ;;  %v3113_v10 = vadd.f32 %v3112_v41, %v3072_v29  ;;  %v3114_v42 = vpop.f32.mrb[17].mxu0  ;;  %v3314_v29 = vunpack.c.l.bf16 (!%p3899_p7), %v3311_v14 }
 0x22e   : > { %v3155_v23 = vpop.f32.mrb[17].mxu1  ;;  %v3115_v24 = vadd.f32 %v3114_v42, %v3074_v32  ;;  %v3116_v43 = vpop.f32.mrb[18].mxu0  ;;  %v3307_v32 = vadd.f32 (!%p3899_p7), %v3293_v11, %v3281_v22 }
 0x22f   : > { %v3157_v44 = vpop.f32.mrb[18].mxu1  ;;  %v3154_v45 = vadd.f32 %v3153_v5, %v3113_v10  ;;  %v3117_v46 = vpop.f32.mrb[19].mxu0  ;;  %v3320_v10 = vmax.f32 (!%p3899_p7), %v3316_v39, 0.0 }
 0x230   : > { %v3158_v47 = vpop.f32.mrb[19].mxu1  ;;  %v3156_v49 = vadd.f32 %v3155_v23, %v3115_v24  ;;  %v3317_v40 = vadd.f32 (!%p3899_p7), %v3313_v35, %v3307_v32 }
 0x232   : > { %v3321_v42 = vmax.f32 (!%p3899_p7), %v3317_v40, 0.0 }
 0x234   : > { %v3907_v43 = vpack.c.bf16 (!%p3899_p7), %v3321_v42, %v3320_v10 }
 0x236   : > { %3340 = vst [vmem:[%s5117_s5] sm:$0xff] (!%p3899_p7), %v3907_v43 }
 0x26c   : > { %v3194_v50 = vpop.f32.mrb[20].mxu0 }
 0x26d   : > { %v3235_v48 = vpop.f32.mrb[20].mxu1  ;;  %v3195_v52 = vadd.f32 %v3194_v50, %v3154_v45  ;;  %v3196_v51 = vpop.f32.mrb[21].mxu0 }
 0x26e   : > { %v3237_v53 = vpop.f32.mrb[21].mxu1  ;;  %v3197_v7 = vadd.f32 %v3196_v51, %v3156_v49  ;;  %v3198_v8 = vpop.f32.mrb[22].mxu0  ;;  %3253 = sbr.rel (%p3899_p7) target bundleno = 647 (0x287), region = 48 }
 0x26f   : > { %v3239_v55 = vpop.f32.mrb[22].mxu1  ;;  %v3236_v56 = vadd.f32 %v3235_v48, %v3195_v52  ;;  %v3199_v37 = vpop.f32.mrb[23].mxu0 }
 0x270   : > { %v3240_v38 = vpop.f32.mrb[23].mxu1  ;;  %v3238_v58 = vadd.f32 %v3237_v53, %v3197_v7 }
 0x271   : > { %v3244_v59 = vadd.f32 %v3236_v56, %v396_v54 }
 0x272   : > { %v3245_v60 = vadd.f32 %v3238_v58, %v397_v57 }
 0x273   : > { %3248 = vst [vmem:[#allocation2 + $0x10] sm:$0xff] %v3244_v59 }
 0x274   : > { %3249 = vst [vmem:[#allocation2 + $0x18] sm:$0xff] %v3245_v60 }
 0x27a   : > { %v3256_v12 = vld [vmem:[#allocation2 + $0x10] sm:$0xff] }
 0x27b   : > { %v3257_v13 = vld [vmem:[#allocation2 + $0x18] sm:$0xff]  ;;  %v3282_v36 = vmul.f32 %v3271_v15, %v3256_v12 }
 0x27c   : > { %v3283_v28 = vmul.f32 %v3275_v16, %v3257_v13 }
 0x27d   : > { %v3308_v33 = vadd.f32 %v3297_v19, %v3282_v36 }
 0x27e   : > { %v3309_v34 = vadd.f32 %v3301_v20, %v3283_v28 }
 0x27f   : > { %v3318_v41 = vadd.f32 %v3314_v29, %v3308_v33 }
 0x280   : > { %v3319_v5 = vadd.f32 %v3315_v30, %v3309_v34 }
 0x281   : > { %v3322_v23 = vmax.f32 %v3318_v41, 0.0 }
 0x282   : > { %v3323_v24 = vmax.f32 %v3319_v5, 0.0 }
 0x284   : > { %v3908_v44 = vpack.c.bf16 %v3323_v24, %v3322_v23 }
 0x286   : > { %3341 = vst [vmem:[%s5117_s5 + $0x8] sm:$0xff] %v3908_v44 }
 0x287 PF: > { %s15_s20 = sadd.s32 1, %s4544_s20   ;;  %s5118_s18 = smov %s4540_s19 }
 0x288   : > { %p12_p8 = scmp.ge.s32.totalorder %s15_s20, 5   ;;  %s5119_s19 = smov %s5121_s21 }
 0x28a   :  { %14 = sbr.rel (!%p12_p8) target bundleno = 2 (0x2), region = 90 }

</bundles_post_ra>
